<compile_context>
chip_gen: v5e
topology: v5e:2x2
jax: 0.10.0
libtpu: 0.0.40
codegen_flags: <defaults>
</compile_context>

<pallas_src>
import functools

import jax
import jax.numpy as jnp
from jax.experimental import pallas as pl
from jax.experimental.pallas import tpu as pltpu


def _caps_visual_kernel(q_ref, feat_ref, b0_ref, wh_ref, wf_ref, wo_ref,
                        bo_ref, out_ref, c_ref, db_sc, qd_sc, *,
                        num_iterations, n_real, n_pad, batch_tile,
                        compute_dtype):
    """One TB-row batch tile per grid step. Ref shapes:

      q_ref    : (TB, D)        query rows (compute dtype)
      feat_ref : (TB*Np, D)     feature rows, flattened, zero-padded N -> Np
      b0_ref   : (TB, Np) f32   initial routing logits (-1e18 masked, -inf pad)
      wh/wf    : (D, D)         projection weights (VMEM resident)
      wo       : (D, Op)        output projection (Op = lane-padded out_dim)
      bo       : (1, Op)  f32   output bias
      out_ref  : (TB, Op) f32
      c_ref    : (TB, Np) f32   final routing coefficients
      db_sc    : (TB, Np) f32   scratch for delta_b rows
      qd_sc    : (TB, D)  f32   scratch for per-row c@f rows
    """
    tb = batch_tile
    cd = compute_dtype

    # Precomputed reciprocals: scalar multiplies instead of full-width divides.
    inv_n = jnp.float32(1.0 / n_real)
    inv_nm1 = jnp.float32(1.0 / max(n_real - 1, 1))   # guard N == 1
    eps = jnp.float32(1e-9)

    # 1.0 on real sequence positions, 0.0 on lane padding.  Padded feat rows
    # project to exact zeros, so delta_b itself needs no extra masking; the
    # mask only keeps the padding out of the variance.
    valid = (jax.lax.broadcasted_iota(jnp.int32, (1, n_pad), 1)
             < n_real).astype(jnp.float32)

    # Projections on the MXU with f32 accumulation.  feat is a (TB*Np, D)
    # slab, so M = TB*Np keeps the MXU well fed.
    q = jnp.dot(q_ref[...], wh_ref[...],
                preferred_element_type=jnp.float32)              # (TB, D) f32
    f = jnp.dot(feat_ref[...], wf_ref[...],
                preferred_element_type=jnp.float32).astype(cd)   # (TB*Np, D)

    b = b0_ref[...]                                              # (TB, Np) f32

    def rows_dot_f(lhs_rows, rhs_contract_dim, dst_ref):
        # Unrolled per-row MXU contractions against this row's feat slab.
        # rhs_contract_dim = 1 -> delta_b rows (contract D), result (1, Np)
        # rhs_contract_dim = 0 -> c@f rows     (contract Np), result (1, D)
        for t in range(tb):
            f_t = f[t * n_pad:(t + 1) * n_pad, :]                # (Np, D)
            l_t = lhs_rows[t:t + 1, :].astype(cd)                # (1, Np|D)
            dst_ref[t:t + 1, :] = jax.lax.dot_general(
                l_t, f_t, (((1,), (rhs_contract_dim,)), ((), ())),
                preferred_element_type=jnp.float32)
        return dst_ref[...]

    for i in range(num_iterations):
        # Softmax over the sequence axis; -inf padded lanes give exactly 0.
        # (approx=True would move this fully to the EUP fast path but breaks
        # the tight f32 parity check, so the exact reciprocal is kept.)
        bmax = jnp.max(b, axis=1, keepdims=True)
        e = jnp.exp(b - bmax)
        c = e * pl.reciprocal(jnp.sum(e, axis=1, keepdims=True), approx=False)

        if i == num_iterations - 1:
            # outputs_t = sum_n c_tn * f_tn  ->  (1, Np) @ (Np, D) per row.
            q = q + rows_dot_f(c, 0, qd_sc)
            out_ref[...] = (jnp.dot(q.astype(cd), wo_ref[...],
                                    preferred_element_type=jnp.float32)
                            + bo_ref[...])
            c_ref[...] = c
        else:
            # delta_b_tn = <q_t, f_tn>: contract over D on the MXU per row.
            delta_b = rows_dot_f(q, 1, db_sc)                    # (TB, Np) f32
            mu = jnp.sum(delta_b, axis=1, keepdims=True) * inv_n
            centered = (delta_b - mu) * valid
            # torch.std default is the unbiased estimator (divide by N-1).
            # One EUP rsqrt replaces sqrt + divide; eps placement differs from
            # 1/(std + eps) only at O(eps).
            var = jnp.sum(centered * centered, axis=1, keepdims=True) * inv_nm1
            delta_b = (delta_b - mu) * jax.lax.rsqrt(var + eps)
            b = b + delta_b                      # padded lanes stay -inf
            # outputs_t = mean_n c_tn * f_tn
            q = q + rows_dot_f(c, 0, qd_sc) * inv_n


def caps_visual_forward(query, feat, feat_mask, W_h, W_f, W_out, b_out, *,
                        num_iterations, batch_tile=8, mxu_dtype=jnp.float32):
    """query: (B, D) f32, feat: (B, N, D) f32, feat_mask: (B, 1, 1, N) bool.

    Returns (out_layer(query), c_out) with shapes (B, out_dim), (B, N).
    mxu_dtype selects the MXU operand dtype (f32 or bf16); accumulation and
    all routing math stay f32.
    Note: self.dp (Dropout) and num_capsules are unused in the PyTorch forward.
    """
    B, N, D = feat.shape
    out_dim = W_out.shape[1]
    cd = jnp.dtype(mxu_dtype)

    # Lane-dense padding of the sequence and output axes.
    n_pad = max(128, pl.cdiv(N, 128) * 128)
    o_pad = max(128, pl.cdiv(out_dim, 128) * 128)

    # Batch tile: sublane-aligned unless a single tile covers the whole batch.
    tb = min(int(batch_tile), B)
    if tb < B and tb % 8 != 0:
        tb = pl.cdiv(tb, 8) * 8
    b_pad = pl.cdiv(B, tb) * tb

    # Wrapper-side layout plumbing (free in XLA):
    #  * initial routing logits: -1e18 on masked real positions (masked_fill),
    #    -inf on lane padding (softmax -> exactly 0 there), 0 on batch-padding
    #    rows (keeps them finite; they are sliced off at the end).
    #  * feat zero-padded (padded rows project to exact zeros) and flattened
    #    to (Bp*Np, D) so the kernel's feat tile is a plain 2-D slab.
    mask2d = feat_mask.reshape(B, N)
    b_init = jnp.where(mask2d, jnp.float32(-1e18), jnp.float32(0.0))
    b_init = jnp.pad(b_init, ((0, b_pad - B), (0, 0)))
    b_init = jnp.pad(b_init, ((0, 0), (0, n_pad - N)),
                     constant_values=-jnp.inf)
    feat_p = jnp.pad(feat, ((0, b_pad - B), (0, n_pad - N), (0, 0)))
    feat_p = feat_p.reshape(b_pad * n_pad, D).astype(cd)
    q_p = jnp.pad(query, ((0, b_pad - B), (0, 0))).astype(cd)
    wh_c = W_h.astype(cd)
    wf_c = W_f.astype(cd)
    wo_c = jnp.pad(W_out, ((0, 0), (0, o_pad - out_dim))).astype(cd)
    bias2d = jnp.pad(b_out, (0, o_pad - out_dim)).reshape(1, o_pad).astype(
        jnp.float32)

    kernel = functools.partial(
        _caps_visual_kernel, num_iterations=num_iterations, n_real=N,
        n_pad=n_pad, batch_tile=tb, compute_dtype=cd)

    # Explicit VMEM budget: double-buffered per-step tiles, single-buffered
    # resident weights/bias, scratch, plus the in-kernel projected-feat value.
    isz = cd.itemsize
    vmem = (2 * (tb * D + tb * n_pad * D) * isz            # q + feat tiles
            + 2 * tb * n_pad * 4                           # b0 tile
            + 2 * (tb * o_pad + tb * n_pad) * 4            # out + c tiles
            + (2 * D * D + D * o_pad) * isz + o_pad * 4    # weights + bias
            + (tb * n_pad + tb * D) * 4                    # scratch
            + 2 * tb * n_pad * D * 4)                      # projected f temp
    vmem_limit = min(max(int(vmem * 1.5) + (4 << 20), 32 << 20), 64 << 20)

    def call(single_buffer_weights):
        w_kw = ({"pipeline_mode": pl.Buffered(1)}
                if single_buffer_weights else {})
        return pl.pallas_call(
            kernel,
            out_shape=(jax.ShapeDtypeStruct((b_pad, o_pad), jnp.float32),
                       jax.ShapeDtypeStruct((b_pad, n_pad), jnp.float32)),
            grid=(b_pad // tb,),
            in_specs=[
                pl.BlockSpec((tb, D), lambda i: (i, 0)),              # query
                pl.BlockSpec((tb * n_pad, D), lambda i: (i, 0)),      # feat slab
                pl.BlockSpec((tb, n_pad), lambda i: (i, 0)),          # init logits
                pl.BlockSpec((D, D), lambda i: (0, 0), **w_kw),       # W_h
                pl.BlockSpec((D, D), lambda i: (0, 0), **w_kw),       # W_f
                pl.BlockSpec((D, o_pad), lambda i: (0, 0), **w_kw),   # W_out
                pl.BlockSpec((1, o_pad), lambda i: (0, 0), **w_kw),   # bias
            ],
            out_specs=(pl.BlockSpec((tb, o_pad), lambda i: (i, 0)),
                       pl.BlockSpec((tb, n_pad), lambda i: (i, 0))),
            scratch_shapes=[pltpu.VMEM((tb, n_pad), jnp.float32),
                            pltpu.VMEM((tb, D), jnp.float32)],
            compiler_params=pltpu.CompilerParams(
                dimension_semantics=("parallel",),
                vmem_limit_bytes=vmem_limit),
        )(q_p, feat_p, b_init, wh_c, wf_c, wo_c, bias2d)

    try:
        out_p, c_p = call(True)
        jax.block_until_ready((out_p, c_p))
    except Exception:
        # Fallback for jax/libtpu versions where single-buffered pipeline_mode
        # (pl.Buffered(1)) is not accepted: default double buffering.
        out_p, c_p = call(False)

    return out_p[:B, :out_dim], c_p[:B, :N]


def caps_visual_reference(query, feat, feat_mask, W_h, W_f, W_out, b_out, *,
                          num_iterations):
    """Pure-JAX reference mirroring the PyTorch forward (f32 matmuls)."""
    B, N, D = feat.shape
    hi = jax.lax.Precision.HIGHEST
    q = jnp.matmul(query, W_h, precision=hi)
    f = jnp.matmul(feat, W_f, precision=hi)
    mask = feat_mask.reshape(B, N)
    b = jnp.where(mask, -1e18, 0.0).astype(jnp.float32)
    c_out = None
    for i in range(num_iterations):
        c = jax.nn.softmax(b, axis=1)
        if i == num_iterations - 1:
            q = q + jnp.sum(c[:, :, None] * f, axis=1)
            c_out = c
        else:
            delta_b = jnp.sum(q[:, None, :] * f, axis=-1)
            mu = jnp.mean(delta_b, axis=1, keepdims=True)
            std = jnp.sqrt(
                jnp.sum((delta_b - mu) ** 2, axis=1, keepdims=True) / (N - 1))
            b = b + (delta_b - mu) / (std + 1e-9)
            q = q + jnp.mean(c[:, :, None] * f, axis=1)
    return jnp.matmul(q, W_out, precision=hi) + b_out, c_out


if __name__ == "__main__":
    B, N, D, OUT_DIM = 16, 8, 32, 32
    NUM_ITERATIONS = 3
    # num_capsules is stored in __init__ but unused in forward; self.dp
    # (Dropout) is likewise never applied in the forward pass.

    key = jax.random.PRNGKey(0)
    k_q, k_f, k_wh, k_wf, k_wo, k_bo = jax.random.split(key, 6)

    query = jax.random.normal(k_q, (B, D), dtype=jnp.float32)
    feat = jax.random.normal(k_f, (B, N, D), dtype=jnp.float32)
    # PyTorch feat_mask comes in as (B, 1, 1, N) bool; mask tail positions of
    # the first batch row.
    feat_mask = jnp.zeros((B, 1, 1, N), dtype=bool).at[0, 0, 0, N - 2:].set(True)

    # Deterministic parameter init (xavier-uniform-like scale; synthetic).
    bound = float(jnp.sqrt(6.0 / (D + D)))
    W_h = jax.random.uniform(k_wh, (D, D), jnp.float32, -bound, bound)
    W_f = jax.random.uniform(k_wf, (D, D), jnp.float32, -bound, bound)
    bound_o = float(jnp.sqrt(1.0 / D))
    # nn.Linear(dim, out_dim): weight (out_dim, dim) -> stored transposed.
    W_out = jax.random.uniform(k_wo, (D, OUT_DIM), jnp.float32, -bound_o, bound_o)
    b_out = jax.random.uniform(k_bo, (OUT_DIM,), jnp.float32, -bound_o, bound_o)

    out_ref, c_ref = caps_visual_reference(query, feat, feat_mask, W_h, W_f,
                                           W_out, b_out,
                                           num_iterations=NUM_ITERATIONS)

    # f32 MXU operands: tight parity with the f32 reference.
    out, c = caps_visual_forward(query, feat, feat_mask, W_h, W_f, W_out, b_out,
                                 num_iterations=NUM_ITERATIONS, batch_tile=8,
                                 mxu_dtype=jnp.float32)
    jax.block_until_ready((out, c))
    assert jnp.allclose(out, out_ref, rtol=5e-4, atol=5e-5), "f32 output mismatch"
    assert jnp.allclose(c, c_ref, rtol=5e-4, atol=5e-5), "f32 routing mismatch"

    # bf16 MXU operands (f32 accumulation, f32 routing math): bf16 tolerance.
    out_bf, c_bf = caps_visual_forward(query, feat, feat_mask, W_h, W_f, W_out,
                                       b_out, num_iterations=NUM_ITERATIONS,
                                       batch_tile=8, mxu_dtype=jnp.bfloat16)
    jax.block_until_ready((out_bf, c_bf))
    assert jnp.allclose(out_bf, out_ref, rtol=5e-2, atol=5e-2), "bf16 output mismatch"
    assert jnp.allclose(c_bf, c_ref, rtol=5e-2, atol=5e-2), "bf16 routing mismatch"

    print("KERNEL_OK")
</pallas_src>

<mosaic_0001>
module attributes {stable_mosaic.version = 11 : i64} {
  func.func @_caps_visual_kernel(%arg0: i32, %arg1: memref<8x32xf32, #tpu.memory_space<vmem>>, %arg2: memref<1024x32xf32, #tpu.memory_space<vmem>>, %arg3: memref<8x128xf32, #tpu.memory_space<vmem>>, %arg4: memref<32x32xf32, #tpu.memory_space<vmem>>, %arg5: memref<32x32xf32, #tpu.memory_space<vmem>>, %arg6: memref<32x128xf32, #tpu.memory_space<vmem>>, %arg7: memref<1x128xf32, #tpu.memory_space<vmem>>, %arg8: memref<8x128xf32, #tpu.memory_space<vmem>>, %arg9: memref<8x128xf32, #tpu.memory_space<vmem>>, %arg10: memref<8x128xf32, #tpu.memory_space<vmem>>, %arg11: memref<8x32xf32, #tpu.memory_space<vmem>>) attributes {dimension_semantics = [#tpu.dimension_semantics<parallel>], iteration_bounds = array<i64: 2>, scalar_prefetch = 0 : i64, scratch_operands = 2 : i64, tpu.core_type = #tpu.core_type<tc>, window_params = [{transform_indices = @transform_0, window_bounds = array<i64: 8, 32>}, {transform_indices = @transform_1, window_bounds = array<i64: 1024, 32>}, {transform_indices = @transform_2, window_bounds = array<i64: 8, 128>}, {pipeline_mode = #tpu.pipeline_mode<synchronous>, transform_indices = @transform_3, window_bounds = array<i64: 32, 32>}, {pipeline_mode = #tpu.pipeline_mode<synchronous>, transform_indices = @transform_4, window_bounds = array<i64: 32, 32>}, {pipeline_mode = #tpu.pipeline_mode<synchronous>, transform_indices = @transform_5, window_bounds = array<i64: 32, 128>}, {pipeline_mode = #tpu.pipeline_mode<synchronous>, transform_indices = @transform_6, window_bounds = array<i64: 1, 128>}, {transform_indices = @transform_7, window_bounds = array<i64: 8, 128>}, {transform_indices = @transform_8, window_bounds = array<i64: 8, 128>}]} {
    %0 = tpu.iota {dimensions = array<i32: 1>} : vector<1x128xi32>
    %c8_i32 = arith.constant 8 : i32
    %1 = vector.broadcast %c8_i32 : i32 to vector<1x128xi32>
    %2 = arith.cmpi slt, %0, %1 : vector<1x128xi32>
    %3 = arith.extui %2 : vector<1x128xi1> to vector<1x128xi32>
    %4 = arith.sitofp %3 : vector<1x128xi32> to vector<1x128xf32>
    %c0 = arith.constant 0 : index
    %c0_0 = arith.constant 0 : index
    %5 = vector.load %arg1[%c0, %c0_0] : memref<8x32xf32, #tpu.memory_space<vmem>>, vector<8x32xf32>
    %c0_1 = arith.constant 0 : index
    %c0_2 = arith.constant 0 : index
    %6 = vector.load %arg4[%c0_1, %c0_2] : memref<32x32xf32, #tpu.memory_space<vmem>>, vector<32x32xf32>
    %cst = arith.constant dense<0.000000e+00> : vector<8x32xf32>
    %7 = tpu.matmul %5, %6, %cst {dimension_numbers = #tpu.dot_dimension_numbers<[1], [0], [0], [1], [0, 0, 1, 1], [], []>} : vector<8x32xf32>, vector<32x32xf32>, vector<8x32xf32> -> vector<8x32xf32>
    %c0_3 = arith.constant 0 : index
    %c0_4 = arith.constant 0 : index
    %8 = vector.load %arg2[%c0_3, %c0_4] : memref<1024x32xf32, #tpu.memory_space<vmem>>, vector<1024x32xf32>
    %c0_5 = arith.constant 0 : index
    %c0_6 = arith.constant 0 : index
    %9 = vector.load %arg5[%c0_5, %c0_6] : memref<32x32xf32, #tpu.memory_space<vmem>>, vector<32x32xf32>
    %cst_7 = arith.constant dense<0.000000e+00> : vector<1024x32xf32>
    %10 = tpu.matmul %8, %9, %cst_7 {dimension_numbers = #tpu.dot_dimension_numbers<[1], [0], [0], [1], [0, 0, 1, 1], [], []>} : vector<1024x32xf32>, vector<32x32xf32>, vector<1024x32xf32> -> vector<1024x32xf32>
    %c0_8 = arith.constant 0 : index
    %c0_9 = arith.constant 0 : index
    %11 = vector.load %arg3[%c0_8, %c0_9] : memref<8x128xf32, #tpu.memory_space<vmem>>, vector<8x128xf32>
    %cst_10 = arith.constant dense<0xFF800000> : vector<8xf32>
    %12 = vector.multi_reduction <maximumf>, %11, %cst_10 [1] : vector<8x128xf32> to vector<8xf32>
    %13 = vector.shape_cast %12 : vector<8xf32> to vector<8x1xf32>
    %14 = vector.broadcast %13 : vector<8x1xf32> to vector<8x128xf32>
    %15 = arith.subf %11, %14 : vector<8x128xf32>
    %16 = math.exp %15 : vector<8x128xf32>
    %cst_11 = arith.constant dense<0.000000e+00> : vector<8xf32>
    %17 = vector.multi_reduction <add>, %16, %cst_11 [1] : vector<8x128xf32> to vector<8xf32>
    %18 = vector.shape_cast %17 : vector<8xf32> to vector<8x1xf32>
    %19 = tpu.reciprocal %18 : vector<8x1xf32> -> vector<8x1xf32>
    %20 = vector.broadcast %19 : vector<8x1xf32> to vector<8x128xf32>
    %21 = arith.mulf %16, %20 : vector<8x128xf32>
    %22 = vector.extract_strided_slice %10 {offsets = [0, 0], sizes = [128, 32], strides = [1, 1]} : vector<1024x32xf32> to vector<128x32xf32>
    %23 = vector.extract_strided_slice %7 {offsets = [0, 0], sizes = [1, 32], strides = [1, 1]} : vector<8x32xf32> to vector<1x32xf32>
    %cst_12 = arith.constant dense<0.000000e+00> : vector<1x128xf32>
    %24 = tpu.matmul %23, %22, %cst_12 {dimension_numbers = #tpu.dot_dimension_numbers<[1], [1], [0], [0], [0, 0, 1, 0], [], []>} : vector<1x32xf32>, vector<128x32xf32>, vector<1x128xf32> -> vector<1x128xf32>
    %c0_13 = arith.constant 0 : index
    %c0_14 = arith.constant 0 : index
    %25 = vector.load %arg10[%c0_13, %c0_14] : memref<8x128xf32, #tpu.memory_space<vmem>>, vector<1x128xf32>
    tpu.vector_store %arg10[%c0_13, %c0_14], %24 {strides = array<i32>} : memref<8x128xf32, #tpu.memory_space<vmem>>, vector<1x128xf32>,
    %26 = vector.extract_strided_slice %10 {offsets = [128, 0], sizes = [128, 32], strides = [1, 1]} : vector<1024x32xf32> to vector<128x32xf32>
    %27 = vector.extract_strided_slice %7 {offsets = [1, 0], sizes = [1, 32], strides = [1, 1]} : vector<8x32xf32> to vector<1x32xf32>
    %cst_15 = arith.constant dense<0.000000e+00> : vector<1x128xf32>
    %28 = tpu.matmul %27, %26, %cst_15 {dimension_numbers = #tpu.dot_dimension_numbers<[1], [1], [0], [0], [0, 0, 1, 0], [], []>} : vector<1x32xf32>, vector<128x32xf32>, vector<1x128xf32> -> vector<1x128xf32>
    %c1 = arith.constant 1 : index
    %c0_16 = arith.constant 0 : index
    %29 = vector.load %arg10[%c1, %c0_16] : memref<8x128xf32, #tpu.memory_space<vmem>>, vector<1x128xf32>
    tpu.vector_store %arg10[%c1, %c0_16], %28 {strides = array<i32>} : memref<8x128xf32, #tpu.memory_space<vmem>>, vector<1x128xf32>,
    %30 = vector.extract_strided_slice %10 {offsets = [256, 0], sizes = [128, 32], strides = [1, 1]} : vector<1024x32xf32> to vector<128x32xf32>
    %31 = vector.extract_strided_slice %7 {offsets = [2, 0], sizes = [1, 32], strides = [1, 1]} : vector<8x32xf32> to vector<1x32xf32>
    %cst_17 = arith.constant dense<0.000000e+00> : vector<1x128xf32>
    %32 = tpu.matmul %31, %30, %cst_17 {dimension_numbers = #tpu.dot_dimension_numbers<[1], [1], [0], [0], [0, 0, 1, 0], [], []>} : vector<1x32xf32>, vector<128x32xf32>, vector<1x128xf32> -> vector<1x128xf32>
    %c2 = arith.constant 2 : index
    %c0_18 = arith.constant 0 : index
    %33 = vector.load %arg10[%c2, %c0_18] : memref<8x128xf32, #tpu.memory_space<vmem>>, vector<1x128xf32>
    tpu.vector_store %arg10[%c2, %c0_18], %32 {strides = array<i32>} : memref<8x128xf32, #tpu.memory_space<vmem>>, vector<1x128xf32>,
    %34 = vector.extract_strided_slice %10 {offsets = [384, 0], sizes = [128, 32], strides = [1, 1]} : vector<1024x32xf32> to vector<128x32xf32>
    %35 = vector.extract_strided_slice %7 {offsets = [3, 0], sizes = [1, 32], strides = [1, 1]} : vector<8x32xf32> to vector<1x32xf32>
    %cst_19 = arith.constant dense<0.000000e+00> : vector<1x128xf32>
    %36 = tpu.matmul %35, %34, %cst_19 {dimension_numbers = #tpu.dot_dimension_numbers<[1], [1], [0], [0], [0, 0, 1, 0], [], []>} : vector<1x32xf32>, vector<128x32xf32>, vector<1x128xf32> -> vector<1x128xf32>
    %c3 = arith.constant 3 : index
    %c0_20 = arith.constant 0 : index
    %37 = vector.load %arg10[%c3, %c0_20] : memref<8x128xf32, #tpu.memory_space<vmem>>, vector<1x128xf32>
    tpu.vector_store %arg10[%c3, %c0_20], %36 {strides = array<i32>} : memref<8x128xf32, #tpu.memory_space<vmem>>, vector<1x128xf32>,
    %38 = vector.extract_strided_slice %10 {offsets = [512, 0], sizes = [128, 32], strides = [1, 1]} : vector<1024x32xf32> to vector<128x32xf32>
    %39 = vector.extract_strided_slice %7 {offsets = [4, 0], sizes = [1, 32], strides = [1, 1]} : vector<8x32xf32> to vector<1x32xf32>
    %cst_21 = arith.constant dense<0.000000e+00> : vector<1x128xf32>
    %40 = tpu.matmul %39, %38, %cst_21 {dimension_numbers = #tpu.dot_dimension_numbers<[1], [1], [0], [0], [0, 0, 1, 0], [], []>} : vector<1x32xf32>, vector<128x32xf32>, vector<1x128xf32> -> vector<1x128xf32>
    %c4 = arith.constant 4 : index
    %c0_22 = arith.constant 0 : index
    %41 = vector.load %arg10[%c4, %c0_22] : memref<8x128xf32, #tpu.memory_space<vmem>>, vector<1x128xf32>
    tpu.vector_store %arg10[%c4, %c0_22], %40 {strides = array<i32>} : memref<8x128xf32, #tpu.memory_space<vmem>>, vector<1x128xf32>,
    %42 = vector.extract_strided_slice %10 {offsets = [640, 0], sizes = [128, 32], strides = [1, 1]} : vector<1024x32xf32> to vector<128x32xf32>
    %43 = vector.extract_strided_slice %7 {offsets = [5, 0], sizes = [1, 32], strides = [1, 1]} : vector<8x32xf32> to vector<1x32xf32>
    %cst_23 = arith.constant dense<0.000000e+00> : vector<1x128xf32>
    %44 = tpu.matmul %43, %42, %cst_23 {dimension_numbers = #tpu.dot_dimension_numbers<[1], [1], [0], [0], [0, 0, 1, 0], [], []>} : vector<1x32xf32>, vector<128x32xf32>, vector<1x128xf32> -> vector<1x128xf32>
    %c5 = arith.constant 5 : index
    %c0_24 = arith.constant 0 : index
    %45 = vector.load %arg10[%c5, %c0_24] : memref<8x128xf32, #tpu.memory_space<vmem>>, vector<1x128xf32>
    tpu.vector_store %arg10[%c5, %c0_24], %44 {strides = array<i32>} : memref<8x128xf32, #tpu.memory_space<vmem>>, vector<1x128xf32>,
    %46 = vector.extract_strided_slice %10 {offsets = [768, 0], sizes = [128, 32], strides = [1, 1]} : vector<1024x32xf32> to vector<128x32xf32>
    %47 = vector.extract_strided_slice %7 {offsets = [6, 0], sizes = [1, 32], strides = [1, 1]} : vector<8x32xf32> to vector<1x32xf32>
    %cst_25 = arith.constant dense<0.000000e+00> : vector<1x128xf32>
    %48 = tpu.matmul %47, %46, %cst_25 {dimension_numbers = #tpu.dot_dimension_numbers<[1], [1], [0], [0], [0, 0, 1, 0], [], []>} : vector<1x32xf32>, vector<128x32xf32>, vector<1x128xf32> -> vector<1x128xf32>
    %c6 = arith.constant 6 : index
    %c0_26 = arith.constant 0 : index
    %49 = vector.load %arg10[%c6, %c0_26] : memref<8x128xf32, #tpu.memory_space<vmem>>, vector<1x128xf32>
    tpu.vector_store %arg10[%c6, %c0_26], %48 {strides = array<i32>} : memref<8x128xf32, #tpu.memory_space<vmem>>, vector<1x128xf32>,
    %50 = vector.extract_strided_slice %10 {offsets = [896, 0], sizes = [128, 32], strides = [1, 1]} : vector<1024x32xf32> to vector<128x32xf32>
    %51 = vector.extract_strided_slice %7 {offsets = [7, 0], sizes = [1, 32], strides = [1, 1]} : vector<8x32xf32> to vector<1x32xf32>
    %cst_27 = arith.constant dense<0.000000e+00> : vector<1x128xf32>
    %52 = tpu.matmul %51, %50, %cst_27 {dimension_numbers = #tpu.dot_dimension_numbers<[1], [1], [0], [0], [0, 0, 1, 0], [], []>} : vector<1x32xf32>, vector<128x32xf32>, vector<1x128xf32> -> vector<1x128xf32>
    %c7 = arith.constant 7 : index
    %c0_28 = arith.constant 0 : index
    %53 = vector.load %arg10[%c7, %c0_28] : memref<8x128xf32, #tpu.memory_space<vmem>>, vector<1x128xf32>
    tpu.vector_store %arg10[%c7, %c0_28], %52 {strides = array<i32>} : memref<8x128xf32, #tpu.memory_space<vmem>>, vector<1x128xf32>,
    %c0_29 = arith.constant 0 : index
    %c0_30 = arith.constant 0 : index
    %54 = vector.load %arg10[%c0_29, %c0_30] : memref<8x128xf32, #tpu.memory_space<vmem>>, vector<8x128xf32>
    %cst_31 = arith.constant dense<0.000000e+00> : vector<8xf32>
    %55 = vector.multi_reduction <add>, %54, %cst_31 [1] : vector<8x128xf32> to vector<8xf32>
    %56 = vector.shape_cast %55 : vector<8xf32> to vector<8x1xf32>
    %cst_32 = arith.constant 1.250000e-01 : f32
    %57 = vector.broadcast %cst_32 : f32 to vector<8x1xf32>
    %58 = arith.mulf %56, %57 : vector<8x1xf32>
    %59 = vector.broadcast %58 : vector<8x1xf32> to vector<8x128xf32>
    %60 = arith.subf %54, %59 : vector<8x128xf32>
    %61 = vector.broadcast %4 : vector<1x128xf32> to vector<8x128xf32>
    %62 = arith.mulf %60, %61 : vector<8x128xf32>
    %63 = arith.mulf %62, %62 : vector<8x128xf32>
    %cst_33 = arith.constant dense<0.000000e+00> : vector<8xf32>
    %64 = vector.multi_reduction <add>, %63, %cst_33 [1] : vector<8x128xf32> to vector<8xf32>
    %65 = vector.shape_cast %64 : vector<8xf32> to vector<8x1xf32>
    %cst_34 = arith.constant 0.142857149 : f32
    %66 = vector.broadcast %cst_34 : f32 to vector<8x1xf32>
    %67 = arith.mulf %65, %66 : vector<8x1xf32>
    %68 = vector.broadcast %58 : vector<8x1xf32> to vector<8x128xf32>
    %69 = arith.subf %54, %68 : vector<8x128xf32>
    %cst_35 = arith.constant 9.99999971E-10 : f32
    %70 = vector.broadcast %cst_35 : f32 to vector<8x1xf32>
    %71 = arith.addf %67, %70 : vector<8x1xf32>
    %72 = math.rsqrt %71 : vector<8x1xf32>
    %73 = vector.broadcast %72 : vector<8x1xf32> to vector<8x128xf32>
    %74 = arith.mulf %69, %73 : vector<8x128xf32>
    %75 = arith.addf %11, %74 : vector<8x128xf32>
    %76 = vector.extract_strided_slice %10 {offsets = [0, 0], sizes = [128, 32], strides = [1, 1]} : vector<1024x32xf32> to vector<128x32xf32>
    %77 = vector.extract_strided_slice %21 {offsets = [0, 0], sizes = [1, 128], strides = [1, 1]} : vector<8x128xf32> to vector<1x128xf32>
    %cst_36 = arith.constant dense<0.000000e+00> : vector<1x32xf32>
    %78 = tpu.matmul %77, %76, %cst_36 {dimension_numbers = #tpu.dot_dimension_numbers<[1], [0], [0], [1], [0, 0, 1, 1], [], []>} : vector<1x128xf32>, vector<128x32xf32>, vector<1x32xf32> -> vector<1x32xf32>
    %c0_37 = arith.constant 0 : index
    %c0_38 = arith.constant 0 : index
    %79 = vector.load %arg11[%c0_37, %c0_38] : memref<8x32xf32, #tpu.memory_space<vmem>>, vector<1x32xf32>
    tpu.vector_store %arg11[%c0_37, %c0_38], %78 {strides = array<i32>} : memref<8x32xf32, #tpu.memory_space<vmem>>, vector<1x32xf32>,
    %80 = vector.extract_strided_slice %10 {offsets = [128, 0], sizes = [128, 32], strides = [1, 1]} : vector<1024x32xf32> to vector<128x32xf32>
    %81 = vector.extract_strided_slice %21 {offsets = [1, 0], sizes = [1, 128], strides = [1, 1]} : vector<8x128xf32> to vector<1x128xf32>
    %cst_39 = arith.constant dense<0.000000e+00> : vector<1x32xf32>
    %82 = tpu.matmul %81, %80, %cst_39 {dimension_numbers = #tpu.dot_dimension_numbers<[1], [0], [0], [1], [0, 0, 1, 1], [], []>} : vector<1x128xf32>, vector<128x32xf32>, vector<1x32xf32> -> vector<1x32xf32>
    %c1_40 = arith.constant 1 : index
    %c0_41 = arith.constant 0 : index
    %83 = vector.load %arg11[%c1_40, %c0_41] : memref<8x32xf32, #tpu.memory_space<vmem>>, vector<1x32xf32>
    tpu.vector_store %arg11[%c1_40, %c0_41], %82 {strides = array<i32>} : memref<8x32xf32, #tpu.memory_space<vmem>>, vector<1x32xf32>,
    %84 = vector.extract_strided_slice %10 {offsets = [256, 0], sizes = [128, 32], strides = [1, 1]} : vector<1024x32xf32> to vector<128x32xf32>
    %85 = vector.extract_strided_slice %21 {offsets = [2, 0], sizes = [1, 128], strides = [1, 1]} : vector<8x128xf32> to vector<1x128xf32>
    %cst_42 = arith.constant dense<0.000000e+00> : vector<1x32xf32>
    %86 = tpu.matmul %85, %84, %cst_42 {dimension_numbers = #tpu.dot_dimension_numbers<[1], [0], [0], [1], [0, 0, 1, 1], [], []>} : vector<1x128xf32>, vector<128x32xf32>, vector<1x32xf32> -> vector<1x32xf32>
    %c2_43 = arith.constant 2 : index
    %c0_44 = arith.constant 0 : index
    %87 = vector.load %arg11[%c2_43, %c0_44] : memref<8x32xf32, #tpu.memory_space<vmem>>, vector<1x32xf32>
    tpu.vector_store %arg11[%c2_43, %c0_44], %86 {strides = array<i32>} : memref<8x32xf32, #tpu.memory_space<vmem>>, vector<1x32xf32>,
    %88 = vector.extract_strided_slice %10 {offsets = [384, 0], sizes = [128, 32], strides = [1, 1]} : vector<1024x32xf32> to vector<128x32xf32>
    %89 = vector.extract_strided_slice %21 {offsets = [3, 0], sizes = [1, 128], strides = [1, 1]} : vector<8x128xf32> to vector<1x128xf32>
    %cst_45 = arith.constant dense<0.000000e+00> : vector<1x32xf32>
    %90 = tpu.matmul %89, %88, %cst_45 {dimension_numbers = #tpu.dot_dimension_numbers<[1], [0], [0], [1], [0, 0, 1, 1], [], []>} : vector<1x128xf32>, vector<128x32xf32>, vector<1x32xf32> -> vector<1x32xf32>
    %c3_46 = arith.constant 3 : index
    %c0_47 = arith.constant 0 : index
    %91 = vector.load %arg11[%c3_46, %c0_47] : memref<8x32xf32, #tpu.memory_space<vmem>>, vector<1x32xf32>
    tpu.vector_store %arg11[%c3_46, %c0_47], %90 {strides = array<i32>} : memref<8x32xf32, #tpu.memory_space<vmem>>, vector<1x32xf32>,
    %92 = vector.extract_strided_slice %10 {offsets = [512, 0], sizes = [128, 32], strides = [1, 1]} : vector<1024x32xf32> to vector<128x32xf32>
    %93 = vector.extract_strided_slice %21 {offsets = [4, 0], sizes = [1, 128], strides = [1, 1]} : vector<8x128xf32> to vector<1x128xf32>
    %cst_48 = arith.constant dense<0.000000e+00> : vector<1x32xf32>
    %94 = tpu.matmul %93, %92, %cst_48 {dimension_numbers = #tpu.dot_dimension_numbers<[1], [0], [0], [1], [0, 0, 1, 1], [], []>} : vector<1x128xf32>, vector<128x32xf32>, vector<1x32xf32> -> vector<1x32xf32>
    %c4_49 = arith.constant 4 : index
    %c0_50 = arith.constant 0 : index
    %95 = vector.load %arg11[%c4_49, %c0_50] : memref<8x32xf32, #tpu.memory_space<vmem>>, vector<1x32xf32>
    tpu.vector_store %arg11[%c4_49, %c0_50], %94 {strides = array<i32>} : memref<8x32xf32, #tpu.memory_space<vmem>>, vector<1x32xf32>,
    %96 = vector.extract_strided_slice %10 {offsets = [640, 0], sizes = [128, 32], strides = [1, 1]} : vector<1024x32xf32> to vector<128x32xf32>
    %97 = vector.extract_strided_slice %21 {offsets = [5, 0], sizes = [1, 128], strides = [1, 1]} : vector<8x128xf32> to vector<1x128xf32>
    %cst_51 = arith.constant dense<0.000000e+00> : vector<1x32xf32>
    %98 = tpu.matmul %97, %96, %cst_51 {dimension_numbers = #tpu.dot_dimension_numbers<[1], [0], [0], [1], [0, 0, 1, 1], [], []>} : vector<1x128xf32>, vector<128x32xf32>, vector<1x32xf32> -> vector<1x32xf32>
    %c5_52 = arith.constant 5 : index
    %c0_53 = arith.constant 0 : index
    %99 = vector.load %arg11[%c5_52, %c0_53] : memref<8x32xf32, #tpu.memory_space<vmem>>, vector<1x32xf32>
    tpu.vector_store %arg11[%c5_52, %c0_53], %98 {strides = array<i32>} : memref<8x32xf32, #tpu.memory_space<vmem>>, vector<1x32xf32>,
    %100 = vector.extract_strided_slice %10 {offsets = [768, 0], sizes = [128, 32], strides = [1, 1]} : vector<1024x32xf32> to vector<128x32xf32>
    %101 = vector.extract_strided_slice %21 {offsets = [6, 0], sizes = [1, 128], strides = [1, 1]} : vector<8x128xf32> to vector<1x128xf32>
    %cst_54 = arith.constant dense<0.000000e+00> : vector<1x32xf32>
    %102 = tpu.matmul %101, %100, %cst_54 {dimension_numbers = #tpu.dot_dimension_numbers<[1], [0], [0], [1], [0, 0, 1, 1], [], []>} : vector<1x128xf32>, vector<128x32xf32>, vector<1x32xf32> -> vector<1x32xf32>
    %c6_55 = arith.constant 6 : index
    %c0_56 = arith.constant 0 : index
    %103 = vector.load %arg11[%c6_55, %c0_56] : memref<8x32xf32, #tpu.memory_space<vmem>>, vector<1x32xf32>
    tpu.vector_store %arg11[%c6_55, %c0_56], %102 {strides = array<i32>} : memref<8x32xf32, #tpu.memory_space<vmem>>, vector<1x32xf32>,
    %104 = vector.extract_strided_slice %10 {offsets = [896, 0], sizes = [128, 32], strides = [1, 1]} : vector<1024x32xf32> to vector<128x32xf32>
    %105 = vector.extract_strided_slice %21 {offsets = [7, 0], sizes = [1, 128], strides = [1, 1]} : vector<8x128xf32> to vector<1x128xf32>
    %cst_57 = arith.constant dense<0.000000e+00> : vector<1x32xf32>
    %106 = tpu.matmul %105, %104, %cst_57 {dimension_numbers = #tpu.dot_dimension_numbers<[1], [0], [0], [1], [0, 0, 1, 1], [], []>} : vector<1x128xf32>, vector<128x32xf32>, vector<1x32xf32> -> vector<1x32xf32>
    %c7_58 = arith.constant 7 : index
    %c0_59 = arith.constant 0 : index
    %107 = vector.load %arg11[%c7_58, %c0_59] : memref<8x32xf32, #tpu.memory_space<vmem>>, vector<1x32xf32>
    tpu.vector_store %arg11[%c7_58, %c0_59], %106 {strides = array<i32>} : memref<8x32xf32, #tpu.memory_space<vmem>>, vector<1x32xf32>,
    %c0_60 = arith.constant 0 : index
    %c0_61 = arith.constant 0 : index
    %108 = vector.load %arg11[%c0_60, %c0_61] : memref<8x32xf32, #tpu.memory_space<vmem>>, vector<8x32xf32>
    %cst_62 = arith.constant 1.250000e-01 : f32
    %109 = vector.broadcast %cst_62 : f32 to vector<8x32xf32>
    %110 = arith.mulf %108, %109 : vector<8x32xf32>
    %111 = arith.addf %7, %110 : vector<8x32xf32>
    %cst_63 = arith.constant dense<0xFF800000> : vector<8xf32>
    %112 = vector.multi_reduction <maximumf>, %75, %cst_63 [1] : vector<8x128xf32> to vector<8xf32>
    %113 = vector.shape_cast %112 : vector<8xf32> to vector<8x1xf32>
    %114 = vector.broadcast %113 : vector<8x1xf32> to vector<8x128xf32>
    %115 = arith.subf %75, %114 : vector<8x128xf32>
    %116 = math.exp %115 : vector<8x128xf32>
    %cst_64 = arith.constant dense<0.000000e+00> : vector<8xf32>
    %117 = vector.multi_reduction <add>, %116, %cst_64 [1] : vector<8x128xf32> to vector<8xf32>
    %118 = vector.shape_cast %117 : vector<8xf32> to vector<8x1xf32>
    %119 = tpu.reciprocal %118 : vector<8x1xf32> -> vector<8x1xf32>
    %120 = vector.broadcast %119 : vector<8x1xf32> to vector<8x128xf32>
    %121 = arith.mulf %116, %120 : vector<8x128xf32>
    %122 = vector.extract_strided_slice %10 {offsets = [0, 0], sizes = [128, 32], strides = [1, 1]} : vector<1024x32xf32> to vector<128x32xf32>
    %123 = vector.extract_strided_slice %111 {offsets = [0, 0], sizes = [1, 32], strides = [1, 1]} : vector<8x32xf32> to vector<1x32xf32>
    %cst_65 = arith.constant dense<0.000000e+00> : vector<1x128xf32>
    %124 = tpu.matmul %123, %122, %cst_65 {dimension_numbers = #tpu.dot_dimension_numbers<[1], [1], [0], [0], [0, 0, 1, 0], [], []>} : vector<1x32xf32>, vector<128x32xf32>, vector<1x128xf32> -> vector<1x128xf32>
    %c0_66 = arith.constant 0 : index
    %c0_67 = arith.constant 0 : index
    %125 = vector.load %arg10[%c0_66, %c0_67] : memref<8x128xf32, #tpu.memory_space<vmem>>, vector<1x128xf32>
    tpu.vector_store %arg10[%c0_66, %c0_67], %124 {strides = array<i32>} : memref<8x128xf32, #tpu.memory_space<vmem>>, vector<1x128xf32>,
    %126 = vector.extract_strided_slice %10 {offsets = [128, 0], sizes = [128, 32], strides = [1, 1]} : vector<1024x32xf32> to vector<128x32xf32>
    %127 = vector.extract_strided_slice %111 {offsets = [1, 0], sizes = [1, 32], strides = [1, 1]} : vector<8x32xf32> to vector<1x32xf32>
    %cst_68 = arith.constant dense<0.000000e+00> : vector<1x128xf32>
    %128 = tpu.matmul %127, %126, %cst_68 {dimension_numbers = #tpu.dot_dimension_numbers<[1], [1], [0], [0], [0, 0, 1, 0], [], []>} : vector<1x32xf32>, vector<128x32xf32>, vector<1x128xf32> -> vector<1x128xf32>
    %c1_69 = arith.constant 1 : index
    %c0_70 = arith.constant 0 : index
    %129 = vector.load %arg10[%c1_69, %c0_70] : memref<8x128xf32, #tpu.memory_space<vmem>>, vector<1x128xf32>
    tpu.vector_store %arg10[%c1_69, %c0_70], %128 {strides = array<i32>} : memref<8x128xf32, #tpu.memory_space<vmem>>, vector<1x128xf32>,
    %130 = vector.extract_strided_slice %10 {offsets = [256, 0], sizes = [128, 32], strides = [1, 1]} : vector<1024x32xf32> to vector<128x32xf32>
    %131 = vector.extract_strided_slice %111 {offsets = [2, 0], sizes = [1, 32], strides = [1, 1]} : vector<8x32xf32> to vector<1x32xf32>
    %cst_71 = arith.constant dense<0.000000e+00> : vector<1x128xf32>
    %132 = tpu.matmul %131, %130, %cst_71 {dimension_numbers = #tpu.dot_dimension_numbers<[1], [1], [0], [0], [0, 0, 1, 0], [], []>} : vector<1x32xf32>, vector<128x32xf32>, vector<1x128xf32> -> vector<1x128xf32>
    %c2_72 = arith.constant 2 : index
    %c0_73 = arith.constant 0 : index
    %133 = vector.load %arg10[%c2_72, %c0_73] : memref<8x128xf32, #tpu.memory_space<vmem>>, vector<1x128xf32>
    tpu.vector_store %arg10[%c2_72, %c0_73], %132 {strides = array<i32>} : memref<8x128xf32, #tpu.memory_space<vmem>>, vector<1x128xf32>,
    %134 = vector.extract_strided_slice %10 {offsets = [384, 0], sizes = [128, 32], strides = [1, 1]} : vector<1024x32xf32> to vector<128x32xf32>
    %135 = vector.extract_strided_slice %111 {offsets = [3, 0], sizes = [1, 32], strides = [1, 1]} : vector<8x32xf32> to vector<1x32xf32>
    %cst_74 = arith.constant dense<0.000000e+00> : vector<1x128xf32>
    %136 = tpu.matmul %135, %134, %cst_74 {dimension_numbers = #tpu.dot_dimension_numbers<[1], [1], [0], [0], [0, 0, 1, 0], [], []>} : vector<1x32xf32>, vector<128x32xf32>, vector<1x128xf32> -> vector<1x128xf32>
    %c3_75 = arith.constant 3 : index
    %c0_76 = arith.constant 0 : index
    %137 = vector.load %arg10[%c3_75, %c0_76] : memref<8x128xf32, #tpu.memory_space<vmem>>, vector<1x128xf32>
    tpu.vector_store %arg10[%c3_75, %c0_76], %136 {strides = array<i32>} : memref<8x128xf32, #tpu.memory_space<vmem>>, vector<1x128xf32>,
    %138 = vector.extract_strided_slice %10 {offsets = [512, 0], sizes = [128, 32], strides = [1, 1]} : vector<1024x32xf32> to vector<128x32xf32>
    %139 = vector.extract_strided_slice %111 {offsets = [4, 0], sizes = [1, 32], strides = [1, 1]} : vector<8x32xf32> to vector<1x32xf32>
    %cst_77 = arith.constant dense<0.000000e+00> : vector<1x128xf32>
    %140 = tpu.matmul %139, %138, %cst_77 {dimension_numbers = #tpu.dot_dimension_numbers<[1], [1], [0], [0], [0, 0, 1, 0], [], []>} : vector<1x32xf32>, vector<128x32xf32>, vector<1x128xf32> -> vector<1x128xf32>
    %c4_78 = arith.constant 4 : index
    %c0_79 = arith.constant 0 : index
    %141 = vector.load %arg10[%c4_78, %c0_79] : memref<8x128xf32, #tpu.memory_space<vmem>>, vector<1x128xf32>
    tpu.vector_store %arg10[%c4_78, %c0_79], %140 {strides = array<i32>} : memref<8x128xf32, #tpu.memory_space<vmem>>, vector<1x128xf32>,
    %142 = vector.extract_strided_slice %10 {offsets = [640, 0], sizes = [128, 32], strides = [1, 1]} : vector<1024x32xf32> to vector<128x32xf32>
    %143 = vector.extract_strided_slice %111 {offsets = [5, 0], sizes = [1, 32], strides = [1, 1]} : vector<8x32xf32> to vector<1x32xf32>
    %cst_80 = arith.constant dense<0.000000e+00> : vector<1x128xf32>
    %144 = tpu.matmul %143, %142, %cst_80 {dimension_numbers = #tpu.dot_dimension_numbers<[1], [1], [0], [0], [0, 0, 1, 0], [], []>} : vector<1x32xf32>, vector<128x32xf32>, vector<1x128xf32> -> vector<1x128xf32>
    %c5_81 = arith.constant 5 : index
    %c0_82 = arith.constant 0 : index
    %145 = vector.load %arg10[%c5_81, %c0_82] : memref<8x128xf32, #tpu.memory_space<vmem>>, vector<1x128xf32>
    tpu.vector_store %arg10[%c5_81, %c0_82], %144 {strides = array<i32>} : memref<8x128xf32, #tpu.memory_space<vmem>>, vector<1x128xf32>,
    %146 = vector.extract_strided_slice %10 {offsets = [768, 0], sizes = [128, 32], strides = [1, 1]} : vector<1024x32xf32> to vector<128x32xf32>
    %147 = vector.extract_strided_slice %111 {offsets = [6, 0], sizes = [1, 32], strides = [1, 1]} : vector<8x32xf32> to vector<1x32xf32>
    %cst_83 = arith.constant dense<0.000000e+00> : vector<1x128xf32>
    %148 = tpu.matmul %147, %146, %cst_83 {dimension_numbers = #tpu.dot_dimension_numbers<[1], [1], [0], [0], [0, 0, 1, 0], [], []>} : vector<1x32xf32>, vector<128x32xf32>, vector<1x128xf32> -> vector<1x128xf32>
    %c6_84 = arith.constant 6 : index
    %c0_85 = arith.constant 0 : index
    %149 = vector.load %arg10[%c6_84, %c0_85] : memref<8x128xf32, #tpu.memory_space<vmem>>, vector<1x128xf32>
    tpu.vector_store %arg10[%c6_84, %c0_85], %148 {strides = array<i32>} : memref<8x128xf32, #tpu.memory_space<vmem>>, vector<1x128xf32>,
    %150 = vector.extract_strided_slice %10 {offsets = [896, 0], sizes = [128, 32], strides = [1, 1]} : vector<1024x32xf32> to vector<128x32xf32>
    %151 = vector.extract_strided_slice %111 {offsets = [7, 0], sizes = [1, 32], strides = [1, 1]} : vector<8x32xf32> to vector<1x32xf32>
    %cst_86 = arith.constant dense<0.000000e+00> : vector<1x128xf32>
    %152 = tpu.matmul %151, %150, %cst_86 {dimension_numbers = #tpu.dot_dimension_numbers<[1], [1], [0], [0], [0, 0, 1, 0], [], []>} : vector<1x32xf32>, vector<128x32xf32>, vector<1x128xf32> -> vector<1x128xf32>
    %c7_87 = arith.constant 7 : index
    %c0_88 = arith.constant 0 : index
    %153 = vector.load %arg10[%c7_87, %c0_88] : memref<8x128xf32, #tpu.memory_space<vmem>>, vector<1x128xf32>
    tpu.vector_store %arg10[%c7_87, %c0_88], %152 {strides = array<i32>} : memref<8x128xf32, #tpu.memory_space<vmem>>, vector<1x128xf32>,
    %c0_89 = arith.constant 0 : index
    %c0_90 = arith.constant 0 : index
    %154 = vector.load %arg10[%c0_89, %c0_90] : memref<8x128xf32, #tpu.memory_space<vmem>>, vector<8x128xf32>
    %cst_91 = arith.constant dense<0.000000e+00> : vector<8xf32>
    %155 = vector.multi_reduction <add>, %154, %cst_91 [1] : vector<8x128xf32> to vector<8xf32>
    %156 = vector.shape_cast %155 : vector<8xf32> to vector<8x1xf32>
    %cst_92 = arith.constant 1.250000e-01 : f32
    %157 = vector.broadcast %cst_92 : f32 to vector<8x1xf32>
    %158 = arith.mulf %156, %157 : vector<8x1xf32>
    %159 = vector.broadcast %158 : vector<8x1xf32> to vector<8x128xf32>
    %160 = arith.subf %154, %159 : vector<8x128xf32>
    %161 = vector.broadcast %4 : vector<1x128xf32> to vector<8x128xf32>
    %162 = arith.mulf %160, %161 : vector<8x128xf32>
    %163 = arith.mulf %162, %162 : vector<8x128xf32>
    %cst_93 = arith.constant dense<0.000000e+00> : vector<8xf32>
    %164 = vector.multi_reduction <add>, %163, %cst_93 [1] : vector<8x128xf32> to vector<8xf32>
    %165 = vector.shape_cast %164 : vector<8xf32> to vector<8x1xf32>
    %cst_94 = arith.constant 0.142857149 : f32
    %166 = vector.broadcast %cst_94 : f32 to vector<8x1xf32>
    %167 = arith.mulf %165, %166 : vector<8x1xf32>
    %168 = vector.broadcast %158 : vector<8x1xf32> to vector<8x128xf32>
    %169 = arith.subf %154, %168 : vector<8x128xf32>
    %cst_95 = arith.constant 9.99999971E-10 : f32
    %170 = vector.broadcast %cst_95 : f32 to vector<8x1xf32>
    %171 = arith.addf %167, %170 : vector<8x1xf32>
    %172 = math.rsqrt %171 : vector<8x1xf32>
    %173 = vector.broadcast %172 : vector<8x1xf32> to vector<8x128xf32>
    %174 = arith.mulf %169, %173 : vector<8x128xf32>
    %175 = arith.addf %75, %174 : vector<8x128xf32>
    %176 = vector.extract_strided_slice %10 {offsets = [0, 0], sizes = [128, 32], strides = [1, 1]} : vector<1024x32xf32> to vector<128x32xf32>
    %177 = vector.extract_strided_slice %121 {offsets = [0, 0], sizes = [1, 128], strides = [1, 1]} : vector<8x128xf32> to vector<1x128xf32>
    %cst_96 = arith.constant dense<0.000000e+00> : vector<1x32xf32>
    %178 = tpu.matmul %177, %176, %cst_96 {dimension_numbers = #tpu.dot_dimension_numbers<[1], [0], [0], [1], [0, 0, 1, 1], [], []>} : vector<1x128xf32>, vector<128x32xf32>, vector<1x32xf32> -> vector<1x32xf32>
    %c0_97 = arith.constant 0 : index
    %c0_98 = arith.constant 0 : index
    %179 = vector.load %arg11[%c0_97, %c0_98] : memref<8x32xf32, #tpu.memory_space<vmem>>, vector<1x32xf32>
    tpu.vector_store %arg11[%c0_97, %c0_98], %178 {strides = array<i32>} : memref<8x32xf32, #tpu.memory_space<vmem>>, vector<1x32xf32>,
    %180 = vector.extract_strided_slice %10 {offsets = [128, 0], sizes = [128, 32], strides = [1, 1]} : vector<1024x32xf32> to vector<128x32xf32>
    %181 = vector.extract_strided_slice %121 {offsets = [1, 0], sizes = [1, 128], strides = [1, 1]} : vector<8x128xf32> to vector<1x128xf32>
    %cst_99 = arith.constant dense<0.000000e+00> : vector<1x32xf32>
    %182 = tpu.matmul %181, %180, %cst_99 {dimension_numbers = #tpu.dot_dimension_numbers<[1], [0], [0], [1], [0, 0, 1, 1], [], []>} : vector<1x128xf32>, vector<128x32xf32>, vector<1x32xf32> -> vector<1x32xf32>
    %c1_100 = arith.constant 1 : index
    %c0_101 = arith.constant 0 : index
    %183 = vector.load %arg11[%c1_100, %c0_101] : memref<8x32xf32, #tpu.memory_space<vmem>>, vector<1x32xf32>
    tpu.vector_store %arg11[%c1_100, %c0_101], %182 {strides = array<i32>} : memref<8x32xf32, #tpu.memory_space<vmem>>, vector<1x32xf32>,
    %184 = vector.extract_strided_slice %10 {offsets = [256, 0], sizes = [128, 32], strides = [1, 1]} : vector<1024x32xf32> to vector<128x32xf32>
    %185 = vector.extract_strided_slice %121 {offsets = [2, 0], sizes = [1, 128], strides = [1, 1]} : vector<8x128xf32> to vector<1x128xf32>
    %cst_102 = arith.constant dense<0.000000e+00> : vector<1x32xf32>
    %186 = tpu.matmul %185, %184, %cst_102 {dimension_numbers = #tpu.dot_dimension_numbers<[1], [0], [0], [1], [0, 0, 1, 1], [], []>} : vector<1x128xf32>, vector<128x32xf32>, vector<1x32xf32> -> vector<1x32xf32>
    %c2_103 = arith.constant 2 : index
    %c0_104 = arith.constant 0 : index
    %187 = vector.load %arg11[%c2_103, %c0_104] : memref<8x32xf32, #tpu.memory_space<vmem>>, vector<1x32xf32>
    tpu.vector_store %arg11[%c2_103, %c0_104], %186 {strides = array<i32>} : memref<8x32xf32, #tpu.memory_space<vmem>>, vector<1x32xf32>,
    %188 = vector.extract_strided_slice %10 {offsets = [384, 0], sizes = [128, 32], strides = [1, 1]} : vector<1024x32xf32> to vector<128x32xf32>
    %189 = vector.extract_strided_slice %121 {offsets = [3, 0], sizes = [1, 128], strides = [1, 1]} : vector<8x128xf32> to vector<1x128xf32>
    %cst_105 = arith.constant dense<0.000000e+00> : vector<1x32xf32>
    %190 = tpu.matmul %189, %188, %cst_105 {dimension_numbers = #tpu.dot_dimension_numbers<[1], [0], [0], [1], [0, 0, 1, 1], [], []>} : vector<1x128xf32>, vector<128x32xf32>, vector<1x32xf32> -> vector<1x32xf32>
    %c3_106 = arith.constant 3 : index
    %c0_107 = arith.constant 0 : index
    %191 = vector.load %arg11[%c3_106, %c0_107] : memref<8x32xf32, #tpu.memory_space<vmem>>, vector<1x32xf32>
    tpu.vector_store %arg11[%c3_106, %c0_107], %190 {strides = array<i32>} : memref<8x32xf32, #tpu.memory_space<vmem>>, vector<1x32xf32>,
    %192 = vector.extract_strided_slice %10 {offsets = [512, 0], sizes = [128, 32], strides = [1, 1]} : vector<1024x32xf32> to vector<128x32xf32>
    %193 = vector.extract_strided_slice %121 {offsets = [4, 0], sizes = [1, 128], strides = [1, 1]} : vector<8x128xf32> to vector<1x128xf32>
    %cst_108 = arith.constant dense<0.000000e+00> : vector<1x32xf32>
    %194 = tpu.matmul %193, %192, %cst_108 {dimension_numbers = #tpu.dot_dimension_numbers<[1], [0], [0], [1], [0, 0, 1, 1], [], []>} : vector<1x128xf32>, vector<128x32xf32>, vector<1x32xf32> -> vector<1x32xf32>
    %c4_109 = arith.constant 4 : index
    %c0_110 = arith.constant 0 : index
    %195 = vector.load %arg11[%c4_109, %c0_110] : memref<8x32xf32, #tpu.memory_space<vmem>>, vector<1x32xf32>
    tpu.vector_store %arg11[%c4_109, %c0_110], %194 {strides = array<i32>} : memref<8x32xf32, #tpu.memory_space<vmem>>, vector<1x32xf32>,
    %196 = vector.extract_strided_slice %10 {offsets = [640, 0], sizes = [128, 32], strides = [1, 1]} : vector<1024x32xf32> to vector<128x32xf32>
    %197 = vector.extract_strided_slice %121 {offsets = [5, 0], sizes = [1, 128], strides = [1, 1]} : vector<8x128xf32> to vector<1x128xf32>
    %cst_111 = arith.constant dense<0.000000e+00> : vector<1x32xf32>
    %198 = tpu.matmul %197, %196, %cst_111 {dimension_numbers = #tpu.dot_dimension_numbers<[1], [0], [0], [1], [0, 0, 1, 1], [], []>} : vector<1x128xf32>, vector<128x32xf32>, vector<1x32xf32> -> vector<1x32xf32>
    %c5_112 = arith.constant 5 : index
    %c0_113 = arith.constant 0 : index
    %199 = vector.load %arg11[%c5_112, %c0_113] : memref<8x32xf32, #tpu.memory_space<vmem>>, vector<1x32xf32>
    tpu.vector_store %arg11[%c5_112, %c0_113], %198 {strides = array<i32>} : memref<8x32xf32, #tpu.memory_space<vmem>>, vector<1x32xf32>,
    %200 = vector.extract_strided_slice %10 {offsets = [768, 0], sizes = [128, 32], strides = [1, 1]} : vector<1024x32xf32> to vector<128x32xf32>
    %201 = vector.extract_strided_slice %121 {offsets = [6, 0], sizes = [1, 128], strides = [1, 1]} : vector<8x128xf32> to vector<1x128xf32>
    %cst_114 = arith.constant dense<0.000000e+00> : vector<1x32xf32>
    %202 = tpu.matmul %201, %200, %cst_114 {dimension_numbers = #tpu.dot_dimension_numbers<[1], [0], [0], [1], [0, 0, 1, 1], [], []>} : vector<1x128xf32>, vector<128x32xf32>, vector<1x32xf32> -> vector<1x32xf32>
    %c6_115 = arith.constant 6 : index
    %c0_116 = arith.constant 0 : index
    %203 = vector.load %arg11[%c6_115, %c0_116] : memref<8x32xf32, #tpu.memory_space<vmem>>, vector<1x32xf32>
    tpu.vector_store %arg11[%c6_115, %c0_116], %202 {strides = array<i32>} : memref<8x32xf32, #tpu.memory_space<vmem>>, vector<1x32xf32>,
    %204 = vector.extract_strided_slice %10 {offsets = [896, 0], sizes = [128, 32], strides = [1, 1]} : vector<1024x32xf32> to vector<128x32xf32>
    %205 = vector.extract_strided_slice %121 {offsets = [7, 0], sizes = [1, 128], strides = [1, 1]} : vector<8x128xf32> to vector<1x128xf32>
    %cst_117 = arith.constant dense<0.000000e+00> : vector<1x32xf32>
    %206 = tpu.matmul %205, %204, %cst_117 {dimension_numbers = #tpu.dot_dimension_numbers<[1], [0], [0], [1], [0, 0, 1, 1], [], []>} : vector<1x128xf32>, vector<128x32xf32>, vector<1x32xf32> -> vector<1x32xf32>
    %c7_118 = arith.constant 7 : index
    %c0_119 = arith.constant 0 : index
    %207 = vector.load %arg11[%c7_118, %c0_119] : memref<8x32xf32, #tpu.memory_space<vmem>>, vector<1x32xf32>
    tpu.vector_store %arg11[%c7_118, %c0_119], %206 {strides = array<i32>} : memref<8x32xf32, #tpu.memory_space<vmem>>, vector<1x32xf32>,
    %c0_120 = arith.constant 0 : index
    %c0_121 = arith.constant 0 : index
    %208 = vector.load %arg11[%c0_120, %c0_121] : memref<8x32xf32, #tpu.memory_space<vmem>>, vector<8x32xf32>
    %cst_122 = arith.constant 1.250000e-01 : f32
    %209 = vector.broadcast %cst_122 : f32 to vector<8x32xf32>
    %210 = arith.mulf %208, %209 : vector<8x32xf32>
    %211 = arith.addf %111, %210 : vector<8x32xf32>
    %cst_123 = arith.constant dense<0xFF800000> : vector<8xf32>
    %212 = vector.multi_reduction <maximumf>, %175, %cst_123 [1] : vector<8x128xf32> to vector<8xf32>
    %213 = vector.shape_cast %212 : vector<8xf32> to vector<8x1xf32>
    %214 = vector.broadcast %213 : vector<8x1xf32> to vector<8x128xf32>
    %215 = arith.subf %175, %214 : vector<8x128xf32>
    %216 = math.exp %215 : vector<8x128xf32>
    %cst_124 = arith.constant dense<0.000000e+00> : vector<8xf32>
    %217 = vector.multi_reduction <add>, %216, %cst_124 [1] : vector<8x128xf32> to vector<8xf32>
    %218 = vector.shape_cast %217 : vector<8xf32> to vector<8x1xf32>
    %219 = tpu.reciprocal %218 : vector<8x1xf32> -> vector<8x1xf32>
    %220 = vector.broadcast %219 : vector<8x1xf32> to vector<8x128xf32>
    %221 = arith.mulf %216, %220 : vector<8x128xf32>
    %222 = vector.extract_strided_slice %10 {offsets = [0, 0], sizes = [128, 32], strides = [1, 1]} : vector<1024x32xf32> to vector<128x32xf32>
    %223 = vector.extract_strided_slice %221 {offsets = [0, 0], sizes = [1, 128], strides = [1, 1]} : vector<8x128xf32> to vector<1x128xf32>
    %cst_125 = arith.constant dense<0.000000e+00> : vector<1x32xf32>
    %224 = tpu.matmul %223, %222, %cst_125 {dimension_numbers = #tpu.dot_dimension_numbers<[1], [0], [0], [1], [0, 0, 1, 1], [], []>} : vector<1x128xf32>, vector<128x32xf32>, vector<1x32xf32> -> vector<1x32xf32>
    %c0_126 = arith.constant 0 : index
    %c0_127 = arith.constant 0 : index
    %225 = vector.load %arg11[%c0_126, %c0_127] : memref<8x32xf32, #tpu.memory_space<vmem>>, vector<1x32xf32>
    tpu.vector_store %arg11[%c0_126, %c0_127], %224 {strides = array<i32>} : memref<8x32xf32, #tpu.memory_space<vmem>>, vector<1x32xf32>,
    %226 = vector.extract_strided_slice %10 {offsets = [128, 0], sizes = [128, 32], strides = [1, 1]} : vector<1024x32xf32> to vector<128x32xf32>
    %227 = vector.extract_strided_slice %221 {offsets = [1, 0], sizes = [1, 128], strides = [1, 1]} : vector<8x128xf32> to vector<1x128xf32>
    %cst_128 = arith.constant dense<0.000000e+00> : vector<1x32xf32>
    %228 = tpu.matmul %227, %226, %cst_128 {dimension_numbers = #tpu.dot_dimension_numbers<[1], [0], [0], [1], [0, 0, 1, 1], [], []>} : vector<1x128xf32>, vector<128x32xf32>, vector<1x32xf32> -> vector<1x32xf32>
    %c1_129 = arith.constant 1 : index
    %c0_130 = arith.constant 0 : index
    %229 = vector.load %arg11[%c1_129, %c0_130] : memref<8x32xf32, #tpu.memory_space<vmem>>, vector<1x32xf32>
    tpu.vector_store %arg11[%c1_129, %c0_130], %228 {strides = array<i32>} : memref<8x32xf32, #tpu.memory_space<vmem>>, vector<1x32xf32>,
    %230 = vector.extract_strided_slice %10 {offsets = [256, 0], sizes = [128, 32], strides = [1, 1]} : vector<1024x32xf32> to vector<128x32xf32>
    %231 = vector.extract_strided_slice %221 {offsets = [2, 0], sizes = [1, 128], strides = [1, 1]} : vector<8x128xf32> to vector<1x128xf32>
    %cst_131 = arith.constant dense<0.000000e+00> : vector<1x32xf32>
    %232 = tpu.matmul %231, %230, %cst_131 {dimension_numbers = #tpu.dot_dimension_numbers<[1], [0], [0], [1], [0, 0, 1, 1], [], []>} : vector<1x128xf32>, vector<128x32xf32>, vector<1x32xf32> -> vector<1x32xf32>
    %c2_132 = arith.constant 2 : index
    %c0_133 = arith.constant 0 : index
    %233 = vector.load %arg11[%c2_132, %c0_133] : memref<8x32xf32, #tpu.memory_space<vmem>>, vector<1x32xf32>
    tpu.vector_store %arg11[%c2_132, %c0_133], %232 {strides = array<i32>} : memref<8x32xf32, #tpu.memory_space<vmem>>, vector<1x32xf32>,
    %234 = vector.extract_strided_slice %10 {offsets = [384, 0], sizes = [128, 32], strides = [1, 1]} : vector<1024x32xf32> to vector<128x32xf32>
    %235 = vector.extract_strided_slice %221 {offsets = [3, 0], sizes = [1, 128], strides = [1, 1]} : vector<8x128xf32> to vector<1x128xf32>
    %cst_134 = arith.constant dense<0.000000e+00> : vector<1x32xf32>
    %236 = tpu.matmul %235, %234, %cst_134 {dimension_numbers = #tpu.dot_dimension_numbers<[1], [0], [0], [1], [0, 0, 1, 1], [], []>} : vector<1x128xf32>, vector<128x32xf32>, vector<1x32xf32> -> vector<1x32xf32>
    %c3_135 = arith.constant 3 : index
    %c0_136 = arith.constant 0 : index
    %237 = vector.load %arg11[%c3_135, %c0_136] : memref<8x32xf32, #tpu.memory_space<vmem>>, vector<1x32xf32>
    tpu.vector_store %arg11[%c3_135, %c0_136], %236 {strides = array<i32>} : memref<8x32xf32, #tpu.memory_space<vmem>>, vector<1x32xf32>,
    %238 = vector.extract_strided_slice %10 {offsets = [512, 0], sizes = [128, 32], strides = [1, 1]} : vector<1024x32xf32> to vector<128x32xf32>
    %239 = vector.extract_strided_slice %221 {offsets = [4, 0], sizes = [1, 128], strides = [1, 1]} : vector<8x128xf32> to vector<1x128xf32>
    %cst_137 = arith.constant dense<0.000000e+00> : vector<1x32xf32>
    %240 = tpu.matmul %239, %238, %cst_137 {dimension_numbers = #tpu.dot_dimension_numbers<[1], [0], [0], [1], [0, 0, 1, 1], [], []>} : vector<1x128xf32>, vector<128x32xf32>, vector<1x32xf32> -> vector<1x32xf32>
    %c4_138 = arith.constant 4 : index
    %c0_139 = arith.constant 0 : index
    %241 = vector.load %arg11[%c4_138, %c0_139] : memref<8x32xf32, #tpu.memory_space<vmem>>, vector<1x32xf32>
    tpu.vector_store %arg11[%c4_138, %c0_139], %240 {strides = array<i32>} : memref<8x32xf32, #tpu.memory_space<vmem>>, vector<1x32xf32>,
    %242 = vector.extract_strided_slice %10 {offsets = [640, 0], sizes = [128, 32], strides = [1, 1]} : vector<1024x32xf32> to vector<128x32xf32>
    %243 = vector.extract_strided_slice %221 {offsets = [5, 0], sizes = [1, 128], strides = [1, 1]} : vector<8x128xf32> to vector<1x128xf32>
    %cst_140 = arith.constant dense<0.000000e+00> : vector<1x32xf32>
    %244 = tpu.matmul %243, %242, %cst_140 {dimension_numbers = #tpu.dot_dimension_numbers<[1], [0], [0], [1], [0, 0, 1, 1], [], []>} : vector<1x128xf32>, vector<128x32xf32>, vector<1x32xf32> -> vector<1x32xf32>
    %c5_141 = arith.constant 5 : index
    %c0_142 = arith.constant 0 : index
    %245 = vector.load %arg11[%c5_141, %c0_142] : memref<8x32xf32, #tpu.memory_space<vmem>>, vector<1x32xf32>
    tpu.vector_store %arg11[%c5_141, %c0_142], %244 {strides = array<i32>} : memref<8x32xf32, #tpu.memory_space<vmem>>, vector<1x32xf32>,
    %246 = vector.extract_strided_slice %10 {offsets = [768, 0], sizes = [128, 32], strides = [1, 1]} : vector<1024x32xf32> to vector<128x32xf32>
    %247 = vector.extract_strided_slice %221 {offsets = [6, 0], sizes = [1, 128], strides = [1, 1]} : vector<8x128xf32> to vector<1x128xf32>
    %cst_143 = arith.constant dense<0.000000e+00> : vector<1x32xf32>
    %248 = tpu.matmul %247, %246, %cst_143 {dimension_numbers = #tpu.dot_dimension_numbers<[1], [0], [0], [1], [0, 0, 1, 1], [], []>} : vector<1x128xf32>, vector<128x32xf32>, vector<1x32xf32> -> vector<1x32xf32>
    %c6_144 = arith.constant 6 : index
    %c0_145 = arith.constant 0 : index
    %249 = vector.load %arg11[%c6_144, %c0_145] : memref<8x32xf32, #tpu.memory_space<vmem>>, vector<1x32xf32>
    tpu.vector_store %arg11[%c6_144, %c0_145], %248 {strides = array<i32>} : memref<8x32xf32, #tpu.memory_space<vmem>>, vector<1x32xf32>,
    %250 = vector.extract_strided_slice %10 {offsets = [896, 0], sizes = [128, 32], strides = [1, 1]} : vector<1024x32xf32> to vector<128x32xf32>
    %251 = vector.extract_strided_slice %221 {offsets = [7, 0], sizes = [1, 128], strides = [1, 1]} : vector<8x128xf32> to vector<1x128xf32>
    %cst_146 = arith.constant dense<0.000000e+00> : vector<1x32xf32>
    %252 = tpu.matmul %251, %250, %cst_146 {dimension_numbers = #tpu.dot_dimension_numbers<[1], [0], [0], [1], [0, 0, 1, 1], [], []>} : vector<1x128xf32>, vector<128x32xf32>, vector<1x32xf32> -> vector<1x32xf32>
    %c7_147 = arith.constant 7 : index
    %c0_148 = arith.constant 0 : index
    %253 = vector.load %arg11[%c7_147, %c0_148] : memref<8x32xf32, #tpu.memory_space<vmem>>, vector<1x32xf32>
    tpu.vector_store %arg11[%c7_147, %c0_148], %252 {strides = array<i32>} : memref<8x32xf32, #tpu.memory_space<vmem>>, vector<1x32xf32>,
    %c0_149 = arith.constant 0 : index
    %c0_150 = arith.constant 0 : index
    %254 = vector.load %arg11[%c0_149, %c0_150] : memref<8x32xf32, #tpu.memory_space<vmem>>, vector<8x32xf32>
    %255 = arith.addf %211, %254 : vector<8x32xf32>
    %c0_151 = arith.constant 0 : index
    %c0_152 = arith.constant 0 : index
    %256 = vector.load %arg6[%c0_151, %c0_152] : memref<32x128xf32, #tpu.memory_space<vmem>>, vector<32x128xf32>
    %cst_153 = arith.constant dense<0.000000e+00> : vector<8x128xf32>
    %257 = tpu.matmul %255, %256, %cst_153 {dimension_numbers = #tpu.dot_dimension_numbers<[1], [0], [0], [1], [0, 0, 1, 1], [], []>} : vector<8x32xf32>, vector<32x128xf32>, vector<8x128xf32> -> vector<8x128xf32>
    %c0_154 = arith.constant 0 : index
    %c0_155 = arith.constant 0 : index
    %258 = vector.load %arg7[%c0_154, %c0_155] : memref<1x128xf32, #tpu.memory_space<vmem>>, vector<1x128xf32>
    %259 = vector.broadcast %258 : vector<1x128xf32> to vector<8x128xf32>
    %260 = arith.addf %257, %259 : vector<8x128xf32>
    %c0_156 = arith.constant 0 : index
    %c0_157 = arith.constant 0 : index
    %261 = vector.load %arg8[%c0_156, %c0_157] : memref<8x128xf32, #tpu.memory_space<vmem>>, vector<8x128xf32>
    tpu.vector_store %arg8[%c0_156, %c0_157], %260 {strides = array<i32>} : memref<8x128xf32, #tpu.memory_space<vmem>>, vector<8x128xf32>,
    %c0_158 = arith.constant 0 : index
    %c0_159 = arith.constant 0 : index
    %262 = vector.load %arg9[%c0_158, %c0_159] : memref<8x128xf32, #tpu.memory_space<vmem>>, vector<8x128xf32>
    tpu.vector_store %arg9[%c0_158, %c0_159], %221 {strides = array<i32>} : memref<8x128xf32, #tpu.memory_space<vmem>>, vector<8x128xf32>,
    return
  }
  func.func @transform_0(%arg0: i32) -> (i32, i32) {
    %c0_i32 = arith.constant 0 : i32
    %c0_i32_0 = arith.constant 0 : i32
    return %arg0, %c0_i32 : i32, i32
  }
  func.func @transform_1(%arg0: i32) -> (i32, i32) {
    %c0_i32 = arith.constant 0 : i32
    %c0_i32_0 = arith.constant 0 : i32
    return %arg0, %c0_i32 : i32, i32
  }
  func.func @transform_2(%arg0: i32) -> (i32, i32) {
    %c0_i32 = arith.constant 0 : i32
    %c0_i32_0 = arith.constant 0 : i32
    return %arg0, %c0_i32 : i32, i32
  }
  func.func @transform_3(%arg0: i32) -> (i32, i32) {
    %c0_i32 = arith.constant 0 : i32
    %c0_i32_0 = arith.constant 0 : i32
    %c0_i32_1 = arith.constant 0 : i32
    return %c0_i32, %c0_i32_0 : i32, i32
  }
  func.func @transform_4(%arg0: i32) -> (i32, i32) {
    %c0_i32 = arith.constant 0 : i32
    %c0_i32_0 = arith.constant 0 : i32
    %c0_i32_1 = arith.constant 0 : i32
    return %c0_i32, %c0_i32_0 : i32, i32
  }
  func.func @transform_5(%arg0: i32) -> (i32, i32) {
    %c0_i32 = arith.constant 0 : i32
    %c0_i32_0 = arith.constant 0 : i32
    %c0_i32_1 = arith.constant 0 : i32
    return %c0_i32, %c0_i32_0 : i32, i32
  }
  func.func @transform_6(%arg0: i32) -> (i32, i32) {
    %c0_i32 = arith.constant 0 : i32
    %c0_i32_0 = arith.constant 0 : i32
    %c0_i32_1 = arith.constant 0 : i32
    return %c0_i32, %c0_i32_0 : i32, i32
  }
  func.func @transform_7(%arg0: i32) -> (i32, i32) {
    %c0_i32 = arith.constant 0 : i32
    %c0_i32_0 = arith.constant 0 : i32
    return %arg0, %c0_i32 : i32, i32
  }
  func.func @transform_8(%arg0: i32) -> (i32, i32) {
    %c0_i32 = arith.constant 0 : i32
    %c0_i32_0 = arith.constant 0 : i32
    return %arg0, %c0_i32 : i32, i32
  }
}

module attributes {stable_mosaic.version = 11 : i64} {
  func.func @_caps_visual_kernel(%arg0: i32, %arg1: memref<8x32xf32, #tpu.memory_space<vmem>>, %arg2: memref<1024x32xf32, #tpu.memory_space<vmem>>, %arg3: memref<8x128xf32, #tpu.memory_space<vmem>>, %arg4: memref<32x32xf32, #tpu.memory_space<vmem>>, %arg5: memref<32x32xf32, #tpu.memory_space<vmem>>, %arg6: memref<32x128xf32, #tpu.memory_space<vmem>>, %arg7: memref<1x128xf32, #tpu.memory_space<vmem>>, %arg8: memref<8x128xf32, #tpu.memory_space<vmem>>, %arg9: memref<8x128xf32, #tpu.memory_space<vmem>>, %arg10: memref<8x128xf32, #tpu.memory_space<vmem>>, %arg11: memref<8x32xf32, #tpu.memory_space<vmem>>) attributes {dimension_semantics = [#tpu.dimension_semantics<parallel>], iteration_bounds = array<i64: 2>, scalar_prefetch = 0 : i64, scratch_operands = 2 : i64, tpu.core_type = #tpu.core_type<tc>, window_params = [{transform_indices = @transform_0, window_bounds = array<i64: 8, 32>}, {transform_indices = @transform_1, window_bounds = array<i64: 1024, 32>}, {transform_indices = @transform_2, window_bounds = array<i64: 8, 128>}, {pipeline_mode = #tpu.pipeline_mode<synchronous>, transform_indices = @transform_3, window_bounds = array<i64: 32, 32>}, {pipeline_mode = #tpu.pipeline_mode<synchronous>, transform_indices = @transform_4, window_bounds = array<i64: 32, 32>}, {pipeline_mode = #tpu.pipeline_mode<synchronous>, transform_indices = @transform_5, window_bounds = array<i64: 32, 128>}, {pipeline_mode = #tpu.pipeline_mode<synchronous>, transform_indices = @transform_6, window_bounds = array<i64: 1, 128>}, {transform_indices = @transform_7, window_bounds = array<i64: 8, 128>}, {transform_indices = @transform_8, window_bounds = array<i64: 8, 128>}]} {
    %0 = tpu.iota {dimensions = array<i32: 1>} : vector<1x128xi32>
    %c8_i32 = arith.constant 8 : i32
    %1 = vector.broadcast %c8_i32 : i32 to vector<1x128xi32>
    %2 = arith.cmpi slt, %0, %1 : vector<1x128xi32>
    %3 = arith.extui %2 : vector<1x128xi1> to vector<1x128xi32>
    %4 = arith.sitofp %3 : vector<1x128xi32> to vector<1x128xf32>
    %c0 = arith.constant 0 : index
    %c0_0 = arith.constant 0 : index
    %5 = vector.load %arg1[%c0, %c0_0] : memref<8x32xf32, #tpu.memory_space<vmem>>, vector<8x32xf32>
    %c0_1 = arith.constant 0 : index
    %c0_2 = arith.constant 0 : index
    %6 = vector.load %arg4[%c0_1, %c0_2] : memref<32x32xf32, #tpu.memory_space<vmem>>, vector<32x32xf32>
    %cst = arith.constant dense<0.000000e+00> : vector<8x32xf32>
    %7 = tpu.matmul %5, %6, %cst {dimension_numbers = #tpu.dot_dimension_numbers<[1], [0], [0], [1], [0, 0, 1, 1], [], []>} : vector<8x32xf32>, vector<32x32xf32>, vector<8x32xf32> -> vector<8x32xf32>
    %c0_3 = arith.constant 0 : index
    %c0_4 = arith.constant 0 : index
    %8 = vector.load %arg2[%c0_3, %c0_4] : memref<1024x32xf32, #tpu.memory_space<vmem>>, vector<1024x32xf32>
    %c0_5 = arith.constant 0 : index
    %c0_6 = arith.constant 0 : index
    %9 = vector.load %arg5[%c0_5, %c0_6] : memref<32x32xf32, #tpu.memory_space<vmem>>, vector<32x32xf32>
    %cst_7 = arith.constant dense<0.000000e+00> : vector<1024x32xf32>
    %10 = tpu.matmul %8, %9, %cst_7 {dimension_numbers = #tpu.dot_dimension_numbers<[1], [0], [0], [1], [0, 0, 1, 1], [], []>} : vector<1024x32xf32>, vector<32x32xf32>, vector<1024x32xf32> -> vector<1024x32xf32>
    %c0_8 = arith.constant 0 : index
    %c0_9 = arith.constant 0 : index
    %11 = vector.load %arg3[%c0_8, %c0_9] : memref<8x128xf32, #tpu.memory_space<vmem>>, vector<8x128xf32>
    %cst_10 = arith.constant dense<0xFF800000> : vector<8xf32>
    %12 = vector.multi_reduction <maximumf>, %11, %cst_10 [1] : vector<8x128xf32> to vector<8xf32>
    %13 = vector.shape_cast %12 : vector<8xf32> to vector<8x1xf32>
    %14 = vector.broadcast %13 : vector<8x1xf32> to vector<8x128xf32>
    %15 = arith.subf %11, %14 : vector<8x128xf32>
    %16 = math.exp %15 : vector<8x128xf32>
    %cst_11 = arith.constant dense<0.000000e+00> : vector<8xf32>
    %17 = vector.multi_reduction <add>, %16, %cst_11 [1] : vector<8x128xf32> to vector<8xf32>
    %18 = vector.shape_cast %17 : vector<8xf32> to vector<8x1xf32>
    %19 = tpu.reciprocal %18 : vector<8x1xf32> -> vector<8x1xf32>
    %20 = vector.broadcast %19 : vector<8x1xf32> to vector<8x128xf32>
    %21 = arith.mulf %16, %20 : vector<8x128xf32>
    %22 = vector.extract_strided_slice %10 {offsets = [0, 0], sizes = [128, 32], strides = [1, 1]} : vector<1024x32xf32> to vector<128x32xf32>
    %23 = vector.extract_strided_slice %7 {offsets = [0, 0], sizes = [1, 32], strides = [1, 1]} : vector<8x32xf32> to vector<1x32xf32>
    %cst_12 = arith.constant dense<0.000000e+00> : vector<1x128xf32>
    %24 = tpu.matmul %23, %22, %cst_12 {dimension_numbers = #tpu.dot_dimension_numbers<[1], [1], [0], [0], [0, 0, 1, 0], [], []>} : vector<1x32xf32>, vector<128x32xf32>, vector<1x128xf32> -> vector<1x128xf32>
    %c0_13 = arith.constant 0 : index
    %c0_14 = arith.constant 0 : index
    %25 = vector.load %arg10[%c0_13, %c0_14] : memref<8x128xf32, #tpu.memory_space<vmem>>, vector<1x128xf32>
    tpu.vector_store %arg10[%c0_13, %c0_14], %24 {strides = array<i32>} : memref<8x128xf32, #tpu.memory_space<vmem>>, vector<1x128xf32>,
    %26 = vector.extract_strided_slice %10 {offsets = [128, 0], sizes = [128, 32], strides = [1, 1]} : vector<1024x32xf32> to vector<128x32xf32>
    %27 = vector.extract_strided_slice %7 {offsets = [1, 0], sizes = [1, 32], strides = [1, 1]} : vector<8x32xf32> to vector<1x32xf32>
    %cst_15 = arith.constant dense<0.000000e+00> : vector<1x128xf32>
    %28 = tpu.matmul %27, %26, %cst_15 {dimension_numbers = #tpu.dot_dimension_numbers<[1], [1], [0], [0], [0, 0, 1, 0], [], []>} : vector<1x32xf32>, vector<128x32xf32>, vector<1x128xf32> -> vector<1x128xf32>
    %c1 = arith.constant 1 : index
    %c0_16 = arith.constant 0 : index
    %29 = vector.load %arg10[%c1, %c0_16] : memref<8x128xf32, #tpu.memory_space<vmem>>, vector<1x128xf32>
    tpu.vector_store %arg10[%c1, %c0_16], %28 {strides = array<i32>} : memref<8x128xf32, #tpu.memory_space<vmem>>, vector<1x128xf32>,
    %30 = vector.extract_strided_slice %10 {offsets = [256, 0], sizes = [128, 32], strides = [1, 1]} : vector<1024x32xf32> to vector<128x32xf32>
    %31 = vector.extract_strided_slice %7 {offsets = [2, 0], sizes = [1, 32], strides = [1, 1]} : vector<8x32xf32> to vector<1x32xf32>
    %cst_17 = arith.constant dense<0.000000e+00> : vector<1x128xf32>
    %32 = tpu.matmul %31, %30, %cst_17 {dimension_numbers = #tpu.dot_dimension_numbers<[1], [1], [0], [0], [0, 0, 1, 0], [], []>} : vector<1x32xf32>, vector<128x32xf32>, vector<1x128xf32> -> vector<1x128xf32>
    %c2 = arith.constant 2 : index
    %c0_18 = arith.constant 0 : index
    %33 = vector.load %arg10[%c2, %c0_18] : memref<8x128xf32, #tpu.memory_space<vmem>>, vector<1x128xf32>
    tpu.vector_store %arg10[%c2, %c0_18], %32 {strides = array<i32>} : memref<8x128xf32, #tpu.memory_space<vmem>>, vector<1x128xf32>,
    %34 = vector.extract_strided_slice %10 {offsets = [384, 0], sizes = [128, 32], strides = [1, 1]} : vector<1024x32xf32> to vector<128x32xf32>
    %35 = vector.extract_strided_slice %7 {offsets = [3, 0], sizes = [1, 32], strides = [1, 1]} : vector<8x32xf32> to vector<1x32xf32>
    %cst_19 = arith.constant dense<0.000000e+00> : vector<1x128xf32>
    %36 = tpu.matmul %35, %34, %cst_19 {dimension_numbers = #tpu.dot_dimension_numbers<[1], [1], [0], [0], [0, 0, 1, 0], [], []>} : vector<1x32xf32>, vector<128x32xf32>, vector<1x128xf32> -> vector<1x128xf32>
    %c3 = arith.constant 3 : index
    %c0_20 = arith.constant 0 : index
    %37 = vector.load %arg10[%c3, %c0_20] : memref<8x128xf32, #tpu.memory_space<vmem>>, vector<1x128xf32>
    tpu.vector_store %arg10[%c3, %c0_20], %36 {strides = array<i32>} : memref<8x128xf32, #tpu.memory_space<vmem>>, vector<1x128xf32>,
    %38 = vector.extract_strided_slice %10 {offsets = [512, 0], sizes = [128, 32], strides = [1, 1]} : vector<1024x32xf32> to vector<128x32xf32>
    %39 = vector.extract_strided_slice %7 {offsets = [4, 0], sizes = [1, 32], strides = [1, 1]} : vector<8x32xf32> to vector<1x32xf32>
    %cst_21 = arith.constant dense<0.000000e+00> : vector<1x128xf32>
    %40 = tpu.matmul %39, %38, %cst_21 {dimension_numbers = #tpu.dot_dimension_numbers<[1], [1], [0], [0], [0, 0, 1, 0], [], []>} : vector<1x32xf32>, vector<128x32xf32>, vector<1x128xf32> -> vector<1x128xf32>
    %c4 = arith.constant 4 : index
    %c0_22 = arith.constant 0 : index
    %41 = vector.load %arg10[%c4, %c0_22] : memref<8x128xf32, #tpu.memory_space<vmem>>, vector<1x128xf32>
    tpu.vector_store %arg10[%c4, %c0_22], %40 {strides = array<i32>} : memref<8x128xf32, #tpu.memory_space<vmem>>, vector<1x128xf32>,
    %42 = vector.extract_strided_slice %10 {offsets = [640, 0], sizes = [128, 32], strides = [1, 1]} : vector<1024x32xf32> to vector<128x32xf32>
    %43 = vector.extract_strided_slice %7 {offsets = [5, 0], sizes = [1, 32], strides = [1, 1]} : vector<8x32xf32> to vector<1x32xf32>
    %cst_23 = arith.constant dense<0.000000e+00> : vector<1x128xf32>
    %44 = tpu.matmul %43, %42, %cst_23 {dimension_numbers = #tpu.dot_dimension_numbers<[1], [1], [0], [0], [0, 0, 1, 0], [], []>} : vector<1x32xf32>, vector<128x32xf32>, vector<1x128xf32> -> vector<1x128xf32>
    %c5 = arith.constant 5 : index
    %c0_24 = arith.constant 0 : index
    %45 = vector.load %arg10[%c5, %c0_24] : memref<8x128xf32, #tpu.memory_space<vmem>>, vector<1x128xf32>
    tpu.vector_store %arg10[%c5, %c0_24], %44 {strides = array<i32>} : memref<8x128xf32, #tpu.memory_space<vmem>>, vector<1x128xf32>,
    %46 = vector.extract_strided_slice %10 {offsets = [768, 0], sizes = [128, 32], strides = [1, 1]} : vector<1024x32xf32> to vector<128x32xf32>
    %47 = vector.extract_strided_slice %7 {offsets = [6, 0], sizes = [1, 32], strides = [1, 1]} : vector<8x32xf32> to vector<1x32xf32>
    %cst_25 = arith.constant dense<0.000000e+00> : vector<1x128xf32>
    %48 = tpu.matmul %47, %46, %cst_25 {dimension_numbers = #tpu.dot_dimension_numbers<[1], [1], [0], [0], [0, 0, 1, 0], [], []>} : vector<1x32xf32>, vector<128x32xf32>, vector<1x128xf32> -> vector<1x128xf32>
    %c6 = arith.constant 6 : index
    %c0_26 = arith.constant 0 : index
    %49 = vector.load %arg10[%c6, %c0_26] : memref<8x128xf32, #tpu.memory_space<vmem>>, vector<1x128xf32>
    tpu.vector_store %arg10[%c6, %c0_26], %48 {strides = array<i32>} : memref<8x128xf32, #tpu.memory_space<vmem>>, vector<1x128xf32>,
    %50 = vector.extract_strided_slice %10 {offsets = [896, 0], sizes = [128, 32], strides = [1, 1]} : vector<1024x32xf32> to vector<128x32xf32>
    %51 = vector.extract_strided_slice %7 {offsets = [7, 0], sizes = [1, 32], strides = [1, 1]} : vector<8x32xf32> to vector<1x32xf32>
    %cst_27 = arith.constant dense<0.000000e+00> : vector<1x128xf32>
    %52 = tpu.matmul %51, %50, %cst_27 {dimension_numbers = #tpu.dot_dimension_numbers<[1], [1], [0], [0], [0, 0, 1, 0], [], []>} : vector<1x32xf32>, vector<128x32xf32>, vector<1x128xf32> -> vector<1x128xf32>
    %c7 = arith.constant 7 : index
    %c0_28 = arith.constant 0 : index
    %53 = vector.load %arg10[%c7, %c0_28] : memref<8x128xf32, #tpu.memory_space<vmem>>, vector<1x128xf32>
    tpu.vector_store %arg10[%c7, %c0_28], %52 {strides = array<i32>} : memref<8x128xf32, #tpu.memory_space<vmem>>, vector<1x128xf32>,
    %c0_29 = arith.constant 0 : index
    %c0_30 = arith.constant 0 : index
    %54 = vector.load %arg10[%c0_29, %c0_30] : memref<8x128xf32, #tpu.memory_space<vmem>>, vector<8x128xf32>
    %cst_31 = arith.constant dense<0.000000e+00> : vector<8xf32>
    %55 = vector.multi_reduction <add>, %54, %cst_31 [1] : vector<8x128xf32> to vector<8xf32>
    %56 = vector.shape_cast %55 : vector<8xf32> to vector<8x1xf32>
    %cst_32 = arith.constant 1.250000e-01 : f32
    %57 = vector.broadcast %cst_32 : f32 to vector<8x1xf32>
    %58 = arith.mulf %56, %57 : vector<8x1xf32>
    %59 = vector.broadcast %58 : vector<8x1xf32> to vector<8x128xf32>
    %60 = arith.subf %54, %59 : vector<8x128xf32>
    %61 = vector.broadcast %4 : vector<1x128xf32> to vector<8x128xf32>
    %62 = arith.mulf %60, %61 : vector<8x128xf32>
    %63 = arith.mulf %62, %62 : vector<8x128xf32>
    %cst_33 = arith.constant dense<0.000000e+00> : vector<8xf32>
    %64 = vector.multi_reduction <add>, %63, %cst_33 [1] : vector<8x128xf32> to vector<8xf32>
    %65 = vector.shape_cast %64 : vector<8xf32> to vector<8x1xf32>
    %cst_34 = arith.constant 0.142857149 : f32
    %66 = vector.broadcast %cst_34 : f32 to vector<8x1xf32>
    %67 = arith.mulf %65, %66 : vector<8x1xf32>
    %68 = vector.broadcast %58 : vector<8x1xf32> to vector<8x128xf32>
    %69 = arith.subf %54, %68 : vector<8x128xf32>
    %cst_35 = arith.constant 9.99999971E-10 : f32
    %70 = vector.broadcast %cst_35 : f32 to vector<8x1xf32>
    %71 = arith.addf %67, %70 : vector<8x1xf32>
    %72 = math.rsqrt %71 : vector<8x1xf32>
    %73 = vector.broadcast %72 : vector<8x1xf32> to vector<8x128xf32>
    %74 = arith.mulf %69, %73 : vector<8x128xf32>
    %75 = arith.addf %11, %74 : vector<8x128xf32>
    %76 = vector.extract_strided_slice %10 {offsets = [0, 0], sizes = [128, 32], strides = [1, 1]} : vector<1024x32xf32> to vector<128x32xf32>
    %77 = vector.extract_strided_slice %21 {offsets = [0, 0], sizes = [1, 128], strides = [1, 1]} : vector<8x128xf32> to vector<1x128xf32>
    %cst_36 = arith.constant dense<0.000000e+00> : vector<1x32xf32>
    %78 = tpu.matmul %77, %76, %cst_36 {dimension_numbers = #tpu.dot_dimension_numbers<[1], [0], [0], [1], [0, 0, 1, 1], [], []>} : vector<1x128xf32>, vector<128x32xf32>, vector<1x32xf32> -> vector<1x32xf32>
    %c0_37 = arith.constant 0 : index
    %c0_38 = arith.constant 0 : index
    %79 = vector.load %arg11[%c0_37, %c0_38] : memref<8x32xf32, #tpu.memory_space<vmem>>, vector<1x32xf32>
    tpu.vector_store %arg11[%c0_37, %c0_38], %78 {strides = array<i32>} : memref<8x32xf32, #tpu.memory_space<vmem>>, vector<1x32xf32>,
    %80 = vector.extract_strided_slice %10 {offsets = [128, 0], sizes = [128, 32], strides = [1, 1]} : vector<1024x32xf32> to vector<128x32xf32>
    %81 = vector.extract_strided_slice %21 {offsets = [1, 0], sizes = [1, 128], strides = [1, 1]} : vector<8x128xf32> to vector<1x128xf32>
    %cst_39 = arith.constant dense<0.000000e+00> : vector<1x32xf32>
    %82 = tpu.matmul %81, %80, %cst_39 {dimension_numbers = #tpu.dot_dimension_numbers<[1], [0], [0], [1], [0, 0, 1, 1], [], []>} : vector<1x128xf32>, vector<128x32xf32>, vector<1x32xf32> -> vector<1x32xf32>
    %c1_40 = arith.constant 1 : index
    %c0_41 = arith.constant 0 : index
    %83 = vector.load %arg11[%c1_40, %c0_41] : memref<8x32xf32, #tpu.memory_space<vmem>>, vector<1x32xf32>
    tpu.vector_store %arg11[%c1_40, %c0_41], %82 {strides = array<i32>} : memref<8x32xf32, #tpu.memory_space<vmem>>, vector<1x32xf32>,
    %84 = vector.extract_strided_slice %10 {offsets = [256, 0], sizes = [128, 32], strides = [1, 1]} : vector<1024x32xf32> to vector<128x32xf32>
    %85 = vector.extract_strided_slice %21 {offsets = [2, 0], sizes = [1, 128], strides = [1, 1]} : vector<8x128xf32> to vector<1x128xf32>
    %cst_42 = arith.constant dense<0.000000e+00> : vector<1x32xf32>
    %86 = tpu.matmul %85, %84, %cst_42 {dimension_numbers = #tpu.dot_dimension_numbers<[1], [0], [0], [1], [0, 0, 1, 1], [], []>} : vector<1x128xf32>, vector<128x32xf32>, vector<1x32xf32> -> vector<1x32xf32>
    %c2_43 = arith.constant 2 : index
    %c0_44 = arith.constant 0 : index
    %87 = vector.load %arg11[%c2_43, %c0_44] : memref<8x32xf32, #tpu.memory_space<vmem>>, vector<1x32xf32>
    tpu.vector_store %arg11[%c2_43, %c0_44], %86 {strides = array<i32>} : memref<8x32xf32, #tpu.memory_space<vmem>>, vector<1x32xf32>,
    %88 = vector.extract_strided_slice %10 {offsets = [384, 0], sizes = [128, 32], strides = [1, 1]} : vector<1024x32xf32> to vector<128x32xf32>
    %89 = vector.extract_strided_slice %21 {offsets = [3, 0], sizes = [1, 128], strides = [1, 1]} : vector<8x128xf32> to vector<1x128xf32>
    %cst_45 = arith.constant dense<0.000000e+00> : vector<1x32xf32>
    %90 = tpu.matmul %89, %88, %cst_45 {dimension_numbers = #tpu.dot_dimension_numbers<[1], [0], [0], [1], [0, 0, 1, 1], [], []>} : vector<1x128xf32>, vector<128x32xf32>, vector<1x32xf32> -> vector<1x32xf32>
    %c3_46 = arith.constant 3 : index
    %c0_47 = arith.constant 0 : index
    %91 = vector.load %arg11[%c3_46, %c0_47] : memref<8x32xf32, #tpu.memory_space<vmem>>, vector<1x32xf32>
    tpu.vector_store %arg11[%c3_46, %c0_47], %90 {strides = array<i32>} : memref<8x32xf32, #tpu.memory_space<vmem>>, vector<1x32xf32>,
    %92 = vector.extract_strided_slice %10 {offsets = [512, 0], sizes = [128, 32], strides = [1, 1]} : vector<1024x32xf32> to vector<128x32xf32>
    %93 = vector.extract_strided_slice %21 {offsets = [4, 0], sizes = [1, 128], strides = [1, 1]} : vector<8x128xf32> to vector<1x128xf32>
    %cst_48 = arith.constant dense<0.000000e+00> : vector<1x32xf32>
    %94 = tpu.matmul %93, %92, %cst_48 {dimension_numbers = #tpu.dot_dimension_numbers<[1], [0], [0], [1], [0, 0, 1, 1], [], []>} : vector<1x128xf32>, vector<128x32xf32>, vector<1x32xf32> -> vector<1x32xf32>
    %c4_49 = arith.constant 4 : index
    %c0_50 = arith.constant 0 : index
    %95 = vector.load %arg11[%c4_49, %c0_50] : memref<8x32xf32, #tpu.memory_space<vmem>>, vector<1x32xf32>
    tpu.vector_store %arg11[%c4_49, %c0_50], %94 {strides = array<i32>} : memref<8x32xf32, #tpu.memory_space<vmem>>, vector<1x32xf32>,
    %96 = vector.extract_strided_slice %10 {offsets = [640, 0], sizes = [128, 32], strides = [1, 1]} : vector<1024x32xf32> to vector<128x32xf32>
    %97 = vector.extract_strided_slice %21 {offsets = [5, 0], sizes = [1, 128], strides = [1, 1]} : vector<8x128xf32> to vector<1x128xf32>
    %cst_51 = arith.constant dense<0.000000e+00> : vector<1x32xf32>
    %98 = tpu.matmul %97, %96, %cst_51 {dimension_numbers = #tpu.dot_dimension_numbers<[1], [0], [0], [1], [0, 0, 1, 1], [], []>} : vector<1x128xf32>, vector<128x32xf32>, vector<1x32xf32> -> vector<1x32xf32>
    %c5_52 = arith.constant 5 : index
    %c0_53 = arith.constant 0 : index
    %99 = vector.load %arg11[%c5_52, %c0_53] : memref<8x32xf32, #tpu.memory_space<vmem>>, vector<1x32xf32>
    tpu.vector_store %arg11[%c5_52, %c0_53], %98 {strides = array<i32>} : memref<8x32xf32, #tpu.memory_space<vmem>>, vector<1x32xf32>,
    %100 = vector.extract_strided_slice %10 {offsets = [768, 0], sizes = [128, 32], strides = [1, 1]} : vector<1024x32xf32> to vector<128x32xf32>
    %101 = vector.extract_strided_slice %21 {offsets = [6, 0], sizes = [1, 128], strides = [1, 1]} : vector<8x128xf32> to vector<1x128xf32>
    %cst_54 = arith.constant dense<0.000000e+00> : vector<1x32xf32>
    %102 = tpu.matmul %101, %100, %cst_54 {dimension_numbers = #tpu.dot_dimension_numbers<[1], [0], [0], [1], [0, 0, 1, 1], [], []>} : vector<1x128xf32>, vector<128x32xf32>, vector<1x32xf32> -> vector<1x32xf32>
    %c6_55 = arith.constant 6 : index
    %c0_56 = arith.constant 0 : index
    %103 = vector.load %arg11[%c6_55, %c0_56] : memref<8x32xf32, #tpu.memory_space<vmem>>, vector<1x32xf32>
    tpu.vector_store %arg11[%c6_55, %c0_56], %102 {strides = array<i32>} : memref<8x32xf32, #tpu.memory_space<vmem>>, vector<1x32xf32>,
    %104 = vector.extract_strided_slice %10 {offsets = [896, 0], sizes = [128, 32], strides = [1, 1]} : vector<1024x32xf32> to vector<128x32xf32>
    %105 = vector.extract_strided_slice %21 {offsets = [7, 0], sizes = [1, 128], strides = [1, 1]} : vector<8x128xf32> to vector<1x128xf32>
    %cst_57 = arith.constant dense<0.000000e+00> : vector<1x32xf32>
    %106 = tpu.matmul %105, %104, %cst_57 {dimension_numbers = #tpu.dot_dimension_numbers<[1], [0], [0], [1], [0, 0, 1, 1], [], []>} : vector<1x128xf32>, vector<128x32xf32>, vector<1x32xf32> -> vector<1x32xf32>
    %c7_58 = arith.constant 7 : index
    %c0_59 = arith.constant 0 : index
    %107 = vector.load %arg11[%c7_58, %c0_59] : memref<8x32xf32, #tpu.memory_space<vmem>>, vector<1x32xf32>
    tpu.vector_store %arg11[%c7_58, %c0_59], %106 {strides = array<i32>} : memref<8x32xf32, #tpu.memory_space<vmem>>, vector<1x32xf32>,
    %c0_60 = arith.constant 0 : index
    %c0_61 = arith.constant 0 : index
    %108 = vector.load %arg11[%c0_60, %c0_61] : memref<8x32xf32, #tpu.memory_space<vmem>>, vector<8x32xf32>
    %cst_62 = arith.constant 1.250000e-01 : f32
    %109 = vector.broadcast %cst_62 : f32 to vector<8x32xf32>
    %110 = arith.mulf %108, %109 : vector<8x32xf32>
    %111 = arith.addf %7, %110 : vector<8x32xf32>
    %cst_63 = arith.constant dense<0xFF800000> : vector<8xf32>
    %112 = vector.multi_reduction <maximumf>, %75, %cst_63 [1] : vector<8x128xf32> to vector<8xf32>
    %113 = vector.shape_cast %112 : vector<8xf32> to vector<8x1xf32>
    %114 = vector.broadcast %113 : vector<8x1xf32> to vector<8x128xf32>
    %115 = arith.subf %75, %114 : vector<8x128xf32>
    %116 = math.exp %115 : vector<8x128xf32>
    %cst_64 = arith.constant dense<0.000000e+00> : vector<8xf32>
    %117 = vector.multi_reduction <add>, %116, %cst_64 [1] : vector<8x128xf32> to vector<8xf32>
    %118 = vector.shape_cast %117 : vector<8xf32> to vector<8x1xf32>
    %119 = tpu.reciprocal %118 : vector<8x1xf32> -> vector<8x1xf32>
    %120 = vector.broadcast %119 : vector<8x1xf32> to vector<8x128xf32>
    %121 = arith.mulf %116, %120 : vector<8x128xf32>
    %122 = vector.extract_strided_slice %10 {offsets = [0, 0], sizes = [128, 32], strides = [1, 1]} : vector<1024x32xf32> to vector<128x32xf32>
    %123 = vector.extract_strided_slice %111 {offsets = [0, 0], sizes = [1, 32], strides = [1, 1]} : vector<8x32xf32> to vector<1x32xf32>
    %cst_65 = arith.constant dense<0.000000e+00> : vector<1x128xf32>
    %124 = tpu.matmul %123, %122, %cst_65 {dimension_numbers = #tpu.dot_dimension_numbers<[1], [1], [0], [0], [0, 0, 1, 0], [], []>} : vector<1x32xf32>, vector<128x32xf32>, vector<1x128xf32> -> vector<1x128xf32>
    %c0_66 = arith.constant 0 : index
    %c0_67 = arith.constant 0 : index
    %125 = vector.load %arg10[%c0_66, %c0_67] : memref<8x128xf32, #tpu.memory_space<vmem>>, vector<1x128xf32>
    tpu.vector_store %arg10[%c0_66, %c0_67], %124 {strides = array<i32>} : memref<8x128xf32, #tpu.memory_space<vmem>>, vector<1x128xf32>,
    %126 = vector.extract_strided_slice %10 {offsets = [128, 0], sizes = [128, 32], strides = [1, 1]} : vector<1024x32xf32> to vector<128x32xf32>
    %127 = vector.extract_strided_slice %111 {offsets = [1, 0], sizes = [1, 32], strides = [1, 1]} : vector<8x32xf32> to vector<1x32xf32>
    %cst_68 = arith.constant dense<0.000000e+00> : vector<1x128xf32>
    %128 = tpu.matmul %127, %126, %cst_68 {dimension_numbers = #tpu.dot_dimension_numbers<[1], [1], [0], [0], [0, 0, 1, 0], [], []>} : vector<1x32xf32>, vector<128x32xf32>, vector<1x128xf32> -> vector<1x128xf32>
    %c1_69 = arith.constant 1 : index
    %c0_70 = arith.constant 0 : index
    %129 = vector.load %arg10[%c1_69, %c0_70] : memref<8x128xf32, #tpu.memory_space<vmem>>, vector<1x128xf32>
    tpu.vector_store %arg10[%c1_69, %c0_70], %128 {strides = array<i32>} : memref<8x128xf32, #tpu.memory_space<vmem>>, vector<1x128xf32>,
    %130 = vector.extract_strided_slice %10 {offsets = [256, 0], sizes = [128, 32], strides = [1, 1]} : vector<1024x32xf32> to vector<128x32xf32>
    %131 = vector.extract_strided_slice %111 {offsets = [2, 0], sizes = [1, 32], strides = [1, 1]} : vector<8x32xf32> to vector<1x32xf32>
    %cst_71 = arith.constant dense<0.000000e+00> : vector<1x128xf32>
    %132 = tpu.matmul %131, %130, %cst_71 {dimension_numbers = #tpu.dot_dimension_numbers<[1], [1], [0], [0], [0, 0, 1, 0], [], []>} : vector<1x32xf32>, vector<128x32xf32>, vector<1x128xf32> -> vector<1x128xf32>
    %c2_72 = arith.constant 2 : index
    %c0_73 = arith.constant 0 : index
    %133 = vector.load %arg10[%c2_72, %c0_73] : memref<8x128xf32, #tpu.memory_space<vmem>>, vector<1x128xf32>
    tpu.vector_store %arg10[%c2_72, %c0_73], %132 {strides = array<i32>} : memref<8x128xf32, #tpu.memory_space<vmem>>, vector<1x128xf32>,
    %134 = vector.extract_strided_slice %10 {offsets = [384, 0], sizes = [128, 32], strides = [1, 1]} : vector<1024x32xf32> to vector<128x32xf32>
    %135 = vector.extract_strided_slice %111 {offsets = [3, 0], sizes = [1, 32], strides = [1, 1]} : vector<8x32xf32> to vector<1x32xf32>
    %cst_74 = arith.constant dense<0.000000e+00> : vector<1x128xf32>
    %136 = tpu.matmul %135, %134, %cst_74 {dimension_numbers = #tpu.dot_dimension_numbers<[1], [1], [0], [0], [0, 0, 1, 0], [], []>} : vector<1x32xf32>, vector<128x32xf32>, vector<1x128xf32> -> vector<1x128xf32>
    %c3_75 = arith.constant 3 : index
    %c0_76 = arith.constant 0 : index
    %137 = vector.load %arg10[%c3_75, %c0_76] : memref<8x128xf32, #tpu.memory_space<vmem>>, vector<1x128xf32>
    tpu.vector_store %arg10[%c3_75, %c0_76], %136 {strides = array<i32>} : memref<8x128xf32, #tpu.memory_space<vmem>>, vector<1x128xf32>,
    %138 = vector.extract_strided_slice %10 {offsets = [512, 0], sizes = [128, 32], strides = [1, 1]} : vector<1024x32xf32> to vector<128x32xf32>
    %139 = vector.extract_strided_slice %111 {offsets = [4, 0], sizes = [1, 32], strides = [1, 1]} : vector<8x32xf32> to vector<1x32xf32>
    %cst_77 = arith.constant dense<0.000000e+00> : vector<1x128xf32>
    %140 = tpu.matmul %139, %138, %cst_77 {dimension_numbers = #tpu.dot_dimension_numbers<[1], [1], [0], [0], [0, 0, 1, 0], [], []>} : vector<1x32xf32>, vector<128x32xf32>, vector<1x128xf32> -> vector<1x128xf32>
    %c4_78 = arith.constant 4 : index
    %c0_79 = arith.constant 0 : index
    %141 = vector.load %arg10[%c4_78, %c0_79] : memref<8x128xf32, #tpu.memory_space<vmem>>, vector<1x128xf32>
    tpu.vector_store %arg10[%c4_78, %c0_79], %140 {strides = array<i32>} : memref<8x128xf32, #tpu.memory_space<vmem>>, vector<1x128xf32>,
    %142 = vector.extract_strided_slice %10 {offsets = [640, 0], sizes = [128, 32], strides = [1, 1]} : vector<1024x32xf32> to vector<128x32xf32>
    %143 = vector.extract_strided_slice %111 {offsets = [5, 0], sizes = [1, 32], strides = [1, 1]} : vector<8x32xf32> to vector<1x32xf32>
    %cst_80 = arith.constant dense<0.000000e+00> : vector<1x128xf32>
    %144 = tpu.matmul %143, %142, %cst_80 {dimension_numbers = #tpu.dot_dimension_numbers<[1], [1], [0], [0], [0, 0, 1, 0], [], []>} : vector<1x32xf32>, vector<128x32xf32>, vector<1x128xf32> -> vector<1x128xf32>
    %c5_81 = arith.constant 5 : index
    %c0_82 = arith.constant 0 : index
    %145 = vector.load %arg10[%c5_81, %c0_82] : memref<8x128xf32, #tpu.memory_space<vmem>>, vector<1x128xf32>
    tpu.vector_store %arg10[%c5_81, %c0_82], %144 {strides = array<i32>} : memref<8x128xf32, #tpu.memory_space<vmem>>, vector<1x128xf32>,
    %146 = vector.extract_strided_slice %10 {offsets = [768, 0], sizes = [128, 32], strides = [1, 1]} : vector<1024x32xf32> to vector<128x32xf32>
    %147 = vector.extract_strided_slice %111 {offsets = [6, 0], sizes = [1, 32], strides = [1, 1]} : vector<8x32xf32> to vector<1x32xf32>
    %cst_83 = arith.constant dense<0.000000e+00> : vector<1x128xf32>
    %148 = tpu.matmul %147, %146, %cst_83 {dimension_numbers = #tpu.dot_dimension_numbers<[1], [1], [0], [0], [0, 0, 1, 0], [], []>} : vector<1x32xf32>, vector<128x32xf32>, vector<1x128xf32> -> vector<1x128xf32>
    %c6_84 = arith.constant 6 : index
    %c0_85 = arith.constant 0 : index
    %149 = vector.load %arg10[%c6_84, %c0_85] : memref<8x128xf32, #tpu.memory_space<vmem>>, vector<1x128xf32>
    tpu.vector_store %arg10[%c6_84, %c0_85], %148 {strides = array<i32>} : memref<8x128xf32, #tpu.memory_space<vmem>>, vector<1x128xf32>,
    %150 = vector.extract_strided_slice %10 {offsets = [896, 0], sizes = [128, 32], strides = [1, 1]} : vector<1024x32xf32> to vector<128x32xf32>
    %151 = vector.extract_strided_slice %111 {offsets = [7, 0], sizes = [1, 32], strides = [1, 1]} : vector<8x32xf32> to vector<1x32xf32>
    %cst_86 = arith.constant dense<0.000000e+00> : vector<1x128xf32>
    %152 = tpu.matmul %151, %150, %cst_86 {dimension_numbers = #tpu.dot_dimension_numbers<[1], [1], [0], [0], [0, 0, 1, 0], [], []>} : vector<1x32xf32>, vector<128x32xf32>, vector<1x128xf32> -> vector<1x128xf32>
    %c7_87 = arith.constant 7 : index
    %c0_88 = arith.constant 0 : index
    %153 = vector.load %arg10[%c7_87, %c0_88] : memref<8x128xf32, #tpu.memory_space<vmem>>, vector<1x128xf32>
    tpu.vector_store %arg10[%c7_87, %c0_88], %152 {strides = array<i32>} : memref<8x128xf32, #tpu.memory_space<vmem>>, vector<1x128xf32>,
    %c0_89 = arith.constant 0 : index
    %c0_90 = arith.constant 0 : index
    %154 = vector.load %arg10[%c0_89, %c0_90] : memref<8x128xf32, #tpu.memory_space<vmem>>, vector<8x128xf32>
    %cst_91 = arith.constant dense<0.000000e+00> : vector<8xf32>
    %155 = vector.multi_reduction <add>, %154, %cst_91 [1] : vector<8x128xf32> to vector<8xf32>
    %156 = vector.shape_cast %155 : vector<8xf32> to vector<8x1xf32>
    %cst_92 = arith.constant 1.250000e-01 : f32
    %157 = vector.broadcast %cst_92 : f32 to vector<8x1xf32>
    %158 = arith.mulf %156, %157 : vector<8x1xf32>
    %159 = vector.broadcast %158 : vector<8x1xf32> to vector<8x128xf32>
    %160 = arith.subf %154, %159 : vector<8x128xf32>
    %161 = vector.broadcast %4 : vector<1x128xf32> to vector<8x128xf32>
    %162 = arith.mulf %160, %161 : vector<8x128xf32>
    %163 = arith.mulf %162, %162 : vector<8x128xf32>
    %cst_93 = arith.constant dense<0.000000e+00> : vector<8xf32>
    %164 = vector.multi_reduction <add>, %163, %cst_93 [1] : vector<8x128xf32> to vector<8xf32>
    %165 = vector.shape_cast %164 : vector<8xf32> to vector<8x1xf32>
    %cst_94 = arith.constant 0.142857149 : f32
    %166 = vector.broadcast %cst_94 : f32 to vector<8x1xf32>
    %167 = arith.mulf %165, %166 : vector<8x1xf32>
    %168 = vector.broadcast %158 : vector<8x1xf32> to vector<8x128xf32>
    %169 = arith.subf %154, %168 : vector<8x128xf32>
    %cst_95 = arith.constant 9.99999971E-10 : f32
    %170 = vector.broadcast %cst_95 : f32 to vector<8x1xf32>
    %171 = arith.addf %167, %170 : vector<8x1xf32>
    %172 = math.rsqrt %171 : vector<8x1xf32>
    %173 = vector.broadcast %172 : vector<8x1xf32> to vector<8x128xf32>
    %174 = arith.mulf %169, %173 : vector<8x128xf32>
    %175 = arith.addf %75, %174 : vector<8x128xf32>
    %176 = vector.extract_strided_slice %10 {offsets = [0, 0], sizes = [128, 32], strides = [1, 1]} : vector<1024x32xf32> to vector<128x32xf32>
    %177 = vector.extract_strided_slice %121 {offsets = [0, 0], sizes = [1, 128], strides = [1, 1]} : vector<8x128xf32> to vector<1x128xf32>
    %cst_96 = arith.constant dense<0.000000e+00> : vector<1x32xf32>
    %178 = tpu.matmul %177, %176, %cst_96 {dimension_numbers = #tpu.dot_dimension_numbers<[1], [0], [0], [1], [0, 0, 1, 1], [], []>} : vector<1x128xf32>, vector<128x32xf32>, vector<1x32xf32> -> vector<1x32xf32>
    %c0_97 = arith.constant 0 : index
    %c0_98 = arith.constant 0 : index
    %179 = vector.load %arg11[%c0_97, %c0_98] : memref<8x32xf32, #tpu.memory_space<vmem>>, vector<1x32xf32>
    tpu.vector_store %arg11[%c0_97, %c0_98], %178 {strides = array<i32>} : memref<8x32xf32, #tpu.memory_space<vmem>>, vector<1x32xf32>,
    %180 = vector.extract_strided_slice %10 {offsets = [128, 0], sizes = [128, 32], strides = [1, 1]} : vector<1024x32xf32> to vector<128x32xf32>
    %181 = vector.extract_strided_slice %121 {offsets = [1, 0], sizes = [1, 128], strides = [1, 1]} : vector<8x128xf32> to vector<1x128xf32>
    %cst_99 = arith.constant dense<0.000000e+00> : vector<1x32xf32>
    %182 = tpu.matmul %181, %180, %cst_99 {dimension_numbers = #tpu.dot_dimension_numbers<[1], [0], [0], [1], [0, 0, 1, 1], [], []>} : vector<1x128xf32>, vector<128x32xf32>, vector<1x32xf32> -> vector<1x32xf32>
    %c1_100 = arith.constant 1 : index
    %c0_101 = arith.constant 0 : index
    %183 = vector.load %arg11[%c1_100, %c0_101] : memref<8x32xf32, #tpu.memory_space<vmem>>, vector<1x32xf32>
    tpu.vector_store %arg11[%c1_100, %c0_101], %182 {strides = array<i32>} : memref<8x32xf32, #tpu.memory_space<vmem>>, vector<1x32xf32>,
    %184 = vector.extract_strided_slice %10 {offsets = [256, 0], sizes = [128, 32], strides = [1, 1]} : vector<1024x32xf32> to vector<128x32xf32>
    %185 = vector.extract_strided_slice %121 {offsets = [2, 0], sizes = [1, 128], strides = [1, 1]} : vector<8x128xf32> to vector<1x128xf32>
    %cst_102 = arith.constant dense<0.000000e+00> : vector<1x32xf32>
    %186 = tpu.matmul %185, %184, %cst_102 {dimension_numbers = #tpu.dot_dimension_numbers<[1], [0], [0], [1], [0, 0, 1, 1], [], []>} : vector<1x128xf32>, vector<128x32xf32>, vector<1x32xf32> -> vector<1x32xf32>
    %c2_103 = arith.constant 2 : index
    %c0_104 = arith.constant 0 : index
    %187 = vector.load %arg11[%c2_103, %c0_104] : memref<8x32xf32, #tpu.memory_space<vmem>>, vector<1x32xf32>
    tpu.vector_store %arg11[%c2_103, %c0_104], %186 {strides = array<i32>} : memref<8x32xf32, #tpu.memory_space<vmem>>, vector<1x32xf32>,
    %188 = vector.extract_strided_slice %10 {offsets = [384, 0], sizes = [128, 32], strides = [1, 1]} : vector<1024x32xf32> to vector<128x32xf32>
    %189 = vector.extract_strided_slice %121 {offsets = [3, 0], sizes = [1, 128], strides = [1, 1]} : vector<8x128xf32> to vector<1x128xf32>
    %cst_105 = arith.constant dense<0.000000e+00> : vector<1x32xf32>
    %190 = tpu.matmul %189, %188, %cst_105 {dimension_numbers = #tpu.dot_dimension_numbers<[1], [0], [0], [1], [0, 0, 1, 1], [], []>} : vector<1x128xf32>, vector<128x32xf32>, vector<1x32xf32> -> vector<1x32xf32>
    %c3_106 = arith.constant 3 : index
    %c0_107 = arith.constant 0 : index
    %191 = vector.load %arg11[%c3_106, %c0_107] : memref<8x32xf32, #tpu.memory_space<vmem>>, vector<1x32xf32>
    tpu.vector_store %arg11[%c3_106, %c0_107], %190 {strides = array<i32>} : memref<8x32xf32, #tpu.memory_space<vmem>>, vector<1x32xf32>,
    %192 = vector.extract_strided_slice %10 {offsets = [512, 0], sizes = [128, 32], strides = [1, 1]} : vector<1024x32xf32> to vector<128x32xf32>
    %193 = vector.extract_strided_slice %121 {offsets = [4, 0], sizes = [1, 128], strides = [1, 1]} : vector<8x128xf32> to vector<1x128xf32>
    %cst_108 = arith.constant dense<0.000000e+00> : vector<1x32xf32>
    %194 = tpu.matmul %193, %192, %cst_108 {dimension_numbers = #tpu.dot_dimension_numbers<[1], [0], [0], [1], [0, 0, 1, 1], [], []>} : vector<1x128xf32>, vector<128x32xf32>, vector<1x32xf32> -> vector<1x32xf32>
    %c4_109 = arith.constant 4 : index
    %c0_110 = arith.constant 0 : index
    %195 = vector.load %arg11[%c4_109, %c0_110] : memref<8x32xf32, #tpu.memory_space<vmem>>, vector<1x32xf32>
    tpu.vector_store %arg11[%c4_109, %c0_110], %194 {strides = array<i32>} : memref<8x32xf32, #tpu.memory_space<vmem>>, vector<1x32xf32>,
    %196 = vector.extract_strided_slice %10 {offsets = [640, 0], sizes = [128, 32], strides = [1, 1]} : vector<1024x32xf32> to vector<128x32xf32>
    %197 = vector.extract_strided_slice %121 {offsets = [5, 0], sizes = [1, 128], strides = [1, 1]} : vector<8x128xf32> to vector<1x128xf32>
    %cst_111 = arith.constant dense<0.000000e+00> : vector<1x32xf32>
    %198 = tpu.matmul %197, %196, %cst_111 {dimension_numbers = #tpu.dot_dimension_numbers<[1], [0], [0], [1], [0, 0, 1, 1], [], []>} : vector<1x128xf32>, vector<128x32xf32>, vector<1x32xf32> -> vector<1x32xf32>
    %c5_112 = arith.constant 5 : index
    %c0_113 = arith.constant 0 : index
    %199 = vector.load %arg11[%c5_112, %c0_113] : memref<8x32xf32, #tpu.memory_space<vmem>>, vector<1x32xf32>
    tpu.vector_store %arg11[%c5_112, %c0_113], %198 {strides = array<i32>} : memref<8x32xf32, #tpu.memory_space<vmem>>, vector<1x32xf32>,
    %200 = vector.extract_strided_slice %10 {offsets = [768, 0], sizes = [128, 32], strides = [1, 1]} : vector<1024x32xf32> to vector<128x32xf32>
    %201 = vector.extract_strided_slice %121 {offsets = [6, 0], sizes = [1, 128], strides = [1, 1]} : vector<8x128xf32> to vector<1x128xf32>
    %cst_114 = arith.constant dense<0.000000e+00> : vector<1x32xf32>
    %202 = tpu.matmul %201, %200, %cst_114 {dimension_numbers = #tpu.dot_dimension_numbers<[1], [0], [0], [1], [0, 0, 1, 1], [], []>} : vector<1x128xf32>, vector<128x32xf32>, vector<1x32xf32> -> vector<1x32xf32>
    %c6_115 = arith.constant 6 : index
    %c0_116 = arith.constant 0 : index
    %203 = vector.load %arg11[%c6_115, %c0_116] : memref<8x32xf32, #tpu.memory_space<vmem>>, vector<1x32xf32>
    tpu.vector_store %arg11[%c6_115, %c0_116], %202 {strides = array<i32>} : memref<8x32xf32, #tpu.memory_space<vmem>>, vector<1x32xf32>,
    %204 = vector.extract_strided_slice %10 {offsets = [896, 0], sizes = [128, 32], strides = [1, 1]} : vector<1024x32xf32> to vector<128x32xf32>
    %205 = vector.extract_strided_slice %121 {offsets = [7, 0], sizes = [1, 128], strides = [1, 1]} : vector<8x128xf32> to vector<1x128xf32>
    %cst_117 = arith.constant dense<0.000000e+00> : vector<1x32xf32>
    %206 = tpu.matmul %205, %204, %cst_117 {dimension_numbers = #tpu.dot_dimension_numbers<[1], [0], [0], [1], [0, 0, 1, 1], [], []>} : vector<1x128xf32>, vector<128x32xf32>, vector<1x32xf32> -> vector<1x32xf32>
    %c7_118 = arith.constant 7 : index
    %c0_119 = arith.constant 0 : index
    %207 = vector.load %arg11[%c7_118, %c0_119] : memref<8x32xf32, #tpu.memory_space<vmem>>, vector<1x32xf32>
    tpu.vector_store %arg11[%c7_118, %c0_119], %206 {strides = array<i32>} : memref<8x32xf32, #tpu.memory_space<vmem>>, vector<1x32xf32>,
    %c0_120 = arith.constant 0 : index
    %c0_121 = arith.constant 0 : index
    %208 = vector.load %arg11[%c0_120, %c0_121] : memref<8x32xf32, #tpu.memory_space<vmem>>, vector<8x32xf32>
    %cst_122 = arith.constant 1.250000e-01 : f32
    %209 = vector.broadcast %cst_122 : f32 to vector<8x32xf32>
    %210 = arith.mulf %208, %209 : vector<8x32xf32>
    %211 = arith.addf %111, %210 : vector<8x32xf32>
    %cst_123 = arith.constant dense<0xFF800000> : vector<8xf32>
    %212 = vector.multi_reduction <maximumf>, %175, %cst_123 [1] : vector<8x128xf32> to vector<8xf32>
    %213 = vector.shape_cast %212 : vector<8xf32> to vector<8x1xf32>
    %214 = vector.broadcast %213 : vector<8x1xf32> to vector<8x128xf32>
    %215 = arith.subf %175, %214 : vector<8x128xf32>
    %216 = math.exp %215 : vector<8x128xf32>
    %cst_124 = arith.constant dense<0.000000e+00> : vector<8xf32>
    %217 = vector.multi_reduction <add>, %216, %cst_124 [1] : vector<8x128xf32> to vector<8xf32>
    %218 = vector.shape_cast %217 : vector<8xf32> to vector<8x1xf32>
    %219 = tpu.reciprocal %218 : vector<8x1xf32> -> vector<8x1xf32>
    %220 = vector.broadcast %219 : vector<8x1xf32> to vector<8x128xf32>
    %221 = arith.mulf %216, %220 : vector<8x128xf32>
    %222 = vector.extract_strided_slice %10 {offsets = [0, 0], sizes = [128, 32], strides = [1, 1]} : vector<1024x32xf32> to vector<128x32xf32>
    %223 = vector.extract_strided_slice %221 {offsets = [0, 0], sizes = [1, 128], strides = [1, 1]} : vector<8x128xf32> to vector<1x128xf32>
    %cst_125 = arith.constant dense<0.000000e+00> : vector<1x32xf32>
    %224 = tpu.matmul %223, %222, %cst_125 {dimension_numbers = #tpu.dot_dimension_numbers<[1], [0], [0], [1], [0, 0, 1, 1], [], []>} : vector<1x128xf32>, vector<128x32xf32>, vector<1x32xf32> -> vector<1x32xf32>
    %c0_126 = arith.constant 0 : index
    %c0_127 = arith.constant 0 : index
    %225 = vector.load %arg11[%c0_126, %c0_127] : memref<8x32xf32, #tpu.memory_space<vmem>>, vector<1x32xf32>
    tpu.vector_store %arg11[%c0_126, %c0_127], %224 {strides = array<i32>} : memref<8x32xf32, #tpu.memory_space<vmem>>, vector<1x32xf32>,
    %226 = vector.extract_strided_slice %10 {offsets = [128, 0], sizes = [128, 32], strides = [1, 1]} : vector<1024x32xf32> to vector<128x32xf32>
    %227 = vector.extract_strided_slice %221 {offsets = [1, 0], sizes = [1, 128], strides = [1, 1]} : vector<8x128xf32> to vector<1x128xf32>
    %cst_128 = arith.constant dense<0.000000e+00> : vector<1x32xf32>
    %228 = tpu.matmul %227, %226, %cst_128 {dimension_numbers = #tpu.dot_dimension_numbers<[1], [0], [0], [1], [0, 0, 1, 1], [], []>} : vector<1x128xf32>, vector<128x32xf32>, vector<1x32xf32> -> vector<1x32xf32>
    %c1_129 = arith.constant 1 : index
    %c0_130 = arith.constant 0 : index
    %229 = vector.load %arg11[%c1_129, %c0_130] : memref<8x32xf32, #tpu.memory_space<vmem>>, vector<1x32xf32>
    tpu.vector_store %arg11[%c1_129, %c0_130], %228 {strides = array<i32>} : memref<8x32xf32, #tpu.memory_space<vmem>>, vector<1x32xf32>,
    %230 = vector.extract_strided_slice %10 {offsets = [256, 0], sizes = [128, 32], strides = [1, 1]} : vector<1024x32xf32> to vector<128x32xf32>
    %231 = vector.extract_strided_slice %221 {offsets = [2, 0], sizes = [1, 128], strides = [1, 1]} : vector<8x128xf32> to vector<1x128xf32>
    %cst_131 = arith.constant dense<0.000000e+00> : vector<1x32xf32>
    %232 = tpu.matmul %231, %230, %cst_131 {dimension_numbers = #tpu.dot_dimension_numbers<[1], [0], [0], [1], [0, 0, 1, 1], [], []>} : vector<1x128xf32>, vector<128x32xf32>, vector<1x32xf32> -> vector<1x32xf32>
    %c2_132 = arith.constant 2 : index
    %c0_133 = arith.constant 0 : index
    %233 = vector.load %arg11[%c2_132, %c0_133] : memref<8x32xf32, #tpu.memory_space<vmem>>, vector<1x32xf32>
    tpu.vector_store %arg11[%c2_132, %c0_133], %232 {strides = array<i32>} : memref<8x32xf32, #tpu.memory_space<vmem>>, vector<1x32xf32>,
    %234 = vector.extract_strided_slice %10 {offsets = [384, 0], sizes = [128, 32], strides = [1, 1]} : vector<1024x32xf32> to vector<128x32xf32>
    %235 = vector.extract_strided_slice %221 {offsets = [3, 0], sizes = [1, 128], strides = [1, 1]} : vector<8x128xf32> to vector<1x128xf32>
    %cst_134 = arith.constant dense<0.000000e+00> : vector<1x32xf32>
    %236 = tpu.matmul %235, %234, %cst_134 {dimension_numbers = #tpu.dot_dimension_numbers<[1], [0], [0], [1], [0, 0, 1, 1], [], []>} : vector<1x128xf32>, vector<128x32xf32>, vector<1x32xf32> -> vector<1x32xf32>
    %c3_135 = arith.constant 3 : index
    %c0_136 = arith.constant 0 : index
    %237 = vector.load %arg11[%c3_135, %c0_136] : memref<8x32xf32, #tpu.memory_space<vmem>>, vector<1x32xf32>
    tpu.vector_store %arg11[%c3_135, %c0_136], %236 {strides = array<i32>} : memref<8x32xf32, #tpu.memory_space<vmem>>, vector<1x32xf32>,
    %238 = vector.extract_strided_slice %10 {offsets = [512, 0], sizes = [128, 32], strides = [1, 1]} : vector<1024x32xf32> to vector<128x32xf32>
    %239 = vector.extract_strided_slice %221 {offsets = [4, 0], sizes = [1, 128], strides = [1, 1]} : vector<8x128xf32> to vector<1x128xf32>
    %cst_137 = arith.constant dense<0.000000e+00> : vector<1x32xf32>
    %240 = tpu.matmul %239, %238, %cst_137 {dimension_numbers = #tpu.dot_dimension_numbers<[1], [0], [0], [1], [0, 0, 1, 1], [], []>} : vector<1x128xf32>, vector<128x32xf32>, vector<1x32xf32> -> vector<1x32xf32>
    %c4_138 = arith.constant 4 : index
    %c0_139 = arith.constant 0 : index
    %241 = vector.load %arg11[%c4_138, %c0_139] : memref<8x32xf32, #tpu.memory_space<vmem>>, vector<1x32xf32>
    tpu.vector_store %arg11[%c4_138, %c0_139], %240 {strides = array<i32>} : memref<8x32xf32, #tpu.memory_space<vmem>>, vector<1x32xf32>,
    %242 = vector.extract_strided_slice %10 {offsets = [640, 0], sizes = [128, 32], strides = [1, 1]} : vector<1024x32xf32> to vector<128x32xf32>
    %243 = vector.extract_strided_slice %221 {offsets = [5, 0], sizes = [1, 128], strides = [1, 1]} : vector<8x128xf32> to vector<1x128xf32>
    %cst_140 = arith.constant dense<0.000000e+00> : vector<1x32xf32>
    %244 = tpu.matmul %243, %242, %cst_140 {dimension_numbers = #tpu.dot_dimension_numbers<[1], [0], [0], [1], [0, 0, 1, 1], [], []>} : vector<1x128xf32>, vector<128x32xf32>, vector<1x32xf32> -> vector<1x32xf32>
    %c5_141 = arith.constant 5 : index
    %c0_142 = arith.constant 0 : index
    %245 = vector.load %arg11[%c5_141, %c0_142] : memref<8x32xf32, #tpu.memory_space<vmem>>, vector<1x32xf32>
    tpu.vector_store %arg11[%c5_141, %c0_142], %244 {strides = array<i32>} : memref<8x32xf32, #tpu.memory_space<vmem>>, vector<1x32xf32>,
    %246 = vector.extract_strided_slice %10 {offsets = [768, 0], sizes = [128, 32], strides = [1, 1]} : vector<1024x32xf32> to vector<128x32xf32>
    %247 = vector.extract_strided_slice %221 {offsets = [6, 0], sizes = [1, 128], strides = [1, 1]} : vector<8x128xf32> to vector<1x128xf32>
    %cst_143 = arith.constant dense<0.000000e+00> : vector<1x32xf32>
    %248 = tpu.matmul %247, %246, %cst_143 {dimension_numbers = #tpu.dot_dimension_numbers<[1], [0], [0], [1], [0, 0, 1, 1], [], []>} : vector<1x128xf32>, vector<128x32xf32>, vector<1x32xf32> -> vector<1x32xf32>
    %c6_144 = arith.constant 6 : index
    %c0_145 = arith.constant 0 : index
    %249 = vector.load %arg11[%c6_144, %c0_145] : memref<8x32xf32, #tpu.memory_space<vmem>>, vector<1x32xf32>
    tpu.vector_store %arg11[%c6_144, %c0_145], %248 {strides = array<i32>} : memref<8x32xf32, #tpu.memory_space<vmem>>, vector<1x32xf32>,
    %250 = vector.extract_strided_slice %10 {offsets = [896, 0], sizes = [128, 32], strides = [1, 1]} : vector<1024x32xf32> to vector<128x32xf32>
    %251 = vector.extract_strided_slice %221 {offsets = [7, 0], sizes = [1, 128], strides = [1, 1]} : vector<8x128xf32> to vector<1x128xf32>
    %cst_146 = arith.constant dense<0.000000e+00> : vector<1x32xf32>
    %252 = tpu.matmul %251, %250, %cst_146 {dimension_numbers = #tpu.dot_dimension_numbers<[1], [0], [0], [1], [0, 0, 1, 1], [], []>} : vector<1x128xf32>, vector<128x32xf32>, vector<1x32xf32> -> vector<1x32xf32>
    %c7_147 = arith.constant 7 : index
    %c0_148 = arith.constant 0 : index
    %253 = vector.load %arg11[%c7_147, %c0_148] : memref<8x32xf32, #tpu.memory_space<vmem>>, vector<1x32xf32>
    tpu.vector_store %arg11[%c7_147, %c0_148], %252 {strides = array<i32>} : memref<8x32xf32, #tpu.memory_space<vmem>>, vector<1x32xf32>,
    %c0_149 = arith.constant 0 : index
    %c0_150 = arith.constant 0 : index
    %254 = vector.load %arg11[%c0_149, %c0_150] : memref<8x32xf32, #tpu.memory_space<vmem>>, vector<8x32xf32>
    %255 = arith.addf %211, %254 : vector<8x32xf32>
    %c0_151 = arith.constant 0 : index
    %c0_152 = arith.constant 0 : index
    %256 = vector.load %arg6[%c0_151, %c0_152] : memref<32x128xf32, #tpu.memory_space<vmem>>, vector<32x128xf32>
    %cst_153 = arith.constant dense<0.000000e+00> : vector<8x128xf32>
    %257 = tpu.matmul %255, %256, %cst_153 {dimension_numbers = #tpu.dot_dimension_numbers<[1], [0], [0], [1], [0, 0, 1, 1], [], []>} : vector<8x32xf32>, vector<32x128xf32>, vector<8x128xf32> -> vector<8x128xf32>
    %c0_154 = arith.constant 0 : index
    %c0_155 = arith.constant 0 : index
    %258 = vector.load %arg7[%c0_154, %c0_155] : memref<1x128xf32, #tpu.memory_space<vmem>>, vector<1x128xf32>
    %259 = vector.broadcast %258 : vector<1x128xf32> to vector<8x128xf32>
    %260 = arith.addf %257, %259 : vector<8x128xf32>
    %c0_156 = arith.constant 0 : index
    %c0_157 = arith.constant 0 : index
    %261 = vector.load %arg8[%c0_156, %c0_157] : memref<8x128xf32, #tpu.memory_space<vmem>>, vector<8x128xf32>
    tpu.vector_store %arg8[%c0_156, %c0_157], %260 {strides = array<i32>} : memref<8x128xf32, #tpu.memory_space<vmem>>, vector<8x128xf32>,
    %c0_158 = arith.constant 0 : index
    %c0_159 = arith.constant 0 : index
    %262 = vector.load %arg9[%c0_158, %c0_159] : memref<8x128xf32, #tpu.memory_space<vmem>>, vector<8x128xf32>
    tpu.vector_store %arg9[%c0_158, %c0_159], %221 {strides = array<i32>} : memref<8x128xf32, #tpu.memory_space<vmem>>, vector<8x128xf32>,
    return
  }
  func.func @transform_0(%arg0: i32) -> (i32, i32) {
    %c0_i32 = arith.constant 0 : i32
    %c0_i32_0 = arith.constant 0 : i32
    return %arg0, %c0_i32 : i32, i32
  }
  func.func @transform_1(%arg0: i32) -> (i32, i32) {
    %c0_i32 = arith.constant 0 : i32
    %c0_i32_0 = arith.constant 0 : i32
    return %arg0, %c0_i32 : i32, i32
  }
  func.func @transform_2(%arg0: i32) -> (i32, i32) {
    %c0_i32 = arith.constant 0 : i32
    %c0_i32_0 = arith.constant 0 : i32
    return %arg0, %c0_i32 : i32, i32
  }
  func.func @transform_3(%arg0: i32) -> (i32, i32) {
    %c0_i32 = arith.constant 0 : i32
    %c0_i32_0 = arith.constant 0 : i32
    %c0_i32_1 = arith.constant 0 : i32
    return %c0_i32, %c0_i32_0 : i32, i32
  }
  func.func @transform_4(%arg0: i32) -> (i32, i32) {
    %c0_i32 = arith.constant 0 : i32
    %c0_i32_0 = arith.constant 0 : i32
    %c0_i32_1 = arith.constant 0 : i32
    return %c0_i32, %c0_i32_0 : i32, i32
  }
  func.func @transform_5(%arg0: i32) -> (i32, i32) {
    %c0_i32 = arith.constant 0 : i32
    %c0_i32_0 = arith.constant 0 : i32
    %c0_i32_1 = arith.constant 0 : i32
    return %c0_i32, %c0_i32_0 : i32, i32
  }
  func.func @transform_6(%arg0: i32) -> (i32, i32) {
    %c0_i32 = arith.constant 0 : i32
    %c0_i32_0 = arith.constant 0 : i32
    %c0_i32_1 = arith.constant 0 : i32
    return %c0_i32, %c0_i32_0 : i32, i32
  }
  func.func @transform_7(%arg0: i32) -> (i32, i32) {
    %c0_i32 = arith.constant 0 : i32
    %c0_i32_0 = arith.constant 0 : i32
    return %arg0, %c0_i32 : i32, i32
  }
  func.func @transform_8(%arg0: i32) -> (i32, i32) {
    %c0_i32 = arith.constant 0 : i32
    %c0_i32_0 = arith.constant 0 : i32
    return %arg0, %c0_i32 : i32, i32
  }
}

</mosaic_0001>

<bundles_post_ra>
// kernel: tpu_custom_call.1
= control target key start
LH: loop header
LB: loop body
LE: loop exit
PB: predicated region body
PF: predicated region fallthrough
CT: control target
= control target key end

     0   :  { %s5271_s0 = inlined_call_operand.vmem [shape: f32[16,32], index: 0, kind: input, shape index: {}]   ;;  %s5272_s1 = inlined_call_operand.vmem [shape: f32[2048,32], index: 1, kind: input, shape index: {}]   ;;  %s5273_s2 = inlined_call_operand.vmem [shape: f32[16,128], index: 2, kind: input, shape index: {}]   ;;  %s5274_s3 = inlined_call_operand.vmem [shape: f32[32,32], index: 3, kind: input, shape index: {}]   ;;  %s5275_s4 = inlined_call_operand.vmem [shape: f32[32,32], index: 4, kind: input, shape index: {}]   ;;  %s5276_s5 = inlined_call_operand.vmem [shape: f32[32,128], index: 5, kind: input, shape index: {}]   ;;  %s5277_s6 = inlined_call_operand.vmem [shape: f32[1,128], index: 6, kind: input, shape index: {}]   ;;  %s5278_s7 = inlined_call_operand.hbm [shape: f32[16,128], index: 7, kind: output, shape index: {0}]   ;;  %s5279_s8 = inlined_call_operand.hbm [shape: f32[16,128], index: 8, kind: output, shape index: {1}]  }
   0x1   :  { %5593 = sst [smem:[#allocation133_spill]] %s5271_s0 }
   0x2   :  { %5594 = sst [smem:[#allocation134_spill]] %s5272_s1 }
   0x3   :  { %14 = vsyncpa [#allocation5], 0 }
   0x4   :  { %16 = vsyncpa [#allocation5 + $0x1], 0 }
   0x5   :  { %17 = vsyncpa [#allocation7], 0 }
   0x6   :  { %19 = vsyncpa [#allocation7 + $0x1], 0  ;;  %s3561_s27 = smov 0   ;;  %s3563_s28 = smov 0  }
   0x7   :  { %s3565_s29 = smov 0   ;;  %s3567_s30 = smov 0  }
   0x8 LB: > { %s3582_s9 = sadd.s32 4294967295, %s3513_s30   ;;  %s2925_s10 = sadd.s32 4294967294, %s3513_s30   ;;  %s3513_s30 = sphi %s3567_s30, %s5961_s30   ;;  %s3509_s29 = sphi %s3565_s29, %s5960_s29   ;;  %s3505_s28 = sphi %s3563_s28, %s5959_s28   ;;  %s3501_s27 = sphi %s3561_s27, %s5958_s27  }
   0x9   : > { %s3586_s11 = sadd.s32 1, %s3513_s30   ;;  %s194_s12 = sadd.s32 1, %s3509_s29 }
   0xa   : > { %s191_s13 = ssub.s32 %s3513_s30, %s3586_s11  ;;  %p204_p0 = scmp.ne.s32.totalorder %s3509_s29, %s3505_s28 }
   0xb   : > { %p192_p1 = scmp.eq.s32.totalorder %s191_s13, 0  ;;  %p205_p2 = scmp.eq.s32.totalorder %s3582_s9, 1 }
   0xc   : > { %p210_p3 = scmp.ne.s32.totalorder %s3505_s28, %s3501_s27  ;;  %p211_p4 = scmp.eq.s32.totalorder %s2925_s10, 1 }
   0xd   : > { %s3597_s14 = scalar_select %p192_p1, %s3509_s29, %s194_s12  }
   0xe   : > { %p3599_p5 = por %p205_p2, %p204_p0  ;;  %p3603_p6 = por %p211_p4, %p210_p3 }
   0xf   : > { %p2928_p7 = scmp.ge.s32.totalorder %s3513_s30, 1  ;;  %p290_p8 = scmp.lt.s32.totalorder %s3513_s30, 3 }
  0x11   : > { %p291_p9 = pnand %p2928_p7, %p290_p8 }
  0x13   : > { %294 = sbr.rel (%p291_p9) target bundleno = 2144 (0x860), region = 48 }
  0x18   : > { %v3612_v0 = vld [vmem:[%s5275_s4 + $0x18] sm:$0xff]  ;;  %v3617_v1 = vld [vmem:[%s5275_s4 + $0x10] sm:$0xff]  ;;  %s2932_s21 = sshll.u32 %s3582_s9, 7  ;;  %v3625_v2 = vld [vmem:[%s5275_s4 + $0x8] sm:$0xff]  ;;  %vm361_vm0 = vcmask 261120   ;;  %s5597_s1 = sld [smem:[#allocation134_spill]] }
  0x19   : > { %3344 = vmatpush.msra.mxu1 %v3612_v0  ;;  %p342_p10 = scmp.lt.s32.totalorder %s2932_s21, 255  ;;  %3346 = vmatpush.msra.mxu3 %v3612_v0  ;;  %v3633_v3 = vld [vmem:[%s5275_s4] sm:$0xff]  ;;  %p337_p11 = scmp.lt.s32.totalorder %s3582_s9, 1  ;;  %v360_v22 = vld [vmem:[%s5274_s3 + $0x18] sm:$0xff]  ;;  %v359_v25 = vld [vmem:[%s5274_s3 + $0x10] sm:$0xff]  ;;  %vm1944_vm5 = vcmask 253952  }
  0x1a   : > { %3345 = vmatpush.msra.mxu2 %v3612_v0  ;;  %377 = vmatpush.msra.mxu0 %v360_v22  ;;  %v358_v26 = vld [vmem:[%s5274_s3 + $0x8] sm:$0xff]  ;;  %s5600_s0 = sld [smem:[#allocation133_spill]]  ;;  %v357_v27 = vld [vmem:[%s5274_s3] sm:$0xff] }
  0x1b   : > { %3347 = vmatpush.msra.mxu1 %v3617_v1  ;;  %s5963_s21 = smov (!%p342_p10, %s2932_s21), 255  ;;  %3349 = vmatpush.msra.mxu3 %v3617_v1 }
  0x1c   : > { %3348 = vmatpush.msra.mxu2 %v3617_v1  ;;  %s2933_s26 = sshll.u32 %s5963_s21, 3  ;;  %378 = vmatpush.msra.mxu0 %v359_v25  ;;  %s3340_s21 = sshll.u32 %s3582_s9, 3 }
  0x1d   : > { %3350 = vmatpush.msra.mxu1 %v3625_v2  ;;  %3352 = vmatpush.msra.mxu3 %v3625_v2  ;;  %s3684_s17 = scalar_select %p337_p11, %s3582_s9, 1 }
  0x1e   : > { %s3641_s13 = scalar_lea.vmem %s5597_s1, %s2933_s26  ;;  %3351 = vmatpush.msra.mxu2 %v3625_v2  ;;  %379 = vmatpush.msra.mxu0 %v358_v26  ;;  %s2804_s24 = scalar_lea.hbm %s5279_s8, %s3340_s21 }
  0x1f   : > { %3353 = vmatpush.msra.mxu1 %v3633_v3  ;;  %v403_v4 = vld [vmem:[%s3641_s13 + $0x90] sm:$0xff]  ;;  %3355 = vmatpush.msra.mxu3 %v3633_v3  ;;  %v404_v5 = vld [vmem:[%s3641_s13 + $0x98] sm:$0xff]  ;;  %v405_v6 = vld [vmem:[%s3641_s13 + $0xa0] sm:$0xff]  ;;  %s2931_s20 = sshll.u32 %s3684_s17, 3  ;;  %s2808_s26 = sshll.u32 %s2804_s24, 4  ;;  %s2809_s26 = int_to_ptr.hbm [resolvable:$true] %s2808_s26 }
  0x20   : > { %2955 = vmatmul.msk.f32.vlgmr.msra.gmra.mxu1 %vm361_vm0, %v403_v4  ;;  %3354 = vmatpush.msra.mxu2 %v3633_v3  ;;  %v406_v7 = vld [vmem:[%s3641_s13 + $0xa8] sm:$0xff]  ;;  %v407_v8 = vld [vmem:[%s3641_s13 + $0xb0] sm:$0xff]  ;;  %v408_v9 = vld [vmem:[%s3641_s13 + $0xb8] sm:$0xff]  ;;  %s340_s10 = scalar_lea.vmem %s5600_s0, %s2931_s20  ;;  %s4029_s22 = scalar_lea.vmem %s5273_s2, %s2931_s20 }
  0x21   : > { %v409_v10 = vld [vmem:[%s3641_s13 + $0xc0] sm:$0xff]  ;;  %v410_v11 = vld [vmem:[%s3641_s13 + $0xc8] sm:$0xff]  ;;  %v411_v12 = vld [vmem:[%s3641_s13 + $0xd0] sm:$0xff]  ;;  %380 = vmatpush.msra.mxu0 %v357_v27  ;;  %s3433_s12 = sshra.s32 %s2809_s26, 4  ;;  %s3439_s9 = scalar_lea.hbm %s5279_s8, 16  ;;  %s3434_s12 = int_to_ptr.hbm [resolvable:$true] %s3433_s12 }
  0x22   : > { %v412_v13 = vld [vmem:[%s3641_s13 + $0xd8] sm:$0xff]  ;;  %v413_v14 = vld [vmem:[%s3641_s13 + $0xe0] sm:$0xff]  ;;  %v414_v15 = vld [vmem:[%s3641_s13 + $0xe8] sm:$0xff]  ;;  %s3435_s18 = scalar_lea.hbm %s3434_s12, 8  ;;  %p3440_p1 = scmp.lt.s32.totalorder %s3434_s12, %s5279_s8 }
  0x23   : > { %v415_v16 = vld [vmem:[%s3641_s13 + $0xf0] sm:$0xff]  ;;  %v416_v17 = vld [vmem:[%s3641_s13 + $0xf8] sm:$0xff]  ;;  %v417_v18 = vld [vmem:[%s3641_s13 + $0x100] sm:$0xff]  ;;  %913 = vmatpush.msrb.mxu0 %v3612_v0  ;;  %p3436_p12 = scmp.ne.s32.totalorder %s3434_s12, %s3435_s18  ;;  %p3441_p2 = scmp.lt.s32.totalorder %s3439_s9, %s3435_s18 }
  0x24   : > { %v418_v19 = vld [vmem:[%s3641_s13 + $0x108] sm:$0xff]  ;;  %v419_v21 = vld [vmem:[%s3641_s13 + $0x110] sm:$0xff]  ;;  %v420_v24 = vld [vmem:[%s3641_s13 + $0x118] sm:$0xff] }
  0x25   : > { %v356_v28 = vld [vmem:[%s340_s10] sm:$0xff]  ;;  %914 = vmatpush.msrb.mxu0 %v3617_v1  ;;  %v422_v33 = vld [vmem:[%s3641_s13 + $0x128] sm:$0xff]  ;;  %v423_v36 = vld [vmem:[%s3641_s13 + $0x130] sm:$0xff]  ;;  %p3437_p13 = pnand %p3436_p12, %p3599_p5  ;;  %p3442_p3 = por %p3441_p2, %p3440_p1 }
  0x26   : > { %2936 = vmatmul.msk.f32.vlgmr.msra.gmra.mxu0 %vm361_vm0, %v356_v28  ;;  %v421_v30 = vld [vmem:[%s3641_s13 + $0x120] sm:$0xff]  ;;  %v386_v34 = vld [vmem:[%s3641_s13 + $0x8] sm:$0xff]  ;;  %v387_v37 = vld [vmem:[%s3641_s13 + $0x10] sm:$0xff] }
  0x27   : > { %915 = vmatpush.msrb.mxu0 %v3625_v2  ;;  %v385_v31 = vld [vmem:[%s3641_s13] sm:$0xff]  ;;  %v424_v39 = vld [vmem:[%s3641_s13 + $0x138] sm:$0xff]  ;;  %v426_v45 = vld [vmem:[%s3641_s13 + $0x148] sm:$0xff]  ;;  %p3438_p0 = pneg %p3437_p13 }
  0x28   : > { %2956 = vmatmul.msk.f32.gmra.mxu1 %vm361_vm0, %v404_v5  ;;  %v388_v40 = vld [vmem:[%s3641_s13 + $0x18] sm:$0xff]  ;;  %v425_v42 = vld [vmem:[%s3641_s13 + $0x140] sm:$0xff]  ;;  %v390_v46 = vld [vmem:[%s3641_s13 + $0x28] sm:$0xff] }
  0x29   : > { %916 = vmatpush.msrb.mxu0 %v3633_v3  ;;  %v389_v43 = vld [vmem:[%s3641_s13 + $0x20] sm:$0xff]  ;;  %v427_v48 = vld [vmem:[%s3641_s13 + $0x150] sm:$0xff]  ;;  %v428_v51 = vld [vmem:[%s3641_s13 + $0x158] sm:$0xff]  ;;  %p3443_p4 = pnand %p3442_p3, %p3438_p0 }
  0x2a   : > { %v391_v49 = vld [vmem:[%s3641_s13 + $0x30] sm:$0xff]  ;;  %v392_v52 = vld [vmem:[%s3641_s13 + $0x38] sm:$0xff]  ;;  %v429_v54 = vld [vmem:[%s3641_s13 + $0x160] sm:$0xff] }
  0x2b   : > { %v393_v55 = vld [vmem:[%s3641_s13 + $0x40] sm:$0xff]  ;;  %v430_v57 = vld [vmem:[%s3641_s13 + $0x168] sm:$0xff]  ;;  %v431_v60 = vld [vmem:[%s3641_s13 + $0x170] sm:$0xff] }
  0x2c   : > { %v394_v58 = vld [vmem:[%s3641_s13 + $0x48] sm:$0xff]  ;;  %v395_v61 = vld [vmem:[%s3641_s13 + $0x50] sm:$0xff]  ;;  %v432_v63 = vld [vmem:[%s3641_s13 + $0x178] sm:$0xff] }
  0x2d   : > { %v396_v0 = vld [vmem:[%s3641_s13 + $0x58] sm:$0xff]  ;;  %v433_v2 = vld [vmem:[%s3641_s13 + $0x180] sm:$0xff]  ;;  %v434_v5 = vld [vmem:[%s3641_s13 + $0x188] sm:$0xff] }
  0x2e   : > { %2937 = vmatmul.msk.f32.vlgmr.msrb.gmra.mxu0 %vm361_vm0, %v385_v31  ;;  %v397_v3 = vld [vmem:[%s3641_s13 + $0x60] sm:$0xff]  ;;  %v439_v22 = vld [vmem:[%s3641_s13 + $0x1b0] sm:$0xff]  ;;  %v440_v26 = vld [vmem:[%s3641_s13 + $0x1b8] sm:$0xff] }
  0x30   : > { %2957 = vmatmul.msk.f32.gmra.mxu1 %vm361_vm0, %v405_v6  ;;  %v398_v6 = vld [vmem:[%s3641_s13 + $0x68] sm:$0xff] }
  0x36   : > { %2938 = vmatmul.msk.f32.gmra.mxu0 %vm361_vm0, %v386_v34  ;;  %v442_v34 = vld [vmem:[%s3641_s13 + $0x1c8] sm:$0xff] }
  0x38   : > { %2958 = vmatmul.msk.f32.gmra.mxu1 %vm361_vm0, %v406_v7 }
  0x3e   : > { %2939 = vmatmul.msk.f32.gmra.mxu0 %vm361_vm0, %v387_v37 }
  0x40   : > { %2959 = vmatmul.msk.f32.gmra.mxu1 %vm361_vm0, %v407_v8  ;;  %v435_v8 = vld [vmem:[%s3641_s13 + $0x190] sm:$0xff] }
  0x46   : > { %2940 = vmatmul.msk.f32.gmra.mxu0 %vm361_vm0, %v388_v40 }
  0x48   : > { %2960 = vmatmul.msk.f32.gmra.mxu1 %vm361_vm0, %v408_v9  ;;  %v399_v9 = vld [vmem:[%s3641_s13 + $0x70] sm:$0xff] }
  0x4e   : > { %2941 = vmatmul.msk.f32.gmra.mxu0 %vm361_vm0, %v389_v43  ;;  %v444_v43 = vld [vmem:[%s3641_s13 + $0x1d8] sm:$0xff] }
  0x50   : > { %2961 = vmatmul.msk.f32.gmra.mxu1 %vm361_vm0, %v409_v10 }
  0x56   : > { %2942 = vmatmul.msk.f32.gmra.mxu0 %vm361_vm0, %v390_v46 }
  0x58   : > { %2962 = vmatmul.msk.f32.gmra.mxu1 %vm361_vm0, %v410_v11  ;;  %v436_v11 = vld [vmem:[%s3641_s13 + $0x198] sm:$0xff] }
  0x5e   : > { %2943 = vmatmul.msk.f32.gmra.mxu0 %vm361_vm0, %v391_v49 }
  0x60   : > { %2963 = vmatmul.msk.f32.gmra.mxu1 %vm361_vm0, %v411_v12 }
  0x66   : > { %2944 = vmatmul.msk.f32.gmra.mxu0 %vm361_vm0, %v392_v52  ;;  %v446_v52 = vld [vmem:[%s3641_s13 + $0x1e8] sm:$0xff] }
  0x68   : > { %2964 = vmatmul.msk.f32.gmra.mxu1 %vm361_vm0, %v412_v13  ;;  %v400_v13 = vld [vmem:[%s3641_s13 + $0x78] sm:$0xff] }
  0x6e   : > { %2945 = vmatmul.msk.f32.gmra.mxu0 %vm361_vm0, %v393_v55 }
  0x70   : > { %2965 = vmatmul.msk.f32.gmra.mxu1 %vm361_vm0, %v413_v14 }
  0x76   : > { %2946 = vmatmul.msk.f32.gmra.mxu0 %vm361_vm0, %v394_v58 }
  0x78   : > { %2966 = vmatmul.msk.f32.gmra.mxu1 %vm361_vm0, %v414_v15  ;;  %v437_v15 = vld [vmem:[%s3641_s13 + $0x1a0] sm:$0xff] }
  0x7e   : > { %2947 = vmatmul.msk.f32.gmra.mxu0 %vm361_vm0, %v395_v61  ;;  %v448_v61 = vld [vmem:[%s3641_s13 + $0x1f8] sm:$0xff] }
  0x80   : > { %2967 = vmatmul.msk.f32.gmra.mxu1 %vm361_vm0, %v415_v16 }
  0x86   : > { %2948 = vmatmul.msk.f32.gmra.mxu0 %vm361_vm0, %v396_v0 }
  0x88   : > { %2968 = vmatmul.msk.f32.gmra.mxu1 %vm361_vm0, %v416_v17 }
  0x8e   : > { %2949 = vmatmul.msk.f32.gmra.mxu0 %vm361_vm0, %v397_v3 }
  0x90   : > { %2969 = vmatmul.msk.f32.gmra.mxu1 %vm361_vm0, %v417_v18  ;;  %v438_v18 = vld [vmem:[%s3641_s13 + $0x1a8] sm:$0xff] }
  0x96   : > { %2950 = vmatmul.msk.f32.gmra.mxu0 %vm361_vm0, %v398_v6  ;;  %v450_v6 = vld [vmem:[%s3641_s13 + $0x208] sm:$0xff] }
  0x98   : > { %2970 = vmatmul.msk.f32.gmra.mxu1 %vm361_vm0, %v418_v19 }
  0x9d   : > { %v3680_v20 = vpop.f32.mrf.mxu1 }
  0x9e   : > { %5598 = vst [vmem:[#allocation10_spill] sm:$0xff] %v3680_v20  ;;  %2951 = vmatmul.msk.f32.gmra.mxu0 %vm361_vm0, %v399_v9  ;;  %v401_v9 = vld [vmem:[%s3641_s13 + $0x80] sm:$0xff] }
  0xa0   : > { %2971 = vmatmul.msk.f32.gmra.mxu1 %vm361_vm0, %v419_v21 }
  0xa3   : > { %v3826_v12 = vpop.f32.mrf.mxu0 }
  0xa4   : > { %5617 = vst [vmem:[#allocation28_spill] sm:$0xff] %v3826_v12 }
  0xa5   : > { %v3691_v23 = vpop.f32.mrf.mxu1 }
  0xa6   : > { %5599 = vst [vmem:[#allocation11_spill] sm:$0xff] %v3691_v23  ;;  %2952 = vmatmul.msk.f32.gmra.mxu0 %vm361_vm0, %v400_v13  ;;  %v451_v13 = vld [vmem:[%s3641_s13 + $0x210] sm:$0xff] }
  0xa8   : > { %2972 = vmatmul.msk.f32.gmra.mxu1 %vm361_vm0, %v420_v24 }
  0xab   : > { %v3838_v16 = vpop.f32.mrf.mxu0 }
  0xac   : > { %5619 = vst [vmem:[#allocation30_spill] sm:$0xff] %v3838_v16 }
  0xad   : > { %v3711_v29 = vpop.f32.mrf.mxu1 }
  0xae   : > { %5601 = vst [vmem:[#allocation12_spill] sm:$0xff] %v3711_v29  ;;  %2953 = vmatmul.msk.f32.gmra.mxu0 %vm361_vm0, %v401_v9 }
  0xb0   : > { %2973 = vmatmul.msk.f32.gmra.mxu1 %vm361_vm0, %v421_v30  ;;  %v441_v30 = vld [vmem:[%s3641_s13 + $0x1c0] sm:$0xff] }
  0xb3   : > { %v3848_v19 = vpop.f32.mrf.mxu0 }
  0xb4   : > { %5621 = vst [vmem:[#allocation32_spill] sm:$0xff] %v3848_v19 }
  0xb5   : > { %v3720_v32 = vpop.f32.mrf.mxu1 }
  0xb6   : > { %5602 = vst [vmem:[#allocation13_spill] sm:$0xff] %v3720_v32 }
  0xb8   : > { %2974 = vmatmul.msk.f32.gmra.mxu1 %vm361_vm0, %v422_v33 }
  0xbb   : > { %v3856_v24 = vpop.f32.mrf.mxu0 }
  0xbc   : > { %5623 = vst [vmem:[#allocation34_spill] sm:$0xff] %v3856_v24 }
  0xbd   : > { %v3726_v35 = vpop.f32.mrf.mxu1 }
  0xbe   : > { %5603 = vst [vmem:[#allocation14_spill] sm:$0xff] %v3726_v35 }
  0xc0   : > { %2975 = vmatmul.msk.f32.gmra.mxu1 %vm361_vm0, %v423_v36 }
  0xc3   : > { %v3862_v27 = vpop.f32.mrf.mxu0 }
  0xc4   : > { %5625 = vst [vmem:[#allocation36_spill] sm:$0xff] %v3862_v27 }
  0xc5   : > { %v3732_v38 = vpop.f32.mrf.mxu1 }
  0xc6   : > { %5604 = vst [vmem:[#allocation15_spill] sm:$0xff] %v3732_v38 }
  0xc8   : > { %2976 = vmatmul.msk.f32.gmra.mxu1 %vm361_vm0, %v424_v39  ;;  %v443_v39 = vld [vmem:[%s3641_s13 + $0x1d0] sm:$0xff] }
  0xcb   : > { %v3868_v31 = vpop.f32.mrf.mxu0 }
  0xcc   : > { %5627 = vst [vmem:[#allocation38_spill] sm:$0xff] %v3868_v31 }
  0xcd   : > { %v3738_v41 = vpop.f32.mrf.mxu1 }
  0xce   : > { %5605 = vst [vmem:[#allocation16_spill] sm:$0xff] %v3738_v41 }
  0xd0   : > { %2977 = vmatmul.msk.f32.gmra.mxu1 %vm361_vm0, %v425_v42 }
  0xd3   : > { %v3874_v36 = vpop.f32.mrf.mxu0 }
  0xd4   : > { %5629 = vst [vmem:[#allocation40_spill] sm:$0xff] %v3874_v36 }
  0xd5   : > { %v3744_v44 = vpop.f32.mrf.mxu1 }
  0xd6   : > { %5606 = vst [vmem:[#allocation17_spill] sm:$0xff] %v3744_v44 }
  0xd8   : > { %2978 = vmatmul.msk.f32.gmra.mxu1 %vm361_vm0, %v426_v45 }
  0xdb   : > { %v3880_v40 = vpop.f32.mrf.mxu0 }
  0xdc   : > { %5631 = vst [vmem:[#allocation42_spill] sm:$0xff] %v3880_v40 }
  0xdd   : > { %v3750_v47 = vpop.f32.mrf.mxu1 }
  0xde   : > { %5607 = vst [vmem:[#allocation18_spill] sm:$0xff] %v3750_v47 }
  0xe0   : > { %2979 = vmatmul.msk.f32.gmra.mxu1 %vm361_vm0, %v427_v48  ;;  %v445_v48 = vld [vmem:[%s3641_s13 + $0x1e0] sm:$0xff] }
  0xe3   : > { %v3886_v45 = vpop.f32.mrf.mxu0 }
  0xe4   : > { %5633 = vst [vmem:[#allocation44_spill] sm:$0xff] %v3886_v45 }
  0xe5   : > { %v3756_v50 = vpop.f32.mrf.mxu1 }
  0xe6   : > { %5608 = vst [vmem:[#allocation19_spill] sm:$0xff] %v3756_v50 }
  0xe8   : > { %2980 = vmatmul.msk.f32.gmra.mxu1 %vm361_vm0, %v428_v51 }
  0xeb   : > { %v3892_v49 = vpop.f32.mrf.mxu0 }
  0xec   : > { %5635 = vst [vmem:[#allocation46_spill] sm:$0xff] %v3892_v49 }
  0xed   : > { %v3762_v53 = vpop.f32.mrf.mxu1 }
  0xee   : > { %5609 = vst [vmem:[#allocation20_spill] sm:$0xff] %v3762_v53 }
  0xf0   : > { %2981 = vmatmul.msk.f32.gmra.mxu1 %vm361_vm0, %v429_v54 }
  0xf3   : > { %v3898_v54 = vpop.f32.mrf.mxu0 }
  0xf4   : > { %5637 = vst [vmem:[#allocation48_spill] sm:$0xff] %v3898_v54 }
  0xf5   : > { %v3768_v56 = vpop.f32.mrf.mxu1 }
  0xf6   : > { %5610 = vst [vmem:[#allocation21_spill] sm:$0xff] %v3768_v56 }
  0xf8   : > { %2982 = vmatmul.msk.f32.gmra.mxu1 %vm361_vm0, %v430_v57  ;;  %v447_v57 = vld [vmem:[%s3641_s13 + $0x1f0] sm:$0xff] }
  0xfb   : > { %v3904_v58 = vpop.f32.mrf.mxu0 }
  0xfd   : > { %v3774_v59 = vpop.f32.mrf.mxu1 }
  0xfe   : > { %5611 = vst [vmem:[#allocation22_spill] sm:$0xff] %v3774_v59 }
 0x100   : > { %2983 = vmatmul.msk.f32.gmra.mxu1 %vm361_vm0, %v431_v60 }
 0x105   : > { %v3780_v62 = vpop.f32.mrf.mxu1 }
 0x106   : > { %5612 = vst [vmem:[#allocation23_spill] sm:$0xff] %v3780_v62  ;;  %3082 = vmatpush.xpose.msk.msrb.mxu3 %vm361_vm0, %v3780_v62 }
 0x108   : > { %2984 = vmatmul.msk.f32.gmra.mxu1 %vm361_vm0, %v432_v63  ;;  %v3912_v63 = vpop.f32.mrf.mxu0 }
 0x10a   : > { %3083 = vmatpush.xpose.msk.msrb.mxu3 %vm361_vm0, %v3774_v59  ;;  %v478_v59 = vld [vmem:[%s3641_s13 + $0x2e8] sm:$0xff] }
 0x10d   : > { %v3790_v1 = vpop.f32.mrf.mxu1 }
 0x10e   : > { %5613 = vst [vmem:[#allocation24_spill] sm:$0xff] %v3790_v1  ;;  %3084 = vmatpush.xpose.msk.msrb.mxu3 %vm361_vm0, %v3768_v56 }
 0x110   : > { %2985 = vmatmul.msk.f32.gmra.mxu1 %vm361_vm0, %v433_v2  ;;  %v449_v2 = vld [vmem:[%s3641_s13 + $0x200] sm:$0xff]  ;;  %v3922_v3 = vpop.f32.mrf.mxu0 }
 0x112   : > { %3085 = vmatpush.xpose.msk.msrb.mxu3 %vm361_vm0, %v3762_v53 }
 0x115   : > { %v3800_v4 = vpop.f32.mrf.mxu1 }
 0x116   : > { %5614 = vst [vmem:[#allocation25_spill] sm:$0xff] %v3800_v4  ;;  %3086 = vmatpush.xpose.msk.msrb.mxu3 %vm361_vm0, %v3756_v50  ;;  %v477_v50 = vld [vmem:[%s3641_s13 + $0x2e0] sm:$0xff] }
 0x118   : > { %2986 = vmatmul.msk.f32.gmra.mxu1 %vm361_vm0, %v434_v5 }
 0x11a   : > { %3087 = vmatpush.xpose.msk.msrb.mxu3 %vm361_vm0, %v3750_v47 }
 0x11d   : > { %v3810_v7 = vpop.f32.mrf.mxu1 }
 0x11e   : > { %5615 = vst [vmem:[#allocation26_spill] sm:$0xff] %v3810_v7  ;;  %3088 = vmatpush.xpose.msk.msrb.mxu3 %vm361_vm0, %v3744_v44  ;;  %v476_v44 = vld [vmem:[%s3641_s13 + $0x2d8] sm:$0xff] }
 0x120   : > { %2987 = vmatmul.msk.f32.gmra.mxu1 %vm361_vm0, %v435_v8  ;;  %v3932_v8 = vpop.f32.mrf.mxu0 }
 0x122   : > { %3089 = vmatpush.xpose.msk.msrb.mxu3 %vm361_vm0, %v3738_v41 }
 0x125   : > { %v3820_v10 = vpop.f32.mrf.mxu1 }
 0x126   : > { %5616 = vst [vmem:[#allocation27_spill] sm:$0xff] %v3820_v10  ;;  %3090 = vmatpush.xpose.msk.msrb.mxu3 %vm361_vm0, %v3732_v38 }
 0x128   : > { %2988 = vmatmul.msk.f32.gmra.mxu1 %vm361_vm0, %v436_v11 }
 0x12a   : > { %3091 = vmatpush.xpose.msk.msrb.mxu3 %vm361_vm0, %v3726_v35 }
 0x12d   : > { %v3832_v14 = vpop.f32.mrf.mxu1 }
 0x12e   : > { %5618 = vst [vmem:[#allocation29_spill] sm:$0xff] %v3832_v14  ;;  %3092 = vmatpush.xpose.msk.msrb.mxu3 %vm361_vm0, %v3720_v32 }
 0x130   : > { %2989 = vmatmul.msk.f32.gmra.mxu1 %vm361_vm0, %v437_v15  ;;  %v3944_v15 = vpop.f32.mrf.mxu0 }
 0x132   : > { %3093 = vmatpush.xpose.msk.msrb.mxu3 %vm361_vm0, %v3711_v29  ;;  %v472_v29 = vld [vmem:[%s3641_s13 + $0x2b8] sm:$0xff] }
 0x135   : > { %v3842_v17 = vpop.f32.mrf.mxu1 }
 0x136   : > { %5620 = vst [vmem:[#allocation31_spill] sm:$0xff] %v3842_v17  ;;  %3094 = vmatpush.xpose.msk.msrb.mxu3 %vm361_vm0, %v3691_v23  ;;  %v1541_v23 = vrot.slane %v3826_v12, 3 }
 0x138   : > { %2990 = vmatmul.msk.f32.gmra.mxu1 %vm361_vm0, %v438_v18  ;;  %v402_v18 = vld [vmem:[%s3641_s13 + $0x88] sm:$0xff] }
 0x139   : > { %2954 = vmatmul.msk.f32.gmra.mxu0 %vm361_vm0, %v402_v18  ;;  %v501_v18 = vld [vmem:[%s3641_s13 + $0x3a0] sm:$0xff] }
 0x13a   : > { %3095 = vmatpush.xpose.msk.msrb.mxu3 %vm361_vm0, %v3680_v20 }
 0x13d   : > { %v3852_v21 = vpop.f32.mrf.mxu1 }
 0x13e   : > { %5622 = vst [vmem:[#allocation33_spill] sm:$0xff] %v3852_v21 }
 0x140   : > { %2991 = vmatmul.msk.f32.gmra.mxu1 %vm361_vm0, %v439_v22 }
 0x145   : > { %v3858_v25 = vpop.f32.mrf.mxu1 }
 0x146   : > { %5624 = vst [vmem:[#allocation35_spill] sm:$0xff] %v3858_v25 }
 0x148   : > { %2992 = vmatmul.msk.f32.gmra.mxu1 %vm361_vm0, %v440_v26  ;;  %v452_v26 = vld [vmem:[%s3641_s13 + $0x218] sm:$0xff] }
 0x14d   : > { %v3864_v28 = vpop.f32.mrf.mxu1 }
 0x14e   : > { %5626 = vst [vmem:[#allocation37_spill] sm:$0xff] %v3864_v28 }
 0x150   : > { %2993 = vmatmul.msk.f32.gmra.mxu1 %vm361_vm0, %v441_v30  ;;  %v3956_v30 = vpop.f32.mrf.mxu0 }
 0x151   : > { %3065 = vmatpush.xpose.msk.msrb.mxu2 %vm361_vm0, %v3956_v30 }
 0x155   : > { %v3870_v33 = vpop.f32.mrf.mxu1  ;;  %3066 = vmatpush.xpose.msk.msrb.mxu2 %vm361_vm0, %v3944_v15 }
 0x156   : > { %5628 = vst [vmem:[#allocation39_spill] sm:$0xff] %v3870_v33 }
 0x158   : > { %2994 = vmatmul.msk.f32.gmra.mxu1 %vm361_vm0, %v442_v34 }
 0x159   : > { %3067 = vmatpush.xpose.msk.msrb.mxu2 %vm361_vm0, %v3932_v8 }
 0x15d   : > { %v3876_v37 = vpop.f32.mrf.mxu1  ;;  %3068 = vmatpush.xpose.msk.msrb.mxu2 %vm361_vm0, %v3922_v3 }
 0x15e   : > { %5630 = vst [vmem:[#allocation41_spill] sm:$0xff] %v3876_v37 }
 0x160   : > { %2995 = vmatmul.msk.f32.gmra.mxu1 %vm361_vm0, %v443_v39  ;;  %v453_v39 = vld [vmem:[%s3641_s13 + $0x220] sm:$0xff] }
 0x161   : > { %3069 = vmatpush.xpose.msk.msrb.mxu2 %vm361_vm0, %v3912_v63 }
 0x165   : > { %v3882_v42 = vpop.f32.mrf.mxu1  ;;  %3070 = vmatpush.xpose.msk.msrb.mxu2 %vm361_vm0, %v3904_v58 }
 0x166   : > { %5632 = vst [vmem:[#allocation43_spill] sm:$0xff] %v3882_v42 }
 0x168   : > { %2996 = vmatmul.msk.f32.gmra.mxu1 %vm361_vm0, %v444_v43  ;;  %v498_v43 = vld [vmem:[%s3641_s13 + $0x388] sm:$0xff] }
 0x169   : > { %3050 = vmatmul.msk.f32.vlgmr.msra.gmra.mxu3 %vm361_vm0, %v498_v43  ;;  %3071 = vmatpush.xpose.msk.msrb.mxu2 %vm361_vm0, %v3898_v54  ;;  %v502_v43 = vld [vmem:[%s3641_s13 + $0x3a8] sm:$0xff] }
 0x16d   : > { %v3888_v46 = vpop.f32.mrf.mxu1  ;;  %3072 = vmatpush.xpose.msk.msrb.mxu2 %vm361_vm0, %v3892_v49  ;;  %v483_v49 = vld [vmem:[%s3641_s13 + $0x310] sm:$0xff] }
 0x16e   : > { %5634 = vst [vmem:[#allocation45_spill] sm:$0xff] %v3888_v46 }
 0x170   : > { %2997 = vmatmul.msk.f32.gmra.mxu1 %vm361_vm0, %v445_v48 }
 0x171   : > { %3073 = vmatpush.xpose.msk.msrb.mxu2 %vm361_vm0, %v3886_v45 }
 0x175   : > { %v3894_v51 = vpop.f32.mrf.mxu1  ;;  %3074 = vmatpush.xpose.msk.msrb.mxu2 %vm361_vm0, %v3880_v40  ;;  %v481_v40 = vld [vmem:[%s3641_s13 + $0x300] sm:$0xff] }
 0x176   : > { %5636 = vst [vmem:[#allocation47_spill] sm:$0xff] %v3894_v51 }
 0x178   : > { %2998 = vmatmul.msk.f32.gmra.mxu1 %vm361_vm0, %v446_v52  ;;  %v454_v52 = vld [vmem:[%s3641_s13 + $0x228] sm:$0xff] }
 0x179   : > { %3075 = vmatpush.xpose.msk.msrb.mxu2 %vm361_vm0, %v3874_v36 }
 0x17d   : > { %v3900_v55 = vpop.f32.mrf.mxu1  ;;  %3076 = vmatpush.xpose.msk.msrb.mxu2 %vm361_vm0, %v3868_v31  ;;  %v480_v31 = vld [vmem:[%s3641_s13 + $0x2f8] sm:$0xff] }
 0x17e   : > { %5638 = vst [vmem:[#allocation49_spill] sm:$0xff] %v3900_v55 }
 0x180   : > { %2999 = vmatmul.msk.f32.gmra.mxu1 %vm361_vm0, %v447_v57  ;;  %v499_v57 = vld [vmem:[%s3641_s13 + $0x390] sm:$0xff] }
 0x181   : > { %3051 = vmatmul.msk.f32.gmra.mxu3 %vm361_vm0, %v499_v57  ;;  %v458_v57 = vld [vmem:[%s3641_s13 + $0x248] sm:$0xff]  ;;  %3077 = vmatpush.xpose.msk.msrb.mxu2 %vm361_vm0, %v3862_v27 }
 0x185   : > { %v3906_v60 = vpop.f32.mrf.mxu1  ;;  %3078 = vmatpush.xpose.msk.msrb.mxu2 %vm361_vm0, %v3856_v24 }
 0x186   : > { %5639 = vst [vmem:[#allocation50_spill] sm:$0xff] %v3906_v60  ;;  %3099 = vmatpush.xpose.msk.msra.mxu0 %vm361_vm0, %v3906_v60 }
 0x188   : > { %3000 = vmatmul.msk.f32.gmra.mxu1 %vm361_vm0, %v448_v61 }
 0x189   : > { %3079 = vmatpush.xpose.msk.msrb.mxu2 %vm361_vm0, %v3848_v19  ;;  %v479_v19 = vld [vmem:[%s3641_s13 + $0x2f0] sm:$0xff] }
 0x18a   : > { %3100 = vmatpush.xpose.msk.msra.mxu0 %vm361_vm0, %v3900_v55 }
 0x18d   : > { %v3916_v0 = vpop.f32.mrf.mxu1  ;;  %3080 = vmatpush.xpose.msk.msrb.mxu2 %vm361_vm0, %v3838_v16 }
 0x18e   : > { %5640 = vst [vmem:[#allocation51_spill] sm:$0xff] %v3916_v0  ;;  %3101 = vmatpush.xpose.msk.msra.mxu0 %vm361_vm0, %v3894_v51  ;;  %v473_v51 = vld [vmem:[%s3641_s13 + $0x2c0] sm:$0xff] }
 0x190   : > { %3001 = vmatmul.msk.f32.gmra.mxu1 %vm361_vm0, %v449_v2  ;;  %v455_v2 = vld [vmem:[%s3641_s13 + $0x230] sm:$0xff] }
 0x192   : > { %3102 = vmatpush.xpose.msk.msra.mxu0 %vm361_vm0, %v3888_v46 }
 0x195   : > { %v3926_v5 = vpop.f32.mrf.mxu1 }
 0x196   : > { %5641 = vst [vmem:[#allocation52_spill] sm:$0xff] %v3926_v5  ;;  %3103 = vmatpush.xpose.msk.msra.mxu0 %vm361_vm0, %v3882_v42 }
 0x198   : > { %3002 = vmatmul.msk.f32.gmra.mxu1 %vm361_vm0, %v450_v6  ;;  %v500_v6 = vld [vmem:[%s3641_s13 + $0x398] sm:$0xff] }
 0x199   : > { %3052 = vmatmul.msk.f32.gmra.mxu3 %vm361_vm0, %v500_v6  ;;  %v4038_v6 = vld [vmem:[%s4029_s22] sm:$0xff] }
 0x19a   : > { %3104 = vmatpush.xpose.msk.msra.mxu0 %vm361_vm0, %v3876_v37  ;;  %1303 = vmax.xlane.f32.xlu0 %v4038_v6 }
 0x19d   : > { %v3938_v11 = vpop.f32.mrf.mxu1 }
 0x19e   : > { %5642 = vst [vmem:[#allocation53_spill] sm:$0xff] %v3938_v11  ;;  %3105 = vmatpush.xpose.msk.msra.mxu0 %vm361_vm0, %v3870_v33  ;;  %v471_v33 = vld [vmem:[%s3641_s13 + $0x2b0] sm:$0xff] }
 0x1a0   : > { %3003 = vmatmul.msk.f32.gmra.mxu1 %vm361_vm0, %v451_v13  ;;  %v456_v13 = vld [vmem:[%s3641_s13 + $0x238] sm:$0xff] }
 0x1a1   : > { %3053 = vmatmul.msk.f32.gmra.mxu3 %vm361_vm0, %v501_v18  ;;  %v459_v18 = vld [vmem:[%s3641_s13 + $0x250] sm:$0xff] }
 0x1a2   : > { %3106 = vmatpush.xpose.msk.msra.mxu0 %vm361_vm0, %v3864_v28  ;;  %v4122_v28 = vpop.f32.mrf.mxu0 }
 0x1a3   : > { %5658 = vst [vmem:[#allocation69_spill] sm:$0xff] %v4122_v28 }
 0x1a5   : > { %v3950_v22 = vpop.f32.mrf.mxu1 }
 0x1a6   : > { %5643 = vst [vmem:[#allocation54_spill] sm:$0xff] %v3950_v22  ;;  %3107 = vmatpush.xpose.msk.msra.mxu0 %vm361_vm0, %v3858_v25  ;;  %v511_v25 = vld [vmem:[%s3641_s13 + $0x3f0] sm:$0xff] }
 0x1a8   : > { %3004 = vmatmul.msk.f32.gmra.mxu1 %vm361_vm0, %v452_v26 }
 0x1a9   : > { %3054 = vmatmul.msk.f32.gmra.mxu3 %vm361_vm0, %v502_v43  ;;  %v504_v43 = vld [vmem:[%s3641_s13 + $0x3b8] sm:$0xff] }
 0x1aa   : > { %3108 = vmatpush.xpose.msk.msra.mxu0 %vm361_vm0, %v3852_v21  ;;  %v509_v21 = vld [vmem:[%s3641_s13 + $0x3e0] sm:$0xff] }
 0x1ad   : > { %v3962_v34 = vpop.f32.mrf.mxu1 }
 0x1ae   : > { %5644 = vst [vmem:[#allocation55_spill] sm:$0xff] %v3962_v34  ;;  %3109 = vmatpush.xpose.msk.msra.mxu0 %vm361_vm0, %v3842_v17 }
 0x1b0   : > { %3005 = vmatmul.msk.f32.gmra.mxu1 %vm361_vm0, %v453_v39  ;;  %v457_v39 = vld [vmem:[%s3641_s13 + $0x240] sm:$0xff] }
 0x1b2   : > { %3110 = vmatpush.xpose.msk.msra.mxu0 %vm361_vm0, %v3832_v14 }
 0x1b5   : > { %v3976_v48 = vpop.f32.mrf.mxu1 }
 0x1b6   : > { %5645 = vst [vmem:[#allocation56_spill] sm:$0xff] %v3976_v48  ;;  %3111 = vmatpush.xpose.msk.msra.mxu0 %vm361_vm0, %v3820_v10  ;;  %v507_v10 = vld [vmem:[%s3641_s13 + $0x3d0] sm:$0xff]  ;;  %v4135_v20 = vpop.f32.mrf.mxu0 }
 0x1b7   : > { %5660 = vst [vmem:[#allocation71_spill] sm:$0xff] %v4135_v20  ;;  %3096 = vmatpush.xpose.msk.msrb.mxu3 %vm361_vm0, %v4135_v20 }
 0x1b8   : > { %3006 = vmatmul.msk.f32.gmra.mxu1 %vm361_vm0, %v454_v52 }
 0x1ba   : > { %3112 = vmatpush.xpose.msk.msra.mxu0 %vm361_vm0, %v3810_v7  ;;  %v506_v7 = vld [vmem:[%s3641_s13 + $0x3c8] sm:$0xff] }
 0x1bb   : > { %3097 = vmatpush.xpose.msk.msrb.mxu3 %vm361_vm0, %v4122_v28  ;;  %v469_v28 = vld [vmem:[%s3641_s13 + $0x2a0] sm:$0xff] }
 0x1bd   : > { %v3990_v61 = vpop.f32.mrf.mxu1 }
 0x1be   : > { %5646 = vst [vmem:[#allocation57_spill] sm:$0xff] %v3990_v61  ;;  %3113 = vmatpush.xpose.msk.msra.mxu0 %vm361_vm0, %v3800_v4  ;;  %v505_v4 = vld [vmem:[%s3641_s13 + $0x3c0] sm:$0xff] }
 0x1c0   : > { %3007 = vmatmul.msk.f32.gmra.mxu1 %vm361_vm0, %v455_v2  ;;  %v503_v2 = vld [vmem:[%s3641_s13 + $0x3b0] sm:$0xff] }
 0x1c1   : > { %3055 = vmatmul.msk.f32.gmra.mxu3 %vm361_vm0, %v503_v2  ;;  %v460_v2 = vld [vmem:[%s3641_s13 + $0x258] sm:$0xff] }
 0x1c2   : > { %3114 = vmatpush.xpose.msk.msra.mxu0 %vm361_vm0, %v3790_v1  ;;  %v491_v1 = vld [vmem:[%s3641_s13 + $0x350] sm:$0xff] }
 0x1c5   : > { %v4004_v9 = vpop.f32.mrf.mxu1 }
 0x1c6   : > { %5647 = vst [vmem:[#allocation58_spill] sm:$0xff] %v4004_v9 }
 0x1c8   : > { %3008 = vmatmul.msk.f32.gmra.mxu1 %vm361_vm0, %v456_v13 }
 0x1c9   : > { %3056 = vmatmul.msk.f32.gmra.mxu3 %vm361_vm0, %v504_v43  ;;  %v492_v43 = vld [vmem:[%s3641_s13 + $0x358] sm:$0xff] }
 0x1cd   : > { %v4014_v26 = vpop.f32.mrf.mxu1 }
 0x1ce   : > { %5648 = vst [vmem:[#allocation59_spill] sm:$0xff] %v4014_v26 }
 0x1d0   : > { %3009 = vmatmul.msk.f32.gmra.mxu1 %vm361_vm0, %v457_v39  ;;  %v490_v39 = vld [vmem:[%s3641_s13 + $0x348] sm:$0xff] }
 0x1d1   : > { %3042 = vmatmul.msk.f32.vlgmr.msra.gmra.mxu2 %vm361_vm0, %v490_v39  ;;  %3057 = vmatmul.msk.f32.gmra.mxu3 %vm361_vm0, %v505_v4  ;;  %v461_v39 = vld [vmem:[%s3641_s13 + $0x260] sm:$0xff]  ;;  %v462_v4 = vld [vmem:[%s3641_s13 + $0x268] sm:$0xff] }
 0x1d5   : > { %v4031_v52 = vpop.f32.mrf.mxu1 }
 0x1d6   : > { %5649 = vst [vmem:[#allocation60_spill] sm:$0xff] %v4031_v52 }
 0x1d8   : > { %3010 = vmatmul.msk.f32.gmra.mxu1 %vm361_vm0, %v458_v57 }
 0x1d9   : > { %3043 = vmatmul.msk.f32.gmra.mxu2 %vm361_vm0, %v491_v1  ;;  %3058 = vmatmul.msk.f32.gmra.mxu3 %vm361_vm0, %v506_v7  ;;  %v494_v7 = vld [vmem:[%s3641_s13 + $0x368] sm:$0xff] }
 0x1dd   : > { %v4045_v13 = vpop.f32.mrf.mxu1 }
 0x1de   : > { %5650 = vst [vmem:[#allocation61_spill] sm:$0xff] %v4045_v13 }
 0x1e0   : > { %3011 = vmatmul.msk.f32.gmra.mxu1 %vm361_vm0, %v459_v18 }
 0x1e1   : > { %3044 = vmatmul.msk.f32.gmra.mxu2 %vm361_vm0, %v492_v43  ;;  %3059 = vmatmul.msk.f32.gmra.mxu3 %vm361_vm0, %v507_v10  ;;  %v463_v43 = vld [vmem:[%s3641_s13 + $0x270] sm:$0xff] }
 0x1e2   : > { %v495_v10 = vld [vmem:[%s3641_s13 + $0x370] sm:$0xff] }
 0x1e5   : > { %v4057_v57 = vpop.f32.mrf.mxu1 }
 0x1e6   : > { %5651 = vst [vmem:[#allocation62_spill] sm:$0xff] %v4057_v57 }
 0x1e8   : > { %3012 = vmatmul.msk.f32.gmra.mxu1 %vm361_vm0, %v460_v2  ;;  %v493_v2 = vld [vmem:[%s3641_s13 + $0x360] sm:$0xff] }
 0x1e9   : > { %3045 = vmatmul.msk.f32.gmra.mxu2 %vm361_vm0, %v493_v2  ;;  %v464_v2 = vld [vmem:[%s3641_s13 + $0x278] sm:$0xff] }
 0x1ec   : > { %v4165_v20 = vpop.f32.mrf.mxu3 }
 0x1ed   : > { %v4067_v18 = vpop.f32.mrf.mxu1  ;;  %5663 = vst [vmem:[#allocation74_spill] sm:$0xff] %v4165_v20 }
 0x1ee   : > { %5652 = vst [vmem:[#allocation63_spill] sm:$0xff] %v4067_v18 }
 0x1f0   : > { %3013 = vmatmul.msk.f32.gmra.mxu1 %vm361_vm0, %v461_v39  ;;  %v508_v39 = vld [vmem:[%s3641_s13 + $0x3d8] sm:$0xff] }
 0x1f1   : > { %3046 = vmatmul.msk.f32.gmra.mxu2 %vm361_vm0, %v494_v7  ;;  %3060 = vmatmul.msk.f32.gmra.mxu3 %vm361_vm0, %v508_v39  ;;  %v496_v7 = vld [vmem:[%s3641_s13 + $0x378] sm:$0xff]  ;;  %v510_v39 = vld [vmem:[%s3641_s13 + $0x3e8] sm:$0xff] }
 0x1f5   : > { %v4075_v1 = vpop.f32.mrf.mxu1 }
 0x1f6   : > { %5653 = vst [vmem:[#allocation64_spill] sm:$0xff] %v4075_v1 }
 0x1f8   : > { %3014 = vmatmul.msk.f32.gmra.mxu1 %vm361_vm0, %v462_v4 }
 0x1f9   : > { %3061 = vmatmul.msk.f32.gmra.mxu3 %vm361_vm0, %v509_v21  ;;  %3047 = vmatmul.msk.f32.gmra.mxu2 %vm361_vm0, %v495_v10  ;;  %v497_v10 = vld [vmem:[%s3641_s13 + $0x380] sm:$0xff] }
 0x1fd   : > { %v4083_v14 = vpop.f32.mrf.mxu1 }
 0x1fe   : > { %5654 = vst [vmem:[#allocation65_spill] sm:$0xff] %v4083_v14 }
 0x200   : > { %3015 = vmatmul.msk.f32.gmra.mxu1 %vm361_vm0, %v463_v43  ;;  %v465_v43 = vld [vmem:[%s3641_s13 + $0x280] sm:$0xff] }
 0x201   : > { %3062 = vmatmul.msk.f32.gmra.mxu3 %vm361_vm0, %v510_v39  ;;  %3048 = vmatmul.msk.f32.gmra.mxu2 %vm361_vm0, %v496_v7  ;;  %v467_v7 = vld [vmem:[%s3641_s13 + $0x290] sm:$0xff]  ;;  %v512_v39 = vld [vmem:[%s3641_s13 + $0x3f8] sm:$0xff] }
 0x205   : > { %v4091_v17 = vpop.f32.mrf.mxu1 }
 0x206   : > { %5655 = vst [vmem:[#allocation66_spill] sm:$0xff] %v4091_v17  ;;  %3116 = vmatpush.xpose.msk.msra.mxu2 %vm361_vm0, %v4091_v17 }
 0x208   : > { %3016 = vmatmul.msk.f32.gmra.mxu1 %vm361_vm0, %v464_v2  ;;  %v466_v2 = vld [vmem:[%s3641_s13 + $0x288] sm:$0xff] }
 0x209   : > { %3063 = vmatmul.msk.f32.gmra.mxu3 %vm361_vm0, %v511_v25  ;;  %3049 = vmatmul.msk.f32.gmra.mxu2 %vm361_vm0, %v497_v10  ;;  %v1397_v25 = vrot.slane %v3826_v12, 1 }
 0x20a   : > { %3117 = vmatpush.xpose.msk.msra.mxu2 %vm361_vm0, %v4083_v14 }
 0x20d   : > { %v4103_v4 = vpop.f32.mrf.mxu1  ;;  %v1304_v32 = vpop.xlane.xlu0 %1303 }
 0x20e   : > { %5656 = vst [vmem:[#allocation67_spill] sm:$0xff] %v4103_v4  ;;  %3118 = vmatpush.xpose.msk.msra.mxu2 %vm361_vm0, %v4075_v1 }
 0x210   : > { %3017 = vmatmul.msk.f32.gmra.mxu1 %vm361_vm0, %v465_v43 }
 0x211   : > { %3064 = vmatmul.msk.f32.gmra.mxu3 %vm361_vm0, %v512_v39  ;;  %3081 = vmatmul.msk.f32.vlgmr.msrb.gmra.mxu2 %vm361_vm0, %v3826_v12  ;;  %v468_v39 = vld [vmem:[%s3641_s13 + $0x298] sm:$0xff] }
 0x212   : > { %3119 = vmatpush.xpose.msk.msra.mxu2 %vm361_vm0, %v4067_v18 }
 0x215   : > { %v4115_v21 = vpop.f32.mrf.mxu1 }
 0x216   : > { %5657 = vst [vmem:[#allocation68_spill] sm:$0xff] %v4115_v21  ;;  %3120 = vmatpush.xpose.msk.msra.mxu2 %vm361_vm0, %v4057_v57 }
 0x218   : > { %3018 = vmatmul.msk.f32.gmra.mxu1 %vm361_vm0, %v466_v2  ;;  %v1469_v2 = vrot.slane %v3826_v12, 2 }
 0x219   : > { %3098 = vmatmul.msk.f32.vlgmr.msrb.gmra.mxu3 %vm361_vm0, %v1397_v25 }
 0x21a   : > { %3121 = vmatpush.xpose.msk.msra.mxu2 %vm361_vm0, %v4045_v13  ;;  %3115 = vmatmul.msk.f32.vlgmr.msra.gmra.mxu0 %vm361_vm0, %v1469_v2  ;;  %v470_v2 = vld [vmem:[%s3641_s13 + $0x2a8] sm:$0xff] }
 0x21d   : > { %v4129_v43 = vpop.f32.mrf.mxu1 }
 0x21e   : > { %5659 = vst [vmem:[#allocation70_spill] sm:$0xff] %v4129_v43  ;;  %3122 = vmatpush.xpose.msk.msra.mxu2 %vm361_vm0, %v4031_v52 }
 0x220   : > { %3019 = vmatmul.msk.f32.gmra.mxu1 %vm361_vm0, %v467_v7 }
 0x222   : > { %3123 = vmatpush.xpose.msk.msra.mxu2 %vm361_vm0, %v4014_v26 }
 0x225   : > { %v4149_v10 = vpop.f32.mrf.mxu1 }
 0x226   : > { %5661 = vst [vmem:[#allocation72_spill] sm:$0xff] %v4149_v10  ;;  %3124 = vmatpush.xpose.msk.msra.mxu2 %vm361_vm0, %v4004_v9 }
 0x228   : > { %3020 = vmatmul.msk.f32.gmra.mxu1 %vm361_vm0, %v468_v39  ;;  %v4175_v39 = vpop.f32.mrf.mxu3 }
 0x229   : > { %5665 = vst [vmem:[#allocation76_spill] sm:$0xff] %v4175_v39 }
 0x22a   : > { %3125 = vmatpush.xpose.msk.msra.mxu2 %vm361_vm0, %v3990_v61 }
 0x22d   : > { %v4159_v7 = vpop.f32.mrf.mxu1 }
 0x22e   : > { %5662 = vst [vmem:[#allocation73_spill] sm:$0xff] %v4159_v7  ;;  %3126 = vmatpush.xpose.msk.msra.mxu2 %vm361_vm0, %v3976_v48 }
 0x230   : > { %3021 = vmatmul.msk.f32.gmra.mxu1 %vm361_vm0, %v469_v28  ;;  %v4186_v37 = vpop.f32.mrf.mxu3 }
 0x231   : > { %5667 = vst [vmem:[#allocation78_spill] sm:$0xff] %v4186_v37 }
 0x232   : > { %3127 = vmatpush.xpose.msk.msra.mxu2 %vm361_vm0, %v3962_v34 }
 0x235   : > { %v4169_v25 = vpop.f32.mrf.mxu1 }
 0x236   : > { %5664 = vst [vmem:[#allocation75_spill] sm:$0xff] %v4169_v25  ;;  %3128 = vmatpush.xpose.msk.msra.mxu2 %vm361_vm0, %v3950_v22 }
 0x238   : > { %3022 = vmatmul.msk.f32.gmra.mxu1 %vm361_vm0, %v470_v2  ;;  %v4195_v42 = vpop.f32.mrf.mxu3 }
 0x239   : > { %5669 = vst [vmem:[#allocation80_spill] sm:$0xff] %v4195_v42 }
 0x23a   : > { %3129 = vmatpush.xpose.msk.msra.mxu2 %vm361_vm0, %v3938_v11 }
 0x23d   : > { %v4179_v28 = vpop.f32.mrf.mxu1 }
 0x23e   : > { %5666 = vst [vmem:[#allocation77_spill] sm:$0xff] %v4179_v28  ;;  %3130 = vmatpush.xpose.msk.msra.mxu2 %vm361_vm0, %v3926_v5 }
 0x240   : > { %3023 = vmatmul.msk.f32.gmra.mxu1 %vm361_vm0, %v471_v33  ;;  %v1305_v33 = vsub.f32 %v4038_v6, %v1304_v32  ;;  %v4202_v38 = vpop.f32.mrf.mxu3 }
 0x241   : > { %5671 = vst [vmem:[#allocation82_spill] sm:$0xff] %v4202_v38 }
 0x242   : > { %3131 = vmatpush.xpose.msk.msra.mxu2 %vm361_vm0, %v3916_v0  ;;  %v1306_v46 = vmul.f32 1.442695, %v1305_v33 }
 0x244   : > { %3402 = vpow2.f32 %v1306_v46  ;;  %v475_v46 = vld [vmem:[%s3641_s13 + $0x2d0] sm:$0xff] }
 0x245   : > { %v4190_v2 = vpop.f32.mrf.mxu1  ;;  %3132 = vmatmul.msk.f32.vlgmr.msra.gmra.mxu2 %vm361_vm0, %v1541_v23 }
 0x246   : > { %5668 = vst [vmem:[#allocation79_spill] sm:$0xff] %v4190_v2 }
 0x248   : > { %3024 = vmatmul.msk.f32.gmra.mxu1 %vm361_vm0, %v472_v29  ;;  %v474_v29 = vld [vmem:[%s3641_s13 + $0x2c8] sm:$0xff]  ;;  %v4211_v32 = vpop.f32.mrf.mxu3 }
 0x249   : > { %5673 = vst [vmem:[#allocation84_spill] sm:$0xff] %v4211_v32 }
 0x24a   : > { %v4204_v23 = vpop.eup %3402 }
 0x24b   : > { %1308 = vadd.xlane.f32.xlu0 %v4204_v23 }
 0x24d   : > { %v4198_v35 = vpop.f32.mrf.mxu1 }
 0x24e   : > { %5670 = vst [vmem:[#allocation81_spill] sm:$0xff] %v4198_v35 }
 0x250   : > { %3025 = vmatmul.msk.f32.gmra.mxu1 %vm361_vm0, %v473_v51  ;;  %v4219_v33 = vpop.f32.mrf.mxu3 }
 0x251   : > { %5676 = vst [vmem:[#allocation87_spill] sm:$0xff] %v4219_v33 }
 0x254   : > { %v4217_v51 = vpop.f32.mrf.mxu2 }
 0x255   : > { %v4206_v55 = vpop.f32.mrf.mxu1  ;;  %5675 = vst [vmem:[#allocation86_spill] sm:$0xff] %v4217_v51 }
 0x256   : > { %5672 = vst [vmem:[#allocation83_spill] sm:$0xff] %v4206_v55 }
 0x258   : > { %3026 = vmatmul.msk.f32.gmra.mxu1 %vm361_vm0, %v474_v29  ;;  %v4227_v29 = vpop.f32.mrf.mxu3 }
 0x259   : > { %5679 = vst [vmem:[#allocation90_spill] sm:$0xff] %v4227_v29 }
 0x25c   : > { %v4225_v60 = vpop.f32.mrf.mxu2 }
 0x25d   : > { %v4213_v6 = vpop.f32.mrf.mxu1  ;;  %5678 = vst [vmem:[#allocation89_spill] sm:$0xff] %v4225_v60 }
 0x25e   : > { %5674 = vst [vmem:[#allocation85_spill] sm:$0xff] %v4213_v6 }
 0x260   : > { %3027 = vmatmul.msk.f32.gmra.mxu1 %vm361_vm0, %v475_v46  ;;  %v4235_v53 = vpop.f32.mrf.mxu3 }
 0x261   : > { %5682 = vst [vmem:[#allocation93_spill] sm:$0xff] %v4235_v53 }
 0x264   : > { %v4233_v46 = vpop.f32.mrf.mxu2 }
 0x265   : > { %v4221_v41 = vpop.f32.mrf.mxu1  ;;  %5681 = vst [vmem:[#allocation92_spill] sm:$0xff] %v4233_v46 }
 0x266   : > { %5677 = vst [vmem:[#allocation88_spill] sm:$0xff] %v4221_v41 }
 0x268   : > { %3028 = vmatmul.msk.f32.gmra.mxu1 %vm361_vm0, %v476_v44  ;;  %v4243_v16 = vpop.f32.mrf.mxu3 }
 0x269   : > { %5685 = vst [vmem:[#allocation96_spill] sm:$0xff] %v4243_v16 }
 0x26c   : > { %v4241_v44 = vpop.f32.mrf.mxu2 }
 0x26d   : > { %v4229_v47 = vpop.f32.mrf.mxu1  ;;  %5684 = vst [vmem:[#allocation95_spill] sm:$0xff] %v4241_v44 }
 0x26e   : > { %5680 = vst [vmem:[#allocation91_spill] sm:$0xff] %v4229_v47 }
 0x270   : > { %3029 = vmatmul.msk.f32.gmra.mxu1 %vm361_vm0, %v477_v50 }
 0x274   : > { %v4249_v50 = vpop.f32.mrf.mxu2  ;;  %v4251_v24 = vpop.f32.mrf.mxu3 }
 0x275   : > { %v4237_v56 = vpop.f32.mrf.mxu1  ;;  %5687 = vst [vmem:[#allocation98_spill] sm:$0xff] %v4249_v50 }
 0x276   : > { %5683 = vst [vmem:[#allocation94_spill] sm:$0xff] %v4237_v56 }
 0x277   : > { %5688 = vst [vmem:[#allocation99_spill] sm:$0xff] %v4251_v24 }
 0x278   : > { %3030 = vmatmul.msk.f32.gmra.mxu1 %vm361_vm0, %v478_v59 }
 0x27c   : > { %v4259_v59 = vpop.f32.mrf.mxu3  ;;  %v4263_v36 = vpop.f32.mrf.mxu2 }
 0x27d   : > { %v4245_v62 = vpop.f32.mrf.mxu1  ;;  %5690 = vst [vmem:[#allocation101_spill] sm:$0xff] %v4259_v59 }
 0x27e   : > { %5686 = vst [vmem:[#allocation97_spill] sm:$0xff] %v4245_v62 }
 0x27f   : > { %5691 = vst [vmem:[#allocation102_spill] sm:$0xff] %v4263_v36 }
 0x280   : > { %3031 = vmatmul.msk.f32.gmra.mxu1 %vm361_vm0, %v479_v19 }
 0x284   : > { %v4271_v45 = vpop.f32.mrf.mxu3 }
 0x285   : > { %v4253_v27 = vpop.f32.mrf.mxu1  ;;  %5693 = vst [vmem:[#allocation104_spill] sm:$0xff] %v4271_v45 }
 0x286   : > { %5689 = vst [vmem:[#allocation100_spill] sm:$0xff] %v4253_v27  ;;  %3133 = vmatpush.xpose.msk.msra.mxu3 %vm361_vm0, %v4253_v27  ;;  %v482_v27 = vld [vmem:[%s3641_s13 + $0x308] sm:$0xff] }
 0x288   : > { %3032 = vmatmul.msk.f32.gmra.mxu1 %vm361_vm0, %v480_v31  ;;  %v4275_v31 = vpop.f32.mrf.mxu2 }
 0x289   : > { %5694 = vst [vmem:[#allocation105_spill] sm:$0xff] %v4275_v31  ;;  %3167 = vmatpush.xpose.msk.msrb.mxu2 %vm361_vm0, %v4275_v31 }
 0x28a   : > { %3134 = vmatpush.xpose.msk.msra.mxu3 %vm361_vm0, %v4245_v62 }
 0x28d   : > { %v4265_v19 = vpop.f32.mrf.mxu1  ;;  %3168 = vmatpush.xpose.msk.msrb.mxu2 %vm361_vm0, %v4263_v36 }
 0x28e   : > { %5692 = vst [vmem:[#allocation103_spill] sm:$0xff] %v4265_v19  ;;  %3135 = vmatpush.xpose.msk.msra.mxu3 %vm361_vm0, %v4237_v56 }
 0x290   : > { %3033 = vmatmul.msk.f32.gmra.mxu1 %vm361_vm0, %v481_v40  ;;  %v4287_v40 = vpop.f32.mrf.mxu3 }
 0x291   : > { %5696 = vst [vmem:[#allocation107_spill] sm:$0xff] %v4287_v40  ;;  %3169 = vmatpush.xpose.msk.msrb.mxu2 %vm361_vm0, %v4249_v50 }
 0x292   : > { %3136 = vmatpush.xpose.msk.msra.mxu3 %vm361_vm0, %v4229_v47  ;;  %v4291_v47 = vpop.f32.mrf.mxu2 }
 0x293   : > { %5697 = vst [vmem:[#allocation108_spill] sm:$0xff] %v4291_v47 }
 0x295   : > { %v4279_v62 = vpop.f32.mrf.mxu1  ;;  %3170 = vmatpush.xpose.msk.msrb.mxu2 %vm361_vm0, %v4241_v44 }
 0x296   : > { %5695 = vst [vmem:[#allocation106_spill] sm:$0xff] %v4279_v62  ;;  %3137 = vmatpush.xpose.msk.msra.mxu3 %vm361_vm0, %v4221_v41 }
 0x297   : > { %v1537_v41 = vpop.f32.mrf.mxu0 }
 0x298   : > { %3034 = vmatmul.msk.f32.gmra.mxu1 %vm361_vm0, %v482_v27  ;;  %v4303_v27 = vpop.f32.mrf.mxu3  ;;  %1540 = vst [vmem:[#allocation2 + $0x2] sm:$0x1] %v1537_v41  ;;  %v485_v41 = vld [vmem:[%s3641_s13 + $0x320] sm:$0xff] }
 0x299   : > { %5699 = vst [vmem:[#allocation110_spill] sm:$0xff] %v4303_v27  ;;  %3171 = vmatpush.xpose.msk.msrb.mxu2 %vm361_vm0, %v4233_v46 }
 0x29a   : > { %3138 = vmatpush.xpose.msk.msra.mxu3 %vm361_vm0, %v4213_v6  ;;  %v1393_v6 = vpop.f32.mrf.mxu2 }
 0x29b   : > { %1396 = vst [vmem:[#allocation2] sm:$0x1] %v1393_v6 }
 0x29d   : > { %v4295_v56 = vpop.f32.mrf.mxu1  ;;  %3172 = vmatpush.xpose.msk.msrb.mxu2 %vm361_vm0, %v4225_v60 }
 0x29e   : > { %5698 = vst [vmem:[#allocation109_spill] sm:$0xff] %v4295_v56  ;;  %3139 = vmatpush.xpose.msk.msra.mxu3 %vm361_vm0, %v4206_v55  ;;  %v484_v55 = vld [vmem:[%s3641_s13 + $0x318] sm:$0xff] }
 0x2a0   : > { %3035 = vmatmul.msk.f32.gmra.mxu1 %vm361_vm0, %v483_v49  ;;  %v1465_v49 = vpop.f32.mrf.mxu3 }
 0x2a1   : > { %1468 = vst [vmem:[#allocation2 + $0x1] sm:$0x1] %v1465_v49  ;;  %3173 = vmatpush.xpose.msk.msrb.mxu2 %vm361_vm0, %v4217_v51 }
 0x2a2   : > { %3140 = vmatpush.xpose.msk.msra.mxu3 %vm361_vm0, %v4198_v35 }
 0x2a5   : > { %v4309_v54 = vpop.f32.mrf.mxu1 }
 0x2a6   : > { %5700 = vst [vmem:[#allocation111_spill] sm:$0xff] %v4309_v54  ;;  %3141 = vmatpush.xpose.msk.msra.mxu3 %vm361_vm0, %v4190_v2  ;;  %v486_v2 = vld [vmem:[%s3641_s13 + $0x328] sm:$0xff] }
 0x2a8   : > { %3036 = vmatmul.msk.f32.gmra.mxu1 %vm361_vm0, %v484_v55 }
 0x2aa   : > { %3142 = vmatpush.xpose.msk.msra.mxu3 %vm361_vm0, %v4179_v28 }
 0x2ad   : > { %v4321_v6 = vpop.f32.mrf.mxu1 }
 0x2ae   : > { %5701 = vst [vmem:[#allocation112_spill] sm:$0xff] %v4321_v6  ;;  %3143 = vmatpush.xpose.msk.msra.mxu3 %vm361_vm0, %v4169_v25  ;;  %v487_v25 = vld [vmem:[%s3641_s13 + $0x330] sm:$0xff] }
 0x2b0   : > { %3037 = vmatmul.msk.f32.gmra.mxu1 %vm361_vm0, %v485_v41 }
 0x2b2   : > { %3144 = vmatpush.xpose.msk.msra.mxu3 %vm361_vm0, %v4159_v7 }
 0x2b5   : > { %v4329_v55 = vpop.f32.mrf.mxu1 }
 0x2b6   : > { %5702 = vst [vmem:[#allocation113_spill] sm:$0xff] %v4329_v55  ;;  %3145 = vmatpush.xpose.msk.msra.mxu3 %vm361_vm0, %v4149_v10 }
 0x2b8   : > { %3038 = vmatmul.msk.f32.gmra.mxu1 %vm361_vm0, %v486_v2  ;;  %v1613_v2 = vrot.slane %v3826_v12, 4 }
 0x2ba   : > { %3146 = vmatpush.xpose.msk.msra.mxu3 %vm361_vm0, %v4129_v43  ;;  %v488_v43 = vld [vmem:[%s3641_s13 + $0x338] sm:$0xff] }
 0x2bd   : > { %v4337_v49 = vpop.f32.mrf.mxu1 }
 0x2be   : > { %5703 = vst [vmem:[#allocation114_spill] sm:$0xff] %v4337_v49  ;;  %3147 = vmatpush.xpose.msk.msra.mxu3 %vm361_vm0, %v4115_v21 }
 0x2c0   : > { %3039 = vmatmul.msk.f32.gmra.mxu1 %vm361_vm0, %v487_v25 }
 0x2c2   : > { %3148 = vmatpush.xpose.msk.msra.mxu3 %vm361_vm0, %v4103_v4 }
 0x2c5   : > { %v4348_v41 = vpop.f32.mrf.mxu1  ;;  %3149 = vmatmul.msk.f32.vlgmr.msra.gmra.mxu3 %vm361_vm0, %v1613_v2 }
 0x2c6   : > { %3184 = vmatpush.xpose.msk.msrb.mxu3 %vm361_vm0, %v4303_v27  ;;  %5704 = vst [vmem:[#allocation115_spill] sm:$0xff] %v4348_v41  ;;  %v489_v27 = vld [vmem:[%s3641_s13 + $0x340] sm:$0xff]  ;;  %s5157_s13 = sand.u32 1, %s3505_s28  }
 0x2c7   : > { %s5592_s17 = sshll.u32 %s5157_s13, 3  ;;  %s2780_s10 = scalar_lea.sflag [#allocation7], %s5157_s13 }
 0x2c8   : > { %3040 = vmatmul.msk.f32.gmra.mxu1 %vm361_vm0, %v488_v43  ;;  %v1609_v21 = vpop.f32.mrf.mxu2  ;;  %s5162_s20 = scalar_lea.vmem [#allocation6], %s5592_s17 }
 0x2c9   : > { %1612 = vst [vmem:[#allocation2 + $0x3] sm:$0x1] %v1609_v21  ;;  %s2806_s25 = sshll.u32 %s5162_s20, 4  ;;  %s2807_s25 = int_to_ptr.vmem [resolvable:$true] %s2806_s25 }
 0x2ca   : > { %3185 = vmatpush.xpose.msk.msrb.mxu3 %vm361_vm0, %v4287_v40 }
 0x2cd   : > { %v4357_v25 = vpop.f32.mrf.mxu1 }
 0x2ce   : > { %3186 = vmatpush.xpose.msk.msrb.mxu3 %vm361_vm0, %v4271_v45  ;;  %5705 = vst [vmem:[#allocation116_spill] sm:$0xff] %v4357_v25 }
 0x2d0   : > { %3041 = vmatmul.msk.f32.gmra.mxu1 %vm361_vm0, %v489_v27 }
 0x2d2   : > { %3187 = vmatpush.xpose.msk.msrb.mxu3 %vm361_vm0, %v4259_v59 }
 0x2d5   : > { %v4365_v2 = vpop.f32.mrf.mxu1 }
 0x2d6   : > { %3188 = vmatpush.xpose.msk.msrb.mxu3 %vm361_vm0, %v4251_v24  ;;  %5706 = vst [vmem:[#allocation117_spill] sm:$0xff] %v4365_v2 }
 0x2da   : > { %3189 = vmatpush.xpose.msk.msrb.mxu3 %vm361_vm0, %v4243_v16 }
 0x2dd   : > { %v4371_v21 = vpop.f32.mrf.mxu1 }
 0x2de   : > { %3190 = vmatpush.xpose.msk.msrb.mxu3 %vm361_vm0, %v4235_v53  ;;  %5707 = vst [vmem:[#allocation118_spill] sm:$0xff] %v4371_v21 }
 0x2e2   : > { %3191 = vmatpush.xpose.msk.msrb.mxu3 %vm361_vm0, %v4227_v29 }
 0x2e5   : > { %v4377_v43 = vpop.f32.mrf.mxu1 }
 0x2e6   : > { %3192 = vmatpush.xpose.msk.msrb.mxu3 %vm361_vm0, %v4219_v33  ;;  %5708 = vst [vmem:[#allocation119_spill] sm:$0xff] %v4377_v43  ;;  %v1309_v33 = vpop.xlane.xlu0 %1308 }
 0x2e7   : > { %3404 = vrcp.f32 %v1309_v33  ;;  %vm1315_vm1 = vweird.f32 %v1309_v33 }
 0x2ea   : > { %3193 = vmatpush.xpose.msk.msrb.mxu3 %vm361_vm0, %v4211_v32 }
 0x2ed   : > { %v4383_v27 = vpop.f32.mrf.mxu1 }
 0x2ee   : > { %3194 = vmatpush.xpose.msk.msrb.mxu3 %vm361_vm0, %v4202_v38  ;;  %5709 = vst [vmem:[#allocation120_spill] sm:$0xff] %v4383_v27 }
 0x2f2   : > { %3195 = vmatpush.xpose.msk.msrb.mxu3 %vm361_vm0, %v4195_v42  ;;  %v1829_v42 = vrot.slane %v3826_v12, 7 }
 0x2f5   : > { %v4389_v29 = vpop.f32.mrf.mxu1 }
 0x2f6   : > { %3196 = vmatpush.xpose.msk.msrb.mxu3 %vm361_vm0, %v4186_v37  ;;  %5710 = vst [vmem:[#allocation121_spill] sm:$0xff] %v4389_v29  ;;  %v3405_v37 = vpop.eup %3404 }
 0x2f7   : > { %vm1316_vm2 = vweird.f32 %v3405_v37 }
 0x2f8   : > { %vm1317_vm3 = vmor %vm1315_vm1, %vm1316_vm2 }
 0x2fa   : > { %3197 = vmatpush.xpose.msk.msrb.mxu3 %vm361_vm0, %v4175_v39  ;;  %v1311_v39 = vmul.f32 %v3405_v37, %v1309_v33 }
 0x2fd   : > { %v4395_v32 = vpop.f32.mrf.mxu1 }
 0x2fe   : > { %3198 = vmatpush.xpose.msk.msrb.mxu3 %vm361_vm0, %v4165_v20  ;;  %5711 = vst [vmem:[#allocation122_spill] sm:$0xff] %v4395_v32 }
 0x302   : > { %3199 = vmatpush.xpose.msk.msrb.mxu3 %vm361_vm0, %v4291_v47  ;;  %v1312_v47 = vsub.f32 1.0, %v1311_v39 }
 0x305   : > { %3200 = vmatmul.msk.f32.vlgmr.msrb.gmra.mxu3 %vm361_vm0, %v1829_v42  ;;  %v4404_v38 = vpop.f32.mrf.mxu1  ;;  %v1313_v42 = vmul.f32 %v3405_v37, %v1312_v47 }
 0x306   : > { %1995 = vmatpush.msra.mxu3 %v4091_v17  ;;  %5712 = vst [vmem:[#allocation123_spill] sm:$0xff] %v4404_v38  ;;  %3150 = vmatpush.xpose.msk.msrb.mxu0 %vm361_vm0, %v4404_v38  ;;  %v5756_v17 = vld [vmem:[#allocation69_spill] sm:$0xff] }
 0x307   : > { %v1314_v39 = vadd.f32 %v3405_v37, %v1313_v42 }
 0x308   : > { %1996 = vmatpush.msra.mxu3 %v4083_v14 }
 0x30a   : > { %1997 = vmatpush.msra.mxu3 %v4075_v1  ;;  %3151 = vmatpush.xpose.msk.msrb.mxu0 %vm361_vm0, %v4395_v32  ;;  %v1321_v1 = vand.u32 2147483648, %v1309_v33 }
 0x30c   : > { %1998 = vmatpush.msra.mxu3 %v4067_v18  ;;  %v1322_v47 = vor.u32 1.1754944e-38, %v1321_v1  ;;  %v5755_v18 = vld [vmem:[#allocation35_spill] sm:$0xff] }
 0x30d   : > { %v4414_v14 = vpop.f32.mrf.mxu1 }
 0x30e   : > { %1999 = vmatpush.msra.mxu3 %v4057_v57  ;;  %5713 = vst [vmem:[#allocation124_spill] sm:$0xff] %v4414_v14  ;;  %3152 = vmatpush.xpose.msk.msrb.mxu0 %vm361_vm0, %v4389_v29  ;;  %v1319_v57 = vand.u32 2147483647, %v1309_v33 }
 0x310   : > { %2000 = vmatpush.msra.mxu3 %v4045_v13  ;;  %vm1320_vm4 = vcmp.eq.f32.partialorder %v1319_v57, 8.507059e+37 }
 0x312   : > { %2001 = vmatpush.msra.mxu3 %v4031_v52  ;;  %3153 = vmatpush.xpose.msk.msrb.mxu0 %vm361_vm0, %v4383_v27  ;;  %v1318_v52 = vsel %vm1317_vm3, %v3405_v37, %v1314_v39 }
 0x313   : > { %v1323_v42 = vsel %vm1320_vm4, %v1322_v47, %v1318_v52  ;;  %v1685_v47 = vrot.slane %v3826_v12, 5 }
 0x314   : > { %2002 = vmatpush.msra.mxu3 %v4014_v26  ;;  %v4431_v33 = vmul.f32 %v4204_v23, %v1323_v42  ;;  %v5754_v26 = vld [vmem:[#allocation71_spill] sm:$0xff] }
 0x315   : > { %v4424_v13 = vpop.f32.mrf.mxu1 }
 0x316   : > { %2003 = vmatpush.msra.mxu3 %v4004_v9  ;;  %5714 = vst [vmem:[#allocation125_spill] sm:$0xff] %v4424_v13  ;;  %3154 = vmatpush.xpose.msk.msrb.mxu0 %vm361_vm0, %v4377_v43  ;;  %v1993_v52 = vrot.slane %v4431_v33, 3  ;;  %v5753_v9 = vld [vmem:[#allocation37_spill] sm:$0xff] }
 0x318   : > { %2004 = vmatpush.msra.mxu3 %v3990_v61  ;;  %v5751_v61 = vld [vmem:[#allocation39_spill] sm:$0xff] }
 0x31a   : > { %2005 = vmatpush.msra.mxu3 %v3976_v48  ;;  %3155 = vmatpush.xpose.msk.msrb.mxu0 %vm361_vm0, %v4371_v21  ;;  %v5750_v48 = vld [vmem:[#allocation11_spill] sm:$0xff] }
 0x31c   : > { %2006 = vmatpush.msra.mxu3 %v3962_v34  ;;  %v5749_v34 = vld [vmem:[#allocation41_spill] sm:$0xff] }
 0x31d   : > { %v4437_v37 = vpop.f32.mrf.mxu1 }
 0x31e   : > { %2007 = vmatpush.msra.mxu3 %v3950_v22  ;;  %5715 = vst [vmem:[#allocation126_spill] sm:$0xff] %v4437_v37  ;;  %3156 = vmatpush.xpose.msk.msrb.mxu0 %vm361_vm0, %v4365_v2  ;;  %v5746_v22 = vld [vmem:[#allocation13_spill] sm:$0xff] }
 0x320   : > { %2008 = vmatpush.msra.mxu3 %v3938_v11  ;;  %v5743_v11 = vld [vmem:[#allocation47_spill] sm:$0xff] }
 0x322   : > { %2009 = vmatpush.msra.mxu3 %v3926_v5  ;;  %3157 = vmatpush.xpose.msk.msrb.mxu0 %vm361_vm0, %v4357_v25  ;;  %v5741_v5 = vld [vmem:[#allocation49_spill] sm:$0xff] }
 0x324   : > { %2010 = vmatpush.msra.mxu3 %v3916_v0  ;;  %v5735_v0 = vld [vmem:[#allocation20_spill] sm:$0xff] }
 0x325   : > { %2011 = vmatmul.f32.vlgmr.msra.gmra.mxu3 %v1993_v52  ;;  %v4448_v57 = vpop.f32.mrf.mxu1 }
 0x326   : > { %2064 = vmatpush.msrb.mxu3 %v4275_v31  ;;  %5716 = vst [vmem:[#allocation127_spill] sm:$0xff] %v4448_v57  ;;  %3158 = vmatpush.xpose.msk.msrb.mxu0 %vm361_vm0, %v4348_v41  ;;  %v5731_v31 = vld [vmem:[#allocation23_spill] sm:$0xff] }
 0x328   : > { %2065 = vmatpush.msrb.mxu3 %v4263_v36  ;;  %v5730_v36 = vld [vmem:[#allocation32_spill] sm:$0xff] }
 0x32a   : > { %2066 = vmatpush.msrb.mxu3 %v4249_v50  ;;  %3159 = vmatpush.xpose.msk.msrb.mxu0 %vm361_vm0, %v4337_v49  ;;  %v5729_v50 = vld [vmem:[#allocation34_spill] sm:$0xff] }
 0x32c   : > { %2067 = vmatpush.msrb.mxu3 %v4241_v44  ;;  %v5727_v44 = vld [vmem:[#allocation38_spill] sm:$0xff] }
 0x32d   : > { %v4458_v1 = vpop.f32.mrf.mxu1 }
 0x32e   : > { %2068 = vmatpush.msrb.mxu3 %v4233_v46  ;;  %5717 = vst [vmem:[#allocation128_spill] sm:$0xff] %v4458_v1  ;;  %3160 = vmatpush.xpose.msk.msrb.mxu0 %vm361_vm0, %v4329_v55  ;;  %v5725_v46 = vld [vmem:[#allocation42_spill] sm:$0xff] }
 0x330   : > { %2069 = vmatpush.msrb.mxu3 %v4225_v60  ;;  %v5723_v60 = vld [vmem:[#allocation46_spill] sm:$0xff] }
 0x332   : > { %2070 = vmatpush.msrb.mxu3 %v4217_v51  ;;  %3161 = vmatpush.xpose.msk.msrb.mxu0 %vm361_vm0, %v4321_v6 }
 0x335   : > { %v4464_v23 = vpop.f32.mrf.mxu1 }
 0x336   : > { %5718 = vst [vmem:[#allocation129_spill] sm:$0xff] %v4464_v23  ;;  %3162 = vmatpush.xpose.msk.msrb.mxu0 %vm361_vm0, %v4309_v54 }
 0x33a   : > { %3163 = vmatpush.xpose.msk.msrb.mxu0 %vm361_vm0, %v4295_v56 }
 0x33d   : > { %v4470_v39 = vpop.f32.mrf.mxu1 }
 0x33e   : > { %5719 = vst [vmem:[#allocation130_spill] sm:$0xff] %v4470_v39  ;;  %3164 = vmatpush.xpose.msk.msrb.mxu0 %vm361_vm0, %v4279_v62 }
 0x342   : > { %3165 = vmatpush.xpose.msk.msrb.mxu0 %vm361_vm0, %v4265_v19 }
 0x345   : > { %v4478_v42 = vpop.f32.mrf.mxu1  ;;  %3166 = vmatmul.msk.f32.vlgmr.msrb.gmra.mxu0 %vm361_vm0, %v1685_v47  ;;  %v5722_v47 = vld [vmem:[#allocation48_spill] sm:$0xff] }
 0x346   : > { %1924 = vmatpush.msra.mxu0 %v3956_v30  ;;  %5720 = vst [vmem:[#allocation131_spill] sm:$0xff] %v4478_v42 }
 0x348   : > { %1925 = vmatpush.msra.mxu0 %v3944_v15  ;;  %v1681_v52 = vpop.f32.mrf.mxu3 }
 0x349   : > { %1684 = vst [vmem:[#allocation2 + $0x4] sm:$0x1] %v1681_v52  ;;  %v5724_v52 = vld [vmem:[#allocation44_spill] sm:$0xff] }
 0x34a   : > { %1926 = vmatpush.msra.mxu0 %v3932_v8 }
 0x34c   : > { %1927 = vmatpush.msra.mxu0 %v3922_v3 }
 0x34d   : > { %v4485_v51 = vpop.f32.mrf.mxu1 }
 0x34e   : > { %1928 = vmatpush.msra.mxu0 %v3912_v63  ;;  %5721 = vst [vmem:[#allocation132_spill] sm:$0xff] %v4485_v51  ;;  %3174 = vmatpush.xpose.msk.msrb.mxu2 %vm361_vm0, %v4485_v51 }
 0x34f   : > { %2071 = vmatpush.msrb.mxu3 %v4485_v51  ;;  %v5726_v51 = vld [vmem:[#allocation40_spill] sm:$0xff] }
 0x350   : > { %1929 = vmatpush.msra.mxu0 %v3904_v58 }
 0x351   : > { %2072 = vmatpush.msrb.mxu3 %v4478_v42 }
 0x352   : > { %1930 = vmatpush.msra.mxu0 %v5722_v47  ;;  %3175 = vmatpush.xpose.msk.msrb.mxu2 %vm361_vm0, %v4478_v42  ;;  %v5728_v42 = vld [vmem:[#allocation36_spill] sm:$0xff] }
 0x353   : > { %2073 = vmatpush.msrb.mxu3 %v4470_v39 }
 0x354   : > { %1931 = vmatpush.msra.mxu0 %v5723_v60 }
 0x355   : > { %2074 = vmatpush.msrb.mxu3 %v4464_v23 }
 0x356   : > { %1932 = vmatpush.msra.mxu0 %v5724_v52  ;;  %3176 = vmatpush.xpose.msk.msrb.mxu2 %vm361_vm0, %v4470_v39  ;;  %v2062_v39 = vrot.slane %v4431_v33, 6 }
 0x357   : > { %2075 = vmatpush.msrb.mxu3 %v4458_v1 }
 0x358   : > { %1933 = vmatpush.msra.mxu0 %v5725_v46 }
 0x359   : > { %2076 = vmatpush.msrb.mxu3 %v4448_v57 }
 0x35a   : > { %1934 = vmatpush.msra.mxu0 %v5726_v51  ;;  %3177 = vmatpush.xpose.msk.msrb.mxu2 %vm361_vm0, %v4464_v23  ;;  %v5732_v23 = vld [vmem:[#allocation30_spill] sm:$0xff] }
 0x35b   : > { %2077 = vmatpush.msrb.mxu3 %v4437_v37 }
 0x35c   : > { %1935 = vmatpush.msra.mxu0 %v5727_v44  ;;  %v5769_v44 = vld [vmem:[#allocation24_spill] sm:$0xff] }
 0x35d   : > { %2078 = vmatpush.msrb.mxu3 %v4424_v13 }
 0x35e   : > { %1936 = vmatpush.msra.mxu0 %v5728_v42  ;;  %3178 = vmatpush.xpose.msk.msrb.mxu2 %vm361_vm0, %v4458_v1  ;;  %v5733_v1 = vld [vmem:[#allocation22_spill] sm:$0xff]  ;;  %v5760_v42 = vld [vmem:[#allocation97_spill] sm:$0xff] }
 0x35f   : > { %2079 = vmatpush.msrb.mxu3 %v4414_v14 }
 0x360   : > { %1937 = vmatpush.msra.mxu0 %v5729_v50  ;;  %2080 = vmatmul.f32.vlgmr.msrb.gmra.mxu3 %v2062_v39  ;;  %v5734_v39 = vld [vmem:[#allocation21_spill] sm:$0xff] }
 0x361   : > { %3218 = vmatpush.xpose.msk.msra.mxu3 %vm361_vm0, %v5731_v31 }
 0x362   : > { %1938 = vmatpush.msra.mxu0 %v5730_v36  ;;  %3179 = vmatpush.xpose.msk.msrb.mxu2 %vm361_vm0, %v4448_v57  ;;  %v5736_v57 = vld [vmem:[#allocation19_spill] sm:$0xff]  ;;  %v5758_v36 = vld [vmem:[#allocation100_spill] sm:$0xff] }
 0x364   : > { %1939 = vmatpush.msra.mxu0 %v5732_v23  ;;  %v5757_v23 = vld [vmem:[#allocation33_spill] sm:$0xff] }
 0x365   : > { %1940 = vmatmul.f32.vlgmr.msra.gmra.mxu0 %v4431_v33  ;;  %3219 = vmatpush.xpose.msk.msra.mxu3 %vm361_vm0, %v5733_v1 }
 0x366   : > { %1949 = vmatpush.msrb.mxu0 %v5731_v31  ;;  %3180 = vmatpush.xpose.msk.msrb.mxu2 %vm361_vm0, %v4437_v37  ;;  %v5737_v31 = vld [vmem:[#allocation18_spill] sm:$0xff] }
 0x367   : > { %v5738_v37 = vld [vmem:[#allocation50_spill] sm:$0xff] }
 0x368   : > { %1950 = vmatpush.msrb.mxu0 %v5733_v1  ;;  %v1757_v1 = vrot.slane %v3826_v12, 6  ;;  %v5745_v12 = vld [vmem:[#allocation45_spill] sm:$0xff] }
 0x369   : > { %3220 = vmatpush.xpose.msk.msra.mxu3 %vm361_vm0, %v5734_v39 }
 0x36a   : > { %1951 = vmatpush.msrb.mxu0 %v5734_v39  ;;  %3181 = vmatpush.xpose.msk.msrb.mxu2 %vm361_vm0, %v4424_v13  ;;  %v5739_v39 = vld [vmem:[#allocation17_spill] sm:$0xff]  ;;  %v5740_v13 = vld [vmem:[#allocation16_spill] sm:$0xff] }
 0x36c   : > { %1952 = vmatpush.msrb.mxu0 %v5735_v0 }
 0x36d   : > { %3221 = vmatpush.xpose.msk.msra.mxu3 %vm361_vm0, %v5735_v0  ;;  %v5742_v0 = vld [vmem:[#allocation15_spill] sm:$0xff] }
 0x36e   : > { %1953 = vmatpush.msrb.mxu0 %v5736_v57  ;;  %3182 = vmatpush.xpose.msk.msrb.mxu2 %vm361_vm0, %v4414_v14  ;;  %v5744_v14 = vld [vmem:[#allocation14_spill] sm:$0xff] }
 0x370   : > { %1954 = vmatpush.msrb.mxu0 %v5737_v31 }
 0x371   : > { %3222 = vmatpush.xpose.msk.msra.mxu3 %vm361_vm0, %v5736_v57  ;;  %3183 = vmatmul.msk.f32.vlgmr.msrb.gmra.mxu2 %vm361_vm0, %v1757_v1  ;;  %v5747_v57 = vld [vmem:[#allocation43_spill] sm:$0xff]  ;;  %v5748_v1 = vld [vmem:[#allocation12_spill] sm:$0xff] }
 0x372   : > { %1972 = vmatpush.msra.mxu2 %v5738_v37  ;;  %1955 = vmatpush.msrb.mxu0 %v5739_v39 }
 0x374   : > { %1956 = vmatpush.msrb.mxu0 %v5740_v13  ;;  %1973 = vmatpush.msra.mxu2 %v5741_v5 }
 0x375   : > { %3223 = vmatpush.xpose.msk.msra.mxu3 %vm361_vm0, %v5737_v31  ;;  %v5752_v31 = vld [vmem:[#allocation10_spill] sm:$0xff] }
 0x376   : > { %1957 = vmatpush.msrb.mxu0 %v5742_v0  ;;  %1974 = vmatpush.msra.mxu2 %v5743_v11 }
 0x378   : > { %1958 = vmatpush.msrb.mxu0 %v5744_v14  ;;  %1975 = vmatpush.msra.mxu2 %v5745_v12 }
 0x379   : > { %3224 = vmatpush.xpose.msk.msra.mxu3 %vm361_vm0, %v5739_v39  ;;  %v1947_v39 = vrot.slane %v4431_v33, 1 }
 0x37a   : > { %1959 = vmatpush.msrb.mxu0 %v5746_v22  ;;  %1976 = vmatpush.msra.mxu2 %v5747_v57 }
 0x37c   : > { %1960 = vmatpush.msrb.mxu0 %v5748_v1  ;;  %1977 = vmatpush.msra.mxu2 %v5749_v34 }
 0x37d   : > { %3225 = vmatpush.xpose.msk.msra.mxu3 %vm361_vm0, %v5740_v13  ;;  %v5759_v13 = vld [vmem:[#allocation31_spill] sm:$0xff] }
 0x37e   : > { %1961 = vmatpush.msrb.mxu0 %v5750_v48  ;;  %1978 = vmatpush.msra.mxu2 %v5751_v61 }
 0x380   : > { %1962 = vmatpush.msrb.mxu0 %v5752_v31  ;;  %1979 = vmatpush.msra.mxu2 %v5753_v9  ;;  %v5763_v9 = vld [vmem:[#allocation27_spill] sm:$0xff] }
 0x381   : > { %3226 = vmatpush.xpose.msk.msra.mxu3 %vm361_vm0, %v5742_v0  ;;  %v5762_v0 = vld [vmem:[#allocation94_spill] sm:$0xff] }
 0x382   : > { %1963 = vmatpush.msrb.mxu0 %v5754_v26  ;;  %1980 = vmatpush.msra.mxu2 %v5755_v18  ;;  %v5761_v18 = vld [vmem:[#allocation29_spill] sm:$0xff] }
 0x384   : > { %1964 = vmatpush.msrb.mxu0 %v5756_v17  ;;  %1981 = vmatpush.msra.mxu2 %v5757_v23  ;;  %v5765_v23 = vld [vmem:[#allocation26_spill] sm:$0xff] }
 0x385   : > { %1965 = vmatmul.f32.vlgmr.msrb.gmra.mxu0 %v1947_v39  ;;  %3227 = vmatpush.xpose.msk.msra.mxu3 %vm361_vm0, %v5744_v14  ;;  %v5764_v39 = vld [vmem:[#allocation91_spill] sm:$0xff]  ;;  %v5767_v14 = vld [vmem:[#allocation25_spill] sm:$0xff] }
 0x386   : > { %2018 = vmatpush.msra.mxu0 %v5758_v36  ;;  %1982 = vmatpush.msra.mxu2 %v5759_v13  ;;  %v5766_v13 = vld [vmem:[#allocation88_spill] sm:$0xff] }
 0x388   : > { %v1897_v50 = vpop.f32.mrf.mxu3  ;;  %2019 = vmatpush.msra.mxu0 %v5760_v42  ;;  %1983 = vmatpush.msra.mxu2 %v5761_v18  ;;  %v5768_v18 = vld [vmem:[#allocation85_spill] sm:$0xff] }
 0x389   : > { %1900 = vst [vmem:[#allocation2 + $0x7] sm:$0x1] %v1897_v50  ;;  %3228 = vmatpush.xpose.msk.msra.mxu3 %vm361_vm0, %v5746_v22  ;;  %v1970_v50 = vrot.slane %v4431_v33, 2  ;;  %v5771_v22 = vld [vmem:[#allocation79_spill] sm:$0xff] }
 0x38a   : > { %2020 = vmatpush.msra.mxu0 %v5762_v0  ;;  %1984 = vmatpush.msra.mxu2 %v5763_v9  ;;  %v5770_v9 = vld [vmem:[#allocation83_spill] sm:$0xff] }
 0x38c   : > { %2021 = vmatpush.msra.mxu0 %v5764_v39  ;;  %1985 = vmatpush.msra.mxu2 %v5765_v23 }
 0x38d   : > { %3229 = vmatpush.xpose.msk.msra.mxu3 %vm361_vm0, %v5748_v1  ;;  %v5775_v1 = vld [vmem:[#allocation110_spill] sm:$0xff] }
 0x38e   : > { %2022 = vmatpush.msra.mxu0 %v5766_v13  ;;  %1986 = vmatpush.msra.mxu2 %v5767_v14 }
 0x390   : > { %2023 = vmatpush.msra.mxu0 %v5768_v18  ;;  %1987 = vmatpush.msra.mxu2 %v5769_v44 }
 0x391   : > { %1988 = vmatmul.f32.vlgmr.msra.gmra.mxu2 %v1970_v50  ;;  %3230 = vmatpush.xpose.msk.msra.mxu3 %vm361_vm0, %v5750_v48  ;;  %v5772_v50 = vld [vmem:[#allocation75_spill] sm:$0xff]  ;;  %v5774_v48 = vld [vmem:[#allocation68_spill] sm:$0xff] }
 0x392   : > { %2024 = vmatpush.msra.mxu0 %v5770_v9  ;;  %2041 = vmatpush.msrb.mxu2 %v4404_v38 }
 0x394   : > { %2025 = vmatpush.msra.mxu0 %v4198_v35  ;;  %2042 = vmatpush.msrb.mxu2 %v4395_v32 }
 0x395   : > { %3231 = vmatpush.xpose.msk.msra.mxu3 %vm361_vm0, %v5752_v31  ;;  %v5773_v31 = vld [vmem:[#allocation70_spill] sm:$0xff] }
 0x396   : > { %2026 = vmatpush.msra.mxu0 %v5771_v22  ;;  %2043 = vmatpush.msrb.mxu2 %v4389_v29 }
 0x398   : > { %2027 = vmatpush.msra.mxu0 %v4179_v28  ;;  %2044 = vmatpush.msrb.mxu2 %v4383_v27 }
 0x399   : > { %3232 = vmatpush.xpose.msk.msra.mxu3 %vm361_vm0, %v5754_v26  ;;  %v2016_v26 = vrot.slane %v4431_v33, 4 }
 0x39a   : > { %2028 = vmatpush.msra.mxu0 %v5772_v50  ;;  %2045 = vmatpush.msrb.mxu2 %v4377_v43 }
 0x39c   : > { %2029 = vmatpush.msra.mxu0 %v4159_v7  ;;  %2046 = vmatpush.msrb.mxu2 %v4371_v21 }
 0x39d   : > { %3233 = vmatpush.xpose.msk.msra.mxu3 %vm361_vm0, %v5756_v17 }
 0x39e   : > { %2030 = vmatpush.msra.mxu0 %v4149_v10  ;;  %2047 = vmatpush.msrb.mxu2 %v4365_v2 }
 0x3a0   : > { %2031 = vmatpush.msra.mxu0 %v5773_v31  ;;  %2048 = vmatpush.msrb.mxu2 %v4357_v25 }
 0x3a1   : > { %3269 = vmatpush.xpose.msk.msrb.mxu3 %vm361_vm0, %v5758_v36  ;;  %v5783_v36 = vld [vmem:[#allocation108_spill] sm:$0xff] }
 0x3a2   : > { %2032 = vmatpush.msra.mxu0 %v5774_v48  ;;  %2049 = vmatpush.msrb.mxu2 %v4348_v41 }
 0x3a4   : > { %2033 = vmatpush.msra.mxu0 %v4103_v4  ;;  %2050 = vmatpush.msrb.mxu2 %v4337_v49 }
 0x3a5   : > { %2034 = vmatmul.f32.vlgmr.msra.gmra.mxu0 %v2016_v26  ;;  %3270 = vmatpush.xpose.msk.msrb.mxu3 %vm361_vm0, %v5760_v42  ;;  %v5776_v26 = vld [vmem:[#allocation90_spill] sm:$0xff]  ;;  %v5782_v42 = vld [vmem:[#allocation76_spill] sm:$0xff] }
 0x3a6   : > { %2087 = vmatpush.msrb.mxu0 %v5775_v1  ;;  %2051 = vmatpush.msrb.mxu2 %v4329_v55 }
 0x3a8   : > { %v2012_v17 = vpop.f32.mrf.mxu3  ;;  %2088 = vmatpush.msrb.mxu0 %v4287_v40  ;;  %2052 = vmatpush.msrb.mxu2 %v4321_v6 }
 0x3a9   : > { %2015 = vst.msk [vmem:[#allocation3 + $0x3] sm:$0x1] %vm1944_vm5, %v2012_v17  ;;  %3271 = vmatpush.xpose.msk.msrb.mxu3 %vm361_vm0, %v5762_v0  ;;  %v2039_v17 = vrot.slane %v4431_v33, 5  ;;  %v5778_v0 = vld [vmem:[#allocation84_spill] sm:$0xff] }
 0x3aa   : > { %2089 = vmatpush.msrb.mxu0 %v4271_v45  ;;  %2053 = vmatpush.msrb.mxu2 %v4309_v54 }
 0x3ac   : > { %2090 = vmatpush.msrb.mxu0 %v4259_v59  ;;  %2054 = vmatpush.msrb.mxu2 %v4295_v56 }
 0x3ad   : > { %3272 = vmatpush.xpose.msk.msrb.mxu3 %vm361_vm0, %v5764_v39  ;;  %v5777_v39 = vld [vmem:[#allocation87_spill] sm:$0xff] }
 0x3ae   : > { %2091 = vmatpush.msrb.mxu0 %v4251_v24  ;;  %2055 = vmatpush.msrb.mxu2 %v4279_v62 }
 0x3b0   : > { %2092 = vmatpush.msrb.mxu0 %v4243_v16  ;;  %2056 = vmatpush.msrb.mxu2 %v4265_v19 }
 0x3b1   : > { %3273 = vmatpush.xpose.msk.msrb.mxu3 %vm361_vm0, %v5766_v13  ;;  %2057 = vmatmul.f32.vlgmr.msrb.gmra.mxu2 %v2039_v17  ;;  %v5779_v17 = vld [vmem:[#allocation82_spill] sm:$0xff]  ;;  %v5780_v13 = vld [vmem:[#allocation80_spill] sm:$0xff] }
 0x3b2   : > { %2093 = vmatpush.msrb.mxu0 %v4235_v53  ;;  %3201 = vmatpush.xpose.msk.msra.mxu2 %vm361_vm0, %v3956_v30 }
 0x3b4   : > { %2094 = vmatpush.msrb.mxu0 %v5776_v26 }
 0x3b5   : > { %3274 = vmatpush.xpose.msk.msrb.mxu3 %vm361_vm0, %v5768_v18  ;;  %v5781_v18 = vld [vmem:[#allocation78_spill] sm:$0xff] }
 0x3b6   : > { %2095 = vmatpush.msrb.mxu0 %v5777_v39  ;;  %3202 = vmatpush.xpose.msk.msra.mxu2 %vm361_vm0, %v3944_v15 }
 0x3b8   : > { %2096 = vmatpush.msrb.mxu0 %v5778_v0 }
 0x3b9   : > { %3275 = vmatpush.xpose.msk.msrb.mxu3 %vm361_vm0, %v5770_v9  ;;  %v2085_v9 = vrot.slane %v4431_v33, 7  ;;  %v5786_v33 = vld [vmem:[#allocation36_spill] sm:$0xff] }
 0x3ba   : > { %2097 = vmatpush.msrb.mxu0 %v5779_v17  ;;  %3203 = vmatpush.xpose.msk.msra.mxu2 %vm361_vm0, %v3932_v8 }
 0x3bc   : > { %2098 = vmatpush.msrb.mxu0 %v5780_v13 }
 0x3bd   : > { %3276 = vmatpush.xpose.msk.msrb.mxu3 %vm361_vm0, %v4198_v35 }
 0x3be   : > { %2099 = vmatpush.msrb.mxu0 %v5781_v18  ;;  %3204 = vmatpush.xpose.msk.msra.mxu2 %vm361_vm0, %v3922_v3 }
 0x3c0   : > { %2100 = vmatpush.msrb.mxu0 %v5782_v42 }
 0x3c1   : > { %3277 = vmatpush.xpose.msk.msrb.mxu3 %vm361_vm0, %v5771_v22  ;;  %v5792_v22 = vld [vmem:[#allocation30_spill] sm:$0xff] }
 0x3c2   : > { %2101 = vmatpush.msrb.mxu0 %v4165_v20  ;;  %3205 = vmatpush.xpose.msk.msra.mxu2 %vm361_vm0, %v3912_v63  ;;  %v1753_v35 = vpop.f32.mrf.mxu0 }
 0x3c3   : > { %1756 = vst [vmem:[#allocation2 + $0x5] sm:$0x1] %v1753_v35  ;;  %v5784_v35 = vld [vmem:[#allocation38_spill] sm:$0xff] }
 0x3c4   : > { %2102 = vmatpush.msrb.mxu0 %v5783_v36 }
 0x3c5   : > { %2103 = vmatmul.f32.vlgmr.msrb.gmra.mxu0 %v2085_v9  ;;  %3278 = vmatpush.xpose.msk.msrb.mxu3 %vm361_vm0, %v4179_v28  ;;  %v5785_v9 = vld [vmem:[#allocation37_spill] sm:$0xff]  ;;  %v5791_v28 = vld [vmem:[#allocation31_spill] sm:$0xff] }
 0x3c6   : > { %3235 = vmatpush.xpose.msk.msra.mxu0 %vm361_vm0, %v5738_v37  ;;  %3206 = vmatpush.xpose.msk.msra.mxu2 %vm361_vm0, %v3904_v58 }
 0x3c9   : > { %3279 = vmatpush.xpose.msk.msrb.mxu3 %vm361_vm0, %v5772_v50  ;;  %v5790_v50 = vld [vmem:[#allocation32_spill] sm:$0xff] }
 0x3ca   : > { %3236 = vmatpush.xpose.msk.msra.mxu0 %vm361_vm0, %v5741_v5  ;;  %3207 = vmatpush.xpose.msk.msra.mxu2 %vm361_vm0, %v5722_v47 }
 0x3cd   : > { %3280 = vmatpush.xpose.msk.msrb.mxu3 %vm361_vm0, %v4159_v7  ;;  %v5789_v7 = vld [vmem:[#allocation33_spill] sm:$0xff] }
 0x3ce   : > { %3237 = vmatpush.xpose.msk.msra.mxu0 %vm361_vm0, %v5743_v11  ;;  %3208 = vmatpush.xpose.msk.msra.mxu2 %vm361_vm0, %v5723_v60 }
 0x3d1   : > { %3281 = vmatpush.xpose.msk.msrb.mxu3 %vm361_vm0, %v4149_v10  ;;  %v5787_v10 = vld [vmem:[#allocation35_spill] sm:$0xff] }
 0x3d2   : > { %3238 = vmatpush.xpose.msk.msra.mxu0 %vm361_vm0, %v5745_v12  ;;  %3209 = vmatpush.xpose.msk.msra.mxu2 %vm361_vm0, %v5724_v52 }
 0x3d5   : > { %3282 = vmatpush.xpose.msk.msrb.mxu3 %vm361_vm0, %v5773_v31 }
 0x3d6   : > { %3239 = vmatpush.xpose.msk.msra.mxu0 %vm361_vm0, %v5747_v57  ;;  %3210 = vmatpush.xpose.msk.msra.mxu2 %vm361_vm0, %v5725_v46 }
 0x3d9   : > { %3283 = vmatpush.xpose.msk.msrb.mxu3 %vm361_vm0, %v5774_v48 }
 0x3da   : > { %3240 = vmatpush.xpose.msk.msra.mxu0 %vm361_vm0, %v5749_v34  ;;  %3211 = vmatpush.xpose.msk.msra.mxu2 %vm361_vm0, %v5726_v51  ;;  %v5799_v34 = vld [vmem:[#allocation62_spill] sm:$0xff] }
 0x3dd   : > { %3284 = vmatpush.xpose.msk.msrb.mxu3 %vm361_vm0, %v4103_v4  ;;  %v5788_v4 = vld [vmem:[#allocation34_spill] sm:$0xff] }
 0x3de   : > { %3241 = vmatpush.xpose.msk.msra.mxu0 %vm361_vm0, %v5751_v61  ;;  %3212 = vmatpush.xpose.msk.msra.mxu2 %vm361_vm0, %v5784_v35  ;;  %v5797_v61 = vld [vmem:[#allocation64_spill] sm:$0xff] }
 0x3e2   : > { %3242 = vmatpush.xpose.msk.msra.mxu0 %vm361_vm0, %v5785_v9  ;;  %3213 = vmatpush.xpose.msk.msra.mxu2 %vm361_vm0, %v5786_v33  ;;  %v1941_v48 = vpop.f32.mrf.mxu0  ;;  %v5795_v9 = vld [vmem:[#allocation65_spill] sm:$0xff] }
 0x3e3   : > { %1945 = vst.msk [vmem:[#allocation3] sm:$0x1] %vm1944_vm5, %v1941_v48  ;;  %v2081_v31 = vpop.f32.mrf.mxu3  ;;  %v5793_v48 = vld [vmem:[#allocation66_spill] sm:$0xff] }
 0x3e4   : > { %2084 = vst.msk [vmem:[#allocation3 + $0x6] sm:$0x1] %vm1944_vm5, %v2081_v31  ;;  %v5796_v31 = vld [vmem:[#allocation27_spill] sm:$0xff] }
 0x3e6   : > { %3243 = vmatpush.xpose.msk.msra.mxu0 %vm361_vm0, %v5787_v10  ;;  %3214 = vmatpush.xpose.msk.msra.mxu2 %vm361_vm0, %v5788_v4  ;;  %v5794_v10 = vld [vmem:[#allocation29_spill] sm:$0xff] }
 0x3ea   : > { %3244 = vmatpush.xpose.msk.msra.mxu0 %vm361_vm0, %v5789_v7  ;;  %3215 = vmatpush.xpose.msk.msra.mxu2 %vm361_vm0, %v5790_v50 }
 0x3ee   : > { %3245 = vmatpush.xpose.msk.msra.mxu0 %vm361_vm0, %v5791_v28  ;;  %3216 = vmatpush.xpose.msk.msra.mxu2 %vm361_vm0, %v5792_v22  ;;  %v5798_v28 = vld [vmem:[#allocation63_spill] sm:$0xff] }
 0x3f2   : > { %3252 = vmatpush.xpose.msk.msrb.mxu2 %vm361_vm0, %v5793_v48  ;;  %3246 = vmatpush.xpose.msk.msra.mxu0 %vm361_vm0, %v5794_v10 }
 0x3f4   : > { %v1825_v7 = vpop.f32.mrf.mxu2 }
 0x3f5   : > { %1828 = vst [vmem:[#allocation2 + $0x6] sm:$0x1] %v1825_v7 }
 0x3f6   : > { %3253 = vmatpush.xpose.msk.msrb.mxu2 %vm361_vm0, %v5795_v9  ;;  %3247 = vmatpush.xpose.msk.msra.mxu0 %vm361_vm0, %v5796_v31  ;;  %v5802_v31 = vld [vmem:[#allocation59_spill] sm:$0xff] }
 0x3fa   : > { %3254 = vmatpush.xpose.msk.msrb.mxu2 %vm361_vm0, %v5797_v61  ;;  %3248 = vmatpush.xpose.msk.msra.mxu0 %vm361_vm0, %v5765_v23  ;;  %v5800_v23 = vld [vmem:[#allocation61_spill] sm:$0xff] }
 0x3fc   : > { %v4751_v10 = vld [vmem:[#allocation2] sm:$0xff] }
 0x3fd   : > { %1902 = vadd.xlane.f32.xlu1 %v4751_v10 }
 0x3fe   : > { %3255 = vmatpush.xpose.msk.msrb.mxu2 %vm361_vm0, %v5798_v28  ;;  %3249 = vmatpush.xpose.msk.msra.mxu0 %vm361_vm0, %v5767_v14  ;;  %v5801_v14 = vld [vmem:[#allocation60_spill] sm:$0xff] }
 0x402   : > { %3256 = vmatpush.xpose.msk.msrb.mxu2 %vm361_vm0, %v5799_v34  ;;  %3250 = vmatpush.xpose.msk.msra.mxu0 %vm361_vm0, %v5769_v44  ;;  %v1966_v7 = vpop.f32.mrf.mxu0 }
 0x403   : > { %1969 = vst.msk [vmem:[#allocation3 + $0x1] sm:$0x1] %vm1944_vm5, %v1966_v7  ;;  %v5804_v7 = vld [vmem:[#allocation57_spill] sm:$0xff] }
 0x406   : > { %3286 = vmatpush.xpose.msk.msrb.mxu0 %vm361_vm0, %v4404_v38  ;;  %3257 = vmatpush.xpose.msk.msrb.mxu2 %vm361_vm0, %v5800_v23  ;;  %v5803_v38 = vld [vmem:[#allocation58_spill] sm:$0xff] }
 0x40a   : > { %3287 = vmatpush.xpose.msk.msrb.mxu0 %vm361_vm0, %v4395_v32  ;;  %3258 = vmatpush.xpose.msk.msrb.mxu2 %vm361_vm0, %v5801_v14 }
 0x40e   : > { %3288 = vmatpush.xpose.msk.msrb.mxu0 %vm361_vm0, %v4389_v29  ;;  %3259 = vmatpush.xpose.msk.msrb.mxu2 %vm361_vm0, %v5802_v31  ;;  %v5805_v29 = vld [vmem:[#allocation56_spill] sm:$0xff] }
 0x412   : > { %3289 = vmatpush.xpose.msk.msrb.mxu0 %vm361_vm0, %v4383_v27  ;;  %3260 = vmatpush.xpose.msk.msrb.mxu2 %vm361_vm0, %v5803_v38  ;;  %v5806_v27 = vld [vmem:[#allocation55_spill] sm:$0xff] }
 0x414   : > { %v1989_v32 = vpop.f32.mrf.mxu2 }
 0x415   : > { %1992 = vst.msk [vmem:[#allocation3 + $0x2] sm:$0x1] %vm1944_vm5, %v1989_v32  ;;  %v5808_v32 = vld [vmem:[#allocation53_spill] sm:$0xff] }
 0x416   : > { %3290 = vmatpush.xpose.msk.msrb.mxu0 %vm361_vm0, %v4377_v43  ;;  %3261 = vmatpush.xpose.msk.msrb.mxu2 %vm361_vm0, %v5804_v7  ;;  %v5807_v43 = vld [vmem:[#allocation54_spill] sm:$0xff] }
 0x41a   : > { %3291 = vmatpush.xpose.msk.msrb.mxu0 %vm361_vm0, %v4371_v21  ;;  %3262 = vmatpush.xpose.msk.msrb.mxu2 %vm361_vm0, %v5805_v29 }
 0x41e   : > { %3292 = vmatpush.xpose.msk.msrb.mxu0 %vm361_vm0, %v4365_v2  ;;  %3263 = vmatpush.xpose.msk.msrb.mxu2 %vm361_vm0, %v5806_v27  ;;  %v5809_v2 = vld [vmem:[#allocation52_spill] sm:$0xff] }
 0x422   : > { %3293 = vmatpush.xpose.msk.msrb.mxu0 %vm361_vm0, %v4357_v25  ;;  %3264 = vmatpush.xpose.msk.msrb.mxu2 %vm361_vm0, %v5807_v43  ;;  %v2035_v44 = vpop.f32.mrf.mxu0  ;;  %v5810_v25 = vld [vmem:[#allocation51_spill] sm:$0xff] }
 0x423   : > { %2038 = vst.msk [vmem:[#allocation3 + $0x4] sm:$0x1] %vm1944_vm5, %v2035_v44 }
 0x426   : > { %3294 = vmatpush.xpose.msk.msrb.mxu0 %vm361_vm0, %v4348_v41  ;;  %3265 = vmatpush.xpose.msk.msrb.mxu2 %vm361_vm0, %v5808_v32  ;;  %v5811_v41 = vld [vmem:[#allocation28_spill] sm:$0xff] }
 0x42a   : > { %3295 = vmatpush.xpose.msk.msrb.mxu0 %vm361_vm0, %v4337_v49  ;;  %3266 = vmatpush.xpose.msk.msrb.mxu2 %vm361_vm0, %v5809_v2 }
 0x42e   : > { %3296 = vmatpush.xpose.msk.msrb.mxu0 %vm361_vm0, %v4329_v55  ;;  %3267 = vmatpush.xpose.msk.msrb.mxu2 %vm361_vm0, %v5810_v25 }
 0x432   : > { %3297 = vmatpush.xpose.msk.msrb.mxu0 %vm361_vm0, %v4321_v6 }
 0x434   : > { %v2058_v44 = vpop.f32.mrf.mxu2 }
 0x435   : > { %2061 = vst.msk [vmem:[#allocation3 + $0x5] sm:$0x1] %vm1944_vm5, %v2058_v44 }
 0x436   : > { %3298 = vmatpush.xpose.msk.msrb.mxu0 %vm361_vm0, %v4309_v54  ;;  %v5813_v54 = vld [vmem:[#allocation105_spill] sm:$0xff] }
 0x43a   : > { %3299 = vmatpush.xpose.msk.msrb.mxu0 %vm361_vm0, %v4295_v56 }
 0x43e   : > { %3300 = vmatpush.xpose.msk.msrb.mxu0 %vm361_vm0, %v4279_v62 }
 0x442   : > { %3301 = vmatpush.xpose.msk.msrb.mxu0 %vm361_vm0, %v4265_v19  ;;  %v2104_v55 = vpop.f32.mrf.mxu0 }
 0x443   : > { %2107 = vst.msk [vmem:[#allocation3 + $0x7] sm:$0x1] %vm1944_vm5, %v2104_v55 }
 0x44a   : > { %v2108_v49 = vld [vmem:[#allocation3] sm:$0xff] }
 0x44b   : > { %v2109_v6 = vmul.f32 0.125, %v2108_v49 }
 0x44d   : > { %v4818_v21 = vadd.f32 %v2109_v6, %v5811_v41  ;;  %v5814_v6 = vld [vmem:[#allocation102_spill] sm:$0xff] }
 0x44e   : > { %v5815_v41 = vld [vmem:[#allocation98_spill] sm:$0xff] }
 0x44f   : > { %5812 = vst [vmem:[#allocation48_spill] sm:$0xff] %v4818_v21  ;;  %3217 = vmatmul.msk.f32.vlgmr.msra.gmra.mxu2 %vm361_vm0, %v4818_v21  ;;  %v2157_v44 = vrot.slane %v4818_v21, 1  ;;  %v2181_v56 = vrot.slane %v4818_v21, 2  ;;  %v2205_v55 = vrot.slane %v4818_v21, 3  ;;  %v2253_v49 = vrot.slane %v4818_v21, 5 }
 0x450   : > { %3303 = vmatpush.xpose.msk.msra.mxu2 %vm361_vm0, %v5813_v54 }
 0x451   : > { %3234 = vmatmul.msk.f32.vlgmr.msra.gmra.mxu3 %vm361_vm0, %v2157_v44  ;;  %3251 = vmatmul.msk.f32.vlgmr.msra.gmra.mxu0 %vm361_vm0, %v2181_v56  ;;  %v2229_v56 = vrot.slane %v4818_v21, 4  ;;  %v5816_v44 = vld [vmem:[#allocation95_spill] sm:$0xff] }
 0x452   : > { %3320 = vmatpush.xpose.msk.msra.mxu3 %vm361_vm0, %v5775_v1  ;;  %2348 = vmatpush.msra.mxu0 %v3956_v30  ;;  %v5823_v1 = vld [vmem:[#allocation22_spill] sm:$0xff] }
 0x454   : > { %3304 = vmatpush.xpose.msk.msra.mxu2 %vm361_vm0, %v5814_v6  ;;  %2349 = vmatpush.msra.mxu0 %v3944_v15 }
 0x456   : > { %3321 = vmatpush.xpose.msk.msra.mxu3 %vm361_vm0, %v4287_v40  ;;  %2350 = vmatpush.msra.mxu0 %v3932_v8  ;;  %v5822_v40 = vld [vmem:[#allocation23_spill] sm:$0xff] }
 0x457   : > { %3268 = vmatmul.msk.f32.vlgmr.msrb.gmra.mxu2 %vm361_vm0, %v2205_v55  ;;  %v5817_v55 = vld [vmem:[#allocation92_spill] sm:$0xff] }
 0x458   : > { %3305 = vmatpush.xpose.msk.msra.mxu2 %vm361_vm0, %v5815_v41  ;;  %2351 = vmatpush.msra.mxu0 %v3922_v3 }
 0x459   : > { %3285 = vmatmul.msk.f32.vlgmr.msrb.gmra.mxu3 %vm361_vm0, %v2229_v56  ;;  %3302 = vmatmul.msk.f32.vlgmr.msrb.gmra.mxu0 %vm361_vm0, %v2253_v49  ;;  %v5818_v56 = vld [vmem:[#allocation89_spill] sm:$0xff]  ;;  %v5819_v49 = vld [vmem:[#allocation86_spill] sm:$0xff] }
 0x45a   : > { %3322 = vmatpush.xpose.msk.msra.mxu3 %vm361_vm0, %v4271_v45  ;;  %2352 = vmatpush.msra.mxu0 %v3912_v63 }
 0x45c   : > { %3306 = vmatpush.xpose.msk.msra.mxu2 %vm361_vm0, %v5816_v44  ;;  %2353 = vmatpush.msra.mxu0 %v3904_v58 }
 0x45e   : > { %3323 = vmatpush.xpose.msk.msra.mxu3 %vm361_vm0, %v4259_v59  ;;  %2354 = vmatpush.msra.mxu0 %v5722_v47  ;;  %v351_v59 = vlaneseq }
 0x460   : > { %3307 = vmatpush.xpose.msk.msra.mxu2 %vm361_vm0, %v5817_v55  ;;  %2355 = vmatpush.msra.mxu0 %v5723_v60  ;;  %v352_v45 = vand.u32 127, %v351_v59  ;;  %v5840_v60 = vld [vmem:[#allocation11_spill] sm:$0xff] }
 0x462   : > { %3324 = vmatpush.xpose.msk.msra.mxu3 %vm361_vm0, %v4251_v24  ;;  %2356 = vmatpush.msra.mxu0 %v5724_v52  ;;  %v5820_v24 = vld [vmem:[#allocation132_spill] sm:$0xff]  ;;  %vm353_vm6 = vcmp.lt.s32.totalorder %v352_v45, 8  ;;  %v5837_v52 = vld [vmem:[#allocation13_spill] sm:$0xff] }
 0x463   : > { %v5826_v45 = vld [vmem:[#allocation20_spill] sm:$0xff] }
 0x464   : > { %3308 = vmatpush.xpose.msk.msra.mxu2 %vm361_vm0, %v5818_v56  ;;  %2357 = vmatpush.msra.mxu0 %v5725_v46  ;;  %v5833_v46 = vld [vmem:[#allocation127_spill] sm:$0xff] }
 0x466   : > { %3325 = vmatpush.xpose.msk.msra.mxu3 %vm361_vm0, %v4243_v16  ;;  %2358 = vmatpush.msra.mxu0 %v5726_v51  ;;  %v5821_v16 = vld [vmem:[#allocation131_spill] sm:$0xff]  ;;  %v5829_v51 = vld [vmem:[#allocation18_spill] sm:$0xff] }
 0x468   : > { %3309 = vmatpush.xpose.msk.msra.mxu2 %vm361_vm0, %v5819_v49  ;;  %2359 = vmatpush.msra.mxu0 %v5784_v35  ;;  %v5828_v35 = vld [vmem:[#allocation19_spill] sm:$0xff] }
 0x46a   : > { %3326 = vmatpush.xpose.msk.msra.mxu3 %vm361_vm0, %v4235_v53  ;;  %2360 = vmatpush.msra.mxu0 %v5786_v33  ;;  %v5825_v33 = vld [vmem:[#allocation21_spill] sm:$0xff] }
 0x46c   : > { %3310 = vmatpush.xpose.msk.msra.mxu2 %vm361_vm0, %v5820_v24  ;;  %2361 = vmatpush.msra.mxu0 %v5788_v4  ;;  %v5824_v4 = vld [vmem:[#allocation130_spill] sm:$0xff] }
 0x46e   : > { %3327 = vmatpush.xpose.msk.msra.mxu3 %vm361_vm0, %v5776_v26  ;;  %2362 = vmatpush.msra.mxu0 %v5790_v50  ;;  %v3515_v26 = vmov 0.0  }
 0x46f   : > { %v4888_v50 = vsel %vm353_vm6, 1.0, %v3515_v26 }
 0x470   : > { %3311 = vmatpush.xpose.msk.msra.mxu2 %vm361_vm0, %v5821_v16  ;;  %2363 = vmatpush.msra.mxu0 %v5792_v22  ;;  %v1903_v53 = vpop.xlane.xlu1 %1902 }
 0x471   : > { %v1904_v59 = vmul.f32 0.125, %v1903_v53  ;;  %v5827_v53 = vld [vmem:[#allocation129_spill] sm:$0xff] }
 0x472   : > { %2372 = vmatpush.msrb.mxu0 %v5822_v40  ;;  %3328 = vmatpush.xpose.msk.msra.mxu3 %vm361_vm0, %v5777_v39 }
 0x473   : > { %v4892_v22 = vsub.f32 %v4751_v10, %v1904_v59  ;;  %v5830_v10 = vld [vmem:[#allocation128_spill] sm:$0xff]  ;;  %v5831_v59 = vld [vmem:[#allocation17_spill] sm:$0xff] }
 0x474   : > { %2373 = vmatpush.msrb.mxu0 %v5823_v1  ;;  %3312 = vmatpush.xpose.msk.msra.mxu2 %vm361_vm0, %v5824_v4 }
 0x475   : > { %v1906_v39 = vmul.f32 %v4888_v50, %v4892_v22 }
 0x476   : > { %2374 = vmatpush.msrb.mxu0 %v5825_v33  ;;  %3329 = vmatpush.xpose.msk.msra.mxu3 %vm361_vm0, %v5778_v0  ;;  %v5832_v0 = vld [vmem:[#allocation16_spill] sm:$0xff] }
 0x477   : > { %v1907_v26 = vmul.f32 %v1906_v39, %v1906_v39  ;;  %v5834_v39 = vld [vmem:[#allocation15_spill] sm:$0xff] }
 0x478   : > { %2375 = vmatpush.msrb.mxu0 %v5826_v45  ;;  %3313 = vmatpush.xpose.msk.msra.mxu2 %vm361_vm0, %v5827_v53 }
 0x479   : > { %1908 = vadd.xlane.f32.xlu2 %v1907_v26  ;;  %v5836_v26 = vld [vmem:[#allocation126_spill] sm:$0xff] }
 0x47a   : > { %2376 = vmatpush.msrb.mxu0 %v5828_v35  ;;  %3330 = vmatpush.xpose.msk.msra.mxu3 %vm361_vm0, %v5779_v17  ;;  %v5835_v17 = vld [vmem:[#allocation14_spill] sm:$0xff] }
 0x47c   : > { %2377 = vmatpush.msrb.mxu0 %v5829_v51  ;;  %3314 = vmatpush.xpose.msk.msra.mxu2 %vm361_vm0, %v5830_v10 }
 0x47e   : > { %2378 = vmatpush.msrb.mxu0 %v5831_v59  ;;  %3331 = vmatpush.xpose.msk.msra.mxu3 %vm361_vm0, %v5780_v13  ;;  %v5838_v13 = vld [vmem:[#allocation12_spill] sm:$0xff] }
 0x480   : > { %2379 = vmatpush.msrb.mxu0 %v5832_v0  ;;  %3315 = vmatpush.xpose.msk.msra.mxu2 %vm361_vm0, %v5833_v46  ;;  %v5839_v0 = vld [vmem:[#allocation125_spill] sm:$0xff] }
 0x482   : > { %2380 = vmatpush.msrb.mxu0 %v5834_v39  ;;  %3332 = vmatpush.xpose.msk.msra.mxu3 %vm361_vm0, %v5781_v18  ;;  %v5841_v18 = vld [vmem:[#allocation10_spill] sm:$0xff]  ;;  %v5843_v39 = vld [vmem:[#allocation71_spill] sm:$0xff] }
 0x484   : > { %2381 = vmatpush.msrb.mxu0 %v5835_v17  ;;  %3316 = vmatpush.xpose.msk.msra.mxu2 %vm361_vm0, %v5836_v26  ;;  %v5842_v17 = vld [vmem:[#allocation124_spill] sm:$0xff] }
 0x486   : > { %2382 = vmatpush.msrb.mxu0 %v5837_v52  ;;  %3333 = vmatpush.xpose.msk.msra.mxu3 %vm361_vm0, %v5782_v42  ;;  %v2277_v42 = vrot.slane %v4818_v21, 6 }
 0x488   : > { %2383 = vmatpush.msrb.mxu0 %v5838_v13  ;;  %3317 = vmatpush.xpose.msk.msra.mxu2 %vm361_vm0, %v5839_v0 }
 0x48a   : > { %2384 = vmatpush.msrb.mxu0 %v5840_v60  ;;  %3334 = vmatpush.xpose.msk.msra.mxu3 %vm361_vm0, %v4165_v20  ;;  %v5844_v60 = vld [vmem:[#allocation69_spill] sm:$0xff]  ;;  %v2301_v20 = vrot.slane %v4818_v21, 7  ;;  %v5846_v21 = vld [vmem:[#allocation39_spill] sm:$0xff] }
 0x48c   : > { %2385 = vmatpush.msrb.mxu0 %v5841_v18  ;;  %3318 = vmatpush.xpose.msk.msra.mxu2 %vm361_vm0, %v5842_v17 }
 0x48e   : > { %2386 = vmatpush.msrb.mxu0 %v5843_v39  ;;  %3335 = vmatpush.xpose.msk.msra.mxu3 %vm361_vm0, %v5783_v36 }
 0x48f   : > { %3319 = vmatmul.msk.f32.vlgmr.msra.gmra.mxu2 %vm361_vm0, %v2277_v42  ;;  %v5845_v42 = vld [vmem:[#allocation41_spill] sm:$0xff] }
 0x490   : > { %2395 = vmatpush.msrb.mxu2 %v5738_v37  ;;  %2387 = vmatpush.msrb.mxu0 %v5844_v60 }
 0x491   : > { %3336 = vmatmul.msk.f32.vlgmr.msra.gmra.mxu3 %vm361_vm0, %v2301_v20  ;;  %v5847_v20 = vld [vmem:[#allocation37_spill] sm:$0xff] }
 0x492   : > { %2396 = vmatpush.msrb.mxu2 %v5741_v5  ;;  %2418 = vmatpush.msrb.mxu3 %v5793_v48 }
 0x494   : > { %2397 = vmatpush.msrb.mxu2 %v5743_v11  ;;  %2419 = vmatpush.msrb.mxu3 %v5795_v9  ;;  %v5848_v11 = vld [vmem:[#allocation35_spill] sm:$0xff] }
 0x496   : > { %2398 = vmatpush.msrb.mxu2 %v5745_v12  ;;  %2420 = vmatpush.msrb.mxu3 %v5797_v61  ;;  %v5849_v12 = vld [vmem:[#allocation33_spill] sm:$0xff] }
 0x498   : > { %2399 = vmatpush.msrb.mxu2 %v5747_v57  ;;  %2421 = vmatpush.msrb.mxu3 %v5798_v28  ;;  %v5850_v57 = vld [vmem:[#allocation31_spill] sm:$0xff] }
 0x49a   : > { %2400 = vmatpush.msrb.mxu2 %v5845_v42  ;;  %2422 = vmatpush.msrb.mxu3 %v5799_v34  ;;  %v5851_v42 = vld [vmem:[#allocation29_spill] sm:$0xff] }
 0x49c   : > { %2401 = vmatpush.msrb.mxu2 %v5846_v21  ;;  %2423 = vmatpush.msrb.mxu3 %v5800_v23  ;;  %v5852_v21 = vld [vmem:[#allocation27_spill] sm:$0xff] }
 0x49e   : > { %2402 = vmatpush.msrb.mxu2 %v5847_v20  ;;  %2424 = vmatpush.msrb.mxu3 %v5801_v14  ;;  %v5853_v20 = vld [vmem:[#allocation26_spill] sm:$0xff] }
 0x4a0   : > { %2403 = vmatpush.msrb.mxu2 %v5848_v11  ;;  %2425 = vmatpush.msrb.mxu3 %v5802_v31  ;;  %v5854_v11 = vld [vmem:[#allocation25_spill] sm:$0xff] }
 0x4a2   : > { %2404 = vmatpush.msrb.mxu2 %v5849_v12  ;;  %2426 = vmatpush.msrb.mxu3 %v5803_v38  ;;  %v5855_v12 = vld [vmem:[#allocation24_spill] sm:$0xff] }
 0x4a4   : > { %2405 = vmatpush.msrb.mxu2 %v5850_v57  ;;  %2427 = vmatpush.msrb.mxu3 %v5804_v7  ;;  %v5856_v57 = vld [vmem:[#allocation123_spill] sm:$0xff] }
 0x4a6   : > { %2406 = vmatpush.msrb.mxu2 %v5851_v42  ;;  %2428 = vmatpush.msrb.mxu3 %v5805_v29  ;;  %v5857_v42 = vld [vmem:[#allocation122_spill] sm:$0xff] }
 0x4a8   : > { %2407 = vmatpush.msrb.mxu2 %v5852_v21  ;;  %2429 = vmatpush.msrb.mxu3 %v5806_v27  ;;  %v5858_v21 = vld [vmem:[#allocation121_spill] sm:$0xff] }
 0x4aa   : > { %2408 = vmatpush.msrb.mxu2 %v5853_v20  ;;  %2430 = vmatpush.msrb.mxu3 %v5807_v43  ;;  %v5859_v20 = vld [vmem:[#allocation120_spill] sm:$0xff] }
 0x4ac   : > { %2409 = vmatpush.msrb.mxu2 %v5854_v11  ;;  %2431 = vmatpush.msrb.mxu3 %v5808_v32  ;;  %v5860_v11 = vld [vmem:[#allocation119_spill] sm:$0xff] }
 0x4ae   : > { %2410 = vmatpush.msrb.mxu2 %v5855_v12  ;;  %2432 = vmatpush.msrb.mxu3 %v5809_v2  ;;  %v5861_v12 = vld [vmem:[#allocation118_spill] sm:$0xff] }
 0x4b0   : > { %2464 = vmatpush.msra.mxu2 %v5856_v57  ;;  %2433 = vmatpush.msrb.mxu3 %v5810_v25  ;;  %v5862_v57 = vld [vmem:[#allocation117_spill] sm:$0xff] }
 0x4b2   : > { %2465 = vmatpush.msra.mxu2 %v5857_v42  ;;  %2487 = vmatpush.msra.mxu3 %v5813_v54  ;;  %v5863_v54 = vld [vmem:[#allocation116_spill] sm:$0xff] }
 0x4b4   : > { %2466 = vmatpush.msra.mxu2 %v5858_v21  ;;  %2488 = vmatpush.msra.mxu3 %v5814_v6  ;;  %v5864_v6 = vld [vmem:[#allocation115_spill] sm:$0xff] }
 0x4b6   : > { %2467 = vmatpush.msra.mxu2 %v5859_v20  ;;  %2489 = vmatpush.msra.mxu3 %v5815_v41  ;;  %v5865_v41 = vld [vmem:[#allocation114_spill] sm:$0xff] }
 0x4b8   : > { %2468 = vmatpush.msra.mxu2 %v5860_v11  ;;  %2490 = vmatpush.msra.mxu3 %v5816_v44  ;;  %v5866_v44 = vld [vmem:[#allocation113_spill] sm:$0xff] }
 0x4ba   : > { %2469 = vmatpush.msra.mxu2 %v5861_v12  ;;  %2491 = vmatpush.msra.mxu3 %v5817_v55  ;;  %v5867_v55 = vld [vmem:[#allocation112_spill] sm:$0xff] }
 0x4bc   : > { %2470 = vmatpush.msra.mxu2 %v5862_v57  ;;  %2492 = vmatpush.msra.mxu3 %v5818_v56  ;;  %v5868_v56 = vld [vmem:[#allocation111_spill] sm:$0xff] }
 0x4be   : > { %2471 = vmatpush.msra.mxu2 %v5863_v54  ;;  %2493 = vmatpush.msra.mxu3 %v5819_v49  ;;  %v5869_v49 = vld [vmem:[#allocation109_spill] sm:$0xff] }
 0x4c0   : > { %2472 = vmatpush.msra.mxu2 %v5864_v6  ;;  %2494 = vmatpush.msra.mxu3 %v5820_v24 }
 0x4c2   : > { %2473 = vmatpush.msra.mxu2 %v5865_v41  ;;  %2495 = vmatpush.msra.mxu3 %v5821_v16 }
 0x4c4   : > { %2474 = vmatpush.msra.mxu2 %v5866_v44  ;;  %2496 = vmatpush.msra.mxu3 %v5824_v4 }
 0x4c6   : > { %2475 = vmatpush.msra.mxu2 %v5867_v55  ;;  %2497 = vmatpush.msra.mxu3 %v5827_v53 }
 0x4c8   : > { %2476 = vmatpush.msra.mxu2 %v5868_v56  ;;  %2498 = vmatpush.msra.mxu3 %v5830_v10 }
 0x4ca   : > { %2477 = vmatpush.msra.mxu2 %v5869_v49  ;;  %2499 = vmatpush.msra.mxu3 %v5833_v46 }
 0x4cc   : > { %2478 = vmatpush.msra.mxu2 %v4279_v62  ;;  %2500 = vmatpush.msra.mxu3 %v5836_v26 }
 0x4ce   : > { %2479 = vmatpush.msra.mxu2 %v4265_v19  ;;  %2501 = vmatpush.msra.mxu3 %v5839_v0  ;;  %v2201_v4 = vpop.f32.mrf.mxu0 }
 0x4cf   : > { %2204 = vst [vmem:[#allocation2 + $0x2] sm:$0x1] %v2201_v4 }
 0x4d0   : > { %2502 = vmatpush.msra.mxu3 %v5842_v17 }
 0x4d2   : > { %v2153_v53 = vpop.f32.mrf.mxu2 }
 0x4d3   : > { %2156 = vst [vmem:[#allocation2] sm:$0x1] %v2153_v53 }
 0x4d4   : > { %v2177_v16 = vpop.f32.mrf.mxu3 }
 0x4d5   : > { %2180 = vst [vmem:[#allocation2 + $0x1] sm:$0x1] %v2177_v16 }
 0x4d6   : > { %v2273_v10 = vpop.f32.mrf.mxu0 }
 0x4d7   : > { %2276 = vst [vmem:[#allocation2 + $0x5] sm:$0x1] %v2273_v10 }
 0x4da   : > { %v2225_v24 = vpop.f32.mrf.mxu2 }
 0x4db   : > { %2228 = vst [vmem:[#allocation2 + $0x3] sm:$0x1] %v2225_v24  ;;  %v3418_v24 = vld [vmem:[%s4029_s22] sm:$0xff] }
 0x4dc   : > { %v2249_v46 = vpop.f32.mrf.mxu3 }
 0x4dd   : > { %2252 = vst [vmem:[#allocation2 + $0x4] sm:$0x1] %v2249_v46 }
 0x4ec   : > { %v1909_v26 = vpop.xlane.xlu2 %1908 }
 0x4ed   : > { %v1910_v62 = vmul.f32 0.14285715, %v1909_v26 }
 0x4ef   : > { %v1911_v19 = vadd.f32 1e-09, %v1910_v62 }
 0x4f1   : > { %3406 = vrsqrt.f32 %v1911_v19  ;;  %vm1918_vm8 = vweird.f32 %v1911_v19 }
 0x4f7   : > { %v3407_v0 = vpop.eup %3406 }
 0x4f8   : > { %v1913_v49 = vmul.f32 %v3407_v0, %v1911_v19  ;;  %vm1919_vm7 = vweird.f32 %v3407_v0 }
 0x4f9   : > { %vm1920_vm9 = vmor %vm1918_vm8, %vm1919_vm7 }
 0x4fa   : > { %v1914_v17 = vmul.f32 %v3407_v0, %v1913_v49 }
 0x4fc   : > { %v1915_v56 = vmul.f32 0.5, %v1914_v17 }
 0x4fe   : > { %v1916_v4 = vsub.f32 1.5, %v1915_v56 }
 0x500   : > { %v1917_v53 = vmul.f32 %v3407_v0, %v1916_v4 }
 0x502   : > { %v1921_v16 = vsel %vm1920_vm9, %v3407_v0, %v1917_v53 }
 0x503   : > { %v1922_v10 = vmul.f32 %v1921_v16, %v4892_v22 }
 0x505   : > { %v1923_v55 = vadd.f32 %v3418_v24, %v1922_v10 }
 0x507   : > { %2111 = vmax.xlane.f32.xlu0 %v1923_v55 }
 0x512   : > { %v2297_v46 = vpop.f32.mrf.mxu2 }
 0x513   : > { %2300 = vst [vmem:[#allocation2 + $0x6] sm:$0x1] %v2297_v46 }
 0x514   : > { %v2321_v26 = vpop.f32.mrf.mxu3 }
 0x515   : > { %2324 = vst [vmem:[#allocation2 + $0x7] sm:$0x1] %v2321_v26 }
 0x51c   : > { %v2325_v62 = vld [vmem:[#allocation2] sm:$0xff] }
 0x51d   : > { %2326 = vadd.xlane.f32.xlu1 %v2325_v62 }
 0x57a   : > { %v2112_v44 = vpop.xlane.xlu0 %2111 }
 0x57b   : > { %v2113_v56 = vsub.f32 %v1923_v55, %v2112_v44 }
 0x57d   : > { %v2114_v4 = vmul.f32 1.442695, %v2113_v56 }
 0x57f   : > { %3408 = vpow2.f32 %v2114_v4 }
 0x585   : > { %v3409_v22 = vpop.eup %3408 }
 0x590   : > { %v2327_v49 = vpop.xlane.xlu1 %2326 }
 0x591   : > { %v2328_v17 = vmul.f32 0.125, %v2327_v49 }
 0x593   : > { %v2329_v41 = vsub.f32 %v2325_v62, %v2328_v17 }
 0x595   : > { %v2330_v19 = vmul.f32 %v4888_v50, %v2329_v41 }
 0x597   : > { %v2331_v0 = vmul.f32 %v2330_v19, %v2330_v19 }
 0x599   : > { %2332 = vadd.xlane.f32.xlu2 %v2331_v0 }
 0x5a1   : > { %2116 = vadd.xlane.f32.xlu2 %v3409_v22 }
 0x60c   : > { %v2333_v53 = vpop.xlane.xlu2 %2332 }
 0x60d   : > { %v2334_v16 = vmul.f32 0.14285715, %v2333_v53 }
 0x60f   : > { %v2335_v10 = vadd.f32 1e-09, %v2334_v16 }
 0x611   : > { %3410 = vrsqrt.f32 %v2335_v10  ;;  %vm2342_vm11 = vweird.f32 %v2335_v10 }
 0x614   : > { %v2117_v24 = vpop.xlane.xlu2 %2116 }
 0x615   : > { %3412 = vrcp.f32 %v2117_v24  ;;  %v2129_v56 = vand.u32 2147483648, %v2117_v24  ;;  %v2127_v4 = vand.u32 2147483647, %v2117_v24  ;;  %vm2123_vm14 = vweird.f32 %v2117_v24 }
 0x617   : > { %v3411_v46 = vpop.eup %3410  ;;  %v2130_v54 = vor.u32 1.1754944e-38, %v2129_v56  ;;  %vm2128_vm1 = vcmp.eq.f32.partialorder %v2127_v4, 8.507059e+37  ;;  %v5891_v56 = vld [vmem:[#allocation70_spill] sm:$0xff]  ;;  %v5893_v4 = vld [vmem:[#allocation11_spill] sm:$0xff] }
 0x618   : > { %v2337_v26 = vmul.f32 %v3411_v46, %v2335_v10  ;;  %vm2343_vm10 = vweird.f32 %v3411_v46 }
 0x619   : > { %vm2344_vm13 = vmor %vm2342_vm11, %vm2343_vm10 }
 0x61a   : > { %v2338_v6 = vmul.f32 %v3411_v46, %v2337_v26 }
 0x61b   : > { %v3413_v49 = vpop.eup %3412 }
 0x61c   : > { %v2339_v44 = vmul.f32 0.5, %v2338_v6  ;;  %v2119_v62 = vmul.f32 %v3413_v49, %v2117_v24  ;;  %vm2124_vm12 = vweird.f32 %v3413_v49  ;;  %v5870_v24 = vld [vmem:[#allocation100_spill] sm:$0xff] }
 0x61d   : > { %vm2125_vm15 = vmor %vm2123_vm14, %vm2124_vm12 }
 0x61e   : > { %v2340_v17 = vsub.f32 1.5, %v2339_v44  ;;  %v2120_v50 = vsub.f32 1.0, %v2119_v62 }
 0x620   : > { %v2121_v19 = vmul.f32 %v3413_v49, %v2120_v50  ;;  %v2341_v0 = vmul.f32 %v3411_v46, %v2340_v17  ;;  %v5889_v17 = vld [vmem:[#allocation72_spill] sm:$0xff]  ;;  %v5890_v50 = vld [vmem:[#allocation38_spill] sm:$0xff] }
 0x622   : > { %v2122_v53 = vadd.f32 %v3413_v49, %v2121_v19  ;;  %v2345_v16 = vsel %vm2344_vm13, %v3411_v46, %v2341_v0  ;;  %v5883_v46 = vld [vmem:[#allocation15_spill] sm:$0xff]  ;;  %v5892_v19 = vld [vmem:[#allocation36_spill] sm:$0xff] }
 0x623   : > { %v2346_v57 = vmul.f32 %v2345_v16, %v2329_v41  ;;  %v5871_v41 = vld [vmem:[#allocation97_spill] sm:$0xff]  ;;  %v5894_v0 = vld [vmem:[#allocation68_spill] sm:$0xff]  ;;  %v5896_v16 = vld [vmem:[#allocation67_spill] sm:$0xff] }
 0x624   : > { %v2126_v26 = vsel %vm2125_vm15, %v3413_v49, %v2122_v53  ;;  %v5886_v49 = vld [vmem:[#allocation14_spill] sm:$0xff] }
 0x625   : > { %v2131_v6 = vsel %vm2128_vm1, %v2130_v54, %v2126_v26  ;;  %v5006_v12 = vadd.f32 %v2346_v57, %v1923_v55  ;;  %v5872_v54 = vld [vmem:[#allocation94_spill] sm:$0xff]  ;;  %v5873_v55 = vld [vmem:[#allocation91_spill] sm:$0xff]  ;;  %v5897_v26 = vld [vmem:[#allocation32_spill] sm:$0xff] }
 0x626   : > { %v5008_v44 = vmul.f32 %v3409_v22, %v2131_v6  ;;  %v5895_v53 = vld [vmem:[#allocation34_spill] sm:$0xff] }
 0x627   : > { %2534 = vmax.xlane.f32.xlu1 %v5006_v12  ;;  %v5899_v6 = vld [vmem:[#allocation30_spill] sm:$0xff] }
 0x628   : > { %2364 = vmatmul.f32.vlgmr.msra.gmra.mxu0 %v5008_v44  ;;  %v2393_v10 = vrot.slane %v5008_v44, 2  ;;  %v2416_v62 = vrot.slane %v5008_v44, 3  ;;  %v2370_v57 = vrot.slane %v5008_v44, 1  ;;  %v2462_v22 = vrot.slane %v5008_v44, 5 }
 0x629   : > { %2441 = vmatpush.msra.mxu0 %v5870_v24 }
 0x62a   : > { %2411 = vmatmul.f32.vlgmr.msrb.gmra.mxu2 %v2393_v10  ;;  %2434 = vmatmul.f32.vlgmr.msrb.gmra.mxu3 %v2416_v62  ;;  %v5900_v10 = vld [vmem:[#allocation107_spill] sm:$0xff]  ;;  %v5919_v62 = vld [vmem:[#allocation37_spill] sm:$0xff] }
 0x62b   : > { %2442 = vmatpush.msra.mxu0 %v5871_v41  ;;  %2556 = vmatpush.msrb.mxu2 %v3956_v30  ;;  %v5874_v30 = vld [vmem:[#allocation88_spill] sm:$0xff] }
 0x62c   : > { %2580 = vmatpush.msrb.mxu3 %v5822_v40  ;;  %v2485_v40 = vrot.slane %v5008_v44, 6 }
 0x62d   : > { %2443 = vmatpush.msra.mxu0 %v5872_v54  ;;  %2557 = vmatpush.msrb.mxu2 %v3944_v15  ;;  %v5875_v15 = vld [vmem:[#allocation85_spill] sm:$0xff] }
 0x62e   : > { %2581 = vmatpush.msrb.mxu3 %v5823_v1  ;;  %v5877_v1 = vld [vmem:[#allocation81_spill] sm:$0xff] }
 0x62f   : > { %2444 = vmatpush.msra.mxu0 %v5873_v55  ;;  %2558 = vmatpush.msrb.mxu2 %v3932_v8  ;;  %v5876_v8 = vld [vmem:[#allocation83_spill] sm:$0xff] }
 0x630   : > { %2582 = vmatpush.msrb.mxu3 %v5825_v33  ;;  %2388 = vmatmul.f32.vlgmr.msrb.gmra.mxu0 %v2370_v57  ;;  %v5879_v33 = vld [vmem:[#allocation46_spill] sm:$0xff]  ;;  %v5926_v57 = vld [vmem:[#allocation25_spill] sm:$0xff] }
 0x631   : > { %2445 = vmatpush.msra.mxu0 %v5874_v30  ;;  %2559 = vmatpush.msrb.mxu2 %v3922_v3  ;;  %v5878_v3 = vld [vmem:[#allocation79_spill] sm:$0xff] }
 0x632   : > { %2583 = vmatpush.msrb.mxu3 %v5826_v45  ;;  %2480 = vmatmul.f32.vlgmr.msra.gmra.mxu2 %v2462_v22  ;;  %v5880_v45 = vld [vmem:[#allocation16_spill] sm:$0xff]  ;;  %v5928_v22 = vld [vmem:[#allocation123_spill] sm:$0xff] }
 0x633   : > { %2446 = vmatpush.msra.mxu0 %v5875_v15  ;;  %2503 = vmatmul.f32.vlgmr.msra.gmra.mxu3 %v2485_v40  ;;  %v5930_v40 = vld [vmem:[#allocation117_spill] sm:$0xff] }
 0x634   : > { %2560 = vmatpush.msrb.mxu2 %v3912_v63  ;;  %2584 = vmatpush.msrb.mxu3 %v5828_v35  ;;  %v5881_v63 = vld [vmem:[#allocation77_spill] sm:$0xff]  ;;  %v5882_v35 = vld [vmem:[#allocation44_spill] sm:$0xff] }
 0x635   : > { %2447 = vmatpush.msra.mxu0 %v5876_v8 }
 0x636   : > { %2561 = vmatpush.msrb.mxu2 %v3904_v58  ;;  %2585 = vmatpush.msrb.mxu3 %v5829_v51  ;;  %v5884_v58 = vld [vmem:[#allocation75_spill] sm:$0xff]  ;;  %v5885_v51 = vld [vmem:[#allocation42_spill] sm:$0xff] }
 0x637   : > { %2448 = vmatpush.msra.mxu0 %v5877_v1 }
 0x638   : > { %2562 = vmatpush.msrb.mxu2 %v5722_v47  ;;  %2586 = vmatpush.msrb.mxu3 %v5831_v59  ;;  %v5887_v47 = vld [vmem:[#allocation73_spill] sm:$0xff]  ;;  %v5888_v59 = vld [vmem:[#allocation40_spill] sm:$0xff] }
 0x639   : > { %2449 = vmatpush.msra.mxu0 %v5878_v3 }
 0x63a   : > { %2563 = vmatpush.msrb.mxu2 %v5879_v33  ;;  %2587 = vmatpush.msrb.mxu3 %v5880_v45  ;;  %v5937_v45 = vld [vmem:[#allocation109_spill] sm:$0xff] }
 0x63b   : > { %2450 = vmatpush.msra.mxu0 %v5881_v63 }
 0x63c   : > { %2564 = vmatpush.msrb.mxu2 %v5882_v35  ;;  %2588 = vmatpush.msrb.mxu3 %v5883_v46  ;;  %v5938_v35 = vld [vmem:[#allocation106_spill] sm:$0xff] }
 0x63d   : > { %2451 = vmatpush.msra.mxu0 %v5884_v58 }
 0x63e   : > { %2565 = vmatpush.msrb.mxu2 %v5885_v51  ;;  %2589 = vmatpush.msrb.mxu3 %v5886_v49 }
 0x63f   : > { %2452 = vmatpush.msra.mxu0 %v5887_v47 }
 0x640   : > { %2566 = vmatpush.msrb.mxu2 %v5888_v59  ;;  %2590 = vmatpush.msrb.mxu3 %v5837_v52  ;;  %v2439_v52 = vrot.slane %v5008_v44, 4 }
 0x641   : > { %2453 = vmatpush.msra.mxu0 %v5889_v17 }
 0x642   : > { %2567 = vmatpush.msrb.mxu2 %v5890_v50  ;;  %2591 = vmatpush.msrb.mxu3 %v5838_v13  ;;  %v5898_v13 = vld [vmem:[#allocation110_spill] sm:$0xff] }
 0x643   : > { %2454 = vmatpush.msra.mxu0 %v5891_v56 }
 0x644   : > { %2568 = vmatpush.msrb.mxu2 %v5892_v19  ;;  %2592 = vmatpush.msrb.mxu3 %v5893_v4 }
 0x645   : > { %2455 = vmatpush.msra.mxu0 %v5894_v0 }
 0x646   : > { %2569 = vmatpush.msrb.mxu2 %v5895_v53  ;;  %2593 = vmatpush.msrb.mxu3 %v5841_v18  ;;  %v5901_v18 = vld [vmem:[#allocation104_spill] sm:$0xff] }
 0x647   : > { %2456 = vmatpush.msra.mxu0 %v5896_v16 }
 0x648   : > { %2570 = vmatpush.msrb.mxu2 %v5897_v26  ;;  %2594 = vmatpush.msrb.mxu3 %v5843_v39  ;;  %v5902_v39 = vld [vmem:[#allocation101_spill] sm:$0xff] }
 0x649   : > { %2457 = vmatmul.f32.vlgmr.msra.gmra.mxu0 %v2439_v52 }
 0x64a   : > { %2510 = vmatpush.msrb.mxu0 %v5898_v13  ;;  %2571 = vmatpush.msrb.mxu2 %v5899_v6 }
 0x64b   : > { %2595 = vmatpush.msrb.mxu3 %v5844_v60  ;;  %v5903_v60 = vld [vmem:[#allocation99_spill] sm:$0xff] }
 0x64c   : > { %2626 = vmatpush.msra.mxu2 %v5793_v48  ;;  %2511 = vmatpush.msrb.mxu0 %v5900_v10  ;;  %v5904_v48 = vld [vmem:[#allocation96_spill] sm:$0xff] }
 0x64d   : > { %2649 = vmatpush.msra.mxu3 %v5870_v24  ;;  %v5920_v24 = vld [vmem:[#allocation35_spill] sm:$0xff] }
 0x64e   : > { %2627 = vmatpush.msra.mxu2 %v5795_v9  ;;  %2512 = vmatpush.msrb.mxu0 %v5901_v18  ;;  %v5905_v9 = vld [vmem:[#allocation93_spill] sm:$0xff] }
 0x64f   : > { %2650 = vmatpush.msra.mxu3 %v5871_v41  ;;  %v5923_v41 = vld [vmem:[#allocation29_spill] sm:$0xff] }
 0x650   : > { %2628 = vmatpush.msra.mxu2 %v5797_v61  ;;  %2513 = vmatpush.msrb.mxu0 %v5902_v39  ;;  %v5906_v61 = vld [vmem:[#allocation90_spill] sm:$0xff] }
 0x651   : > { %2651 = vmatpush.msra.mxu3 %v5872_v54  ;;  %v5925_v54 = vld [vmem:[#allocation26_spill] sm:$0xff] }
 0x652   : > { %2629 = vmatpush.msra.mxu2 %v5798_v28  ;;  %2514 = vmatpush.msrb.mxu0 %v5903_v60  ;;  %v5907_v28 = vld [vmem:[#allocation87_spill] sm:$0xff] }
 0x653   : > { %2652 = vmatpush.msra.mxu3 %v5873_v55  ;;  %v5927_v55 = vld [vmem:[#allocation24_spill] sm:$0xff] }
 0x654   : > { %2630 = vmatpush.msra.mxu2 %v5799_v34  ;;  %2515 = vmatpush.msrb.mxu0 %v5904_v48  ;;  %v5908_v34 = vld [vmem:[#allocation84_spill] sm:$0xff] }
 0x655   : > { %2653 = vmatpush.msra.mxu3 %v5874_v30  ;;  %v5929_v30 = vld [vmem:[#allocation118_spill] sm:$0xff] }
 0x656   : > { %2631 = vmatpush.msra.mxu2 %v5800_v23  ;;  %2516 = vmatpush.msrb.mxu0 %v5905_v9  ;;  %v5909_v23 = vld [vmem:[#allocation82_spill] sm:$0xff] }
 0x657   : > { %2654 = vmatpush.msra.mxu3 %v5875_v15  ;;  %v5931_v15 = vld [vmem:[#allocation116_spill] sm:$0xff] }
 0x658   : > { %2632 = vmatpush.msra.mxu2 %v5801_v14  ;;  %2517 = vmatpush.msrb.mxu0 %v5906_v61  ;;  %v5910_v14 = vld [vmem:[#allocation80_spill] sm:$0xff] }
 0x659   : > { %2655 = vmatpush.msra.mxu3 %v5876_v8  ;;  %v5932_v8 = vld [vmem:[#allocation115_spill] sm:$0xff] }
 0x65a   : > { %2633 = vmatpush.msra.mxu2 %v5802_v31  ;;  %2518 = vmatpush.msrb.mxu0 %v5907_v28  ;;  %v5911_v31 = vld [vmem:[#allocation78_spill] sm:$0xff] }
 0x65b   : > { %2656 = vmatpush.msra.mxu3 %v5877_v1 }
 0x65c   : > { %2634 = vmatpush.msra.mxu2 %v5803_v38  ;;  %2519 = vmatpush.msrb.mxu0 %v5908_v34  ;;  %v5912_v38 = vld [vmem:[#allocation76_spill] sm:$0xff] }
 0x65d   : > { %2657 = vmatpush.msra.mxu3 %v5878_v3  ;;  %v5933_v3 = vld [vmem:[#allocation114_spill] sm:$0xff] }
 0x65e   : > { %2635 = vmatpush.msra.mxu2 %v5804_v7  ;;  %2520 = vmatpush.msrb.mxu0 %v5909_v23  ;;  %v5913_v7 = vld [vmem:[#allocation74_spill] sm:$0xff] }
 0x65f   : > { %2658 = vmatpush.msra.mxu3 %v5881_v63 }
 0x660   : > { %2636 = vmatpush.msra.mxu2 %v5805_v29  ;;  %2521 = vmatpush.msrb.mxu0 %v5910_v14  ;;  %v2508_v29 = vrot.slane %v5008_v44, 7  ;;  %v5918_v44 = vld [vmem:[#allocation39_spill] sm:$0xff] }
 0x661   : > { %2659 = vmatpush.msra.mxu3 %v5884_v58  ;;  %v5939_v58 = vld [vmem:[#allocation103_spill] sm:$0xff] }
 0x662   : > { %2637 = vmatpush.msra.mxu2 %v5806_v27  ;;  %2522 = vmatpush.msrb.mxu0 %v5911_v31  ;;  %v5915_v27 = vld [vmem:[#allocation45_spill] sm:$0xff] }
 0x663   : > { %2660 = vmatpush.msra.mxu3 %v5887_v47 }
 0x664   : > { %2638 = vmatpush.msra.mxu2 %v5807_v43  ;;  %2523 = vmatpush.msrb.mxu0 %v5912_v38  ;;  %v5914_v43 = vld [vmem:[#allocation47_spill] sm:$0xff] }
 0x665   : > { %2661 = vmatpush.msra.mxu3 %v5889_v17 }
 0x666   : > { %2639 = vmatpush.msra.mxu2 %v5808_v32  ;;  %2524 = vmatpush.msrb.mxu0 %v5913_v7  ;;  %v5917_v32 = vld [vmem:[#allocation41_spill] sm:$0xff] }
 0x667   : > { %2662 = vmatpush.msra.mxu3 %v5891_v56 }
 0x668   : > { %2640 = vmatpush.msra.mxu2 %v5809_v2  ;;  %2525 = vmatpush.msrb.mxu0 %v5783_v36  ;;  %v5916_v2 = vld [vmem:[#allocation43_spill] sm:$0xff] }
 0x669   : > { %2663 = vmatpush.msra.mxu3 %v5894_v0  ;;  %2526 = vmatmul.f32.vlgmr.msrb.gmra.mxu0 %v2508_v29 }
 0x66a   : > { %2641 = vmatpush.msra.mxu2 %v5810_v25  ;;  %2603 = vmatpush.msra.mxu0 %v5738_v37  ;;  %v5921_v25 = vld [vmem:[#allocation33_spill] sm:$0xff]  ;;  %v5922_v37 = vld [vmem:[#allocation31_spill] sm:$0xff] }
 0x66b   : > { %2664 = vmatpush.msra.mxu3 %v5896_v16 }
 0x66c   : > { %2604 = vmatpush.msra.mxu0 %v5741_v5  ;;  %v5924_v5 = vld [vmem:[#allocation27_spill] sm:$0xff] }
 0x66e   : > { %2605 = vmatpush.msra.mxu0 %v5914_v43 }
 0x670   : > { %2606 = vmatpush.msra.mxu0 %v5915_v27 }
 0x672   : > { %2607 = vmatpush.msra.mxu0 %v5916_v2 }
 0x674   : > { %2608 = vmatpush.msra.mxu0 %v5917_v32 }
 0x676   : > { %2609 = vmatpush.msra.mxu0 %v5918_v44  ;;  %v5940_v44 = vld [vmem:[#allocation105_spill] sm:$0xff] }
 0x678   : > { %2610 = vmatpush.msra.mxu0 %v5919_v62  ;;  %v5941_v62 = vld [vmem:[#allocation102_spill] sm:$0xff] }
 0x67a   : > { %2611 = vmatpush.msra.mxu0 %v5920_v24  ;;  %v5942_v24 = vld [vmem:[#allocation98_spill] sm:$0xff] }
 0x67c   : > { %2612 = vmatpush.msra.mxu0 %v5921_v25 }
 0x67e   : > { %2613 = vmatpush.msra.mxu0 %v5922_v37  ;;  %v5943_v37 = vld [vmem:[#allocation95_spill] sm:$0xff] }
 0x680   : > { %2614 = vmatpush.msra.mxu0 %v5923_v41 }
 0x682   : > { %2615 = vmatpush.msra.mxu0 %v5924_v5 }
 0x684   : > { %2616 = vmatpush.msra.mxu0 %v5925_v54  ;;  %v5944_v54 = vld [vmem:[#allocation92_spill] sm:$0xff] }
 0x686   : > { %2617 = vmatpush.msra.mxu0 %v5926_v57  ;;  %v5945_v57 = vld [vmem:[#allocation89_spill] sm:$0xff] }
 0x688   : > { %2618 = vmatpush.msra.mxu0 %v5927_v55  ;;  %v5949_v55 = vld [vmem:[#allocation130_spill] sm:$0xff] }
 0x68a   : > { %2672 = vmatpush.msrb.mxu0 %v5928_v22  ;;  %v5955_v22 = vld [vmem:[#allocation124_spill] sm:$0xff] }
 0x68c   : > { %2673 = vmatpush.msrb.mxu0 %v5857_v42  ;;  %v5934_v42 = vld [vmem:[#allocation113_spill] sm:$0xff] }
 0x68e   : > { %2674 = vmatpush.msrb.mxu0 %v5858_v21 }
 0x690   : > { %2675 = vmatpush.msrb.mxu0 %v5859_v20  ;;  %v5935_v20 = vld [vmem:[#allocation112_spill] sm:$0xff] }
 0x692   : > { %2676 = vmatpush.msrb.mxu0 %v5860_v11  ;;  %v5936_v11 = vld [vmem:[#allocation111_spill] sm:$0xff] }
 0x694   : > { %2677 = vmatpush.msrb.mxu0 %v5929_v30 }
 0x696   : > { %2678 = vmatpush.msrb.mxu0 %v5930_v40  ;;  %v2742_v40 = vld [vmem:[%s5276_s5 + $0x8] sm:$0xff] }
 0x698   : > { %2679 = vmatpush.msrb.mxu0 %v5931_v15  ;;  %v2741_v15 = vld [vmem:[%s5276_s5] sm:$0xff] }
 0x69a   : > { %2680 = vmatpush.msrb.mxu0 %v5932_v8  ;;  %v2535_v1 = vpop.xlane.xlu1 %2534 }
 0x69b   : > { %v2536_v33 = vsub.f32 %v5006_v12, %v2535_v1 }
 0x69c   : > { %2681 = vmatpush.msrb.mxu0 %v5933_v3 }
 0x69d   : > { %v2537_v21 = vmul.f32 1.442695, %v2536_v33 }
 0x69e   : > { %2682 = vmatpush.msrb.mxu0 %v5934_v42 }
 0x69f   : > { %3414 = vpow2.f32 %v2537_v21  ;;  %v5956_v21 = vld [vmem:[#allocation48_spill] sm:$0xff] }
 0x6a0   : > { %2683 = vmatpush.msrb.mxu0 %v5935_v20 }
 0x6a2   : > { %2684 = vmatpush.msrb.mxu0 %v5936_v11 }
 0x6a4   : > { %2685 = vmatpush.msrb.mxu0 %v5937_v45 }
 0x6a5   : > { %v3415_v63 = vpop.eup %3414  ;;  %v2365_v46 = vpop.f32.mrf.mxu0 }
 0x6a6   : > { %2686 = vmatpush.msrb.mxu0 %v5938_v35  ;;  %2368 = vst.msk [vmem:[#allocation3] sm:$0x1] %vm1944_vm5, %v2365_v46  ;;  %2539 = vadd.xlane.f32.xlu0 %v3415_v63 }
 0x6a8   : > { %2687 = vmatpush.msrb.mxu0 %v5939_v58 }
 0x6ad   : > { %v2389_v12 = vpop.f32.mrf.mxu0  ;;  %v2412_v51 = vpop.f32.mrf.mxu2 }
 0x6ae   : > { %2392 = vst.msk [vmem:[#allocation3 + $0x1] sm:$0x1] %vm1944_vm5, %v2389_v12  ;;  %v2435_v49 = vpop.f32.mrf.mxu3 }
 0x6af   : > { %2415 = vst.msk [vmem:[#allocation3 + $0x2] sm:$0x1] %vm1944_vm5, %v2412_v51 }
 0x6b0   : > { %2438 = vst.msk [vmem:[#allocation3 + $0x3] sm:$0x1] %vm1944_vm5, %v2435_v49 }
 0x6b5   : > { %v2481_v47 = vpop.f32.mrf.mxu2 }
 0x6b6   : > { %2484 = vst.msk [vmem:[#allocation3 + $0x5] sm:$0x1] %vm1944_vm5, %v2481_v47  ;;  %v2504_v59 = vpop.f32.mrf.mxu3 }
 0x6b7   : > { %2507 = vst.msk [vmem:[#allocation3 + $0x6] sm:$0x1] %vm1944_vm5, %v2504_v59 }
 0x6c6   : > { %v2458_v17 = vpop.f32.mrf.mxu0 }
 0x6c7   : > { %2461 = vst.msk [vmem:[#allocation3 + $0x4] sm:$0x1] %vm1944_vm5, %v2458_v17 }
 0x6e6   : > { %v2527_v50 = vpop.f32.mrf.mxu0 }
 0x6e7   : > { %2530 = vst.msk [vmem:[#allocation3 + $0x7] sm:$0x1] %vm1944_vm5, %v2527_v50 }
 0x719   : > { %v2540_v56 = vpop.xlane.xlu0 %2539 }
 0x71a   : > { %3416 = vrcp.f32 %v2540_v56  ;;  %v2552_v53 = vand.u32 2147483648, %v2540_v56  ;;  %v2550_v52 = vand.u32 2147483647, %v2540_v56  ;;  %vm2546_vm3 = vweird.f32 %v2540_v56 }
 0x71c   : > { %v2553_v6 = vor.u32 1.1754944e-38, %v2552_v53  ;;  %vm2551_vm6 = vcmp.eq.f32.partialorder %v2550_v52, 8.507059e+37 }
 0x720   : > { %v3417_v19 = vpop.eup %3416 }
 0x721   : > { %v2542_v4 = vmul.f32 %v3417_v19, %v2540_v56  ;;  %vm2547_vm2 = vweird.f32 %v3417_v19 }
 0x722   : > { %vm2548_vm4 = vmor %vm2546_vm3, %vm2547_vm2 }
 0x723   : > { %v2543_v0 = vsub.f32 1.0, %v2542_v4 }
 0x725   : > { %v2544_v16 = vmul.f32 %v3417_v19, %v2543_v0 }
 0x727   : > { %v2545_v26 = vadd.f32 %v3417_v19, %v2544_v16 }
 0x729   : > { %v2549_v29 = vsel %vm2548_vm4, %v3417_v19, %v2545_v26 }
 0x72a   : > { %v2554_v43 = vsel %vm2551_vm6, %v2553_v6, %v2549_v29 }
 0x72b   : > { %v2555_v27 = vmul.f32 %v3415_v63, %v2554_v43 }
 0x72d   : > { %2572 = vmatmul.f32.vlgmr.msrb.gmra.mxu2 %v2555_v27  ;;  %v2578_v2 = vrot.slane %v2555_v27, 1  ;;  %v2601_v32 = vrot.slane %v2555_v27, 2  ;;  %2773 = vst [vmem:[%s5162_s20] sm:$0xff] %v2555_v27  ;;  %v2624_v25 = vrot.slane %v2555_v27, 3  ;;  %v2647_v41 = vrot.slane %v2555_v27, 4 }
 0x72e   : > { %2695 = vmatpush.msrb.mxu2 %v5940_v44  ;;  %v2670_v5 = vrot.slane %v2555_v27, 5 }
 0x72f   : > { %2596 = vmatmul.f32.vlgmr.msrb.gmra.mxu3 %v2578_v2  ;;  %2619 = vmatmul.f32.vlgmr.msra.gmra.mxu0 %v2601_v32 }
 0x730   : > { %2696 = vmatpush.msrb.mxu2 %v5941_v62  ;;  %2718 = vmatpush.msrb.mxu3 %v5898_v13  ;;  %v5946_v13 = vld [vmem:[#allocation86_spill] sm:$0xff] }
 0x732   : > { %2697 = vmatpush.msrb.mxu2 %v5942_v24  ;;  %2719 = vmatpush.msrb.mxu3 %v5900_v10  ;;  %v5947_v10 = vld [vmem:[#allocation132_spill] sm:$0xff] }
 0x734   : > { %2698 = vmatpush.msrb.mxu2 %v5943_v37  ;;  %2720 = vmatpush.msrb.mxu3 %v5901_v18  ;;  %v5948_v18 = vld [vmem:[#allocation131_spill] sm:$0xff] }
 0x735   : > { %2642 = vmatmul.f32.vlgmr.msra.gmra.mxu2 %v2624_v25 }
 0x736   : > { %2699 = vmatpush.msrb.mxu2 %v5944_v54  ;;  %2721 = vmatpush.msrb.mxu3 %v5902_v39  ;;  %v5950_v39 = vld [vmem:[#allocation129_spill] sm:$0xff] }
 0x737   : > { %2665 = vmatmul.f32.vlgmr.msra.gmra.mxu3 %v2647_v41  ;;  %2688 = vmatmul.f32.vlgmr.msrb.gmra.mxu0 %v2670_v5 }
 0x738   : > { %2700 = vmatpush.msrb.mxu2 %v5945_v57  ;;  %2722 = vmatpush.msrb.mxu3 %v5903_v60  ;;  %v5951_v60 = vld [vmem:[#allocation128_spill] sm:$0xff] }
 0x73a   : > { %2701 = vmatpush.msrb.mxu2 %v5946_v13  ;;  %2723 = vmatpush.msrb.mxu3 %v5904_v48  ;;  %v5952_v48 = vld [vmem:[#allocation127_spill] sm:$0xff] }
 0x73c   : > { %2702 = vmatpush.msrb.mxu2 %v5947_v10  ;;  %2724 = vmatpush.msrb.mxu3 %v5905_v9  ;;  %v5953_v9 = vld [vmem:[#allocation126_spill] sm:$0xff] }
 0x73e   : > { %2703 = vmatpush.msrb.mxu2 %v5948_v18  ;;  %2725 = vmatpush.msrb.mxu3 %v5906_v61  ;;  %v5954_v61 = vld [vmem:[#allocation125_spill] sm:$0xff] }
 0x740   : > { %2704 = vmatpush.msrb.mxu2 %v5949_v55  ;;  %2726 = vmatpush.msrb.mxu3 %v5907_v28  ;;  %v2693_v28 = vrot.slane %v2555_v27, 6 }
 0x742   : > { %2705 = vmatpush.msrb.mxu2 %v5950_v39  ;;  %2727 = vmatpush.msrb.mxu3 %v5908_v34  ;;  %v2716_v34 = vrot.slane %v2555_v27, 7 }
 0x744   : > { %2706 = vmatpush.msrb.mxu2 %v5951_v60  ;;  %2728 = vmatpush.msrb.mxu3 %v5909_v23  ;;  %v2531_v23 = vld [vmem:[#allocation3] sm:$0xff] }
 0x745   : > { %v2532_v42 = vmul.f32 0.125, %v2531_v23 }
 0x746   : > { %2707 = vmatpush.msrb.mxu2 %v5952_v48  ;;  %2729 = vmatpush.msrb.mxu3 %v5910_v14 }
 0x747   : > { %v2533_v20 = vadd.f32 %v2532_v42, %v5956_v21 }
 0x748   : > { %2708 = vmatpush.msrb.mxu2 %v5953_v9  ;;  %2730 = vmatpush.msrb.mxu3 %v5911_v31 }
 0x74a   : > { %2709 = vmatpush.msrb.mxu2 %v5954_v61  ;;  %2731 = vmatpush.msrb.mxu3 %v5912_v38  ;;  %v2744_v38 = vld [vmem:[%s5276_s5 + $0x18] sm:$0xff] }
 0x74b   : > { %2764 = vmatpush.msra.mxu0 %v2744_v38 }
 0x74c   : > { %2710 = vmatpush.msrb.mxu2 %v5955_v22  ;;  %2732 = vmatpush.msrb.mxu3 %v5913_v7  ;;  %v2743_v7 = vld [vmem:[%s5276_s5 + $0x10] sm:$0xff] }
 0x74d   : > { %2711 = vmatmul.f32.vlgmr.msrb.gmra.mxu2 %v2693_v28  ;;  %2765 = vmatpush.msra.mxu0 %v2743_v7 }
 0x74e   : > { %2733 = vmatpush.msrb.mxu3 %v5783_v36 }
 0x74f   : > { %2734 = vmatmul.f32.vlgmr.msrb.gmra.mxu3 %v2716_v34  ;;  %2766 = vmatpush.msra.mxu0 %v2742_v40 }
 0x751   : > { %2767 = vmatpush.msra.mxu0 %v2741_v15 }
 0x7ac   : > { %v2620_v14 = vpop.f32.mrf.mxu0 }
 0x7ad   : > { %2623 = vst.msk [vmem:[#allocation3 + $0x2] sm:$0x1] %vm1944_vm5, %v2620_v14 }
 0x7b0   : > { %v2573_v30 = vpop.f32.mrf.mxu2 }
 0x7b1   : > { %2576 = vst.msk [vmem:[#allocation3] sm:$0x1] %vm1944_vm5, %v2573_v30 }
 0x7b2   : > { %v2597_v31 = vpop.f32.mrf.mxu3 }
 0x7b3   : > { %2600 = vst.msk [vmem:[#allocation3 + $0x1] sm:$0x1] %vm1944_vm5, %v2597_v31 }
 0x7b4   : > { %v2689_v36 = vpop.f32.mrf.mxu0 }
 0x7b5   : > { %2692 = vst.msk [vmem:[#allocation3 + $0x5] sm:$0x1] %vm1944_vm5, %v2689_v36 }
 0x7b8   : > { %v2643_v8 = vpop.f32.mrf.mxu2 }
 0x7b9   : > { %2646 = vst.msk [vmem:[#allocation3 + $0x3] sm:$0x1] %vm1944_vm5, %v2643_v8 }
 0x7ba   : > { %v2666_v1 = vpop.f32.mrf.mxu3 }
 0x7bb   : > { %2669 = vst.msk [vmem:[#allocation3 + $0x4] sm:$0x1] %vm1944_vm5, %v2666_v1 }
 0x7d0   : > { %v2712_v3 = vpop.f32.mrf.mxu2 }
 0x7d1   : > { %2715 = vst.msk [vmem:[#allocation3 + $0x6] sm:$0x1] %vm1944_vm5, %v2712_v3 }
 0x7d2   : > { %v2735_v33 = vpop.f32.mrf.mxu3 }
 0x7d3   : > { %2738 = vst.msk [vmem:[#allocation3 + $0x7] sm:$0x1] %vm1944_vm5, %v2735_v33 }
 0x7da   : > { %v2739_v11 = vld [vmem:[#allocation3] sm:$0xff] }
 0x7db   : > { %v2740_v45 = vadd.f32 %v2739_v11, %v2533_v20 }
 0x7dd   : > { %3337 = vmatmul.msk.f32.vlgmr.msra.gmra.mxu0 %vm361_vm0, %v2740_v45 }
 0x7de   : > { %3446 = shalt.err (!%p3443_p4)
}
 0x7df   : > { %3357 = dma.vmem_to_hbm [thread:$0]  (%p3599_p5), %s2807_s25, 128, %s2809_s26, %s2780_s10   ;;  %v3401_v63 = vld [vmem:[%s5277_s6] ss:$0 sm:$0xff] }
 0x7e0   : > { %s2790_s23 = scalar_lea.hbm %s5278_s7, %s3340_s21  ;;  %s5957_s0 = sshll.u32 %s5157_s13, 3 }
 0x7e1   : > { %s329_s1 = scalar_lea.vmem [#allocation4], %s5957_s0  ;;  %s2794_s18 = sshll.u32 %s2790_s23, 4  ;;  %s2795_s18 = int_to_ptr.hbm [resolvable:$true] %s2794_s18 }
 0x7e2   : > { %s2792_s12 = sshll.u32 %s329_s1, 4  ;;  %s2775_s19 = scalar_lea.sflag [#allocation5], %s5157_s13  ;;  %s2793_s12 = int_to_ptr.vmem [resolvable:$true] %s2792_s12 }
 0x7e3   : > { %s3461_s25 = sshra.s32 %s2795_s18, 4  ;;  %s3467_s9 = scalar_lea.hbm %s5278_s7, 16  ;;  %s3462_s25 = int_to_ptr.hbm [resolvable:$true] %s3461_s25 }
 0x7e4   : > { %s3463_s26 = scalar_lea.hbm %s3462_s25, 8  ;;  %p3468_p10 = scmp.lt.s32.totalorder %s3462_s25, %s5278_s7 }
 0x7e5   : > { %p3464_p7 = scmp.ne.s32.totalorder %s3462_s25, %s3463_s26  ;;  %p3469_p11 = scmp.lt.s32.totalorder %s3467_s9, %s3463_s26 }
 0x7e7   : > { %p3465_p8 = pnand %p3464_p7, %p3599_p5  ;;  %p3470_p12 = por %p3469_p11, %p3468_p10 }
 0x7e9   : > { %p3466_p9 = pneg %p3465_p8 }
 0x7eb   : > { %p3471_p13 = pnand %p3470_p12, %p3466_p9 }
 0x85a   : > { %v2769_v35 = vpop.f32.mrf.mxu0 }
 0x85b   : > { %v2770_v46 = vadd.f32 %v3401_v63, %v2769_v35 }
 0x85d   : > { %2772 = vst [vmem:[%s329_s1] sm:$0xff] %v2770_v46 }
 0x85e   : > { %3474 = shalt.err (!%p3471_p13)
}
 0x85f   : > { %3356 = dma.vmem_to_hbm [thread:$0]  (%p3599_p5), %s2793_s12, 128, %s2795_s18, %s2775_s19  }
 0x860 PF: > { %p3367_p0 = scmp.ge.s32.totalorder %s3513_s30, 2  ;;  %s2820_s13 = sand.u32 1, %s3501_s27  }
 0x861   : > { %s2821_s23 = scalar_lea.sflag [#allocation5], %s2820_s13 }
 0x862   : > { %p3361_p1 = pnand %p3367_p0, %p3603_p6 }
 0x864   : > { %p3362_p2 = pneg %p3361_p1 }
 0x866   : > { %3492 = dma.done.wait (%p3362_p2), %s2821_s23, 128  }
 0x867   : > { %3494 = vsyncadd (%p3362_p2), %s2821_s23, 4294967168  ;;  %s2831_s17 = scalar_lea.sflag [#allocation7], %s2820_s13 }
 0x868   : > { %3496 = dma.done.wait (%p3362_p2), %s2831_s17, 128  }
 0x869   : > { %3498 = vsyncadd (%p3362_p2), %s2831_s17, 4294967168  ;;  %p22_p5 = scmp.ge.s32.totalorder %s3586_s11, 4   ;;  %s5958_s27 = smov %s3505_s28 }
 0x86a   : > { %s5959_s28 = smov %s3509_s29  ;;  %s5960_s29 = smov %s3597_s14 }
 0x86b   : > { %s5961_s30 = smov %s3586_s11  ;;  %24 = sbr.rel (!%p22_p5) target bundleno = 8 (0x8), region = 106 }
 0x870   :  { %2837 = vsyncpa [#allocation5], 1 }
 0x871   :  { %2839 = vsyncpa [#allocation5 + $0x1], 1 }
 0x872   :  { %2840 = vsyncpa [#allocation7], 1 }
 0x873   :  { %2842 = vsyncpa [#allocation7 + $0x1], 1 }

// kernel: tpu_custom_call.1
= control target key start
LH: loop header
LB: loop body
LE: loop exit
PB: predicated region body
PF: predicated region fallthrough
CT: control target
= control target key end

     0   :  { %s5271_s0 = inlined_call_operand.vmem [shape: f32[16,32], index: 0, kind: input, shape index: {}]   ;;  %s5272_s1 = inlined_call_operand.vmem [shape: f32[2048,32], index: 1, kind: input, shape index: {}]   ;;  %s5273_s2 = inlined_call_operand.vmem [shape: f32[16,128], index: 2, kind: input, shape index: {}]   ;;  %s5274_s3 = inlined_call_operand.vmem [shape: f32[32,32], index: 3, kind: input, shape index: {}]   ;;  %s5275_s4 = inlined_call_operand.vmem [shape: f32[32,32], index: 4, kind: input, shape index: {}]   ;;  %s5276_s5 = inlined_call_operand.vmem [shape: f32[32,128], index: 5, kind: input, shape index: {}]   ;;  %s5277_s6 = inlined_call_operand.vmem [shape: f32[1,128], index: 6, kind: input, shape index: {}]   ;;  %s5278_s7 = inlined_call_operand.hbm [shape: f32[16,128], index: 7, kind: output, shape index: {0}]   ;;  %s5279_s8 = inlined_call_operand.hbm [shape: f32[16,128], index: 8, kind: output, shape index: {1}]  }
   0x1   :  { %5593 = sst [smem:[#allocation133_spill]] %s5271_s0 }
   0x2   :  { %5594 = sst [smem:[#allocation134_spill]] %s5272_s1 }
   0x3   :  { %14 = vsyncpa [#allocation5], 0 }
   0x4   :  { %16 = vsyncpa [#allocation5 + $0x1], 0 }
   0x5   :  { %17 = vsyncpa [#allocation7], 0 }
   0x6   :  { %19 = vsyncpa [#allocation7 + $0x1], 0  ;;  %s3561_s27 = smov 0   ;;  %s3563_s28 = smov 0  }
   0x7   :  { %s3565_s29 = smov 0   ;;  %s3567_s30 = smov 0  }
   0x8 LB: > { %s3582_s9 = sadd.s32 4294967295, %s3513_s30   ;;  %s2925_s10 = sadd.s32 4294967294, %s3513_s30   ;;  %s3513_s30 = sphi %s3567_s30, %s5961_s30   ;;  %s3509_s29 = sphi %s3565_s29, %s5960_s29   ;;  %s3505_s28 = sphi %s3563_s28, %s5959_s28   ;;  %s3501_s27 = sphi %s3561_s27, %s5958_s27  }
   0x9   : > { %s3586_s11 = sadd.s32 1, %s3513_s30   ;;  %s194_s12 = sadd.s32 1, %s3509_s29 }
   0xa   : > { %s191_s13 = ssub.s32 %s3513_s30, %s3586_s11  ;;  %p204_p0 = scmp.ne.s32.totalorder %s3509_s29, %s3505_s28 }
   0xb   : > { %p192_p1 = scmp.eq.s32.totalorder %s191_s13, 0  ;;  %p205_p2 = scmp.eq.s32.totalorder %s3582_s9, 1 }
   0xc   : > { %p210_p3 = scmp.ne.s32.totalorder %s3505_s28, %s3501_s27  ;;  %p211_p4 = scmp.eq.s32.totalorder %s2925_s10, 1 }
   0xd   : > { %s3597_s14 = scalar_select %p192_p1, %s3509_s29, %s194_s12  }
   0xe   : > { %p3599_p5 = por %p205_p2, %p204_p0  ;;  %p3603_p6 = por %p211_p4, %p210_p3 }
   0xf   : > { %p2928_p7 = scmp.ge.s32.totalorder %s3513_s30, 1  ;;  %p290_p8 = scmp.lt.s32.totalorder %s3513_s30, 3 }
  0x11   : > { %p291_p9 = pnand %p2928_p7, %p290_p8 }
  0x13   : > { %294 = sbr.rel (%p291_p9) target bundleno = 2144 (0x860), region = 48 }
  0x18   : > { %v3612_v0 = vld [vmem:[%s5275_s4 + $0x18] sm:$0xff]  ;;  %v3617_v1 = vld [vmem:[%s5275_s4 + $0x10] sm:$0xff]  ;;  %s2932_s21 = sshll.u32 %s3582_s9, 7  ;;  %v3625_v2 = vld [vmem:[%s5275_s4 + $0x8] sm:$0xff]  ;;  %vm361_vm0 = vcmask 261120   ;;  %s5597_s1 = sld [smem:[#allocation134_spill]] }
  0x19   : > { %3344 = vmatpush.msra.mxu1 %v3612_v0  ;;  %p342_p10 = scmp.lt.s32.totalorder %s2932_s21, 255  ;;  %3346 = vmatpush.msra.mxu3 %v3612_v0  ;;  %v3633_v3 = vld [vmem:[%s5275_s4] sm:$0xff]  ;;  %p337_p11 = scmp.lt.s32.totalorder %s3582_s9, 1  ;;  %v360_v22 = vld [vmem:[%s5274_s3 + $0x18] sm:$0xff]  ;;  %v359_v25 = vld [vmem:[%s5274_s3 + $0x10] sm:$0xff]  ;;  %vm1944_vm5 = vcmask 253952  }
  0x1a   : > { %3345 = vmatpush.msra.mxu2 %v3612_v0  ;;  %377 = vmatpush.msra.mxu0 %v360_v22  ;;  %v358_v26 = vld [vmem:[%s5274_s3 + $0x8] sm:$0xff]  ;;  %s5600_s0 = sld [smem:[#allocation133_spill]]  ;;  %v357_v27 = vld [vmem:[%s5274_s3] sm:$0xff] }
  0x1b   : > { %3347 = vmatpush.msra.mxu1 %v3617_v1  ;;  %s5963_s21 = smov (!%p342_p10, %s2932_s21), 255  ;;  %3349 = vmatpush.msra.mxu3 %v3617_v1 }
  0x1c   : > { %3348 = vmatpush.msra.mxu2 %v3617_v1  ;;  %s2933_s26 = sshll.u32 %s5963_s21, 3  ;;  %378 = vmatpush.msra.mxu0 %v359_v25  ;;  %s3340_s21 = sshll.u32 %s3582_s9, 3 }
  0x1d   : > { %3350 = vmatpush.msra.mxu1 %v3625_v2  ;;  %3352 = vmatpush.msra.mxu3 %v3625_v2  ;;  %s3684_s17 = scalar_select %p337_p11, %s3582_s9, 1 }
  0x1e   : > { %s3641_s13 = scalar_lea.vmem %s5597_s1, %s2933_s26  ;;  %3351 = vmatpush.msra.mxu2 %v3625_v2  ;;  %379 = vmatpush.msra.mxu0 %v358_v26  ;;  %s2804_s24 = scalar_lea.hbm %s5279_s8, %s3340_s21 }
  0x1f   : > { %3353 = vmatpush.msra.mxu1 %v3633_v3  ;;  %v403_v4 = vld [vmem:[%s3641_s13 + $0x90] sm:$0xff]  ;;  %3355 = vmatpush.msra.mxu3 %v3633_v3  ;;  %v404_v5 = vld [vmem:[%s3641_s13 + $0x98] sm:$0xff]  ;;  %v405_v6 = vld [vmem:[%s3641_s13 + $0xa0] sm:$0xff]  ;;  %s2931_s20 = sshll.u32 %s3684_s17, 3  ;;  %s2808_s26 = sshll.u32 %s2804_s24, 4  ;;  %s2809_s26 = int_to_ptr.hbm [resolvable:$true] %s2808_s26 }
  0x20   : > { %2955 = vmatmul.msk.f32.vlgmr.msra.gmra.mxu1 %vm361_vm0, %v403_v4  ;;  %3354 = vmatpush.msra.mxu2 %v3633_v3  ;;  %v406_v7 = vld [vmem:[%s3641_s13 + $0xa8] sm:$0xff]  ;;  %v407_v8 = vld [vmem:[%s3641_s13 + $0xb0] sm:$0xff]  ;;  %v408_v9 = vld [vmem:[%s3641_s13 + $0xb8] sm:$0xff]  ;;  %s340_s10 = scalar_lea.vmem %s5600_s0, %s2931_s20  ;;  %s4029_s22 = scalar_lea.vmem %s5273_s2, %s2931_s20 }
  0x21   : > { %v409_v10 = vld [vmem:[%s3641_s13 + $0xc0] sm:$0xff]  ;;  %v410_v11 = vld [vmem:[%s3641_s13 + $0xc8] sm:$0xff]  ;;  %v411_v12 = vld [vmem:[%s3641_s13 + $0xd0] sm:$0xff]  ;;  %380 = vmatpush.msra.mxu0 %v357_v27  ;;  %s3433_s12 = sshra.s32 %s2809_s26, 4  ;;  %s3439_s9 = scalar_lea.hbm %s5279_s8, 16  ;;  %s3434_s12 = int_to_ptr.hbm [resolvable:$true] %s3433_s12 }
  0x22   : > { %v412_v13 = vld [vmem:[%s3641_s13 + $0xd8] sm:$0xff]  ;;  %v413_v14 = vld [vmem:[%s3641_s13 + $0xe0] sm:$0xff]  ;;  %v414_v15 = vld [vmem:[%s3641_s13 + $0xe8] sm:$0xff]  ;;  %s3435_s18 = scalar_lea.hbm %s3434_s12, 8  ;;  %p3440_p1 = scmp.lt.s32.totalorder %s3434_s12, %s5279_s8 }
  0x23   : > { %v415_v16 = vld [vmem:[%s3641_s13 + $0xf0] sm:$0xff]  ;;  %v416_v17 = vld [vmem:[%s3641_s13 + $0xf8] sm:$0xff]  ;;  %v417_v18 = vld [vmem:[%s3641_s13 + $0x100] sm:$0xff]  ;;  %913 = vmatpush.msrb.mxu0 %v3612_v0  ;;  %p3436_p12 = scmp.ne.s32.totalorder %s3434_s12, %s3435_s18  ;;  %p3441_p2 = scmp.lt.s32.totalorder %s3439_s9, %s3435_s18 }
  0x24   : > { %v418_v19 = vld [vmem:[%s3641_s13 + $0x108] sm:$0xff]  ;;  %v419_v21 = vld [vmem:[%s3641_s13 + $0x110] sm:$0xff]  ;;  %v420_v24 = vld [vmem:[%s3641_s13 + $0x118] sm:$0xff] }
  0x25   : > { %v356_v28 = vld [vmem:[%s340_s10] sm:$0xff]  ;;  %914 = vmatpush.msrb.mxu0 %v3617_v1  ;;  %v422_v33 = vld [vmem:[%s3641_s13 + $0x128] sm:$0xff]  ;;  %v423_v36 = vld [vmem:[%s3641_s13 + $0x130] sm:$0xff]  ;;  %p3437_p13 = pnand %p3436_p12, %p3599_p5  ;;  %p3442_p3 = por %p3441_p2, %p3440_p1 }
  0x26   : > { %2936 = vmatmul.msk.f32.vlgmr.msra.gmra.mxu0 %vm361_vm0, %v356_v28  ;;  %v421_v30 = vld [vmem:[%s3641_s13 + $0x120] sm:$0xff]  ;;  %v386_v34 = vld [vmem:[%s3641_s13 + $0x8] sm:$0xff]  ;;  %v387_v37 = vld [vmem:[%s3641_s13 + $0x10] sm:$0xff] }
  0x27   : > { %915 = vmatpush.msrb.mxu0 %v3625_v2  ;;  %v385_v31 = vld [vmem:[%s3641_s13] sm:$0xff]  ;;  %v424_v39 = vld [vmem:[%s3641_s13 + $0x138] sm:$0xff]  ;;  %v426_v45 = vld [vmem:[%s3641_s13 + $0x148] sm:$0xff]  ;;  %p3438_p0 = pneg %p3437_p13 }
  0x28   : > { %2956 = vmatmul.msk.f32.gmra.mxu1 %vm361_vm0, %v404_v5  ;;  %v388_v40 = vld [vmem:[%s3641_s13 + $0x18] sm:$0xff]  ;;  %v425_v42 = vld [vmem:[%s3641_s13 + $0x140] sm:$0xff]  ;;  %v390_v46 = vld [vmem:[%s3641_s13 + $0x28] sm:$0xff] }
  0x29   : > { %916 = vmatpush.msrb.mxu0 %v3633_v3  ;;  %v389_v43 = vld [vmem:[%s3641_s13 + $0x20] sm:$0xff]  ;;  %v427_v48 = vld [vmem:[%s3641_s13 + $0x150] sm:$0xff]  ;;  %v428_v51 = vld [vmem:[%s3641_s13 + $0x158] sm:$0xff]  ;;  %p3443_p4 = pnand %p3442_p3, %p3438_p0 }
  0x2a   : > { %v391_v49 = vld [vmem:[%s3641_s13 + $0x30] sm:$0xff]  ;;  %v392_v52 = vld [vmem:[%s3641_s13 + $0x38] sm:$0xff]  ;;  %v429_v54 = vld [vmem:[%s3641_s13 + $0x160] sm:$0xff] }
  0x2b   : > { %v393_v55 = vld [vmem:[%s3641_s13 + $0x40] sm:$0xff]  ;;  %v430_v57 = vld [vmem:[%s3641_s13 + $0x168] sm:$0xff]  ;;  %v431_v60 = vld [vmem:[%s3641_s13 + $0x170] sm:$0xff] }
  0x2c   : > { %v394_v58 = vld [vmem:[%s3641_s13 + $0x48] sm:$0xff]  ;;  %v395_v61 = vld [vmem:[%s3641_s13 + $0x50] sm:$0xff]  ;;  %v432_v63 = vld [vmem:[%s3641_s13 + $0x178] sm:$0xff] }
  0x2d   : > { %v396_v0 = vld [vmem:[%s3641_s13 + $0x58] sm:$0xff]  ;;  %v433_v2 = vld [vmem:[%s3641_s13 + $0x180] sm:$0xff]  ;;  %v434_v5 = vld [vmem:[%s3641_s13 + $0x188] sm:$0xff] }
  0x2e   : > { %2937 = vmatmul.msk.f32.vlgmr.msrb.gmra.mxu0 %vm361_vm0, %v385_v31  ;;  %v397_v3 = vld [vmem:[%s3641_s13 + $0x60] sm:$0xff]  ;;  %v439_v22 = vld [vmem:[%s3641_s13 + $0x1b0] sm:$0xff]  ;;  %v440_v26 = vld [vmem:[%s3641_s13 + $0x1b8] sm:$0xff] }
  0x30   : > { %2957 = vmatmul.msk.f32.gmra.mxu1 %vm361_vm0, %v405_v6  ;;  %v398_v6 = vld [vmem:[%s3641_s13 + $0x68] sm:$0xff] }
  0x36   : > { %2938 = vmatmul.msk.f32.gmra.mxu0 %vm361_vm0, %v386_v34  ;;  %v442_v34 = vld [vmem:[%s3641_s13 + $0x1c8] sm:$0xff] }
  0x38   : > { %2958 = vmatmul.msk.f32.gmra.mxu1 %vm361_vm0, %v406_v7 }
  0x3e   : > { %2939 = vmatmul.msk.f32.gmra.mxu0 %vm361_vm0, %v387_v37 }
  0x40   : > { %2959 = vmatmul.msk.f32.gmra.mxu1 %vm361_vm0, %v407_v8  ;;  %v435_v8 = vld [vmem:[%s3641_s13 + $0x190] sm:$0xff] }
  0x46   : > { %2940 = vmatmul.msk.f32.gmra.mxu0 %vm361_vm0, %v388_v40 }
  0x48   : > { %2960 = vmatmul.msk.f32.gmra.mxu1 %vm361_vm0, %v408_v9  ;;  %v399_v9 = vld [vmem:[%s3641_s13 + $0x70] sm:$0xff] }
  0x4e   : > { %2941 = vmatmul.msk.f32.gmra.mxu0 %vm361_vm0, %v389_v43  ;;  %v444_v43 = vld [vmem:[%s3641_s13 + $0x1d8] sm:$0xff] }
  0x50   : > { %2961 = vmatmul.msk.f32.gmra.mxu1 %vm361_vm0, %v409_v10 }
  0x56   : > { %2942 = vmatmul.msk.f32.gmra.mxu0 %vm361_vm0, %v390_v46 }
  0x58   : > { %2962 = vmatmul.msk.f32.gmra.mxu1 %vm361_vm0, %v410_v11  ;;  %v436_v11 = vld [vmem:[%s3641_s13 + $0x198] sm:$0xff] }
  0x5e   : > { %2943 = vmatmul.msk.f32.gmra.mxu0 %vm361_vm0, %v391_v49 }
  0x60   : > { %2963 = vmatmul.msk.f32.gmra.mxu1 %vm361_vm0, %v411_v12 }
  0x66   : > { %2944 = vmatmul.msk.f32.gmra.mxu0 %vm361_vm0, %v392_v52  ;;  %v446_v52 = vld [vmem:[%s3641_s13 + $0x1e8] sm:$0xff] }
  0x68   : > { %2964 = vmatmul.msk.f32.gmra.mxu1 %vm361_vm0, %v412_v13  ;;  %v400_v13 = vld [vmem:[%s3641_s13 + $0x78] sm:$0xff] }
  0x6e   : > { %2945 = vmatmul.msk.f32.gmra.mxu0 %vm361_vm0, %v393_v55 }
  0x70   : > { %2965 = vmatmul.msk.f32.gmra.mxu1 %vm361_vm0, %v413_v14 }
  0x76   : > { %2946 = vmatmul.msk.f32.gmra.mxu0 %vm361_vm0, %v394_v58 }
  0x78   : > { %2966 = vmatmul.msk.f32.gmra.mxu1 %vm361_vm0, %v414_v15  ;;  %v437_v15 = vld [vmem:[%s3641_s13 + $0x1a0] sm:$0xff] }
  0x7e   : > { %2947 = vmatmul.msk.f32.gmra.mxu0 %vm361_vm0, %v395_v61  ;;  %v448_v61 = vld [vmem:[%s3641_s13 + $0x1f8] sm:$0xff] }
  0x80   : > { %2967 = vmatmul.msk.f32.gmra.mxu1 %vm361_vm0, %v415_v16 }
  0x86   : > { %2948 = vmatmul.msk.f32.gmra.mxu0 %vm361_vm0, %v396_v0 }
  0x88   : > { %2968 = vmatmul.msk.f32.gmra.mxu1 %vm361_vm0, %v416_v17 }
  0x8e   : > { %2949 = vmatmul.msk.f32.gmra.mxu0 %vm361_vm0, %v397_v3 }
  0x90   : > { %2969 = vmatmul.msk.f32.gmra.mxu1 %vm361_vm0, %v417_v18  ;;  %v438_v18 = vld [vmem:[%s3641_s13 + $0x1a8] sm:$0xff] }
  0x96   : > { %2950 = vmatmul.msk.f32.gmra.mxu0 %vm361_vm0, %v398_v6  ;;  %v450_v6 = vld [vmem:[%s3641_s13 + $0x208] sm:$0xff] }
  0x98   : > { %2970 = vmatmul.msk.f32.gmra.mxu1 %vm361_vm0, %v418_v19 }
  0x9d   : > { %v3680_v20 = vpop.f32.mrf.mxu1 }
  0x9e   : > { %5598 = vst [vmem:[#allocation10_spill] sm:$0xff] %v3680_v20  ;;  %2951 = vmatmul.msk.f32.gmra.mxu0 %vm361_vm0, %v399_v9  ;;  %v401_v9 = vld [vmem:[%s3641_s13 + $0x80] sm:$0xff] }
  0xa0   : > { %2971 = vmatmul.msk.f32.gmra.mxu1 %vm361_vm0, %v419_v21 }
  0xa3   : > { %v3826_v12 = vpop.f32.mrf.mxu0 }
  0xa4   : > { %5617 = vst [vmem:[#allocation28_spill] sm:$0xff] %v3826_v12 }
  0xa5   : > { %v3691_v23 = vpop.f32.mrf.mxu1 }
  0xa6   : > { %5599 = vst [vmem:[#allocation11_spill] sm:$0xff] %v3691_v23  ;;  %2952 = vmatmul.msk.f32.gmra.mxu0 %vm361_vm0, %v400_v13  ;;  %v451_v13 = vld [vmem:[%s3641_s13 + $0x210] sm:$0xff] }
  0xa8   : > { %2972 = vmatmul.msk.f32.gmra.mxu1 %vm361_vm0, %v420_v24 }
  0xab   : > { %v3838_v16 = vpop.f32.mrf.mxu0 }
  0xac   : > { %5619 = vst [vmem:[#allocation30_spill] sm:$0xff] %v3838_v16 }
  0xad   : > { %v3711_v29 = vpop.f32.mrf.mxu1 }
  0xae   : > { %5601 = vst [vmem:[#allocation12_spill] sm:$0xff] %v3711_v29  ;;  %2953 = vmatmul.msk.f32.gmra.mxu0 %vm361_vm0, %v401_v9 }
  0xb0   : > { %2973 = vmatmul.msk.f32.gmra.mxu1 %vm361_vm0, %v421_v30  ;;  %v441_v30 = vld [vmem:[%s3641_s13 + $0x1c0] sm:$0xff] }
  0xb3   : > { %v3848_v19 = vpop.f32.mrf.mxu0 }
  0xb4   : > { %5621 = vst [vmem:[#allocation32_spill] sm:$0xff] %v3848_v19 }
  0xb5   : > { %v3720_v32 = vpop.f32.mrf.mxu1 }
  0xb6   : > { %5602 = vst [vmem:[#allocation13_spill] sm:$0xff] %v3720_v32 }
  0xb8   : > { %2974 = vmatmul.msk.f32.gmra.mxu1 %vm361_vm0, %v422_v33 }
  0xbb   : > { %v3856_v24 = vpop.f32.mrf.mxu0 }
  0xbc   : > { %5623 = vst [vmem:[#allocation34_spill] sm:$0xff] %v3856_v24 }
  0xbd   : > { %v3726_v35 = vpop.f32.mrf.mxu1 }
  0xbe   : > { %5603 = vst [vmem:[#allocation14_spill] sm:$0xff] %v3726_v35 }
  0xc0   : > { %2975 = vmatmul.msk.f32.gmra.mxu1 %vm361_vm0, %v423_v36 }
  0xc3   : > { %v3862_v27 = vpop.f32.mrf.mxu0 }
  0xc4   : > { %5625 = vst [vmem:[#allocation36_spill] sm:$0xff] %v3862_v27 }
  0xc5   : > { %v3732_v38 = vpop.f32.mrf.mxu1 }
  0xc6   : > { %5604 = vst [vmem:[#allocation15_spill] sm:$0xff] %v3732_v38 }
  0xc8   : > { %2976 = vmatmul.msk.f32.gmra.mxu1 %vm361_vm0, %v424_v39  ;;  %v443_v39 = vld [vmem:[%s3641_s13 + $0x1d0] sm:$0xff] }
  0xcb   : > { %v3868_v31 = vpop.f32.mrf.mxu0 }
  0xcc   : > { %5627 = vst [vmem:[#allocation38_spill] sm:$0xff] %v3868_v31 }
  0xcd   : > { %v3738_v41 = vpop.f32.mrf.mxu1 }
  0xce   : > { %5605 = vst [vmem:[#allocation16_spill] sm:$0xff] %v3738_v41 }
  0xd0   : > { %2977 = vmatmul.msk.f32.gmra.mxu1 %vm361_vm0, %v425_v42 }
  0xd3   : > { %v3874_v36 = vpop.f32.mrf.mxu0 }
  0xd4   : > { %5629 = vst [vmem:[#allocation40_spill] sm:$0xff] %v3874_v36 }
  0xd5   : > { %v3744_v44 = vpop.f32.mrf.mxu1 }
  0xd6   : > { %5606 = vst [vmem:[#allocation17_spill] sm:$0xff] %v3744_v44 }
  0xd8   : > { %2978 = vmatmul.msk.f32.gmra.mxu1 %vm361_vm0, %v426_v45 }
  0xdb   : > { %v3880_v40 = vpop.f32.mrf.mxu0 }
  0xdc   : > { %5631 = vst [vmem:[#allocation42_spill] sm:$0xff] %v3880_v40 }
  0xdd   : > { %v3750_v47 = vpop.f32.mrf.mxu1 }
  0xde   : > { %5607 = vst [vmem:[#allocation18_spill] sm:$0xff] %v3750_v47 }
  0xe0   : > { %2979 = vmatmul.msk.f32.gmra.mxu1 %vm361_vm0, %v427_v48  ;;  %v445_v48 = vld [vmem:[%s3641_s13 + $0x1e0] sm:$0xff] }
  0xe3   : > { %v3886_v45 = vpop.f32.mrf.mxu0 }
  0xe4   : > { %5633 = vst [vmem:[#allocation44_spill] sm:$0xff] %v3886_v45 }
  0xe5   : > { %v3756_v50 = vpop.f32.mrf.mxu1 }
  0xe6   : > { %5608 = vst [vmem:[#allocation19_spill] sm:$0xff] %v3756_v50 }
  0xe8   : > { %2980 = vmatmul.msk.f32.gmra.mxu1 %vm361_vm0, %v428_v51 }
  0xeb   : > { %v3892_v49 = vpop.f32.mrf.mxu0 }
  0xec   : > { %5635 = vst [vmem:[#allocation46_spill] sm:$0xff] %v3892_v49 }
  0xed   : > { %v3762_v53 = vpop.f32.mrf.mxu1 }
  0xee   : > { %5609 = vst [vmem:[#allocation20_spill] sm:$0xff] %v3762_v53 }
  0xf0   : > { %2981 = vmatmul.msk.f32.gmra.mxu1 %vm361_vm0, %v429_v54 }
  0xf3   : > { %v3898_v54 = vpop.f32.mrf.mxu0 }
  0xf4   : > { %5637 = vst [vmem:[#allocation48_spill] sm:$0xff] %v3898_v54 }
  0xf5   : > { %v3768_v56 = vpop.f32.mrf.mxu1 }
  0xf6   : > { %5610 = vst [vmem:[#allocation21_spill] sm:$0xff] %v3768_v56 }
  0xf8   : > { %2982 = vmatmul.msk.f32.gmra.mxu1 %vm361_vm0, %v430_v57  ;;  %v447_v57 = vld [vmem:[%s3641_s13 + $0x1f0] sm:$0xff] }
  0xfb   : > { %v3904_v58 = vpop.f32.mrf.mxu0 }
  0xfd   : > { %v3774_v59 = vpop.f32.mrf.mxu1 }
  0xfe   : > { %5611 = vst [vmem:[#allocation22_spill] sm:$0xff] %v3774_v59 }
 0x100   : > { %2983 = vmatmul.msk.f32.gmra.mxu1 %vm361_vm0, %v431_v60 }
 0x105   : > { %v3780_v62 = vpop.f32.mrf.mxu1 }
 0x106   : > { %5612 = vst [vmem:[#allocation23_spill] sm:$0xff] %v3780_v62  ;;  %3082 = vmatpush.xpose.msk.msrb.mxu3 %vm361_vm0, %v3780_v62 }
 0x108   : > { %2984 = vmatmul.msk.f32.gmra.mxu1 %vm361_vm0, %v432_v63  ;;  %v3912_v63 = vpop.f32.mrf.mxu0 }
 0x10a   : > { %3083 = vmatpush.xpose.msk.msrb.mxu3 %vm361_vm0, %v3774_v59  ;;  %v478_v59 = vld [vmem:[%s3641_s13 + $0x2e8] sm:$0xff] }
 0x10d   : > { %v3790_v1 = vpop.f32.mrf.mxu1 }
 0x10e   : > { %5613 = vst [vmem:[#allocation24_spill] sm:$0xff] %v3790_v1  ;;  %3084 = vmatpush.xpose.msk.msrb.mxu3 %vm361_vm0, %v3768_v56 }
 0x110   : > { %2985 = vmatmul.msk.f32.gmra.mxu1 %vm361_vm0, %v433_v2  ;;  %v449_v2 = vld [vmem:[%s3641_s13 + $0x200] sm:$0xff]  ;;  %v3922_v3 = vpop.f32.mrf.mxu0 }
 0x112   : > { %3085 = vmatpush.xpose.msk.msrb.mxu3 %vm361_vm0, %v3762_v53 }
 0x115   : > { %v3800_v4 = vpop.f32.mrf.mxu1 }
 0x116   : > { %5614 = vst [vmem:[#allocation25_spill] sm:$0xff] %v3800_v4  ;;  %3086 = vmatpush.xpose.msk.msrb.mxu3 %vm361_vm0, %v3756_v50  ;;  %v477_v50 = vld [vmem:[%s3641_s13 + $0x2e0] sm:$0xff] }
 0x118   : > { %2986 = vmatmul.msk.f32.gmra.mxu1 %vm361_vm0, %v434_v5 }
 0x11a   : > { %3087 = vmatpush.xpose.msk.msrb.mxu3 %vm361_vm0, %v3750_v47 }
 0x11d   : > { %v3810_v7 = vpop.f32.mrf.mxu1 }
 0x11e   : > { %5615 = vst [vmem:[#allocation26_spill] sm:$0xff] %v3810_v7  ;;  %3088 = vmatpush.xpose.msk.msrb.mxu3 %vm361_vm0, %v3744_v44  ;;  %v476_v44 = vld [vmem:[%s3641_s13 + $0x2d8] sm:$0xff] }
 0x120   : > { %2987 = vmatmul.msk.f32.gmra.mxu1 %vm361_vm0, %v435_v8  ;;  %v3932_v8 = vpop.f32.mrf.mxu0 }
 0x122   : > { %3089 = vmatpush.xpose.msk.msrb.mxu3 %vm361_vm0, %v3738_v41 }
 0x125   : > { %v3820_v10 = vpop.f32.mrf.mxu1 }
 0x126   : > { %5616 = vst [vmem:[#allocation27_spill] sm:$0xff] %v3820_v10  ;;  %3090 = vmatpush.xpose.msk.msrb.mxu3 %vm361_vm0, %v3732_v38 }
 0x128   : > { %2988 = vmatmul.msk.f32.gmra.mxu1 %vm361_vm0, %v436_v11 }
 0x12a   : > { %3091 = vmatpush.xpose.msk.msrb.mxu3 %vm361_vm0, %v3726_v35 }
 0x12d   : > { %v3832_v14 = vpop.f32.mrf.mxu1 }
 0x12e   : > { %5618 = vst [vmem:[#allocation29_spill] sm:$0xff] %v3832_v14  ;;  %3092 = vmatpush.xpose.msk.msrb.mxu3 %vm361_vm0, %v3720_v32 }
 0x130   : > { %2989 = vmatmul.msk.f32.gmra.mxu1 %vm361_vm0, %v437_v15  ;;  %v3944_v15 = vpop.f32.mrf.mxu0 }
 0x132   : > { %3093 = vmatpush.xpose.msk.msrb.mxu3 %vm361_vm0, %v3711_v29  ;;  %v472_v29 = vld [vmem:[%s3641_s13 + $0x2b8] sm:$0xff] }
 0x135   : > { %v3842_v17 = vpop.f32.mrf.mxu1 }
 0x136   : > { %5620 = vst [vmem:[#allocation31_spill] sm:$0xff] %v3842_v17  ;;  %3094 = vmatpush.xpose.msk.msrb.mxu3 %vm361_vm0, %v3691_v23  ;;  %v1541_v23 = vrot.slane %v3826_v12, 3 }
 0x138   : > { %2990 = vmatmul.msk.f32.gmra.mxu1 %vm361_vm0, %v438_v18  ;;  %v402_v18 = vld [vmem:[%s3641_s13 + $0x88] sm:$0xff] }
 0x139   : > { %2954 = vmatmul.msk.f32.gmra.mxu0 %vm361_vm0, %v402_v18  ;;  %v501_v18 = vld [vmem:[%s3641_s13 + $0x3a0] sm:$0xff] }
 0x13a   : > { %3095 = vmatpush.xpose.msk.msrb.mxu3 %vm361_vm0, %v3680_v20 }
 0x13d   : > { %v3852_v21 = vpop.f32.mrf.mxu1 }
 0x13e   : > { %5622 = vst [vmem:[#allocation33_spill] sm:$0xff] %v3852_v21 }
 0x140   : > { %2991 = vmatmul.msk.f32.gmra.mxu1 %vm361_vm0, %v439_v22 }
 0x145   : > { %v3858_v25 = vpop.f32.mrf.mxu1 }
 0x146   : > { %5624 = vst [vmem:[#allocation35_spill] sm:$0xff] %v3858_v25 }
 0x148   : > { %2992 = vmatmul.msk.f32.gmra.mxu1 %vm361_vm0, %v440_v26  ;;  %v452_v26 = vld [vmem:[%s3641_s13 + $0x218] sm:$0xff] }
 0x14d   : > { %v3864_v28 = vpop.f32.mrf.mxu1 }
 0x14e   : > { %5626 = vst [vmem:[#allocation37_spill] sm:$0xff] %v3864_v28 }
 0x150   : > { %2993 = vmatmul.msk.f32.gmra.mxu1 %vm361_vm0, %v441_v30  ;;  %v3956_v30 = vpop.f32.mrf.mxu0 }
 0x151   : > { %3065 = vmatpush.xpose.msk.msrb.mxu2 %vm361_vm0, %v3956_v30 }
 0x155   : > { %v3870_v33 = vpop.f32.mrf.mxu1  ;;  %3066 = vmatpush.xpose.msk.msrb.mxu2 %vm361_vm0, %v3944_v15 }
 0x156   : > { %5628 = vst [vmem:[#allocation39_spill] sm:$0xff] %v3870_v33 }
 0x158   : > { %2994 = vmatmul.msk.f32.gmra.mxu1 %vm361_vm0, %v442_v34 }
 0x159   : > { %3067 = vmatpush.xpose.msk.msrb.mxu2 %vm361_vm0, %v3932_v8 }
 0x15d   : > { %v3876_v37 = vpop.f32.mrf.mxu1  ;;  %3068 = vmatpush.xpose.msk.msrb.mxu2 %vm361_vm0, %v3922_v3 }
 0x15e   : > { %5630 = vst [vmem:[#allocation41_spill] sm:$0xff] %v3876_v37 }
 0x160   : > { %2995 = vmatmul.msk.f32.gmra.mxu1 %vm361_vm0, %v443_v39  ;;  %v453_v39 = vld [vmem:[%s3641_s13 + $0x220] sm:$0xff] }
 0x161   : > { %3069 = vmatpush.xpose.msk.msrb.mxu2 %vm361_vm0, %v3912_v63 }
 0x165   : > { %v3882_v42 = vpop.f32.mrf.mxu1  ;;  %3070 = vmatpush.xpose.msk.msrb.mxu2 %vm361_vm0, %v3904_v58 }
 0x166   : > { %5632 = vst [vmem:[#allocation43_spill] sm:$0xff] %v3882_v42 }
 0x168   : > { %2996 = vmatmul.msk.f32.gmra.mxu1 %vm361_vm0, %v444_v43  ;;  %v498_v43 = vld [vmem:[%s3641_s13 + $0x388] sm:$0xff] }
 0x169   : > { %3050 = vmatmul.msk.f32.vlgmr.msra.gmra.mxu3 %vm361_vm0, %v498_v43  ;;  %3071 = vmatpush.xpose.msk.msrb.mxu2 %vm361_vm0, %v3898_v54  ;;  %v502_v43 = vld [vmem:[%s3641_s13 + $0x3a8] sm:$0xff] }
 0x16d   : > { %v3888_v46 = vpop.f32.mrf.mxu1  ;;  %3072 = vmatpush.xpose.msk.msrb.mxu2 %vm361_vm0, %v3892_v49  ;;  %v483_v49 = vld [vmem:[%s3641_s13 + $0x310] sm:$0xff] }
 0x16e   : > { %5634 = vst [vmem:[#allocation45_spill] sm:$0xff] %v3888_v46 }
 0x170   : > { %2997 = vmatmul.msk.f32.gmra.mxu1 %vm361_vm0, %v445_v48 }
 0x171   : > { %3073 = vmatpush.xpose.msk.msrb.mxu2 %vm361_vm0, %v3886_v45 }
 0x175   : > { %v3894_v51 = vpop.f32.mrf.mxu1  ;;  %3074 = vmatpush.xpose.msk.msrb.mxu2 %vm361_vm0, %v3880_v40  ;;  %v481_v40 = vld [vmem:[%s3641_s13 + $0x300] sm:$0xff] }
 0x176   : > { %5636 = vst [vmem:[#allocation47_spill] sm:$0xff] %v3894_v51 }
 0x178   : > { %2998 = vmatmul.msk.f32.gmra.mxu1 %vm361_vm0, %v446_v52  ;;  %v454_v52 = vld [vmem:[%s3641_s13 + $0x228] sm:$0xff] }
 0x179   : > { %3075 = vmatpush.xpose.msk.msrb.mxu2 %vm361_vm0, %v3874_v36 }
 0x17d   : > { %v3900_v55 = vpop.f32.mrf.mxu1  ;;  %3076 = vmatpush.xpose.msk.msrb.mxu2 %vm361_vm0, %v3868_v31  ;;  %v480_v31 = vld [vmem:[%s3641_s13 + $0x2f8] sm:$0xff] }
 0x17e   : > { %5638 = vst [vmem:[#allocation49_spill] sm:$0xff] %v3900_v55 }
 0x180   : > { %2999 = vmatmul.msk.f32.gmra.mxu1 %vm361_vm0, %v447_v57  ;;  %v499_v57 = vld [vmem:[%s3641_s13 + $0x390] sm:$0xff] }
 0x181   : > { %3051 = vmatmul.msk.f32.gmra.mxu3 %vm361_vm0, %v499_v57  ;;  %v458_v57 = vld [vmem:[%s3641_s13 + $0x248] sm:$0xff]  ;;  %3077 = vmatpush.xpose.msk.msrb.mxu2 %vm361_vm0, %v3862_v27 }
 0x185   : > { %v3906_v60 = vpop.f32.mrf.mxu1  ;;  %3078 = vmatpush.xpose.msk.msrb.mxu2 %vm361_vm0, %v3856_v24 }
 0x186   : > { %5639 = vst [vmem:[#allocation50_spill] sm:$0xff] %v3906_v60  ;;  %3099 = vmatpush.xpose.msk.msra.mxu0 %vm361_vm0, %v3906_v60 }
 0x188   : > { %3000 = vmatmul.msk.f32.gmra.mxu1 %vm361_vm0, %v448_v61 }
 0x189   : > { %3079 = vmatpush.xpose.msk.msrb.mxu2 %vm361_vm0, %v3848_v19  ;;  %v479_v19 = vld [vmem:[%s3641_s13 + $0x2f0] sm:$0xff] }
 0x18a   : > { %3100 = vmatpush.xpose.msk.msra.mxu0 %vm361_vm0, %v3900_v55 }
 0x18d   : > { %v3916_v0 = vpop.f32.mrf.mxu1  ;;  %3080 = vmatpush.xpose.msk.msrb.mxu2 %vm361_vm0, %v3838_v16 }
 0x18e   : > { %5640 = vst [vmem:[#allocation51_spill] sm:$0xff] %v3916_v0  ;;  %3101 = vmatpush.xpose.msk.msra.mxu0 %vm361_vm0, %v3894_v51  ;;  %v473_v51 = vld [vmem:[%s3641_s13 + $0x2c0] sm:$0xff] }
 0x190   : > { %3001 = vmatmul.msk.f32.gmra.mxu1 %vm361_vm0, %v449_v2  ;;  %v455_v2 = vld [vmem:[%s3641_s13 + $0x230] sm:$0xff] }
 0x192   : > { %3102 = vmatpush.xpose.msk.msra.mxu0 %vm361_vm0, %v3888_v46 }
 0x195   : > { %v3926_v5 = vpop.f32.mrf.mxu1 }
 0x196   : > { %5641 = vst [vmem:[#allocation52_spill] sm:$0xff] %v3926_v5  ;;  %3103 = vmatpush.xpose.msk.msra.mxu0 %vm361_vm0, %v3882_v42 }
 0x198   : > { %3002 = vmatmul.msk.f32.gmra.mxu1 %vm361_vm0, %v450_v6  ;;  %v500_v6 = vld [vmem:[%s3641_s13 + $0x398] sm:$0xff] }
 0x199   : > { %3052 = vmatmul.msk.f32.gmra.mxu3 %vm361_vm0, %v500_v6  ;;  %v4038_v6 = vld [vmem:[%s4029_s22] sm:$0xff] }
 0x19a   : > { %3104 = vmatpush.xpose.msk.msra.mxu0 %vm361_vm0, %v3876_v37  ;;  %1303 = vmax.xlane.f32.xlu0 %v4038_v6 }
 0x19d   : > { %v3938_v11 = vpop.f32.mrf.mxu1 }
 0x19e   : > { %5642 = vst [vmem:[#allocation53_spill] sm:$0xff] %v3938_v11  ;;  %3105 = vmatpush.xpose.msk.msra.mxu0 %vm361_vm0, %v3870_v33  ;;  %v471_v33 = vld [vmem:[%s3641_s13 + $0x2b0] sm:$0xff] }
 0x1a0   : > { %3003 = vmatmul.msk.f32.gmra.mxu1 %vm361_vm0, %v451_v13  ;;  %v456_v13 = vld [vmem:[%s3641_s13 + $0x238] sm:$0xff] }
 0x1a1   : > { %3053 = vmatmul.msk.f32.gmra.mxu3 %vm361_vm0, %v501_v18  ;;  %v459_v18 = vld [vmem:[%s3641_s13 + $0x250] sm:$0xff] }
 0x1a2   : > { %3106 = vmatpush.xpose.msk.msra.mxu0 %vm361_vm0, %v3864_v28  ;;  %v4122_v28 = vpop.f32.mrf.mxu0 }
 0x1a3   : > { %5658 = vst [vmem:[#allocation69_spill] sm:$0xff] %v4122_v28 }
 0x1a5   : > { %v3950_v22 = vpop.f32.mrf.mxu1 }
 0x1a6   : > { %5643 = vst [vmem:[#allocation54_spill] sm:$0xff] %v3950_v22  ;;  %3107 = vmatpush.xpose.msk.msra.mxu0 %vm361_vm0, %v3858_v25  ;;  %v511_v25 = vld [vmem:[%s3641_s13 + $0x3f0] sm:$0xff] }
 0x1a8   : > { %3004 = vmatmul.msk.f32.gmra.mxu1 %vm361_vm0, %v452_v26 }
 0x1a9   : > { %3054 = vmatmul.msk.f32.gmra.mxu3 %vm361_vm0, %v502_v43  ;;  %v504_v43 = vld [vmem:[%s3641_s13 + $0x3b8] sm:$0xff] }
 0x1aa   : > { %3108 = vmatpush.xpose.msk.msra.mxu0 %vm361_vm0, %v3852_v21  ;;  %v509_v21 = vld [vmem:[%s3641_s13 + $0x3e0] sm:$0xff] }
 0x1ad   : > { %v3962_v34 = vpop.f32.mrf.mxu1 }
 0x1ae   : > { %5644 = vst [vmem:[#allocation55_spill] sm:$0xff] %v3962_v34  ;;  %3109 = vmatpush.xpose.msk.msra.mxu0 %vm361_vm0, %v3842_v17 }
 0x1b0   : > { %3005 = vmatmul.msk.f32.gmra.mxu1 %vm361_vm0, %v453_v39  ;;  %v457_v39 = vld [vmem:[%s3641_s13 + $0x240] sm:$0xff] }
 0x1b2   : > { %3110 = vmatpush.xpose.msk.msra.mxu0 %vm361_vm0, %v3832_v14 }
 0x1b5   : > { %v3976_v48 = vpop.f32.mrf.mxu1 }
 0x1b6   : > { %5645 = vst [vmem:[#allocation56_spill] sm:$0xff] %v3976_v48  ;;  %3111 = vmatpush.xpose.msk.msra.mxu0 %vm361_vm0, %v3820_v10  ;;  %v507_v10 = vld [vmem:[%s3641_s13 + $0x3d0] sm:$0xff]  ;;  %v4135_v20 = vpop.f32.mrf.mxu0 }
 0x1b7   : > { %5660 = vst [vmem:[#allocation71_spill] sm:$0xff] %v4135_v20  ;;  %3096 = vmatpush.xpose.msk.msrb.mxu3 %vm361_vm0, %v4135_v20 }
 0x1b8   : > { %3006 = vmatmul.msk.f32.gmra.mxu1 %vm361_vm0, %v454_v52 }
 0x1ba   : > { %3112 = vmatpush.xpose.msk.msra.mxu0 %vm361_vm0, %v3810_v7  ;;  %v506_v7 = vld [vmem:[%s3641_s13 + $0x3c8] sm:$0xff] }
 0x1bb   : > { %3097 = vmatpush.xpose.msk.msrb.mxu3 %vm361_vm0, %v4122_v28  ;;  %v469_v28 = vld [vmem:[%s3641_s13 + $0x2a0] sm:$0xff] }
 0x1bd   : > { %v3990_v61 = vpop.f32.mrf.mxu1 }
 0x1be   : > { %5646 = vst [vmem:[#allocation57_spill] sm:$0xff] %v3990_v61  ;;  %3113 = vmatpush.xpose.msk.msra.mxu0 %vm361_vm0, %v3800_v4  ;;  %v505_v4 = vld [vmem:[%s3641_s13 + $0x3c0] sm:$0xff] }
 0x1c0   : > { %3007 = vmatmul.msk.f32.gmra.mxu1 %vm361_vm0, %v455_v2  ;;  %v503_v2 = vld [vmem:[%s3641_s13 + $0x3b0] sm:$0xff] }
 0x1c1   : > { %3055 = vmatmul.msk.f32.gmra.mxu3 %vm361_vm0, %v503_v2  ;;  %v460_v2 = vld [vmem:[%s3641_s13 + $0x258] sm:$0xff] }
 0x1c2   : > { %3114 = vmatpush.xpose.msk.msra.mxu0 %vm361_vm0, %v3790_v1  ;;  %v491_v1 = vld [vmem:[%s3641_s13 + $0x350] sm:$0xff] }
 0x1c5   : > { %v4004_v9 = vpop.f32.mrf.mxu1 }
 0x1c6   : > { %5647 = vst [vmem:[#allocation58_spill] sm:$0xff] %v4004_v9 }
 0x1c8   : > { %3008 = vmatmul.msk.f32.gmra.mxu1 %vm361_vm0, %v456_v13 }
 0x1c9   : > { %3056 = vmatmul.msk.f32.gmra.mxu3 %vm361_vm0, %v504_v43  ;;  %v492_v43 = vld [vmem:[%s3641_s13 + $0x358] sm:$0xff] }
 0x1cd   : > { %v4014_v26 = vpop.f32.mrf.mxu1 }
 0x1ce   : > { %5648 = vst [vmem:[#allocation59_spill] sm:$0xff] %v4014_v26 }
 0x1d0   : > { %3009 = vmatmul.msk.f32.gmra.mxu1 %vm361_vm0, %v457_v39  ;;  %v490_v39 = vld [vmem:[%s3641_s13 + $0x348] sm:$0xff] }
 0x1d1   : > { %3042 = vmatmul.msk.f32.vlgmr.msra.gmra.mxu2 %vm361_vm0, %v490_v39  ;;  %3057 = vmatmul.msk.f32.gmra.mxu3 %vm361_vm0, %v505_v4  ;;  %v461_v39 = vld [vmem:[%s3641_s13 + $0x260] sm:$0xff]  ;;  %v462_v4 = vld [vmem:[%s3641_s13 + $0x268] sm:$0xff] }
 0x1d5   : > { %v4031_v52 = vpop.f32.mrf.mxu1 }
 0x1d6   : > { %5649 = vst [vmem:[#allocation60_spill] sm:$0xff] %v4031_v52 }
 0x1d8   : > { %3010 = vmatmul.msk.f32.gmra.mxu1 %vm361_vm0, %v458_v57 }
 0x1d9   : > { %3043 = vmatmul.msk.f32.gmra.mxu2 %vm361_vm0, %v491_v1  ;;  %3058 = vmatmul.msk.f32.gmra.mxu3 %vm361_vm0, %v506_v7  ;;  %v494_v7 = vld [vmem:[%s3641_s13 + $0x368] sm:$0xff] }
 0x1dd   : > { %v4045_v13 = vpop.f32.mrf.mxu1 }
 0x1de   : > { %5650 = vst [vmem:[#allocation61_spill] sm:$0xff] %v4045_v13 }
 0x1e0   : > { %3011 = vmatmul.msk.f32.gmra.mxu1 %vm361_vm0, %v459_v18 }
 0x1e1   : > { %3044 = vmatmul.msk.f32.gmra.mxu2 %vm361_vm0, %v492_v43  ;;  %3059 = vmatmul.msk.f32.gmra.mxu3 %vm361_vm0, %v507_v10  ;;  %v463_v43 = vld [vmem:[%s3641_s13 + $0x270] sm:$0xff] }
 0x1e2   : > { %v495_v10 = vld [vmem:[%s3641_s13 + $0x370] sm:$0xff] }
 0x1e5   : > { %v4057_v57 = vpop.f32.mrf.mxu1 }
 0x1e6   : > { %5651 = vst [vmem:[#allocation62_spill] sm:$0xff] %v4057_v57 }
 0x1e8   : > { %3012 = vmatmul.msk.f32.gmra.mxu1 %vm361_vm0, %v460_v2  ;;  %v493_v2 = vld [vmem:[%s3641_s13 + $0x360] sm:$0xff] }
 0x1e9   : > { %3045 = vmatmul.msk.f32.gmra.mxu2 %vm361_vm0, %v493_v2  ;;  %v464_v2 = vld [vmem:[%s3641_s13 + $0x278] sm:$0xff] }
 0x1ec   : > { %v4165_v20 = vpop.f32.mrf.mxu3 }
 0x1ed   : > { %v4067_v18 = vpop.f32.mrf.mxu1  ;;  %5663 = vst [vmem:[#allocation74_spill] sm:$0xff] %v4165_v20 }
 0x1ee   : > { %5652 = vst [vmem:[#allocation63_spill] sm:$0xff] %v4067_v18 }
 0x1f0   : > { %3013 = vmatmul.msk.f32.gmra.mxu1 %vm361_vm0, %v461_v39  ;;  %v508_v39 = vld [vmem:[%s3641_s13 + $0x3d8] sm:$0xff] }
 0x1f1   : > { %3046 = vmatmul.msk.f32.gmra.mxu2 %vm361_vm0, %v494_v7  ;;  %3060 = vmatmul.msk.f32.gmra.mxu3 %vm361_vm0, %v508_v39  ;;  %v496_v7 = vld [vmem:[%s3641_s13 + $0x378] sm:$0xff]  ;;  %v510_v39 = vld [vmem:[%s3641_s13 + $0x3e8] sm:$0xff] }
 0x1f5   : > { %v4075_v1 = vpop.f32.mrf.mxu1 }
 0x1f6   : > { %5653 = vst [vmem:[#allocation64_spill] sm:$0xff] %v4075_v1 }
 0x1f8   : > { %3014 = vmatmul.msk.f32.gmra.mxu1 %vm361_vm0, %v462_v4 }
 0x1f9   : > { %3061 = vmatmul.msk.f32.gmra.mxu3 %vm361_vm0, %v509_v21  ;;  %3047 = vmatmul.msk.f32.gmra.mxu2 %vm361_vm0, %v495_v10  ;;  %v497_v10 = vld [vmem:[%s3641_s13 + $0x380] sm:$0xff] }
 0x1fd   : > { %v4083_v14 = vpop.f32.mrf.mxu1 }
 0x1fe   : > { %5654 = vst [vmem:[#allocation65_spill] sm:$0xff] %v4083_v14 }
 0x200   : > { %3015 = vmatmul.msk.f32.gmra.mxu1 %vm361_vm0, %v463_v43  ;;  %v465_v43 = vld [vmem:[%s3641_s13 + $0x280] sm:$0xff] }
 0x201   : > { %3062 = vmatmul.msk.f32.gmra.mxu3 %vm361_vm0, %v510_v39  ;;  %3048 = vmatmul.msk.f32.gmra.mxu2 %vm361_vm0, %v496_v7  ;;  %v467_v7 = vld [vmem:[%s3641_s13 + $0x290] sm:$0xff]  ;;  %v512_v39 = vld [vmem:[%s3641_s13 + $0x3f8] sm:$0xff] }
 0x205   : > { %v4091_v17 = vpop.f32.mrf.mxu1 }
 0x206   : > { %5655 = vst [vmem:[#allocation66_spill] sm:$0xff] %v4091_v17  ;;  %3116 = vmatpush.xpose.msk.msra.mxu2 %vm361_vm0, %v4091_v17 }
 0x208   : > { %3016 = vmatmul.msk.f32.gmra.mxu1 %vm361_vm0, %v464_v2  ;;  %v466_v2 = vld [vmem:[%s3641_s13 + $0x288] sm:$0xff] }
 0x209   : > { %3063 = vmatmul.msk.f32.gmra.mxu3 %vm361_vm0, %v511_v25  ;;  %3049 = vmatmul.msk.f32.gmra.mxu2 %vm361_vm0, %v497_v10  ;;  %v1397_v25 = vrot.slane %v3826_v12, 1 }
 0x20a   : > { %3117 = vmatpush.xpose.msk.msra.mxu2 %vm361_vm0, %v4083_v14 }
 0x20d   : > { %v4103_v4 = vpop.f32.mrf.mxu1  ;;  %v1304_v32 = vpop.xlane.xlu0 %1303 }
 0x20e   : > { %5656 = vst [vmem:[#allocation67_spill] sm:$0xff] %v4103_v4  ;;  %3118 = vmatpush.xpose.msk.msra.mxu2 %vm361_vm0, %v4075_v1 }
 0x210   : > { %3017 = vmatmul.msk.f32.gmra.mxu1 %vm361_vm0, %v465_v43 }
 0x211   : > { %3064 = vmatmul.msk.f32.gmra.mxu3 %vm361_vm0, %v512_v39  ;;  %3081 = vmatmul.msk.f32.vlgmr.msrb.gmra.mxu2 %vm361_vm0, %v3826_v12  ;;  %v468_v39 = vld [vmem:[%s3641_s13 + $0x298] sm:$0xff] }
 0x212   : > { %3119 = vmatpush.xpose.msk.msra.mxu2 %vm361_vm0, %v4067_v18 }
 0x215   : > { %v4115_v21 = vpop.f32.mrf.mxu1 }
 0x216   : > { %5657 = vst [vmem:[#allocation68_spill] sm:$0xff] %v4115_v21  ;;  %3120 = vmatpush.xpose.msk.msra.mxu2 %vm361_vm0, %v4057_v57 }
 0x218   : > { %3018 = vmatmul.msk.f32.gmra.mxu1 %vm361_vm0, %v466_v2  ;;  %v1469_v2 = vrot.slane %v3826_v12, 2 }
 0x219   : > { %3098 = vmatmul.msk.f32.vlgmr.msrb.gmra.mxu3 %vm361_vm0, %v1397_v25 }
 0x21a   : > { %3121 = vmatpush.xpose.msk.msra.mxu2 %vm361_vm0, %v4045_v13  ;;  %3115 = vmatmul.msk.f32.vlgmr.msra.gmra.mxu0 %vm361_vm0, %v1469_v2  ;;  %v470_v2 = vld [vmem:[%s3641_s13 + $0x2a8] sm:$0xff] }
 0x21d   : > { %v4129_v43 = vpop.f32.mrf.mxu1 }
 0x21e   : > { %5659 = vst [vmem:[#allocation70_spill] sm:$0xff] %v4129_v43  ;;  %3122 = vmatpush.xpose.msk.msra.mxu2 %vm361_vm0, %v4031_v52 }
 0x220   : > { %3019 = vmatmul.msk.f32.gmra.mxu1 %vm361_vm0, %v467_v7 }
 0x222   : > { %3123 = vmatpush.xpose.msk.msra.mxu2 %vm361_vm0, %v4014_v26 }
 0x225   : > { %v4149_v10 = vpop.f32.mrf.mxu1 }
 0x226   : > { %5661 = vst [vmem:[#allocation72_spill] sm:$0xff] %v4149_v10  ;;  %3124 = vmatpush.xpose.msk.msra.mxu2 %vm361_vm0, %v4004_v9 }
 0x228   : > { %3020 = vmatmul.msk.f32.gmra.mxu1 %vm361_vm0, %v468_v39  ;;  %v4175_v39 = vpop.f32.mrf.mxu3 }
 0x229   : > { %5665 = vst [vmem:[#allocation76_spill] sm:$0xff] %v4175_v39 }
 0x22a   : > { %3125 = vmatpush.xpose.msk.msra.mxu2 %vm361_vm0, %v3990_v61 }
 0x22d   : > { %v4159_v7 = vpop.f32.mrf.mxu1 }
 0x22e   : > { %5662 = vst [vmem:[#allocation73_spill] sm:$0xff] %v4159_v7  ;;  %3126 = vmatpush.xpose.msk.msra.mxu2 %vm361_vm0, %v3976_v48 }
 0x230   : > { %3021 = vmatmul.msk.f32.gmra.mxu1 %vm361_vm0, %v469_v28  ;;  %v4186_v37 = vpop.f32.mrf.mxu3 }
 0x231   : > { %5667 = vst [vmem:[#allocation78_spill] sm:$0xff] %v4186_v37 }
 0x232   : > { %3127 = vmatpush.xpose.msk.msra.mxu2 %vm361_vm0, %v3962_v34 }
 0x235   : > { %v4169_v25 = vpop.f32.mrf.mxu1 }
 0x236   : > { %5664 = vst [vmem:[#allocation75_spill] sm:$0xff] %v4169_v25  ;;  %3128 = vmatpush.xpose.msk.msra.mxu2 %vm361_vm0, %v3950_v22 }
 0x238   : > { %3022 = vmatmul.msk.f32.gmra.mxu1 %vm361_vm0, %v470_v2  ;;  %v4195_v42 = vpop.f32.mrf.mxu3 }
 0x239   : > { %5669 = vst [vmem:[#allocation80_spill] sm:$0xff] %v4195_v42 }
 0x23a   : > { %3129 = vmatpush.xpose.msk.msra.mxu2 %vm361_vm0, %v3938_v11 }
 0x23d   : > { %v4179_v28 = vpop.f32.mrf.mxu1 }
 0x23e   : > { %5666 = vst [vmem:[#allocation77_spill] sm:$0xff] %v4179_v28  ;;  %3130 = vmatpush.xpose.msk.msra.mxu2 %vm361_vm0, %v3926_v5 }
 0x240   : > { %3023 = vmatmul.msk.f32.gmra.mxu1 %vm361_vm0, %v471_v33  ;;  %v1305_v33 = vsub.f32 %v4038_v6, %v1304_v32  ;;  %v4202_v38 = vpop.f32.mrf.mxu3 }
 0x241   : > { %5671 = vst [vmem:[#allocation82_spill] sm:$0xff] %v4202_v38 }
 0x242   : > { %3131 = vmatpush.xpose.msk.msra.mxu2 %vm361_vm0, %v3916_v0  ;;  %v1306_v46 = vmul.f32 1.442695, %v1305_v33 }
 0x244   : > { %3402 = vpow2.f32 %v1306_v46  ;;  %v475_v46 = vld [vmem:[%s3641_s13 + $0x2d0] sm:$0xff] }
 0x245   : > { %v4190_v2 = vpop.f32.mrf.mxu1  ;;  %3132 = vmatmul.msk.f32.vlgmr.msra.gmra.mxu2 %vm361_vm0, %v1541_v23 }
 0x246   : > { %5668 = vst [vmem:[#allocation79_spill] sm:$0xff] %v4190_v2 }
 0x248   : > { %3024 = vmatmul.msk.f32.gmra.mxu1 %vm361_vm0, %v472_v29  ;;  %v474_v29 = vld [vmem:[%s3641_s13 + $0x2c8] sm:$0xff]  ;;  %v4211_v32 = vpop.f32.mrf.mxu3 }
 0x249   : > { %5673 = vst [vmem:[#allocation84_spill] sm:$0xff] %v4211_v32 }
 0x24a   : > { %v4204_v23 = vpop.eup %3402 }
 0x24b   : > { %1308 = vadd.xlane.f32.xlu0 %v4204_v23 }
 0x24d   : > { %v4198_v35 = vpop.f32.mrf.mxu1 }
 0x24e   : > { %5670 = vst [vmem:[#allocation81_spill] sm:$0xff] %v4198_v35 }
 0x250   : > { %3025 = vmatmul.msk.f32.gmra.mxu1 %vm361_vm0, %v473_v51  ;;  %v4219_v33 = vpop.f32.mrf.mxu3 }
 0x251   : > { %5676 = vst [vmem:[#allocation87_spill] sm:$0xff] %v4219_v33 }
 0x254   : > { %v4217_v51 = vpop.f32.mrf.mxu2 }
 0x255   : > { %v4206_v55 = vpop.f32.mrf.mxu1  ;;  %5675 = vst [vmem:[#allocation86_spill] sm:$0xff] %v4217_v51 }
 0x256   : > { %5672 = vst [vmem:[#allocation83_spill] sm:$0xff] %v4206_v55 }
 0x258   : > { %3026 = vmatmul.msk.f32.gmra.mxu1 %vm361_vm0, %v474_v29  ;;  %v4227_v29 = vpop.f32.mrf.mxu3 }
 0x259   : > { %5679 = vst [vmem:[#allocation90_spill] sm:$0xff] %v4227_v29 }
 0x25c   : > { %v4225_v60 = vpop.f32.mrf.mxu2 }
 0x25d   : > { %v4213_v6 = vpop.f32.mrf.mxu1  ;;  %5678 = vst [vmem:[#allocation89_spill] sm:$0xff] %v4225_v60 }
 0x25e   : > { %5674 = vst [vmem:[#allocation85_spill] sm:$0xff] %v4213_v6 }
 0x260   : > { %3027 = vmatmul.msk.f32.gmra.mxu1 %vm361_vm0, %v475_v46  ;;  %v4235_v53 = vpop.f32.mrf.mxu3 }
 0x261   : > { %5682 = vst [vmem:[#allocation93_spill] sm:$0xff] %v4235_v53 }
 0x264   : > { %v4233_v46 = vpop.f32.mrf.mxu2 }
 0x265   : > { %v4221_v41 = vpop.f32.mrf.mxu1  ;;  %5681 = vst [vmem:[#allocation92_spill] sm:$0xff] %v4233_v46 }
 0x266   : > { %5677 = vst [vmem:[#allocation88_spill] sm:$0xff] %v4221_v41 }
 0x268   : > { %3028 = vmatmul.msk.f32.gmra.mxu1 %vm361_vm0, %v476_v44  ;;  %v4243_v16 = vpop.f32.mrf.mxu3 }
 0x269   : > { %5685 = vst [vmem:[#allocation96_spill] sm:$0xff] %v4243_v16 }
 0x26c   : > { %v4241_v44 = vpop.f32.mrf.mxu2 }
 0x26d   : > { %v4229_v47 = vpop.f32.mrf.mxu1  ;;  %5684 = vst [vmem:[#allocation95_spill] sm:$0xff] %v4241_v44 }
 0x26e   : > { %5680 = vst [vmem:[#allocation91_spill] sm:$0xff] %v4229_v47 }
 0x270   : > { %3029 = vmatmul.msk.f32.gmra.mxu1 %vm361_vm0, %v477_v50 }
 0x274   : > { %v4249_v50 = vpop.f32.mrf.mxu2  ;;  %v4251_v24 = vpop.f32.mrf.mxu3 }
 0x275   : > { %v4237_v56 = vpop.f32.mrf.mxu1  ;;  %5687 = vst [vmem:[#allocation98_spill] sm:$0xff] %v4249_v50 }
 0x276   : > { %5683 = vst [vmem:[#allocation94_spill] sm:$0xff] %v4237_v56 }
 0x277   : > { %5688 = vst [vmem:[#allocation99_spill] sm:$0xff] %v4251_v24 }
 0x278   : > { %3030 = vmatmul.msk.f32.gmra.mxu1 %vm361_vm0, %v478_v59 }
 0x27c   : > { %v4259_v59 = vpop.f32.mrf.mxu3  ;;  %v4263_v36 = vpop.f32.mrf.mxu2 }
 0x27d   : > { %v4245_v62 = vpop.f32.mrf.mxu1  ;;  %5690 = vst [vmem:[#allocation101_spill] sm:$0xff] %v4259_v59 }
 0x27e   : > { %5686 = vst [vmem:[#allocation97_spill] sm:$0xff] %v4245_v62 }
 0x27f   : > { %5691 = vst [vmem:[#allocation102_spill] sm:$0xff] %v4263_v36 }
 0x280   : > { %3031 = vmatmul.msk.f32.gmra.mxu1 %vm361_vm0, %v479_v19 }
 0x284   : > { %v4271_v45 = vpop.f32.mrf.mxu3 }
 0x285   : > { %v4253_v27 = vpop.f32.mrf.mxu1  ;;  %5693 = vst [vmem:[#allocation104_spill] sm:$0xff] %v4271_v45 }
 0x286   : > { %5689 = vst [vmem:[#allocation100_spill] sm:$0xff] %v4253_v27  ;;  %3133 = vmatpush.xpose.msk.msra.mxu3 %vm361_vm0, %v4253_v27  ;;  %v482_v27 = vld [vmem:[%s3641_s13 + $0x308] sm:$0xff] }
 0x288   : > { %3032 = vmatmul.msk.f32.gmra.mxu1 %vm361_vm0, %v480_v31  ;;  %v4275_v31 = vpop.f32.mrf.mxu2 }
 0x289   : > { %5694 = vst [vmem:[#allocation105_spill] sm:$0xff] %v4275_v31  ;;  %3167 = vmatpush.xpose.msk.msrb.mxu2 %vm361_vm0, %v4275_v31 }
 0x28a   : > { %3134 = vmatpush.xpose.msk.msra.mxu3 %vm361_vm0, %v4245_v62 }
 0x28d   : > { %v4265_v19 = vpop.f32.mrf.mxu1  ;;  %3168 = vmatpush.xpose.msk.msrb.mxu2 %vm361_vm0, %v4263_v36 }
 0x28e   : > { %5692 = vst [vmem:[#allocation103_spill] sm:$0xff] %v4265_v19  ;;  %3135 = vmatpush.xpose.msk.msra.mxu3 %vm361_vm0, %v4237_v56 }
 0x290   : > { %3033 = vmatmul.msk.f32.gmra.mxu1 %vm361_vm0, %v481_v40  ;;  %v4287_v40 = vpop.f32.mrf.mxu3 }
 0x291   : > { %5696 = vst [vmem:[#allocation107_spill] sm:$0xff] %v4287_v40  ;;  %3169 = vmatpush.xpose.msk.msrb.mxu2 %vm361_vm0, %v4249_v50 }
 0x292   : > { %3136 = vmatpush.xpose.msk.msra.mxu3 %vm361_vm0, %v4229_v47  ;;  %v4291_v47 = vpop.f32.mrf.mxu2 }
 0x293   : > { %5697 = vst [vmem:[#allocation108_spill] sm:$0xff] %v4291_v47 }
 0x295   : > { %v4279_v62 = vpop.f32.mrf.mxu1  ;;  %3170 = vmatpush.xpose.msk.msrb.mxu2 %vm361_vm0, %v4241_v44 }
 0x296   : > { %5695 = vst [vmem:[#allocation106_spill] sm:$0xff] %v4279_v62  ;;  %3137 = vmatpush.xpose.msk.msra.mxu3 %vm361_vm0, %v4221_v41 }
 0x297   : > { %v1537_v41 = vpop.f32.mrf.mxu0 }
 0x298   : > { %3034 = vmatmul.msk.f32.gmra.mxu1 %vm361_vm0, %v482_v27  ;;  %v4303_v27 = vpop.f32.mrf.mxu3  ;;  %1540 = vst [vmem:[#allocation2 + $0x2] sm:$0x1] %v1537_v41  ;;  %v485_v41 = vld [vmem:[%s3641_s13 + $0x320] sm:$0xff] }
 0x299   : > { %5699 = vst [vmem:[#allocation110_spill] sm:$0xff] %v4303_v27  ;;  %3171 = vmatpush.xpose.msk.msrb.mxu2 %vm361_vm0, %v4233_v46 }
 0x29a   : > { %3138 = vmatpush.xpose.msk.msra.mxu3 %vm361_vm0, %v4213_v6  ;;  %v1393_v6 = vpop.f32.mrf.mxu2 }
 0x29b   : > { %1396 = vst [vmem:[#allocation2] sm:$0x1] %v1393_v6 }
 0x29d   : > { %v4295_v56 = vpop.f32.mrf.mxu1  ;;  %3172 = vmatpush.xpose.msk.msrb.mxu2 %vm361_vm0, %v4225_v60 }
 0x29e   : > { %5698 = vst [vmem:[#allocation109_spill] sm:$0xff] %v4295_v56  ;;  %3139 = vmatpush.xpose.msk.msra.mxu3 %vm361_vm0, %v4206_v55  ;;  %v484_v55 = vld [vmem:[%s3641_s13 + $0x318] sm:$0xff] }
 0x2a0   : > { %3035 = vmatmul.msk.f32.gmra.mxu1 %vm361_vm0, %v483_v49  ;;  %v1465_v49 = vpop.f32.mrf.mxu3 }
 0x2a1   : > { %1468 = vst [vmem:[#allocation2 + $0x1] sm:$0x1] %v1465_v49  ;;  %3173 = vmatpush.xpose.msk.msrb.mxu2 %vm361_vm0, %v4217_v51 }
 0x2a2   : > { %3140 = vmatpush.xpose.msk.msra.mxu3 %vm361_vm0, %v4198_v35 }
 0x2a5   : > { %v4309_v54 = vpop.f32.mrf.mxu1 }
 0x2a6   : > { %5700 = vst [vmem:[#allocation111_spill] sm:$0xff] %v4309_v54  ;;  %3141 = vmatpush.xpose.msk.msra.mxu3 %vm361_vm0, %v4190_v2  ;;  %v486_v2 = vld [vmem:[%s3641_s13 + $0x328] sm:$0xff] }
 0x2a8   : > { %3036 = vmatmul.msk.f32.gmra.mxu1 %vm361_vm0, %v484_v55 }
 0x2aa   : > { %3142 = vmatpush.xpose.msk.msra.mxu3 %vm361_vm0, %v4179_v28 }
 0x2ad   : > { %v4321_v6 = vpop.f32.mrf.mxu1 }
 0x2ae   : > { %5701 = vst [vmem:[#allocation112_spill] sm:$0xff] %v4321_v6  ;;  %3143 = vmatpush.xpose.msk.msra.mxu3 %vm361_vm0, %v4169_v25  ;;  %v487_v25 = vld [vmem:[%s3641_s13 + $0x330] sm:$0xff] }
 0x2b0   : > { %3037 = vmatmul.msk.f32.gmra.mxu1 %vm361_vm0, %v485_v41 }
 0x2b2   : > { %3144 = vmatpush.xpose.msk.msra.mxu3 %vm361_vm0, %v4159_v7 }
 0x2b5   : > { %v4329_v55 = vpop.f32.mrf.mxu1 }
 0x2b6   : > { %5702 = vst [vmem:[#allocation113_spill] sm:$0xff] %v4329_v55  ;;  %3145 = vmatpush.xpose.msk.msra.mxu3 %vm361_vm0, %v4149_v10 }
 0x2b8   : > { %3038 = vmatmul.msk.f32.gmra.mxu1 %vm361_vm0, %v486_v2  ;;  %v1613_v2 = vrot.slane %v3826_v12, 4 }
 0x2ba   : > { %3146 = vmatpush.xpose.msk.msra.mxu3 %vm361_vm0, %v4129_v43  ;;  %v488_v43 = vld [vmem:[%s3641_s13 + $0x338] sm:$0xff] }
 0x2bd   : > { %v4337_v49 = vpop.f32.mrf.mxu1 }
 0x2be   : > { %5703 = vst [vmem:[#allocation114_spill] sm:$0xff] %v4337_v49  ;;  %3147 = vmatpush.xpose.msk.msra.mxu3 %vm361_vm0, %v4115_v21 }
 0x2c0   : > { %3039 = vmatmul.msk.f32.gmra.mxu1 %vm361_vm0, %v487_v25 }
 0x2c2   : > { %3148 = vmatpush.xpose.msk.msra.mxu3 %vm361_vm0, %v4103_v4 }
 0x2c5   : > { %v4348_v41 = vpop.f32.mrf.mxu1  ;;  %3149 = vmatmul.msk.f32.vlgmr.msra.gmra.mxu3 %vm361_vm0, %v1613_v2 }
 0x2c6   : > { %3184 = vmatpush.xpose.msk.msrb.mxu3 %vm361_vm0, %v4303_v27  ;;  %5704 = vst [vmem:[#allocation115_spill] sm:$0xff] %v4348_v41  ;;  %v489_v27 = vld [vmem:[%s3641_s13 + $0x340] sm:$0xff]  ;;  %s5157_s13 = sand.u32 1, %s3505_s28  }
 0x2c7   : > { %s5592_s17 = sshll.u32 %s5157_s13, 3  ;;  %s2780_s10 = scalar_lea.sflag [#allocation7], %s5157_s13 }
 0x2c8   : > { %3040 = vmatmul.msk.f32.gmra.mxu1 %vm361_vm0, %v488_v43  ;;  %v1609_v21 = vpop.f32.mrf.mxu2  ;;  %s5162_s20 = scalar_lea.vmem [#allocation6], %s5592_s17 }
 0x2c9   : > { %1612 = vst [vmem:[#allocation2 + $0x3] sm:$0x1] %v1609_v21  ;;  %s2806_s25 = sshll.u32 %s5162_s20, 4  ;;  %s2807_s25 = int_to_ptr.vmem [resolvable:$true] %s2806_s25 }
 0x2ca   : > { %3185 = vmatpush.xpose.msk.msrb.mxu3 %vm361_vm0, %v4287_v40 }
 0x2cd   : > { %v4357_v25 = vpop.f32.mrf.mxu1 }
 0x2ce   : > { %3186 = vmatpush.xpose.msk.msrb.mxu3 %vm361_vm0, %v4271_v45  ;;  %5705 = vst [vmem:[#allocation116_spill] sm:$0xff] %v4357_v25 }
 0x2d0   : > { %3041 = vmatmul.msk.f32.gmra.mxu1 %vm361_vm0, %v489_v27 }
 0x2d2   : > { %3187 = vmatpush.xpose.msk.msrb.mxu3 %vm361_vm0, %v4259_v59 }
 0x2d5   : > { %v4365_v2 = vpop.f32.mrf.mxu1 }
 0x2d6   : > { %3188 = vmatpush.xpose.msk.msrb.mxu3 %vm361_vm0, %v4251_v24  ;;  %5706 = vst [vmem:[#allocation117_spill] sm:$0xff] %v4365_v2 }
 0x2da   : > { %3189 = vmatpush.xpose.msk.msrb.mxu3 %vm361_vm0, %v4243_v16 }
 0x2dd   : > { %v4371_v21 = vpop.f32.mrf.mxu1 }
 0x2de   : > { %3190 = vmatpush.xpose.msk.msrb.mxu3 %vm361_vm0, %v4235_v53  ;;  %5707 = vst [vmem:[#allocation118_spill] sm:$0xff] %v4371_v21 }
 0x2e2   : > { %3191 = vmatpush.xpose.msk.msrb.mxu3 %vm361_vm0, %v4227_v29 }
 0x2e5   : > { %v4377_v43 = vpop.f32.mrf.mxu1 }
 0x2e6   : > { %3192 = vmatpush.xpose.msk.msrb.mxu3 %vm361_vm0, %v4219_v33  ;;  %5708 = vst [vmem:[#allocation119_spill] sm:$0xff] %v4377_v43  ;;  %v1309_v33 = vpop.xlane.xlu0 %1308 }
 0x2e7   : > { %3404 = vrcp.f32 %v1309_v33  ;;  %vm1315_vm1 = vweird.f32 %v1309_v33 }
 0x2ea   : > { %3193 = vmatpush.xpose.msk.msrb.mxu3 %vm361_vm0, %v4211_v32 }
 0x2ed   : > { %v4383_v27 = vpop.f32.mrf.mxu1 }
 0x2ee   : > { %3194 = vmatpush.xpose.msk.msrb.mxu3 %vm361_vm0, %v4202_v38  ;;  %5709 = vst [vmem:[#allocation120_spill] sm:$0xff] %v4383_v27 }
 0x2f2   : > { %3195 = vmatpush.xpose.msk.msrb.mxu3 %vm361_vm0, %v4195_v42  ;;  %v1829_v42 = vrot.slane %v3826_v12, 7 }
 0x2f5   : > { %v4389_v29 = vpop.f32.mrf.mxu1 }
 0x2f6   : > { %3196 = vmatpush.xpose.msk.msrb.mxu3 %vm361_vm0, %v4186_v37  ;;  %5710 = vst [vmem:[#allocation121_spill] sm:$0xff] %v4389_v29  ;;  %v3405_v37 = vpop.eup %3404 }
 0x2f7   : > { %vm1316_vm2 = vweird.f32 %v3405_v37 }
 0x2f8   : > { %vm1317_vm3 = vmor %vm1315_vm1, %vm1316_vm2 }
 0x2fa   : > { %3197 = vmatpush.xpose.msk.msrb.mxu3 %vm361_vm0, %v4175_v39  ;;  %v1311_v39 = vmul.f32 %v3405_v37, %v1309_v33 }
 0x2fd   : > { %v4395_v32 = vpop.f32.mrf.mxu1 }
 0x2fe   : > { %3198 = vmatpush.xpose.msk.msrb.mxu3 %vm361_vm0, %v4165_v20  ;;  %5711 = vst [vmem:[#allocation122_spill] sm:$0xff] %v4395_v32 }
 0x302   : > { %3199 = vmatpush.xpose.msk.msrb.mxu3 %vm361_vm0, %v4291_v47  ;;  %v1312_v47 = vsub.f32 1.0, %v1311_v39 }
 0x305   : > { %3200 = vmatmul.msk.f32.vlgmr.msrb.gmra.mxu3 %vm361_vm0, %v1829_v42  ;;  %v4404_v38 = vpop.f32.mrf.mxu1  ;;  %v1313_v42 = vmul.f32 %v3405_v37, %v1312_v47 }
 0x306   : > { %1995 = vmatpush.msra.mxu3 %v4091_v17  ;;  %5712 = vst [vmem:[#allocation123_spill] sm:$0xff] %v4404_v38  ;;  %3150 = vmatpush.xpose.msk.msrb.mxu0 %vm361_vm0, %v4404_v38  ;;  %v5756_v17 = vld [vmem:[#allocation69_spill] sm:$0xff] }
 0x307   : > { %v1314_v39 = vadd.f32 %v3405_v37, %v1313_v42 }
 0x308   : > { %1996 = vmatpush.msra.mxu3 %v4083_v14 }
 0x30a   : > { %1997 = vmatpush.msra.mxu3 %v4075_v1  ;;  %3151 = vmatpush.xpose.msk.msrb.mxu0 %vm361_vm0, %v4395_v32  ;;  %v1321_v1 = vand.u32 2147483648, %v1309_v33 }
 0x30c   : > { %1998 = vmatpush.msra.mxu3 %v4067_v18  ;;  %v1322_v47 = vor.u32 1.1754944e-38, %v1321_v1  ;;  %v5755_v18 = vld [vmem:[#allocation35_spill] sm:$0xff] }
 0x30d   : > { %v4414_v14 = vpop.f32.mrf.mxu1 }
 0x30e   : > { %1999 = vmatpush.msra.mxu3 %v4057_v57  ;;  %5713 = vst [vmem:[#allocation124_spill] sm:$0xff] %v4414_v14  ;;  %3152 = vmatpush.xpose.msk.msrb.mxu0 %vm361_vm0, %v4389_v29  ;;  %v1319_v57 = vand.u32 2147483647, %v1309_v33 }
 0x310   : > { %2000 = vmatpush.msra.mxu3 %v4045_v13  ;;  %vm1320_vm4 = vcmp.eq.f32.partialorder %v1319_v57, 8.507059e+37 }
 0x312   : > { %2001 = vmatpush.msra.mxu3 %v4031_v52  ;;  %3153 = vmatpush.xpose.msk.msrb.mxu0 %vm361_vm0, %v4383_v27  ;;  %v1318_v52 = vsel %vm1317_vm3, %v3405_v37, %v1314_v39 }
 0x313   : > { %v1323_v42 = vsel %vm1320_vm4, %v1322_v47, %v1318_v52  ;;  %v1685_v47 = vrot.slane %v3826_v12, 5 }
 0x314   : > { %2002 = vmatpush.msra.mxu3 %v4014_v26  ;;  %v4431_v33 = vmul.f32 %v4204_v23, %v1323_v42  ;;  %v5754_v26 = vld [vmem:[#allocation71_spill] sm:$0xff] }
 0x315   : > { %v4424_v13 = vpop.f32.mrf.mxu1 }
 0x316   : > { %2003 = vmatpush.msra.mxu3 %v4004_v9  ;;  %5714 = vst [vmem:[#allocation125_spill] sm:$0xff] %v4424_v13  ;;  %3154 = vmatpush.xpose.msk.msrb.mxu0 %vm361_vm0, %v4377_v43  ;;  %v1993_v52 = vrot.slane %v4431_v33, 3  ;;  %v5753_v9 = vld [vmem:[#allocation37_spill] sm:$0xff] }
 0x318   : > { %2004 = vmatpush.msra.mxu3 %v3990_v61  ;;  %v5751_v61 = vld [vmem:[#allocation39_spill] sm:$0xff] }
 0x31a   : > { %2005 = vmatpush.msra.mxu3 %v3976_v48  ;;  %3155 = vmatpush.xpose.msk.msrb.mxu0 %vm361_vm0, %v4371_v21  ;;  %v5750_v48 = vld [vmem:[#allocation11_spill] sm:$0xff] }
 0x31c   : > { %2006 = vmatpush.msra.mxu3 %v3962_v34  ;;  %v5749_v34 = vld [vmem:[#allocation41_spill] sm:$0xff] }
 0x31d   : > { %v4437_v37 = vpop.f32.mrf.mxu1 }
 0x31e   : > { %2007 = vmatpush.msra.mxu3 %v3950_v22  ;;  %5715 = vst [vmem:[#allocation126_spill] sm:$0xff] %v4437_v37  ;;  %3156 = vmatpush.xpose.msk.msrb.mxu0 %vm361_vm0, %v4365_v2  ;;  %v5746_v22 = vld [vmem:[#allocation13_spill] sm:$0xff] }
 0x320   : > { %2008 = vmatpush.msra.mxu3 %v3938_v11  ;;  %v5743_v11 = vld [vmem:[#allocation47_spill] sm:$0xff] }
 0x322   : > { %2009 = vmatpush.msra.mxu3 %v3926_v5  ;;  %3157 = vmatpush.xpose.msk.msrb.mxu0 %vm361_vm0, %v4357_v25  ;;  %v5741_v5 = vld [vmem:[#allocation49_spill] sm:$0xff] }
 0x324   : > { %2010 = vmatpush.msra.mxu3 %v3916_v0  ;;  %v5735_v0 = vld [vmem:[#allocation20_spill] sm:$0xff] }
 0x325   : > { %2011 = vmatmul.f32.vlgmr.msra.gmra.mxu3 %v1993_v52  ;;  %v4448_v57 = vpop.f32.mrf.mxu1 }
 0x326   : > { %2064 = vmatpush.msrb.mxu3 %v4275_v31  ;;  %5716 = vst [vmem:[#allocation127_spill] sm:$0xff] %v4448_v57  ;;  %3158 = vmatpush.xpose.msk.msrb.mxu0 %vm361_vm0, %v4348_v41  ;;  %v5731_v31 = vld [vmem:[#allocation23_spill] sm:$0xff] }
 0x328   : > { %2065 = vmatpush.msrb.mxu3 %v4263_v36  ;;  %v5730_v36 = vld [vmem:[#allocation32_spill] sm:$0xff] }
 0x32a   : > { %2066 = vmatpush.msrb.mxu3 %v4249_v50  ;;  %3159 = vmatpush.xpose.msk.msrb.mxu0 %vm361_vm0, %v4337_v49  ;;  %v5729_v50 = vld [vmem:[#allocation34_spill] sm:$0xff] }
 0x32c   : > { %2067 = vmatpush.msrb.mxu3 %v4241_v44  ;;  %v5727_v44 = vld [vmem:[#allocation38_spill] sm:$0xff] }
 0x32d   : > { %v4458_v1 = vpop.f32.mrf.mxu1 }
 0x32e   : > { %2068 = vmatpush.msrb.mxu3 %v4233_v46  ;;  %5717 = vst [vmem:[#allocation128_spill] sm:$0xff] %v4458_v1  ;;  %3160 = vmatpush.xpose.msk.msrb.mxu0 %vm361_vm0, %v4329_v55  ;;  %v5725_v46 = vld [vmem:[#allocation42_spill] sm:$0xff] }
 0x330   : > { %2069 = vmatpush.msrb.mxu3 %v4225_v60  ;;  %v5723_v60 = vld [vmem:[#allocation46_spill] sm:$0xff] }
 0x332   : > { %2070 = vmatpush.msrb.mxu3 %v4217_v51  ;;  %3161 = vmatpush.xpose.msk.msrb.mxu0 %vm361_vm0, %v4321_v6 }
 0x335   : > { %v4464_v23 = vpop.f32.mrf.mxu1 }
 0x336   : > { %5718 = vst [vmem:[#allocation129_spill] sm:$0xff] %v4464_v23  ;;  %3162 = vmatpush.xpose.msk.msrb.mxu0 %vm361_vm0, %v4309_v54 }
 0x33a   : > { %3163 = vmatpush.xpose.msk.msrb.mxu0 %vm361_vm0, %v4295_v56 }
 0x33d   : > { %v4470_v39 = vpop.f32.mrf.mxu1 }
 0x33e   : > { %5719 = vst [vmem:[#allocation130_spill] sm:$0xff] %v4470_v39  ;;  %3164 = vmatpush.xpose.msk.msrb.mxu0 %vm361_vm0, %v4279_v62 }
 0x342   : > { %3165 = vmatpush.xpose.msk.msrb.mxu0 %vm361_vm0, %v4265_v19 }
 0x345   : > { %v4478_v42 = vpop.f32.mrf.mxu1  ;;  %3166 = vmatmul.msk.f32.vlgmr.msrb.gmra.mxu0 %vm361_vm0, %v1685_v47  ;;  %v5722_v47 = vld [vmem:[#allocation48_spill] sm:$0xff] }
 0x346   : > { %1924 = vmatpush.msra.mxu0 %v3956_v30  ;;  %5720 = vst [vmem:[#allocation131_spill] sm:$0xff] %v4478_v42 }
 0x348   : > { %1925 = vmatpush.msra.mxu0 %v3944_v15  ;;  %v1681_v52 = vpop.f32.mrf.mxu3 }
 0x349   : > { %1684 = vst [vmem:[#allocation2 + $0x4] sm:$0x1] %v1681_v52  ;;  %v5724_v52 = vld [vmem:[#allocation44_spill] sm:$0xff] }
 0x34a   : > { %1926 = vmatpush.msra.mxu0 %v3932_v8 }
 0x34c   : > { %1927 = vmatpush.msra.mxu0 %v3922_v3 }
 0x34d   : > { %v4485_v51 = vpop.f32.mrf.mxu1 }
 0x34e   : > { %1928 = vmatpush.msra.mxu0 %v3912_v63  ;;  %5721 = vst [vmem:[#allocation132_spill] sm:$0xff] %v4485_v51  ;;  %3174 = vmatpush.xpose.msk.msrb.mxu2 %vm361_vm0, %v4485_v51 }
 0x34f   : > { %2071 = vmatpush.msrb.mxu3 %v4485_v51  ;;  %v5726_v51 = vld [vmem:[#allocation40_spill] sm:$0xff] }
 0x350   : > { %1929 = vmatpush.msra.mxu0 %v3904_v58 }
 0x351   : > { %2072 = vmatpush.msrb.mxu3 %v4478_v42 }
 0x352   : > { %1930 = vmatpush.msra.mxu0 %v5722_v47  ;;  %3175 = vmatpush.xpose.msk.msrb.mxu2 %vm361_vm0, %v4478_v42  ;;  %v5728_v42 = vld [vmem:[#allocation36_spill] sm:$0xff] }
 0x353   : > { %2073 = vmatpush.msrb.mxu3 %v4470_v39 }
 0x354   : > { %1931 = vmatpush.msra.mxu0 %v5723_v60 }
 0x355   : > { %2074 = vmatpush.msrb.mxu3 %v4464_v23 }
 0x356   : > { %1932 = vmatpush.msra.mxu0 %v5724_v52  ;;  %3176 = vmatpush.xpose.msk.msrb.mxu2 %vm361_vm0, %v4470_v39  ;;  %v2062_v39 = vrot.slane %v4431_v33, 6 }
 0x357   : > { %2075 = vmatpush.msrb.mxu3 %v4458_v1 }
 0x358   : > { %1933 = vmatpush.msra.mxu0 %v5725_v46 }
 0x359   : > { %2076 = vmatpush.msrb.mxu3 %v4448_v57 }
 0x35a   : > { %1934 = vmatpush.msra.mxu0 %v5726_v51  ;;  %3177 = vmatpush.xpose.msk.msrb.mxu2 %vm361_vm0, %v4464_v23  ;;  %v5732_v23 = vld [vmem:[#allocation30_spill] sm:$0xff] }
 0x35b   : > { %2077 = vmatpush.msrb.mxu3 %v4437_v37 }
 0x35c   : > { %1935 = vmatpush.msra.mxu0 %v5727_v44  ;;  %v5769_v44 = vld [vmem:[#allocation24_spill] sm:$0xff] }
 0x35d   : > { %2078 = vmatpush.msrb.mxu3 %v4424_v13 }
 0x35e   : > { %1936 = vmatpush.msra.mxu0 %v5728_v42  ;;  %3178 = vmatpush.xpose.msk.msrb.mxu2 %vm361_vm0, %v4458_v1  ;;  %v5733_v1 = vld [vmem:[#allocation22_spill] sm:$0xff]  ;;  %v5760_v42 = vld [vmem:[#allocation97_spill] sm:$0xff] }
 0x35f   : > { %2079 = vmatpush.msrb.mxu3 %v4414_v14 }
 0x360   : > { %1937 = vmatpush.msra.mxu0 %v5729_v50  ;;  %2080 = vmatmul.f32.vlgmr.msrb.gmra.mxu3 %v2062_v39  ;;  %v5734_v39 = vld [vmem:[#allocation21_spill] sm:$0xff] }
 0x361   : > { %3218 = vmatpush.xpose.msk.msra.mxu3 %vm361_vm0, %v5731_v31 }
 0x362   : > { %1938 = vmatpush.msra.mxu0 %v5730_v36  ;;  %3179 = vmatpush.xpose.msk.msrb.mxu2 %vm361_vm0, %v4448_v57  ;;  %v5736_v57 = vld [vmem:[#allocation19_spill] sm:$0xff]  ;;  %v5758_v36 = vld [vmem:[#allocation100_spill] sm:$0xff] }
 0x364   : > { %1939 = vmatpush.msra.mxu0 %v5732_v23  ;;  %v5757_v23 = vld [vmem:[#allocation33_spill] sm:$0xff] }
 0x365   : > { %1940 = vmatmul.f32.vlgmr.msra.gmra.mxu0 %v4431_v33  ;;  %3219 = vmatpush.xpose.msk.msra.mxu3 %vm361_vm0, %v5733_v1 }
 0x366   : > { %1949 = vmatpush.msrb.mxu0 %v5731_v31  ;;  %3180 = vmatpush.xpose.msk.msrb.mxu2 %vm361_vm0, %v4437_v37  ;;  %v5737_v31 = vld [vmem:[#allocation18_spill] sm:$0xff] }
 0x367   : > { %v5738_v37 = vld [vmem:[#allocation50_spill] sm:$0xff] }
 0x368   : > { %1950 = vmatpush.msrb.mxu0 %v5733_v1  ;;  %v1757_v1 = vrot.slane %v3826_v12, 6  ;;  %v5745_v12 = vld [vmem:[#allocation45_spill] sm:$0xff] }
 0x369   : > { %3220 = vmatpush.xpose.msk.msra.mxu3 %vm361_vm0, %v5734_v39 }
 0x36a   : > { %1951 = vmatpush.msrb.mxu0 %v5734_v39  ;;  %3181 = vmatpush.xpose.msk.msrb.mxu2 %vm361_vm0, %v4424_v13  ;;  %v5739_v39 = vld [vmem:[#allocation17_spill] sm:$0xff]  ;;  %v5740_v13 = vld [vmem:[#allocation16_spill] sm:$0xff] }
 0x36c   : > { %1952 = vmatpush.msrb.mxu0 %v5735_v0 }
 0x36d   : > { %3221 = vmatpush.xpose.msk.msra.mxu3 %vm361_vm0, %v5735_v0  ;;  %v5742_v0 = vld [vmem:[#allocation15_spill] sm:$0xff] }
 0x36e   : > { %1953 = vmatpush.msrb.mxu0 %v5736_v57  ;;  %3182 = vmatpush.xpose.msk.msrb.mxu2 %vm361_vm0, %v4414_v14  ;;  %v5744_v14 = vld [vmem:[#allocation14_spill] sm:$0xff] }
 0x370   : > { %1954 = vmatpush.msrb.mxu0 %v5737_v31 }
 0x371   : > { %3222 = vmatpush.xpose.msk.msra.mxu3 %vm361_vm0, %v5736_v57  ;;  %3183 = vmatmul.msk.f32.vlgmr.msrb.gmra.mxu2 %vm361_vm0, %v1757_v1  ;;  %v5747_v57 = vld [vmem:[#allocation43_spill] sm:$0xff]  ;;  %v5748_v1 = vld [vmem:[#allocation12_spill] sm:$0xff] }
 0x372   : > { %1972 = vmatpush.msra.mxu2 %v5738_v37  ;;  %1955 = vmatpush.msrb.mxu0 %v5739_v39 }
 0x374   : > { %1956 = vmatpush.msrb.mxu0 %v5740_v13  ;;  %1973 = vmatpush.msra.mxu2 %v5741_v5 }
 0x375   : > { %3223 = vmatpush.xpose.msk.msra.mxu3 %vm361_vm0, %v5737_v31  ;;  %v5752_v31 = vld [vmem:[#allocation10_spill] sm:$0xff] }
 0x376   : > { %1957 = vmatpush.msrb.mxu0 %v5742_v0  ;;  %1974 = vmatpush.msra.mxu2 %v5743_v11 }
 0x378   : > { %1958 = vmatpush.msrb.mxu0 %v5744_v14  ;;  %1975 = vmatpush.msra.mxu2 %v5745_v12 }
 0x379   : > { %3224 = vmatpush.xpose.msk.msra.mxu3 %vm361_vm0, %v5739_v39  ;;  %v1947_v39 = vrot.slane %v4431_v33, 1 }
 0x37a   : > { %1959 = vmatpush.msrb.mxu0 %v5746_v22  ;;  %1976 = vmatpush.msra.mxu2 %v5747_v57 }
 0x37c   : > { %1960 = vmatpush.msrb.mxu0 %v5748_v1  ;;  %1977 = vmatpush.msra.mxu2 %v5749_v34 }
 0x37d   : > { %3225 = vmatpush.xpose.msk.msra.mxu3 %vm361_vm0, %v5740_v13  ;;  %v5759_v13 = vld [vmem:[#allocation31_spill] sm:$0xff] }
 0x37e   : > { %1961 = vmatpush.msrb.mxu0 %v5750_v48  ;;  %1978 = vmatpush.msra.mxu2 %v5751_v61 }
 0x380   : > { %1962 = vmatpush.msrb.mxu0 %v5752_v31  ;;  %1979 = vmatpush.msra.mxu2 %v5753_v9  ;;  %v5763_v9 = vld [vmem:[#allocation27_spill] sm:$0xff] }
 0x381   : > { %3226 = vmatpush.xpose.msk.msra.mxu3 %vm361_vm0, %v5742_v0  ;;  %v5762_v0 = vld [vmem:[#allocation94_spill] sm:$0xff] }
 0x382   : > { %1963 = vmatpush.msrb.mxu0 %v5754_v26  ;;  %1980 = vmatpush.msra.mxu2 %v5755_v18  ;;  %v5761_v18 = vld [vmem:[#allocation29_spill] sm:$0xff] }
 0x384   : > { %1964 = vmatpush.msrb.mxu0 %v5756_v17  ;;  %1981 = vmatpush.msra.mxu2 %v5757_v23  ;;  %v5765_v23 = vld [vmem:[#allocation26_spill] sm:$0xff] }
 0x385   : > { %1965 = vmatmul.f32.vlgmr.msrb.gmra.mxu0 %v1947_v39  ;;  %3227 = vmatpush.xpose.msk.msra.mxu3 %vm361_vm0, %v5744_v14  ;;  %v5764_v39 = vld [vmem:[#allocation91_spill] sm:$0xff]  ;;  %v5767_v14 = vld [vmem:[#allocation25_spill] sm:$0xff] }
 0x386   : > { %2018 = vmatpush.msra.mxu0 %v5758_v36  ;;  %1982 = vmatpush.msra.mxu2 %v5759_v13  ;;  %v5766_v13 = vld [vmem:[#allocation88_spill] sm:$0xff] }
 0x388   : > { %v1897_v50 = vpop.f32.mrf.mxu3  ;;  %2019 = vmatpush.msra.mxu0 %v5760_v42  ;;  %1983 = vmatpush.msra.mxu2 %v5761_v18  ;;  %v5768_v18 = vld [vmem:[#allocation85_spill] sm:$0xff] }
 0x389   : > { %1900 = vst [vmem:[#allocation2 + $0x7] sm:$0x1] %v1897_v50  ;;  %3228 = vmatpush.xpose.msk.msra.mxu3 %vm361_vm0, %v5746_v22  ;;  %v1970_v50 = vrot.slane %v4431_v33, 2  ;;  %v5771_v22 = vld [vmem:[#allocation79_spill] sm:$0xff] }
 0x38a   : > { %2020 = vmatpush.msra.mxu0 %v5762_v0  ;;  %1984 = vmatpush.msra.mxu2 %v5763_v9  ;;  %v5770_v9 = vld [vmem:[#allocation83_spill] sm:$0xff] }
 0x38c   : > { %2021 = vmatpush.msra.mxu0 %v5764_v39  ;;  %1985 = vmatpush.msra.mxu2 %v5765_v23 }
 0x38d   : > { %3229 = vmatpush.xpose.msk.msra.mxu3 %vm361_vm0, %v5748_v1  ;;  %v5775_v1 = vld [vmem:[#allocation110_spill] sm:$0xff] }
 0x38e   : > { %2022 = vmatpush.msra.mxu0 %v5766_v13  ;;  %1986 = vmatpush.msra.mxu2 %v5767_v14 }
 0x390   : > { %2023 = vmatpush.msra.mxu0 %v5768_v18  ;;  %1987 = vmatpush.msra.mxu2 %v5769_v44 }
 0x391   : > { %1988 = vmatmul.f32.vlgmr.msra.gmra.mxu2 %v1970_v50  ;;  %3230 = vmatpush.xpose.msk.msra.mxu3 %vm361_vm0, %v5750_v48  ;;  %v5772_v50 = vld [vmem:[#allocation75_spill] sm:$0xff]  ;;  %v5774_v48 = vld [vmem:[#allocation68_spill] sm:$0xff] }
 0x392   : > { %2024 = vmatpush.msra.mxu0 %v5770_v9  ;;  %2041 = vmatpush.msrb.mxu2 %v4404_v38 }
 0x394   : > { %2025 = vmatpush.msra.mxu0 %v4198_v35  ;;  %2042 = vmatpush.msrb.mxu2 %v4395_v32 }
 0x395   : > { %3231 = vmatpush.xpose.msk.msra.mxu3 %vm361_vm0, %v5752_v31  ;;  %v5773_v31 = vld [vmem:[#allocation70_spill] sm:$0xff] }
 0x396   : > { %2026 = vmatpush.msra.mxu0 %v5771_v22  ;;  %2043 = vmatpush.msrb.mxu2 %v4389_v29 }
 0x398   : > { %2027 = vmatpush.msra.mxu0 %v4179_v28  ;;  %2044 = vmatpush.msrb.mxu2 %v4383_v27 }
 0x399   : > { %3232 = vmatpush.xpose.msk.msra.mxu3 %vm361_vm0, %v5754_v26  ;;  %v2016_v26 = vrot.slane %v4431_v33, 4 }
 0x39a   : > { %2028 = vmatpush.msra.mxu0 %v5772_v50  ;;  %2045 = vmatpush.msrb.mxu2 %v4377_v43 }
 0x39c   : > { %2029 = vmatpush.msra.mxu0 %v4159_v7  ;;  %2046 = vmatpush.msrb.mxu2 %v4371_v21 }
 0x39d   : > { %3233 = vmatpush.xpose.msk.msra.mxu3 %vm361_vm0, %v5756_v17 }
 0x39e   : > { %2030 = vmatpush.msra.mxu0 %v4149_v10  ;;  %2047 = vmatpush.msrb.mxu2 %v4365_v2 }
 0x3a0   : > { %2031 = vmatpush.msra.mxu0 %v5773_v31  ;;  %2048 = vmatpush.msrb.mxu2 %v4357_v25 }
 0x3a1   : > { %3269 = vmatpush.xpose.msk.msrb.mxu3 %vm361_vm0, %v5758_v36  ;;  %v5783_v36 = vld [vmem:[#allocation108_spill] sm:$0xff] }
 0x3a2   : > { %2032 = vmatpush.msra.mxu0 %v5774_v48  ;;  %2049 = vmatpush.msrb.mxu2 %v4348_v41 }
 0x3a4   : > { %2033 = vmatpush.msra.mxu0 %v4103_v4  ;;  %2050 = vmatpush.msrb.mxu2 %v4337_v49 }
 0x3a5   : > { %2034 = vmatmul.f32.vlgmr.msra.gmra.mxu0 %v2016_v26  ;;  %3270 = vmatpush.xpose.msk.msrb.mxu3 %vm361_vm0, %v5760_v42  ;;  %v5776_v26 = vld [vmem:[#allocation90_spill] sm:$0xff]  ;;  %v5782_v42 = vld [vmem:[#allocation76_spill] sm:$0xff] }
 0x3a6   : > { %2087 = vmatpush.msrb.mxu0 %v5775_v1  ;;  %2051 = vmatpush.msrb.mxu2 %v4329_v55 }
 0x3a8   : > { %v2012_v17 = vpop.f32.mrf.mxu3  ;;  %2088 = vmatpush.msrb.mxu0 %v4287_v40  ;;  %2052 = vmatpush.msrb.mxu2 %v4321_v6 }
 0x3a9   : > { %2015 = vst.msk [vmem:[#allocation3 + $0x3] sm:$0x1] %vm1944_vm5, %v2012_v17  ;;  %3271 = vmatpush.xpose.msk.msrb.mxu3 %vm361_vm0, %v5762_v0  ;;  %v2039_v17 = vrot.slane %v4431_v33, 5  ;;  %v5778_v0 = vld [vmem:[#allocation84_spill] sm:$0xff] }
 0x3aa   : > { %2089 = vmatpush.msrb.mxu0 %v4271_v45  ;;  %2053 = vmatpush.msrb.mxu2 %v4309_v54 }
 0x3ac   : > { %2090 = vmatpush.msrb.mxu0 %v4259_v59  ;;  %2054 = vmatpush.msrb.mxu2 %v4295_v56 }
 0x3ad   : > { %3272 = vmatpush.xpose.msk.msrb.mxu3 %vm361_vm0, %v5764_v39  ;;  %v5777_v39 = vld [vmem:[#allocation87_spill] sm:$0xff] }
 0x3ae   : > { %2091 = vmatpush.msrb.mxu0 %v4251_v24  ;;  %2055 = vmatpush.msrb.mxu2 %v4279_v62 }
 0x3b0   : > { %2092 = vmatpush.msrb.mxu0 %v4243_v16  ;;  %2056 = vmatpush.msrb.mxu2 %v4265_v19 }
 0x3b1   : > { %3273 = vmatpush.xpose.msk.msrb.mxu3 %vm361_vm0, %v5766_v13  ;;  %2057 = vmatmul.f32.vlgmr.msrb.gmra.mxu2 %v2039_v17  ;;  %v5779_v17 = vld [vmem:[#allocation82_spill] sm:$0xff]  ;;  %v5780_v13 = vld [vmem:[#allocation80_spill] sm:$0xff] }
 0x3b2   : > { %2093 = vmatpush.msrb.mxu0 %v4235_v53  ;;  %3201 = vmatpush.xpose.msk.msra.mxu2 %vm361_vm0, %v3956_v30 }
 0x3b4   : > { %2094 = vmatpush.msrb.mxu0 %v5776_v26 }
 0x3b5   : > { %3274 = vmatpush.xpose.msk.msrb.mxu3 %vm361_vm0, %v5768_v18  ;;  %v5781_v18 = vld [vmem:[#allocation78_spill] sm:$0xff] }
 0x3b6   : > { %2095 = vmatpush.msrb.mxu0 %v5777_v39  ;;  %3202 = vmatpush.xpose.msk.msra.mxu2 %vm361_vm0, %v3944_v15 }
 0x3b8   : > { %2096 = vmatpush.msrb.mxu0 %v5778_v0 }
 0x3b9   : > { %3275 = vmatpush.xpose.msk.msrb.mxu3 %vm361_vm0, %v5770_v9  ;;  %v2085_v9 = vrot.slane %v4431_v33, 7  ;;  %v5786_v33 = vld [vmem:[#allocation36_spill] sm:$0xff] }
 0x3ba   : > { %2097 = vmatpush.msrb.mxu0 %v5779_v17  ;;  %3203 = vmatpush.xpose.msk.msra.mxu2 %vm361_vm0, %v3932_v8 }
 0x3bc   : > { %2098 = vmatpush.msrb.mxu0 %v5780_v13 }
 0x3bd   : > { %3276 = vmatpush.xpose.msk.msrb.mxu3 %vm361_vm0, %v4198_v35 }
 0x3be   : > { %2099 = vmatpush.msrb.mxu0 %v5781_v18  ;;  %3204 = vmatpush.xpose.msk.msra.mxu2 %vm361_vm0, %v3922_v3 }
 0x3c0   : > { %2100 = vmatpush.msrb.mxu0 %v5782_v42 }
 0x3c1   : > { %3277 = vmatpush.xpose.msk.msrb.mxu3 %vm361_vm0, %v5771_v22  ;;  %v5792_v22 = vld [vmem:[#allocation30_spill] sm:$0xff] }
 0x3c2   : > { %2101 = vmatpush.msrb.mxu0 %v4165_v20  ;;  %3205 = vmatpush.xpose.msk.msra.mxu2 %vm361_vm0, %v3912_v63  ;;  %v1753_v35 = vpop.f32.mrf.mxu0 }
 0x3c3   : > { %1756 = vst [vmem:[#allocation2 + $0x5] sm:$0x1] %v1753_v35  ;;  %v5784_v35 = vld [vmem:[#allocation38_spill] sm:$0xff] }
 0x3c4   : > { %2102 = vmatpush.msrb.mxu0 %v5783_v36 }
 0x3c5   : > { %2103 = vmatmul.f32.vlgmr.msrb.gmra.mxu0 %v2085_v9  ;;  %3278 = vmatpush.xpose.msk.msrb.mxu3 %vm361_vm0, %v4179_v28  ;;  %v5785_v9 = vld [vmem:[#allocation37_spill] sm:$0xff]  ;;  %v5791_v28 = vld [vmem:[#allocation31_spill] sm:$0xff] }
 0x3c6   : > { %3235 = vmatpush.xpose.msk.msra.mxu0 %vm361_vm0, %v5738_v37  ;;  %3206 = vmatpush.xpose.msk.msra.mxu2 %vm361_vm0, %v3904_v58 }
 0x3c9   : > { %3279 = vmatpush.xpose.msk.msrb.mxu3 %vm361_vm0, %v5772_v50  ;;  %v5790_v50 = vld [vmem:[#allocation32_spill] sm:$0xff] }
 0x3ca   : > { %3236 = vmatpush.xpose.msk.msra.mxu0 %vm361_vm0, %v5741_v5  ;;  %3207 = vmatpush.xpose.msk.msra.mxu2 %vm361_vm0, %v5722_v47 }
 0x3cd   : > { %3280 = vmatpush.xpose.msk.msrb.mxu3 %vm361_vm0, %v4159_v7  ;;  %v5789_v7 = vld [vmem:[#allocation33_spill] sm:$0xff] }
 0x3ce   : > { %3237 = vmatpush.xpose.msk.msra.mxu0 %vm361_vm0, %v5743_v11  ;;  %3208 = vmatpush.xpose.msk.msra.mxu2 %vm361_vm0, %v5723_v60 }
 0x3d1   : > { %3281 = vmatpush.xpose.msk.msrb.mxu3 %vm361_vm0, %v4149_v10  ;;  %v5787_v10 = vld [vmem:[#allocation35_spill] sm:$0xff] }
 0x3d2   : > { %3238 = vmatpush.xpose.msk.msra.mxu0 %vm361_vm0, %v5745_v12  ;;  %3209 = vmatpush.xpose.msk.msra.mxu2 %vm361_vm0, %v5724_v52 }
 0x3d5   : > { %3282 = vmatpush.xpose.msk.msrb.mxu3 %vm361_vm0, %v5773_v31 }
 0x3d6   : > { %3239 = vmatpush.xpose.msk.msra.mxu0 %vm361_vm0, %v5747_v57  ;;  %3210 = vmatpush.xpose.msk.msra.mxu2 %vm361_vm0, %v5725_v46 }
 0x3d9   : > { %3283 = vmatpush.xpose.msk.msrb.mxu3 %vm361_vm0, %v5774_v48 }
 0x3da   : > { %3240 = vmatpush.xpose.msk.msra.mxu0 %vm361_vm0, %v5749_v34  ;;  %3211 = vmatpush.xpose.msk.msra.mxu2 %vm361_vm0, %v5726_v51  ;;  %v5799_v34 = vld [vmem:[#allocation62_spill] sm:$0xff] }
 0x3dd   : > { %3284 = vmatpush.xpose.msk.msrb.mxu3 %vm361_vm0, %v4103_v4  ;;  %v5788_v4 = vld [vmem:[#allocation34_spill] sm:$0xff] }
 0x3de   : > { %3241 = vmatpush.xpose.msk.msra.mxu0 %vm361_vm0, %v5751_v61  ;;  %3212 = vmatpush.xpose.msk.msra.mxu2 %vm361_vm0, %v5784_v35  ;;  %v5797_v61 = vld [vmem:[#allocation64_spill] sm:$0xff] }
 0x3e2   : > { %3242 = vmatpush.xpose.msk.msra.mxu0 %vm361_vm0, %v5785_v9  ;;  %3213 = vmatpush.xpose.msk.msra.mxu2 %vm361_vm0, %v5786_v33  ;;  %v1941_v48 = vpop.f32.mrf.mxu0  ;;  %v5795_v9 = vld [vmem:[#allocation65_spill] sm:$0xff] }
 0x3e3   : > { %1945 = vst.msk [vmem:[#allocation3] sm:$0x1] %vm1944_vm5, %v1941_v48  ;;  %v2081_v31 = vpop.f32.mrf.mxu3  ;;  %v5793_v48 = vld [vmem:[#allocation66_spill] sm:$0xff] }
 0x3e4   : > { %2084 = vst.msk [vmem:[#allocation3 + $0x6] sm:$0x1] %vm1944_vm5, %v2081_v31  ;;  %v5796_v31 = vld [vmem:[#allocation27_spill] sm:$0xff] }
 0x3e6   : > { %3243 = vmatpush.xpose.msk.msra.mxu0 %vm361_vm0, %v5787_v10  ;;  %3214 = vmatpush.xpose.msk.msra.mxu2 %vm361_vm0, %v5788_v4  ;;  %v5794_v10 = vld [vmem:[#allocation29_spill] sm:$0xff] }
 0x3ea   : > { %3244 = vmatpush.xpose.msk.msra.mxu0 %vm361_vm0, %v5789_v7  ;;  %3215 = vmatpush.xpose.msk.msra.mxu2 %vm361_vm0, %v5790_v50 }
 0x3ee   : > { %3245 = vmatpush.xpose.msk.msra.mxu0 %vm361_vm0, %v5791_v28  ;;  %3216 = vmatpush.xpose.msk.msra.mxu2 %vm361_vm0, %v5792_v22  ;;  %v5798_v28 = vld [vmem:[#allocation63_spill] sm:$0xff] }
 0x3f2   : > { %3252 = vmatpush.xpose.msk.msrb.mxu2 %vm361_vm0, %v5793_v48  ;;  %3246 = vmatpush.xpose.msk.msra.mxu0 %vm361_vm0, %v5794_v10 }
 0x3f4   : > { %v1825_v7 = vpop.f32.mrf.mxu2 }
 0x3f5   : > { %1828 = vst [vmem:[#allocation2 + $0x6] sm:$0x1] %v1825_v7 }
 0x3f6   : > { %3253 = vmatpush.xpose.msk.msrb.mxu2 %vm361_vm0, %v5795_v9  ;;  %3247 = vmatpush.xpose.msk.msra.mxu0 %vm361_vm0, %v5796_v31  ;;  %v5802_v31 = vld [vmem:[#allocation59_spill] sm:$0xff] }
 0x3fa   : > { %3254 = vmatpush.xpose.msk.msrb.mxu2 %vm361_vm0, %v5797_v61  ;;  %3248 = vmatpush.xpose.msk.msra.mxu0 %vm361_vm0, %v5765_v23  ;;  %v5800_v23 = vld [vmem:[#allocation61_spill] sm:$0xff] }
 0x3fc   : > { %v4751_v10 = vld [vmem:[#allocation2] sm:$0xff] }
 0x3fd   : > { %1902 = vadd.xlane.f32.xlu1 %v4751_v10 }
 0x3fe   : > { %3255 = vmatpush.xpose.msk.msrb.mxu2 %vm361_vm0, %v5798_v28  ;;  %3249 = vmatpush.xpose.msk.msra.mxu0 %vm361_vm0, %v5767_v14  ;;  %v5801_v14 = vld [vmem:[#allocation60_spill] sm:$0xff] }
 0x402   : > { %3256 = vmatpush.xpose.msk.msrb.mxu2 %vm361_vm0, %v5799_v34  ;;  %3250 = vmatpush.xpose.msk.msra.mxu0 %vm361_vm0, %v5769_v44  ;;  %v1966_v7 = vpop.f32.mrf.mxu0 }
 0x403   : > { %1969 = vst.msk [vmem:[#allocation3 + $0x1] sm:$0x1] %vm1944_vm5, %v1966_v7  ;;  %v5804_v7 = vld [vmem:[#allocation57_spill] sm:$0xff] }
 0x406   : > { %3286 = vmatpush.xpose.msk.msrb.mxu0 %vm361_vm0, %v4404_v38  ;;  %3257 = vmatpush.xpose.msk.msrb.mxu2 %vm361_vm0, %v5800_v23  ;;  %v5803_v38 = vld [vmem:[#allocation58_spill] sm:$0xff] }
 0x40a   : > { %3287 = vmatpush.xpose.msk.msrb.mxu0 %vm361_vm0, %v4395_v32  ;;  %3258 = vmatpush.xpose.msk.msrb.mxu2 %vm361_vm0, %v5801_v14 }
 0x40e   : > { %3288 = vmatpush.xpose.msk.msrb.mxu0 %vm361_vm0, %v4389_v29  ;;  %3259 = vmatpush.xpose.msk.msrb.mxu2 %vm361_vm0, %v5802_v31  ;;  %v5805_v29 = vld [vmem:[#allocation56_spill] sm:$0xff] }
 0x412   : > { %3289 = vmatpush.xpose.msk.msrb.mxu0 %vm361_vm0, %v4383_v27  ;;  %3260 = vmatpush.xpose.msk.msrb.mxu2 %vm361_vm0, %v5803_v38  ;;  %v5806_v27 = vld [vmem:[#allocation55_spill] sm:$0xff] }
 0x414   : > { %v1989_v32 = vpop.f32.mrf.mxu2 }
 0x415   : > { %1992 = vst.msk [vmem:[#allocation3 + $0x2] sm:$0x1] %vm1944_vm5, %v1989_v32  ;;  %v5808_v32 = vld [vmem:[#allocation53_spill] sm:$0xff] }
 0x416   : > { %3290 = vmatpush.xpose.msk.msrb.mxu0 %vm361_vm0, %v4377_v43  ;;  %3261 = vmatpush.xpose.msk.msrb.mxu2 %vm361_vm0, %v5804_v7  ;;  %v5807_v43 = vld [vmem:[#allocation54_spill] sm:$0xff] }
 0x41a   : > { %3291 = vmatpush.xpose.msk.msrb.mxu0 %vm361_vm0, %v4371_v21  ;;  %3262 = vmatpush.xpose.msk.msrb.mxu2 %vm361_vm0, %v5805_v29 }
 0x41e   : > { %3292 = vmatpush.xpose.msk.msrb.mxu0 %vm361_vm0, %v4365_v2  ;;  %3263 = vmatpush.xpose.msk.msrb.mxu2 %vm361_vm0, %v5806_v27  ;;  %v5809_v2 = vld [vmem:[#allocation52_spill] sm:$0xff] }
 0x422   : > { %3293 = vmatpush.xpose.msk.msrb.mxu0 %vm361_vm0, %v4357_v25  ;;  %3264 = vmatpush.xpose.msk.msrb.mxu2 %vm361_vm0, %v5807_v43  ;;  %v2035_v44 = vpop.f32.mrf.mxu0  ;;  %v5810_v25 = vld [vmem:[#allocation51_spill] sm:$0xff] }
 0x423   : > { %2038 = vst.msk [vmem:[#allocation3 + $0x4] sm:$0x1] %vm1944_vm5, %v2035_v44 }
 0x426   : > { %3294 = vmatpush.xpose.msk.msrb.mxu0 %vm361_vm0, %v4348_v41  ;;  %3265 = vmatpush.xpose.msk.msrb.mxu2 %vm361_vm0, %v5808_v32  ;;  %v5811_v41 = vld [vmem:[#allocation28_spill] sm:$0xff] }
 0x42a   : > { %3295 = vmatpush.xpose.msk.msrb.mxu0 %vm361_vm0, %v4337_v49  ;;  %3266 = vmatpush.xpose.msk.msrb.mxu2 %vm361_vm0, %v5809_v2 }
 0x42e   : > { %3296 = vmatpush.xpose.msk.msrb.mxu0 %vm361_vm0, %v4329_v55  ;;  %3267 = vmatpush.xpose.msk.msrb.mxu2 %vm361_vm0, %v5810_v25 }
 0x432   : > { %3297 = vmatpush.xpose.msk.msrb.mxu0 %vm361_vm0, %v4321_v6 }
 0x434   : > { %v2058_v44 = vpop.f32.mrf.mxu2 }
 0x435   : > { %2061 = vst.msk [vmem:[#allocation3 + $0x5] sm:$0x1] %vm1944_vm5, %v2058_v44 }
 0x436   : > { %3298 = vmatpush.xpose.msk.msrb.mxu0 %vm361_vm0, %v4309_v54  ;;  %v5813_v54 = vld [vmem:[#allocation105_spill] sm:$0xff] }
 0x43a   : > { %3299 = vmatpush.xpose.msk.msrb.mxu0 %vm361_vm0, %v4295_v56 }
 0x43e   : > { %3300 = vmatpush.xpose.msk.msrb.mxu0 %vm361_vm0, %v4279_v62 }
 0x442   : > { %3301 = vmatpush.xpose.msk.msrb.mxu0 %vm361_vm0, %v4265_v19  ;;  %v2104_v55 = vpop.f32.mrf.mxu0 }
 0x443   : > { %2107 = vst.msk [vmem:[#allocation3 + $0x7] sm:$0x1] %vm1944_vm5, %v2104_v55 }
 0x44a   : > { %v2108_v49 = vld [vmem:[#allocation3] sm:$0xff] }
 0x44b   : > { %v2109_v6 = vmul.f32 0.125, %v2108_v49 }
 0x44d   : > { %v4818_v21 = vadd.f32 %v2109_v6, %v5811_v41  ;;  %v5814_v6 = vld [vmem:[#allocation102_spill] sm:$0xff] }
 0x44e   : > { %v5815_v41 = vld [vmem:[#allocation98_spill] sm:$0xff] }
 0x44f   : > { %5812 = vst [vmem:[#allocation48_spill] sm:$0xff] %v4818_v21  ;;  %3217 = vmatmul.msk.f32.vlgmr.msra.gmra.mxu2 %vm361_vm0, %v4818_v21  ;;  %v2157_v44 = vrot.slane %v4818_v21, 1  ;;  %v2181_v56 = vrot.slane %v4818_v21, 2  ;;  %v2205_v55 = vrot.slane %v4818_v21, 3  ;;  %v2253_v49 = vrot.slane %v4818_v21, 5 }
 0x450   : > { %3303 = vmatpush.xpose.msk.msra.mxu2 %vm361_vm0, %v5813_v54 }
 0x451   : > { %3234 = vmatmul.msk.f32.vlgmr.msra.gmra.mxu3 %vm361_vm0, %v2157_v44  ;;  %3251 = vmatmul.msk.f32.vlgmr.msra.gmra.mxu0 %vm361_vm0, %v2181_v56  ;;  %v2229_v56 = vrot.slane %v4818_v21, 4  ;;  %v5816_v44 = vld [vmem:[#allocation95_spill] sm:$0xff] }
 0x452   : > { %3320 = vmatpush.xpose.msk.msra.mxu3 %vm361_vm0, %v5775_v1  ;;  %2348 = vmatpush.msra.mxu0 %v3956_v30  ;;  %v5823_v1 = vld [vmem:[#allocation22_spill] sm:$0xff] }
 0x454   : > { %3304 = vmatpush.xpose.msk.msra.mxu2 %vm361_vm0, %v5814_v6  ;;  %2349 = vmatpush.msra.mxu0 %v3944_v15 }
 0x456   : > { %3321 = vmatpush.xpose.msk.msra.mxu3 %vm361_vm0, %v4287_v40  ;;  %2350 = vmatpush.msra.mxu0 %v3932_v8  ;;  %v5822_v40 = vld [vmem:[#allocation23_spill] sm:$0xff] }
 0x457   : > { %3268 = vmatmul.msk.f32.vlgmr.msrb.gmra.mxu2 %vm361_vm0, %v2205_v55  ;;  %v5817_v55 = vld [vmem:[#allocation92_spill] sm:$0xff] }
 0x458   : > { %3305 = vmatpush.xpose.msk.msra.mxu2 %vm361_vm0, %v5815_v41  ;;  %2351 = vmatpush.msra.mxu0 %v3922_v3 }
 0x459   : > { %3285 = vmatmul.msk.f32.vlgmr.msrb.gmra.mxu3 %vm361_vm0, %v2229_v56  ;;  %3302 = vmatmul.msk.f32.vlgmr.msrb.gmra.mxu0 %vm361_vm0, %v2253_v49  ;;  %v5818_v56 = vld [vmem:[#allocation89_spill] sm:$0xff]  ;;  %v5819_v49 = vld [vmem:[#allocation86_spill] sm:$0xff] }
 0x45a   : > { %3322 = vmatpush.xpose.msk.msra.mxu3 %vm361_vm0, %v4271_v45  ;;  %2352 = vmatpush.msra.mxu0 %v3912_v63 }
 0x45c   : > { %3306 = vmatpush.xpose.msk.msra.mxu2 %vm361_vm0, %v5816_v44  ;;  %2353 = vmatpush.msra.mxu0 %v3904_v58 }
 0x45e   : > { %3323 = vmatpush.xpose.msk.msra.mxu3 %vm361_vm0, %v4259_v59  ;;  %2354 = vmatpush.msra.mxu0 %v5722_v47  ;;  %v351_v59 = vlaneseq }
 0x460   : > { %3307 = vmatpush.xpose.msk.msra.mxu2 %vm361_vm0, %v5817_v55  ;;  %2355 = vmatpush.msra.mxu0 %v5723_v60  ;;  %v352_v45 = vand.u32 127, %v351_v59  ;;  %v5840_v60 = vld [vmem:[#allocation11_spill] sm:$0xff] }
 0x462   : > { %3324 = vmatpush.xpose.msk.msra.mxu3 %vm361_vm0, %v4251_v24  ;;  %2356 = vmatpush.msra.mxu0 %v5724_v52  ;;  %v5820_v24 = vld [vmem:[#allocation132_spill] sm:$0xff]  ;;  %vm353_vm6 = vcmp.lt.s32.totalorder %v352_v45, 8  ;;  %v5837_v52 = vld [vmem:[#allocation13_spill] sm:$0xff] }
 0x463   : > { %v5826_v45 = vld [vmem:[#allocation20_spill] sm:$0xff] }
 0x464   : > { %3308 = vmatpush.xpose.msk.msra.mxu2 %vm361_vm0, %v5818_v56  ;;  %2357 = vmatpush.msra.mxu0 %v5725_v46  ;;  %v5833_v46 = vld [vmem:[#allocation127_spill] sm:$0xff] }
 0x466   : > { %3325 = vmatpush.xpose.msk.msra.mxu3 %vm361_vm0, %v4243_v16  ;;  %2358 = vmatpush.msra.mxu0 %v5726_v51  ;;  %v5821_v16 = vld [vmem:[#allocation131_spill] sm:$0xff]  ;;  %v5829_v51 = vld [vmem:[#allocation18_spill] sm:$0xff] }
 0x468   : > { %3309 = vmatpush.xpose.msk.msra.mxu2 %vm361_vm0, %v5819_v49  ;;  %2359 = vmatpush.msra.mxu0 %v5784_v35  ;;  %v5828_v35 = vld [vmem:[#allocation19_spill] sm:$0xff] }
 0x46a   : > { %3326 = vmatpush.xpose.msk.msra.mxu3 %vm361_vm0, %v4235_v53  ;;  %2360 = vmatpush.msra.mxu0 %v5786_v33  ;;  %v5825_v33 = vld [vmem:[#allocation21_spill] sm:$0xff] }
 0x46c   : > { %3310 = vmatpush.xpose.msk.msra.mxu2 %vm361_vm0, %v5820_v24  ;;  %2361 = vmatpush.msra.mxu0 %v5788_v4  ;;  %v5824_v4 = vld [vmem:[#allocation130_spill] sm:$0xff] }
 0x46e   : > { %3327 = vmatpush.xpose.msk.msra.mxu3 %vm361_vm0, %v5776_v26  ;;  %2362 = vmatpush.msra.mxu0 %v5790_v50  ;;  %v3515_v26 = vmov 0.0  }
 0x46f   : > { %v4888_v50 = vsel %vm353_vm6, 1.0, %v3515_v26 }
 0x470   : > { %3311 = vmatpush.xpose.msk.msra.mxu2 %vm361_vm0, %v5821_v16  ;;  %2363 = vmatpush.msra.mxu0 %v5792_v22  ;;  %v1903_v53 = vpop.xlane.xlu1 %1902 }
 0x471   : > { %v1904_v59 = vmul.f32 0.125, %v1903_v53  ;;  %v5827_v53 = vld [vmem:[#allocation129_spill] sm:$0xff] }
 0x472   : > { %2372 = vmatpush.msrb.mxu0 %v5822_v40  ;;  %3328 = vmatpush.xpose.msk.msra.mxu3 %vm361_vm0, %v5777_v39 }
 0x473   : > { %v4892_v22 = vsub.f32 %v4751_v10, %v1904_v59  ;;  %v5830_v10 = vld [vmem:[#allocation128_spill] sm:$0xff]  ;;  %v5831_v59 = vld [vmem:[#allocation17_spill] sm:$0xff] }
 0x474   : > { %2373 = vmatpush.msrb.mxu0 %v5823_v1  ;;  %3312 = vmatpush.xpose.msk.msra.mxu2 %vm361_vm0, %v5824_v4 }
 0x475   : > { %v1906_v39 = vmul.f32 %v4888_v50, %v4892_v22 }
 0x476   : > { %2374 = vmatpush.msrb.mxu0 %v5825_v33  ;;  %3329 = vmatpush.xpose.msk.msra.mxu3 %vm361_vm0, %v5778_v0  ;;  %v5832_v0 = vld [vmem:[#allocation16_spill] sm:$0xff] }
 0x477   : > { %v1907_v26 = vmul.f32 %v1906_v39, %v1906_v39  ;;  %v5834_v39 = vld [vmem:[#allocation15_spill] sm:$0xff] }
 0x478   : > { %2375 = vmatpush.msrb.mxu0 %v5826_v45  ;;  %3313 = vmatpush.xpose.msk.msra.mxu2 %vm361_vm0, %v5827_v53 }
 0x479   : > { %1908 = vadd.xlane.f32.xlu2 %v1907_v26  ;;  %v5836_v26 = vld [vmem:[#allocation126_spill] sm:$0xff] }
 0x47a   : > { %2376 = vmatpush.msrb.mxu0 %v5828_v35  ;;  %3330 = vmatpush.xpose.msk.msra.mxu3 %vm361_vm0, %v5779_v17  ;;  %v5835_v17 = vld [vmem:[#allocation14_spill] sm:$0xff] }
 0x47c   : > { %2377 = vmatpush.msrb.mxu0 %v5829_v51  ;;  %3314 = vmatpush.xpose.msk.msra.mxu2 %vm361_vm0, %v5830_v10 }
 0x47e   : > { %2378 = vmatpush.msrb.mxu0 %v5831_v59  ;;  %3331 = vmatpush.xpose.msk.msra.mxu3 %vm361_vm0, %v5780_v13  ;;  %v5838_v13 = vld [vmem:[#allocation12_spill] sm:$0xff] }
 0x480   : > { %2379 = vmatpush.msrb.mxu0 %v5832_v0  ;;  %3315 = vmatpush.xpose.msk.msra.mxu2 %vm361_vm0, %v5833_v46  ;;  %v5839_v0 = vld [vmem:[#allocation125_spill] sm:$0xff] }
 0x482   : > { %2380 = vmatpush.msrb.mxu0 %v5834_v39  ;;  %3332 = vmatpush.xpose.msk.msra.mxu3 %vm361_vm0, %v5781_v18  ;;  %v5841_v18 = vld [vmem:[#allocation10_spill] sm:$0xff]  ;;  %v5843_v39 = vld [vmem:[#allocation71_spill] sm:$0xff] }
 0x484   : > { %2381 = vmatpush.msrb.mxu0 %v5835_v17  ;;  %3316 = vmatpush.xpose.msk.msra.mxu2 %vm361_vm0, %v5836_v26  ;;  %v5842_v17 = vld [vmem:[#allocation124_spill] sm:$0xff] }
 0x486   : > { %2382 = vmatpush.msrb.mxu0 %v5837_v52  ;;  %3333 = vmatpush.xpose.msk.msra.mxu3 %vm361_vm0, %v5782_v42  ;;  %v2277_v42 = vrot.slane %v4818_v21, 6 }
 0x488   : > { %2383 = vmatpush.msrb.mxu0 %v5838_v13  ;;  %3317 = vmatpush.xpose.msk.msra.mxu2 %vm361_vm0, %v5839_v0 }
 0x48a   : > { %2384 = vmatpush.msrb.mxu0 %v5840_v60  ;;  %3334 = vmatpush.xpose.msk.msra.mxu3 %vm361_vm0, %v4165_v20  ;;  %v5844_v60 = vld [vmem:[#allocation69_spill] sm:$0xff]  ;;  %v2301_v20 = vrot.slane %v4818_v21, 7  ;;  %v5846_v21 = vld [vmem:[#allocation39_spill] sm:$0xff] }
 0x48c   : > { %2385 = vmatpush.msrb.mxu0 %v5841_v18  ;;  %3318 = vmatpush.xpose.msk.msra.mxu2 %vm361_vm0, %v5842_v17 }
 0x48e   : > { %2386 = vmatpush.msrb.mxu0 %v5843_v39  ;;  %3335 = vmatpush.xpose.msk.msra.mxu3 %vm361_vm0, %v5783_v36 }
 0x48f   : > { %3319 = vmatmul.msk.f32.vlgmr.msra.gmra.mxu2 %vm361_vm0, %v2277_v42  ;;  %v5845_v42 = vld [vmem:[#allocation41_spill] sm:$0xff] }
 0x490   : > { %2395 = vmatpush.msrb.mxu2 %v5738_v37  ;;  %2387 = vmatpush.msrb.mxu0 %v5844_v60 }
 0x491   : > { %3336 = vmatmul.msk.f32.vlgmr.msra.gmra.mxu3 %vm361_vm0, %v2301_v20  ;;  %v5847_v20 = vld [vmem:[#allocation37_spill] sm:$0xff] }
 0x492   : > { %2396 = vmatpush.msrb.mxu2 %v5741_v5  ;;  %2418 = vmatpush.msrb.mxu3 %v5793_v48 }
 0x494   : > { %2397 = vmatpush.msrb.mxu2 %v5743_v11  ;;  %2419 = vmatpush.msrb.mxu3 %v5795_v9  ;;  %v5848_v11 = vld [vmem:[#allocation35_spill] sm:$0xff] }
 0x496   : > { %2398 = vmatpush.msrb.mxu2 %v5745_v12  ;;  %2420 = vmatpush.msrb.mxu3 %v5797_v61  ;;  %v5849_v12 = vld [vmem:[#allocation33_spill] sm:$0xff] }
 0x498   : > { %2399 = vmatpush.msrb.mxu2 %v5747_v57  ;;  %2421 = vmatpush.msrb.mxu3 %v5798_v28  ;;  %v5850_v57 = vld [vmem:[#allocation31_spill] sm:$0xff] }
 0x49a   : > { %2400 = vmatpush.msrb.mxu2 %v5845_v42  ;;  %2422 = vmatpush.msrb.mxu3 %v5799_v34  ;;  %v5851_v42 = vld [vmem:[#allocation29_spill] sm:$0xff] }
 0x49c   : > { %2401 = vmatpush.msrb.mxu2 %v5846_v21  ;;  %2423 = vmatpush.msrb.mxu3 %v5800_v23  ;;  %v5852_v21 = vld [vmem:[#allocation27_spill] sm:$0xff] }
 0x49e   : > { %2402 = vmatpush.msrb.mxu2 %v5847_v20  ;;  %2424 = vmatpush.msrb.mxu3 %v5801_v14  ;;  %v5853_v20 = vld [vmem:[#allocation26_spill] sm:$0xff] }
 0x4a0   : > { %2403 = vmatpush.msrb.mxu2 %v5848_v11  ;;  %2425 = vmatpush.msrb.mxu3 %v5802_v31  ;;  %v5854_v11 = vld [vmem:[#allocation25_spill] sm:$0xff] }
 0x4a2   : > { %2404 = vmatpush.msrb.mxu2 %v5849_v12  ;;  %2426 = vmatpush.msrb.mxu3 %v5803_v38  ;;  %v5855_v12 = vld [vmem:[#allocation24_spill] sm:$0xff] }
 0x4a4   : > { %2405 = vmatpush.msrb.mxu2 %v5850_v57  ;;  %2427 = vmatpush.msrb.mxu3 %v5804_v7  ;;  %v5856_v57 = vld [vmem:[#allocation123_spill] sm:$0xff] }
 0x4a6   : > { %2406 = vmatpush.msrb.mxu2 %v5851_v42  ;;  %2428 = vmatpush.msrb.mxu3 %v5805_v29  ;;  %v5857_v42 = vld [vmem:[#allocation122_spill] sm:$0xff] }
 0x4a8   : > { %2407 = vmatpush.msrb.mxu2 %v5852_v21  ;;  %2429 = vmatpush.msrb.mxu3 %v5806_v27  ;;  %v5858_v21 = vld [vmem:[#allocation121_spill] sm:$0xff] }
 0x4aa   : > { %2408 = vmatpush.msrb.mxu2 %v5853_v20  ;;  %2430 = vmatpush.msrb.mxu3 %v5807_v43  ;;  %v5859_v20 = vld [vmem:[#allocation120_spill] sm:$0xff] }
 0x4ac   : > { %2409 = vmatpush.msrb.mxu2 %v5854_v11  ;;  %2431 = vmatpush.msrb.mxu3 %v5808_v32  ;;  %v5860_v11 = vld [vmem:[#allocation119_spill] sm:$0xff] }
 0x4ae   : > { %2410 = vmatpush.msrb.mxu2 %v5855_v12  ;;  %2432 = vmatpush.msrb.mxu3 %v5809_v2  ;;  %v5861_v12 = vld [vmem:[#allocation118_spill] sm:$0xff] }
 0x4b0   : > { %2464 = vmatpush.msra.mxu2 %v5856_v57  ;;  %2433 = vmatpush.msrb.mxu3 %v5810_v25  ;;  %v5862_v57 = vld [vmem:[#allocation117_spill] sm:$0xff] }
 0x4b2   : > { %2465 = vmatpush.msra.mxu2 %v5857_v42  ;;  %2487 = vmatpush.msra.mxu3 %v5813_v54  ;;  %v5863_v54 = vld [vmem:[#allocation116_spill] sm:$0xff] }
 0x4b4   : > { %2466 = vmatpush.msra.mxu2 %v5858_v21  ;;  %2488 = vmatpush.msra.mxu3 %v5814_v6  ;;  %v5864_v6 = vld [vmem:[#allocation115_spill] sm:$0xff] }
 0x4b6   : > { %2467 = vmatpush.msra.mxu2 %v5859_v20  ;;  %2489 = vmatpush.msra.mxu3 %v5815_v41  ;;  %v5865_v41 = vld [vmem:[#allocation114_spill] sm:$0xff] }
 0x4b8   : > { %2468 = vmatpush.msra.mxu2 %v5860_v11  ;;  %2490 = vmatpush.msra.mxu3 %v5816_v44  ;;  %v5866_v44 = vld [vmem:[#allocation113_spill] sm:$0xff] }
 0x4ba   : > { %2469 = vmatpush.msra.mxu2 %v5861_v12  ;;  %2491 = vmatpush.msra.mxu3 %v5817_v55  ;;  %v5867_v55 = vld [vmem:[#allocation112_spill] sm:$0xff] }
 0x4bc   : > { %2470 = vmatpush.msra.mxu2 %v5862_v57  ;;  %2492 = vmatpush.msra.mxu3 %v5818_v56  ;;  %v5868_v56 = vld [vmem:[#allocation111_spill] sm:$0xff] }
 0x4be   : > { %2471 = vmatpush.msra.mxu2 %v5863_v54  ;;  %2493 = vmatpush.msra.mxu3 %v5819_v49  ;;  %v5869_v49 = vld [vmem:[#allocation109_spill] sm:$0xff] }
 0x4c0   : > { %2472 = vmatpush.msra.mxu2 %v5864_v6  ;;  %2494 = vmatpush.msra.mxu3 %v5820_v24 }
 0x4c2   : > { %2473 = vmatpush.msra.mxu2 %v5865_v41  ;;  %2495 = vmatpush.msra.mxu3 %v5821_v16 }
 0x4c4   : > { %2474 = vmatpush.msra.mxu2 %v5866_v44  ;;  %2496 = vmatpush.msra.mxu3 %v5824_v4 }
 0x4c6   : > { %2475 = vmatpush.msra.mxu2 %v5867_v55  ;;  %2497 = vmatpush.msra.mxu3 %v5827_v53 }
 0x4c8   : > { %2476 = vmatpush.msra.mxu2 %v5868_v56  ;;  %2498 = vmatpush.msra.mxu3 %v5830_v10 }
 0x4ca   : > { %2477 = vmatpush.msra.mxu2 %v5869_v49  ;;  %2499 = vmatpush.msra.mxu3 %v5833_v46 }
 0x4cc   : > { %2478 = vmatpush.msra.mxu2 %v4279_v62  ;;  %2500 = vmatpush.msra.mxu3 %v5836_v26 }
 0x4ce   : > { %2479 = vmatpush.msra.mxu2 %v4265_v19  ;;  %2501 = vmatpush.msra.mxu3 %v5839_v0  ;;  %v2201_v4 = vpop.f32.mrf.mxu0 }
 0x4cf   : > { %2204 = vst [vmem:[#allocation2 + $0x2] sm:$0x1] %v2201_v4 }
 0x4d0   : > { %2502 = vmatpush.msra.mxu3 %v5842_v17 }
 0x4d2   : > { %v2153_v53 = vpop.f32.mrf.mxu2 }
 0x4d3   : > { %2156 = vst [vmem:[#allocation2] sm:$0x1] %v2153_v53 }
 0x4d4   : > { %v2177_v16 = vpop.f32.mrf.mxu3 }
 0x4d5   : > { %2180 = vst [vmem:[#allocation2 + $0x1] sm:$0x1] %v2177_v16 }
 0x4d6   : > { %v2273_v10 = vpop.f32.mrf.mxu0 }
 0x4d7   : > { %2276 = vst [vmem:[#allocation2 + $0x5] sm:$0x1] %v2273_v10 }
 0x4da   : > { %v2225_v24 = vpop.f32.mrf.mxu2 }
 0x4db   : > { %2228 = vst [vmem:[#allocation2 + $0x3] sm:$0x1] %v2225_v24  ;;  %v3418_v24 = vld [vmem:[%s4029_s22] sm:$0xff] }
 0x4dc   : > { %v2249_v46 = vpop.f32.mrf.mxu3 }
 0x4dd   : > { %2252 = vst [vmem:[#allocation2 + $0x4] sm:$0x1] %v2249_v46 }
 0x4ec   : > { %v1909_v26 = vpop.xlane.xlu2 %1908 }
 0x4ed   : > { %v1910_v62 = vmul.f32 0.14285715, %v1909_v26 }
 0x4ef   : > { %v1911_v19 = vadd.f32 1e-09, %v1910_v62 }
 0x4f1   : > { %3406 = vrsqrt.f32 %v1911_v19  ;;  %vm1918_vm8 = vweird.f32 %v1911_v19 }
 0x4f7   : > { %v3407_v0 = vpop.eup %3406 }
 0x4f8   : > { %v1913_v49 = vmul.f32 %v3407_v0, %v1911_v19  ;;  %vm1919_vm7 = vweird.f32 %v3407_v0 }
 0x4f9   : > { %vm1920_vm9 = vmor %vm1918_vm8, %vm1919_vm7 }
 0x4fa   : > { %v1914_v17 = vmul.f32 %v3407_v0, %v1913_v49 }
 0x4fc   : > { %v1915_v56 = vmul.f32 0.5, %v1914_v17 }
 0x4fe   : > { %v1916_v4 = vsub.f32 1.5, %v1915_v56 }
 0x500   : > { %v1917_v53 = vmul.f32 %v3407_v0, %v1916_v4 }
 0x502   : > { %v1921_v16 = vsel %vm1920_vm9, %v3407_v0, %v1917_v53 }
 0x503   : > { %v1922_v10 = vmul.f32 %v1921_v16, %v4892_v22 }
 0x505   : > { %v1923_v55 = vadd.f32 %v3418_v24, %v1922_v10 }
 0x507   : > { %2111 = vmax.xlane.f32.xlu0 %v1923_v55 }
 0x512   : > { %v2297_v46 = vpop.f32.mrf.mxu2 }
 0x513   : > { %2300 = vst [vmem:[#allocation2 + $0x6] sm:$0x1] %v2297_v46 }
 0x514   : > { %v2321_v26 = vpop.f32.mrf.mxu3 }
 0x515   : > { %2324 = vst [vmem:[#allocation2 + $0x7] sm:$0x1] %v2321_v26 }
 0x51c   : > { %v2325_v62 = vld [vmem:[#allocation2] sm:$0xff] }
 0x51d   : > { %2326 = vadd.xlane.f32.xlu1 %v2325_v62 }
 0x57a   : > { %v2112_v44 = vpop.xlane.xlu0 %2111 }
 0x57b   : > { %v2113_v56 = vsub.f32 %v1923_v55, %v2112_v44 }
 0x57d   : > { %v2114_v4 = vmul.f32 1.442695, %v2113_v56 }
 0x57f   : > { %3408 = vpow2.f32 %v2114_v4 }
 0x585   : > { %v3409_v22 = vpop.eup %3408 }
 0x590   : > { %v2327_v49 = vpop.xlane.xlu1 %2326 }
 0x591   : > { %v2328_v17 = vmul.f32 0.125, %v2327_v49 }
 0x593   : > { %v2329_v41 = vsub.f32 %v2325_v62, %v2328_v17 }
 0x595   : > { %v2330_v19 = vmul.f32 %v4888_v50, %v2329_v41 }
 0x597   : > { %v2331_v0 = vmul.f32 %v2330_v19, %v2330_v19 }
 0x599   : > { %2332 = vadd.xlane.f32.xlu2 %v2331_v0 }
 0x5a1   : > { %2116 = vadd.xlane.f32.xlu2 %v3409_v22 }
 0x60c   : > { %v2333_v53 = vpop.xlane.xlu2 %2332 }
 0x60d   : > { %v2334_v16 = vmul.f32 0.14285715, %v2333_v53 }
 0x60f   : > { %v2335_v10 = vadd.f32 1e-09, %v2334_v16 }
 0x611   : > { %3410 = vrsqrt.f32 %v2335_v10  ;;  %vm2342_vm11 = vweird.f32 %v2335_v10 }
 0x614   : > { %v2117_v24 = vpop.xlane.xlu2 %2116 }
 0x615   : > { %3412 = vrcp.f32 %v2117_v24  ;;  %v2129_v56 = vand.u32 2147483648, %v2117_v24  ;;  %v2127_v4 = vand.u32 2147483647, %v2117_v24  ;;  %vm2123_vm14 = vweird.f32 %v2117_v24 }
 0x617   : > { %v3411_v46 = vpop.eup %3410  ;;  %v2130_v54 = vor.u32 1.1754944e-38, %v2129_v56  ;;  %vm2128_vm1 = vcmp.eq.f32.partialorder %v2127_v4, 8.507059e+37  ;;  %v5891_v56 = vld [vmem:[#allocation70_spill] sm:$0xff]  ;;  %v5893_v4 = vld [vmem:[#allocation11_spill] sm:$0xff] }
 0x618   : > { %v2337_v26 = vmul.f32 %v3411_v46, %v2335_v10  ;;  %vm2343_vm10 = vweird.f32 %v3411_v46 }
 0x619   : > { %vm2344_vm13 = vmor %vm2342_vm11, %vm2343_vm10 }
 0x61a   : > { %v2338_v6 = vmul.f32 %v3411_v46, %v2337_v26 }
 0x61b   : > { %v3413_v49 = vpop.eup %3412 }
 0x61c   : > { %v2339_v44 = vmul.f32 0.5, %v2338_v6  ;;  %v2119_v62 = vmul.f32 %v3413_v49, %v2117_v24  ;;  %vm2124_vm12 = vweird.f32 %v3413_v49  ;;  %v5870_v24 = vld [vmem:[#allocation100_spill] sm:$0xff] }
 0x61d   : > { %vm2125_vm15 = vmor %vm2123_vm14, %vm2124_vm12 }
 0x61e   : > { %v2340_v17 = vsub.f32 1.5, %v2339_v44  ;;  %v2120_v50 = vsub.f32 1.0, %v2119_v62 }
 0x620   : > { %v2121_v19 = vmul.f32 %v3413_v49, %v2120_v50  ;;  %v2341_v0 = vmul.f32 %v3411_v46, %v2340_v17  ;;  %v5889_v17 = vld [vmem:[#allocation72_spill] sm:$0xff]  ;;  %v5890_v50 = vld [vmem:[#allocation38_spill] sm:$0xff] }
 0x622   : > { %v2122_v53 = vadd.f32 %v3413_v49, %v2121_v19  ;;  %v2345_v16 = vsel %vm2344_vm13, %v3411_v46, %v2341_v0  ;;  %v5883_v46 = vld [vmem:[#allocation15_spill] sm:$0xff]  ;;  %v5892_v19 = vld [vmem:[#allocation36_spill] sm:$0xff] }
 0x623   : > { %v2346_v57 = vmul.f32 %v2345_v16, %v2329_v41  ;;  %v5871_v41 = vld [vmem:[#allocation97_spill] sm:$0xff]  ;;  %v5894_v0 = vld [vmem:[#allocation68_spill] sm:$0xff]  ;;  %v5896_v16 = vld [vmem:[#allocation67_spill] sm:$0xff] }
 0x624   : > { %v2126_v26 = vsel %vm2125_vm15, %v3413_v49, %v2122_v53  ;;  %v5886_v49 = vld [vmem:[#allocation14_spill] sm:$0xff] }
 0x625   : > { %v2131_v6 = vsel %vm2128_vm1, %v2130_v54, %v2126_v26  ;;  %v5006_v12 = vadd.f32 %v2346_v57, %v1923_v55  ;;  %v5872_v54 = vld [vmem:[#allocation94_spill] sm:$0xff]  ;;  %v5873_v55 = vld [vmem:[#allocation91_spill] sm:$0xff]  ;;  %v5897_v26 = vld [vmem:[#allocation32_spill] sm:$0xff] }
 0x626   : > { %v5008_v44 = vmul.f32 %v3409_v22, %v2131_v6  ;;  %v5895_v53 = vld [vmem:[#allocation34_spill] sm:$0xff] }
 0x627   : > { %2534 = vmax.xlane.f32.xlu1 %v5006_v12  ;;  %v5899_v6 = vld [vmem:[#allocation30_spill] sm:$0xff] }
 0x628   : > { %2364 = vmatmul.f32.vlgmr.msra.gmra.mxu0 %v5008_v44  ;;  %v2393_v10 = vrot.slane %v5008_v44, 2  ;;  %v2416_v62 = vrot.slane %v5008_v44, 3  ;;  %v2370_v57 = vrot.slane %v5008_v44, 1  ;;  %v2462_v22 = vrot.slane %v5008_v44, 5 }
 0x629   : > { %2441 = vmatpush.msra.mxu0 %v5870_v24 }
 0x62a   : > { %2411 = vmatmul.f32.vlgmr.msrb.gmra.mxu2 %v2393_v10  ;;  %2434 = vmatmul.f32.vlgmr.msrb.gmra.mxu3 %v2416_v62  ;;  %v5900_v10 = vld [vmem:[#allocation107_spill] sm:$0xff]  ;;  %v5919_v62 = vld [vmem:[#allocation37_spill] sm:$0xff] }
 0x62b   : > { %2442 = vmatpush.msra.mxu0 %v5871_v41  ;;  %2556 = vmatpush.msrb.mxu2 %v3956_v30  ;;  %v5874_v30 = vld [vmem:[#allocation88_spill] sm:$0xff] }
 0x62c   : > { %2580 = vmatpush.msrb.mxu3 %v5822_v40  ;;  %v2485_v40 = vrot.slane %v5008_v44, 6 }
 0x62d   : > { %2443 = vmatpush.msra.mxu0 %v5872_v54  ;;  %2557 = vmatpush.msrb.mxu2 %v3944_v15  ;;  %v5875_v15 = vld [vmem:[#allocation85_spill] sm:$0xff] }
 0x62e   : > { %2581 = vmatpush.msrb.mxu3 %v5823_v1  ;;  %v5877_v1 = vld [vmem:[#allocation81_spill] sm:$0xff] }
 0x62f   : > { %2444 = vmatpush.msra.mxu0 %v5873_v55  ;;  %2558 = vmatpush.msrb.mxu2 %v3932_v8  ;;  %v5876_v8 = vld [vmem:[#allocation83_spill] sm:$0xff] }
 0x630   : > { %2582 = vmatpush.msrb.mxu3 %v5825_v33  ;;  %2388 = vmatmul.f32.vlgmr.msrb.gmra.mxu0 %v2370_v57  ;;  %v5879_v33 = vld [vmem:[#allocation46_spill] sm:$0xff]  ;;  %v5926_v57 = vld [vmem:[#allocation25_spill] sm:$0xff] }
 0x631   : > { %2445 = vmatpush.msra.mxu0 %v5874_v30  ;;  %2559 = vmatpush.msrb.mxu2 %v3922_v3  ;;  %v5878_v3 = vld [vmem:[#allocation79_spill] sm:$0xff] }
 0x632   : > { %2583 = vmatpush.msrb.mxu3 %v5826_v45  ;;  %2480 = vmatmul.f32.vlgmr.msra.gmra.mxu2 %v2462_v22  ;;  %v5880_v45 = vld [vmem:[#allocation16_spill] sm:$0xff]  ;;  %v5928_v22 = vld [vmem:[#allocation123_spill] sm:$0xff] }
 0x633   : > { %2446 = vmatpush.msra.mxu0 %v5875_v15  ;;  %2503 = vmatmul.f32.vlgmr.msra.gmra.mxu3 %v2485_v40  ;;  %v5930_v40 = vld [vmem:[#allocation117_spill] sm:$0xff] }
 0x634   : > { %2560 = vmatpush.msrb.mxu2 %v3912_v63  ;;  %2584 = vmatpush.msrb.mxu3 %v5828_v35  ;;  %v5881_v63 = vld [vmem:[#allocation77_spill] sm:$0xff]  ;;  %v5882_v35 = vld [vmem:[#allocation44_spill] sm:$0xff] }
 0x635   : > { %2447 = vmatpush.msra.mxu0 %v5876_v8 }
 0x636   : > { %2561 = vmatpush.msrb.mxu2 %v3904_v58  ;;  %2585 = vmatpush.msrb.mxu3 %v5829_v51  ;;  %v5884_v58 = vld [vmem:[#allocation75_spill] sm:$0xff]  ;;  %v5885_v51 = vld [vmem:[#allocation42_spill] sm:$0xff] }
 0x637   : > { %2448 = vmatpush.msra.mxu0 %v5877_v1 }
 0x638   : > { %2562 = vmatpush.msrb.mxu2 %v5722_v47  ;;  %2586 = vmatpush.msrb.mxu3 %v5831_v59  ;;  %v5887_v47 = vld [vmem:[#allocation73_spill] sm:$0xff]  ;;  %v5888_v59 = vld [vmem:[#allocation40_spill] sm:$0xff] }
 0x639   : > { %2449 = vmatpush.msra.mxu0 %v5878_v3 }
 0x63a   : > { %2563 = vmatpush.msrb.mxu2 %v5879_v33  ;;  %2587 = vmatpush.msrb.mxu3 %v5880_v45  ;;  %v5937_v45 = vld [vmem:[#allocation109_spill] sm:$0xff] }
 0x63b   : > { %2450 = vmatpush.msra.mxu0 %v5881_v63 }
 0x63c   : > { %2564 = vmatpush.msrb.mxu2 %v5882_v35  ;;  %2588 = vmatpush.msrb.mxu3 %v5883_v46  ;;  %v5938_v35 = vld [vmem:[#allocation106_spill] sm:$0xff] }
 0x63d   : > { %2451 = vmatpush.msra.mxu0 %v5884_v58 }
 0x63e   : > { %2565 = vmatpush.msrb.mxu2 %v5885_v51  ;;  %2589 = vmatpush.msrb.mxu3 %v5886_v49 }
 0x63f   : > { %2452 = vmatpush.msra.mxu0 %v5887_v47 }
 0x640   : > { %2566 = vmatpush.msrb.mxu2 %v5888_v59  ;;  %2590 = vmatpush.msrb.mxu3 %v5837_v52  ;;  %v2439_v52 = vrot.slane %v5008_v44, 4 }
 0x641   : > { %2453 = vmatpush.msra.mxu0 %v5889_v17 }
 0x642   : > { %2567 = vmatpush.msrb.mxu2 %v5890_v50  ;;  %2591 = vmatpush.msrb.mxu3 %v5838_v13  ;;  %v5898_v13 = vld [vmem:[#allocation110_spill] sm:$0xff] }
 0x643   : > { %2454 = vmatpush.msra.mxu0 %v5891_v56 }
 0x644   : > { %2568 = vmatpush.msrb.mxu2 %v5892_v19  ;;  %2592 = vmatpush.msrb.mxu3 %v5893_v4 }
 0x645   : > { %2455 = vmatpush.msra.mxu0 %v5894_v0 }
 0x646   : > { %2569 = vmatpush.msrb.mxu2 %v5895_v53  ;;  %2593 = vmatpush.msrb.mxu3 %v5841_v18  ;;  %v5901_v18 = vld [vmem:[#allocation104_spill] sm:$0xff] }
 0x647   : > { %2456 = vmatpush.msra.mxu0 %v5896_v16 }
 0x648   : > { %2570 = vmatpush.msrb.mxu2 %v5897_v26  ;;  %2594 = vmatpush.msrb.mxu3 %v5843_v39  ;;  %v5902_v39 = vld [vmem:[#allocation101_spill] sm:$0xff] }
 0x649   : > { %2457 = vmatmul.f32.vlgmr.msra.gmra.mxu0 %v2439_v52 }
 0x64a   : > { %2510 = vmatpush.msrb.mxu0 %v5898_v13  ;;  %2571 = vmatpush.msrb.mxu2 %v5899_v6 }
 0x64b   : > { %2595 = vmatpush.msrb.mxu3 %v5844_v60  ;;  %v5903_v60 = vld [vmem:[#allocation99_spill] sm:$0xff] }
 0x64c   : > { %2626 = vmatpush.msra.mxu2 %v5793_v48  ;;  %2511 = vmatpush.msrb.mxu0 %v5900_v10  ;;  %v5904_v48 = vld [vmem:[#allocation96_spill] sm:$0xff] }
 0x64d   : > { %2649 = vmatpush.msra.mxu3 %v5870_v24  ;;  %v5920_v24 = vld [vmem:[#allocation35_spill] sm:$0xff] }
 0x64e   : > { %2627 = vmatpush.msra.mxu2 %v5795_v9  ;;  %2512 = vmatpush.msrb.mxu0 %v5901_v18  ;;  %v5905_v9 = vld [vmem:[#allocation93_spill] sm:$0xff] }
 0x64f   : > { %2650 = vmatpush.msra.mxu3 %v5871_v41  ;;  %v5923_v41 = vld [vmem:[#allocation29_spill] sm:$0xff] }
 0x650   : > { %2628 = vmatpush.msra.mxu2 %v5797_v61  ;;  %2513 = vmatpush.msrb.mxu0 %v5902_v39  ;;  %v5906_v61 = vld [vmem:[#allocation90_spill] sm:$0xff] }
 0x651   : > { %2651 = vmatpush.msra.mxu3 %v5872_v54  ;;  %v5925_v54 = vld [vmem:[#allocation26_spill] sm:$0xff] }
 0x652   : > { %2629 = vmatpush.msra.mxu2 %v5798_v28  ;;  %2514 = vmatpush.msrb.mxu0 %v5903_v60  ;;  %v5907_v28 = vld [vmem:[#allocation87_spill] sm:$0xff] }
 0x653   : > { %2652 = vmatpush.msra.mxu3 %v5873_v55  ;;  %v5927_v55 = vld [vmem:[#allocation24_spill] sm:$0xff] }
 0x654   : > { %2630 = vmatpush.msra.mxu2 %v5799_v34  ;;  %2515 = vmatpush.msrb.mxu0 %v5904_v48  ;;  %v5908_v34 = vld [vmem:[#allocation84_spill] sm:$0xff] }
 0x655   : > { %2653 = vmatpush.msra.mxu3 %v5874_v30  ;;  %v5929_v30 = vld [vmem:[#allocation118_spill] sm:$0xff] }
 0x656   : > { %2631 = vmatpush.msra.mxu2 %v5800_v23  ;;  %2516 = vmatpush.msrb.mxu0 %v5905_v9  ;;  %v5909_v23 = vld [vmem:[#allocation82_spill] sm:$0xff] }
 0x657   : > { %2654 = vmatpush.msra.mxu3 %v5875_v15  ;;  %v5931_v15 = vld [vmem:[#allocation116_spill] sm:$0xff] }
 0x658   : > { %2632 = vmatpush.msra.mxu2 %v5801_v14  ;;  %2517 = vmatpush.msrb.mxu0 %v5906_v61  ;;  %v5910_v14 = vld [vmem:[#allocation80_spill] sm:$0xff] }
 0x659   : > { %2655 = vmatpush.msra.mxu3 %v5876_v8  ;;  %v5932_v8 = vld [vmem:[#allocation115_spill] sm:$0xff] }
 0x65a   : > { %2633 = vmatpush.msra.mxu2 %v5802_v31  ;;  %2518 = vmatpush.msrb.mxu0 %v5907_v28  ;;  %v5911_v31 = vld [vmem:[#allocation78_spill] sm:$0xff] }
 0x65b   : > { %2656 = vmatpush.msra.mxu3 %v5877_v1 }
 0x65c   : > { %2634 = vmatpush.msra.mxu2 %v5803_v38  ;;  %2519 = vmatpush.msrb.mxu0 %v5908_v34  ;;  %v5912_v38 = vld [vmem:[#allocation76_spill] sm:$0xff] }
 0x65d   : > { %2657 = vmatpush.msra.mxu3 %v5878_v3  ;;  %v5933_v3 = vld [vmem:[#allocation114_spill] sm:$0xff] }
 0x65e   : > { %2635 = vmatpush.msra.mxu2 %v5804_v7  ;;  %2520 = vmatpush.msrb.mxu0 %v5909_v23  ;;  %v5913_v7 = vld [vmem:[#allocation74_spill] sm:$0xff] }
 0x65f   : > { %2658 = vmatpush.msra.mxu3 %v5881_v63 }
 0x660   : > { %2636 = vmatpush.msra.mxu2 %v5805_v29  ;;  %2521 = vmatpush.msrb.mxu0 %v5910_v14  ;;  %v2508_v29 = vrot.slane %v5008_v44, 7  ;;  %v5918_v44 = vld [vmem:[#allocation39_spill] sm:$0xff] }
 0x661   : > { %2659 = vmatpush.msra.mxu3 %v5884_v58  ;;  %v5939_v58 = vld [vmem:[#allocation103_spill] sm:$0xff] }
 0x662   : > { %2637 = vmatpush.msra.mxu2 %v5806_v27  ;;  %2522 = vmatpush.msrb.mxu0 %v5911_v31  ;;  %v5915_v27 = vld [vmem:[#allocation45_spill] sm:$0xff] }
 0x663   : > { %2660 = vmatpush.msra.mxu3 %v5887_v47 }
 0x664   : > { %2638 = vmatpush.msra.mxu2 %v5807_v43  ;;  %2523 = vmatpush.msrb.mxu0 %v5912_v38  ;;  %v5914_v43 = vld [vmem:[#allocation47_spill] sm:$0xff] }
 0x665   : > { %2661 = vmatpush.msra.mxu3 %v5889_v17 }
 0x666   : > { %2639 = vmatpush.msra.mxu2 %v5808_v32  ;;  %2524 = vmatpush.msrb.mxu0 %v5913_v7  ;;  %v5917_v32 = vld [vmem:[#allocation41_spill] sm:$0xff] }
 0x667   : > { %2662 = vmatpush.msra.mxu3 %v5891_v56 }
 0x668   : > { %2640 = vmatpush.msra.mxu2 %v5809_v2  ;;  %2525 = vmatpush.msrb.mxu0 %v5783_v36  ;;  %v5916_v2 = vld [vmem:[#allocation43_spill] sm:$0xff] }
 0x669   : > { %2663 = vmatpush.msra.mxu3 %v5894_v0  ;;  %2526 = vmatmul.f32.vlgmr.msrb.gmra.mxu0 %v2508_v29 }
 0x66a   : > { %2641 = vmatpush.msra.mxu2 %v5810_v25  ;;  %2603 = vmatpush.msra.mxu0 %v5738_v37  ;;  %v5921_v25 = vld [vmem:[#allocation33_spill] sm:$0xff]  ;;  %v5922_v37 = vld [vmem:[#allocation31_spill] sm:$0xff] }
 0x66b   : > { %2664 = vmatpush.msra.mxu3 %v5896_v16 }
 0x66c   : > { %2604 = vmatpush.msra.mxu0 %v5741_v5  ;;  %v5924_v5 = vld [vmem:[#allocation27_spill] sm:$0xff] }
 0x66e   : > { %2605 = vmatpush.msra.mxu0 %v5914_v43 }
 0x670   : > { %2606 = vmatpush.msra.mxu0 %v5915_v27 }
 0x672   : > { %2607 = vmatpush.msra.mxu0 %v5916_v2 }
 0x674   : > { %2608 = vmatpush.msra.mxu0 %v5917_v32 }
 0x676   : > { %2609 = vmatpush.msra.mxu0 %v5918_v44  ;;  %v5940_v44 = vld [vmem:[#allocation105_spill] sm:$0xff] }
 0x678   : > { %2610 = vmatpush.msra.mxu0 %v5919_v62  ;;  %v5941_v62 = vld [vmem:[#allocation102_spill] sm:$0xff] }
 0x67a   : > { %2611 = vmatpush.msra.mxu0 %v5920_v24  ;;  %v5942_v24 = vld [vmem:[#allocation98_spill] sm:$0xff] }
 0x67c   : > { %2612 = vmatpush.msra.mxu0 %v5921_v25 }
 0x67e   : > { %2613 = vmatpush.msra.mxu0 %v5922_v37  ;;  %v5943_v37 = vld [vmem:[#allocation95_spill] sm:$0xff] }
 0x680   : > { %2614 = vmatpush.msra.mxu0 %v5923_v41 }
 0x682   : > { %2615 = vmatpush.msra.mxu0 %v5924_v5 }
 0x684   : > { %2616 = vmatpush.msra.mxu0 %v5925_v54  ;;  %v5944_v54 = vld [vmem:[#allocation92_spill] sm:$0xff] }
 0x686   : > { %2617 = vmatpush.msra.mxu0 %v5926_v57  ;;  %v5945_v57 = vld [vmem:[#allocation89_spill] sm:$0xff] }
 0x688   : > { %2618 = vmatpush.msra.mxu0 %v5927_v55  ;;  %v5949_v55 = vld [vmem:[#allocation130_spill] sm:$0xff] }
 0x68a   : > { %2672 = vmatpush.msrb.mxu0 %v5928_v22  ;;  %v5955_v22 = vld [vmem:[#allocation124_spill] sm:$0xff] }
 0x68c   : > { %2673 = vmatpush.msrb.mxu0 %v5857_v42  ;;  %v5934_v42 = vld [vmem:[#allocation113_spill] sm:$0xff] }
 0x68e   : > { %2674 = vmatpush.msrb.mxu0 %v5858_v21 }
 0x690   : > { %2675 = vmatpush.msrb.mxu0 %v5859_v20  ;;  %v5935_v20 = vld [vmem:[#allocation112_spill] sm:$0xff] }
 0x692   : > { %2676 = vmatpush.msrb.mxu0 %v5860_v11  ;;  %v5936_v11 = vld [vmem:[#allocation111_spill] sm:$0xff] }
 0x694   : > { %2677 = vmatpush.msrb.mxu0 %v5929_v30 }
 0x696   : > { %2678 = vmatpush.msrb.mxu0 %v5930_v40  ;;  %v2742_v40 = vld [vmem:[%s5276_s5 + $0x8] sm:$0xff] }
 0x698   : > { %2679 = vmatpush.msrb.mxu0 %v5931_v15  ;;  %v2741_v15 = vld [vmem:[%s5276_s5] sm:$0xff] }
 0x69a   : > { %2680 = vmatpush.msrb.mxu0 %v5932_v8  ;;  %v2535_v1 = vpop.xlane.xlu1 %2534 }
 0x69b   : > { %v2536_v33 = vsub.f32 %v5006_v12, %v2535_v1 }
 0x69c   : > { %2681 = vmatpush.msrb.mxu0 %v5933_v3 }
 0x69d   : > { %v2537_v21 = vmul.f32 1.442695, %v2536_v33 }
 0x69e   : > { %2682 = vmatpush.msrb.mxu0 %v5934_v42 }
 0x69f   : > { %3414 = vpow2.f32 %v2537_v21  ;;  %v5956_v21 = vld [vmem:[#allocation48_spill] sm:$0xff] }
 0x6a0   : > { %2683 = vmatpush.msrb.mxu0 %v5935_v20 }
 0x6a2   : > { %2684 = vmatpush.msrb.mxu0 %v5936_v11 }
 0x6a4   : > { %2685 = vmatpush.msrb.mxu0 %v5937_v45 }
 0x6a5   : > { %v3415_v63 = vpop.eup %3414  ;;  %v2365_v46 = vpop.f32.mrf.mxu0 }
 0x6a6   : > { %2686 = vmatpush.msrb.mxu0 %v5938_v35  ;;  %2368 = vst.msk [vmem:[#allocation3] sm:$0x1] %vm1944_vm5, %v2365_v46  ;;  %2539 = vadd.xlane.f32.xlu0 %v3415_v63 }
 0x6a8   : > { %2687 = vmatpush.msrb.mxu0 %v5939_v58 }
 0x6ad   : > { %v2389_v12 = vpop.f32.mrf.mxu0  ;;  %v2412_v51 = vpop.f32.mrf.mxu2 }
 0x6ae   : > { %2392 = vst.msk [vmem:[#allocation3 + $0x1] sm:$0x1] %vm1944_vm5, %v2389_v12  ;;  %v2435_v49 = vpop.f32.mrf.mxu3 }
 0x6af   : > { %2415 = vst.msk [vmem:[#allocation3 + $0x2] sm:$0x1] %vm1944_vm5, %v2412_v51 }
 0x6b0   : > { %2438 = vst.msk [vmem:[#allocation3 + $0x3] sm:$0x1] %vm1944_vm5, %v2435_v49 }
 0x6b5   : > { %v2481_v47 = vpop.f32.mrf.mxu2 }
 0x6b6   : > { %2484 = vst.msk [vmem:[#allocation3 + $0x5] sm:$0x1] %vm1944_vm5, %v2481_v47  ;;  %v2504_v59 = vpop.f32.mrf.mxu3 }
 0x6b7   : > { %2507 = vst.msk [vmem:[#allocation3 + $0x6] sm:$0x1] %vm1944_vm5, %v2504_v59 }
 0x6c6   : > { %v2458_v17 = vpop.f32.mrf.mxu0 }
 0x6c7   : > { %2461 = vst.msk [vmem:[#allocation3 + $0x4] sm:$0x1] %vm1944_vm5, %v2458_v17 }
 0x6e6   : > { %v2527_v50 = vpop.f32.mrf.mxu0 }
 0x6e7   : > { %2530 = vst.msk [vmem:[#allocation3 + $0x7] sm:$0x1] %vm1944_vm5, %v2527_v50 }
 0x719   : > { %v2540_v56 = vpop.xlane.xlu0 %2539 }
 0x71a   : > { %3416 = vrcp.f32 %v2540_v56  ;;  %v2552_v53 = vand.u32 2147483648, %v2540_v56  ;;  %v2550_v52 = vand.u32 2147483647, %v2540_v56  ;;  %vm2546_vm3 = vweird.f32 %v2540_v56 }
 0x71c   : > { %v2553_v6 = vor.u32 1.1754944e-38, %v2552_v53  ;;  %vm2551_vm6 = vcmp.eq.f32.partialorder %v2550_v52, 8.507059e+37 }
 0x720   : > { %v3417_v19 = vpop.eup %3416 }
 0x721   : > { %v2542_v4 = vmul.f32 %v3417_v19, %v2540_v56  ;;  %vm2547_vm2 = vweird.f32 %v3417_v19 }
 0x722   : > { %vm2548_vm4 = vmor %vm2546_vm3, %vm2547_vm2 }
 0x723   : > { %v2543_v0 = vsub.f32 1.0, %v2542_v4 }
 0x725   : > { %v2544_v16 = vmul.f32 %v3417_v19, %v2543_v0 }
 0x727   : > { %v2545_v26 = vadd.f32 %v3417_v19, %v2544_v16 }
 0x729   : > { %v2549_v29 = vsel %vm2548_vm4, %v3417_v19, %v2545_v26 }
 0x72a   : > { %v2554_v43 = vsel %vm2551_vm6, %v2553_v6, %v2549_v29 }
 0x72b   : > { %v2555_v27 = vmul.f32 %v3415_v63, %v2554_v43 }
 0x72d   : > { %2572 = vmatmul.f32.vlgmr.msrb.gmra.mxu2 %v2555_v27  ;;  %v2578_v2 = vrot.slane %v2555_v27, 1  ;;  %v2601_v32 = vrot.slane %v2555_v27, 2  ;;  %2773 = vst [vmem:[%s5162_s20] sm:$0xff] %v2555_v27  ;;  %v2624_v25 = vrot.slane %v2555_v27, 3  ;;  %v2647_v41 = vrot.slane %v2555_v27, 4 }
 0x72e   : > { %2695 = vmatpush.msrb.mxu2 %v5940_v44  ;;  %v2670_v5 = vrot.slane %v2555_v27, 5 }
 0x72f   : > { %2596 = vmatmul.f32.vlgmr.msrb.gmra.mxu3 %v2578_v2  ;;  %2619 = vmatmul.f32.vlgmr.msra.gmra.mxu0 %v2601_v32 }
 0x730   : > { %2696 = vmatpush.msrb.mxu2 %v5941_v62  ;;  %2718 = vmatpush.msrb.mxu3 %v5898_v13  ;;  %v5946_v13 = vld [vmem:[#allocation86_spill] sm:$0xff] }
 0x732   : > { %2697 = vmatpush.msrb.mxu2 %v5942_v24  ;;  %2719 = vmatpush.msrb.mxu3 %v5900_v10  ;;  %v5947_v10 = vld [vmem:[#allocation132_spill] sm:$0xff] }
 0x734   : > { %2698 = vmatpush.msrb.mxu2 %v5943_v37  ;;  %2720 = vmatpush.msrb.mxu3 %v5901_v18  ;;  %v5948_v18 = vld [vmem:[#allocation131_spill] sm:$0xff] }
 0x735   : > { %2642 = vmatmul.f32.vlgmr.msra.gmra.mxu2 %v2624_v25 }
 0x736   : > { %2699 = vmatpush.msrb.mxu2 %v5944_v54  ;;  %2721 = vmatpush.msrb.mxu3 %v5902_v39  ;;  %v5950_v39 = vld [vmem:[#allocation129_spill] sm:$0xff] }
 0x737   : > { %2665 = vmatmul.f32.vlgmr.msra.gmra.mxu3 %v2647_v41  ;;  %2688 = vmatmul.f32.vlgmr.msrb.gmra.mxu0 %v2670_v5 }
 0x738   : > { %2700 = vmatpush.msrb.mxu2 %v5945_v57  ;;  %2722 = vmatpush.msrb.mxu3 %v5903_v60  ;;  %v5951_v60 = vld [vmem:[#allocation128_spill] sm:$0xff] }
 0x73a   : > { %2701 = vmatpush.msrb.mxu2 %v5946_v13  ;;  %2723 = vmatpush.msrb.mxu3 %v5904_v48  ;;  %v5952_v48 = vld [vmem:[#allocation127_spill] sm:$0xff] }
 0x73c   : > { %2702 = vmatpush.msrb.mxu2 %v5947_v10  ;;  %2724 = vmatpush.msrb.mxu3 %v5905_v9  ;;  %v5953_v9 = vld [vmem:[#allocation126_spill] sm:$0xff] }
 0x73e   : > { %2703 = vmatpush.msrb.mxu2 %v5948_v18  ;;  %2725 = vmatpush.msrb.mxu3 %v5906_v61  ;;  %v5954_v61 = vld [vmem:[#allocation125_spill] sm:$0xff] }
 0x740   : > { %2704 = vmatpush.msrb.mxu2 %v5949_v55  ;;  %2726 = vmatpush.msrb.mxu3 %v5907_v28  ;;  %v2693_v28 = vrot.slane %v2555_v27, 6 }
 0x742   : > { %2705 = vmatpush.msrb.mxu2 %v5950_v39  ;;  %2727 = vmatpush.msrb.mxu3 %v5908_v34  ;;  %v2716_v34 = vrot.slane %v2555_v27, 7 }
 0x744   : > { %2706 = vmatpush.msrb.mxu2 %v5951_v60  ;;  %2728 = vmatpush.msrb.mxu3 %v5909_v23  ;;  %v2531_v23 = vld [vmem:[#allocation3] sm:$0xff] }
 0x745   : > { %v2532_v42 = vmul.f32 0.125, %v2531_v23 }
 0x746   : > { %2707 = vmatpush.msrb.mxu2 %v5952_v48  ;;  %2729 = vmatpush.msrb.mxu3 %v5910_v14 }
 0x747   : > { %v2533_v20 = vadd.f32 %v2532_v42, %v5956_v21 }
 0x748   : > { %2708 = vmatpush.msrb.mxu2 %v5953_v9  ;;  %2730 = vmatpush.msrb.mxu3 %v5911_v31 }
 0x74a   : > { %2709 = vmatpush.msrb.mxu2 %v5954_v61  ;;  %2731 = vmatpush.msrb.mxu3 %v5912_v38  ;;  %v2744_v38 = vld [vmem:[%s5276_s5 + $0x18] sm:$0xff] }
 0x74b   : > { %2764 = vmatpush.msra.mxu0 %v2744_v38 }
 0x74c   : > { %2710 = vmatpush.msrb.mxu2 %v5955_v22  ;;  %2732 = vmatpush.msrb.mxu3 %v5913_v7  ;;  %v2743_v7 = vld [vmem:[%s5276_s5 + $0x10] sm:$0xff] }
 0x74d   : > { %2711 = vmatmul.f32.vlgmr.msrb.gmra.mxu2 %v2693_v28  ;;  %2765 = vmatpush.msra.mxu0 %v2743_v7 }
 0x74e   : > { %2733 = vmatpush.msrb.mxu3 %v5783_v36 }
 0x74f   : > { %2734 = vmatmul.f32.vlgmr.msrb.gmra.mxu3 %v2716_v34  ;;  %2766 = vmatpush.msra.mxu0 %v2742_v40 }
 0x751   : > { %2767 = vmatpush.msra.mxu0 %v2741_v15 }
 0x7ac   : > { %v2620_v14 = vpop.f32.mrf.mxu0 }
 0x7ad   : > { %2623 = vst.msk [vmem:[#allocation3 + $0x2] sm:$0x1] %vm1944_vm5, %v2620_v14 }
 0x7b0   : > { %v2573_v30 = vpop.f32.mrf.mxu2 }
 0x7b1   : > { %2576 = vst.msk [vmem:[#allocation3] sm:$0x1] %vm1944_vm5, %v2573_v30 }
 0x7b2   : > { %v2597_v31 = vpop.f32.mrf.mxu3 }
 0x7b3   : > { %2600 = vst.msk [vmem:[#allocation3 + $0x1] sm:$0x1] %vm1944_vm5, %v2597_v31 }
 0x7b4   : > { %v2689_v36 = vpop.f32.mrf.mxu0 }
 0x7b5   : > { %2692 = vst.msk [vmem:[#allocation3 + $0x5] sm:$0x1] %vm1944_vm5, %v2689_v36 }
 0x7b8   : > { %v2643_v8 = vpop.f32.mrf.mxu2 }
 0x7b9   : > { %2646 = vst.msk [vmem:[#allocation3 + $0x3] sm:$0x1] %vm1944_vm5, %v2643_v8 }
 0x7ba   : > { %v2666_v1 = vpop.f32.mrf.mxu3 }
 0x7bb   : > { %2669 = vst.msk [vmem:[#allocation3 + $0x4] sm:$0x1] %vm1944_vm5, %v2666_v1 }
 0x7d0   : > { %v2712_v3 = vpop.f32.mrf.mxu2 }
 0x7d1   : > { %2715 = vst.msk [vmem:[#allocation3 + $0x6] sm:$0x1] %vm1944_vm5, %v2712_v3 }
 0x7d2   : > { %v2735_v33 = vpop.f32.mrf.mxu3 }
 0x7d3   : > { %2738 = vst.msk [vmem:[#allocation3 + $0x7] sm:$0x1] %vm1944_vm5, %v2735_v33 }
 0x7da   : > { %v2739_v11 = vld [vmem:[#allocation3] sm:$0xff] }
 0x7db   : > { %v2740_v45 = vadd.f32 %v2739_v11, %v2533_v20 }
 0x7dd   : > { %3337 = vmatmul.msk.f32.vlgmr.msra.gmra.mxu0 %vm361_vm0, %v2740_v45 }
 0x7de   : > { %3446 = shalt.err (!%p3443_p4)
}
 0x7df   : > { %3357 = dma.vmem_to_hbm [thread:$0]  (%p3599_p5), %s2807_s25, 128, %s2809_s26, %s2780_s10   ;;  %v3401_v63 = vld [vmem:[%s5277_s6] ss:$0 sm:$0xff] }
 0x7e0   : > { %s2790_s23 = scalar_lea.hbm %s5278_s7, %s3340_s21  ;;  %s5957_s0 = sshll.u32 %s5157_s13, 3 }
 0x7e1   : > { %s329_s1 = scalar_lea.vmem [#allocation4], %s5957_s0  ;;  %s2794_s18 = sshll.u32 %s2790_s23, 4  ;;  %s2795_s18 = int_to_ptr.hbm [resolvable:$true] %s2794_s18 }
 0x7e2   : > { %s2792_s12 = sshll.u32 %s329_s1, 4  ;;  %s2775_s19 = scalar_lea.sflag [#allocation5], %s5157_s13  ;;  %s2793_s12 = int_to_ptr.vmem [resolvable:$true] %s2792_s12 }
 0x7e3   : > { %s3461_s25 = sshra.s32 %s2795_s18, 4  ;;  %s3467_s9 = scalar_lea.hbm %s5278_s7, 16  ;;  %s3462_s25 = int_to_ptr.hbm [resolvable:$true] %s3461_s25 }
 0x7e4   : > { %s3463_s26 = scalar_lea.hbm %s3462_s25, 8  ;;  %p3468_p10 = scmp.lt.s32.totalorder %s3462_s25, %s5278_s7 }
 0x7e5   : > { %p3464_p7 = scmp.ne.s32.totalorder %s3462_s25, %s3463_s26  ;;  %p3469_p11 = scmp.lt.s32.totalorder %s3467_s9, %s3463_s26 }
 0x7e7   : > { %p3465_p8 = pnand %p3464_p7, %p3599_p5  ;;  %p3470_p12 = por %p3469_p11, %p3468_p10 }
 0x7e9   : > { %p3466_p9 = pneg %p3465_p8 }
 0x7eb   : > { %p3471_p13 = pnand %p3470_p12, %p3466_p9 }
 0x85a   : > { %v2769_v35 = vpop.f32.mrf.mxu0 }
 0x85b   : > { %v2770_v46 = vadd.f32 %v3401_v63, %v2769_v35 }
 0x85d   : > { %2772 = vst [vmem:[%s329_s1] sm:$0xff] %v2770_v46 }
 0x85e   : > { %3474 = shalt.err (!%p3471_p13)
}
 0x85f   : > { %3356 = dma.vmem_to_hbm [thread:$0]  (%p3599_p5), %s2793_s12, 128, %s2795_s18, %s2775_s19  }
 0x860 PF: > { %p3367_p0 = scmp.ge.s32.totalorder %s3513_s30, 2  ;;  %s2820_s13 = sand.u32 1, %s3501_s27  }
 0x861   : > { %s2821_s23 = scalar_lea.sflag [#allocation5], %s2820_s13 }
 0x862   : > { %p3361_p1 = pnand %p3367_p0, %p3603_p6 }
 0x864   : > { %p3362_p2 = pneg %p3361_p1 }
 0x866   : > { %3492 = dma.done.wait (%p3362_p2), %s2821_s23, 128  }
 0x867   : > { %3494 = vsyncadd (%p3362_p2), %s2821_s23, 4294967168  ;;  %s2831_s17 = scalar_lea.sflag [#allocation7], %s2820_s13 }
 0x868   : > { %3496 = dma.done.wait (%p3362_p2), %s2831_s17, 128  }
 0x869   : > { %3498 = vsyncadd (%p3362_p2), %s2831_s17, 4294967168  ;;  %p22_p5 = scmp.ge.s32.totalorder %s3586_s11, 4   ;;  %s5958_s27 = smov %s3505_s28 }
 0x86a   : > { %s5959_s28 = smov %s3509_s29  ;;  %s5960_s29 = smov %s3597_s14 }
 0x86b   : > { %s5961_s30 = smov %s3586_s11  ;;  %24 = sbr.rel (!%p22_p5) target bundleno = 8 (0x8), region = 106 }
 0x870   :  { %2837 = vsyncpa [#allocation5], 1 }
 0x871   :  { %2839 = vsyncpa [#allocation5 + $0x1], 1 }
 0x872   :  { %2840 = vsyncpa [#allocation7], 1 }
 0x873   :  { %2842 = vsyncpa [#allocation7 + $0x1], 1 }

</bundles_post_ra>
